<compile_context>
chip_gen: v7x
topology: tpu7x:2x2x1
jax: 0.10.0
libtpu: 0.0.40
codegen_flags: <defaults>
</compile_context>

<pallas_src>
import functools
import math

import jax
import jax.numpy as jnp
from jax.experimental import pallas as pl
from jax.experimental.pallas import tpu as pltpu

W_DTYPE = jnp.bfloat16   # matmul weights live in bf16; statistics stay f32


# ----------------------------- Pallas kernels -------------------------------

def _tmod_kernel(tf_ref, w1_ref, b1_ref, w2_ref, b2_ref, aw_ref, ab_ref, o_ref):
    """t_embedder MLP + every block's adaLN modulation in one lane-dense matmul."""
    t = jnp.dot(tf_ref[...], w1_ref[...], preferred_element_type=jnp.float32) + b1_ref[...]
    t = jax.nn.silu(t)
    t = jnp.dot(t, w2_ref[...], preferred_element_type=jnp.float32) + b2_ref[...]
    st = jax.nn.silu(t)                                          # (B, C)
    mod = jnp.dot(st, aw_ref[...], preferred_element_type=jnp.float32) + ab_ref[...]
    o_ref[...] = mod                                             # (B, nb*6C) lane-dense


def _dit_kernel(feats_ref, pos_ref, cond_ref, mod_ref,
                in_w_ref, in_b_ref,
                saq_w_ref, saq_b_ref, sak_w_ref, sak_b_ref, sav_w_ref, sav_b_ref,
                sao_w_ref, sao_b_ref,
                caq_w_ref, caq_b_ref, cak_w_ref, cak_b_ref, cav_w_ref, cav_b_ref,
                cao_w_ref, cao_b_ref,
                mlp1_w_ref, mlp1_b_ref, mlp2_w_ref, mlp2_b_ref,
                out_w_ref, out_b_ref,
                o_ref, h_ref,
                *, num_heads, num_kv_heads, head_dim, eps_block, eps_final):
    """One (batch, block) grid step of the fused SparseDiT torso.

    grid = (B, num_blocks); the block axis is the inner ("arbitrary") axis.
    h_ref is a VMEM scratch holding the residual stream: initialized at blk==0
    from input_layer + positional embedding, updated every block, and turned
    into the final output (LayerNorm + out_layer) at the last block.
    """
    blk = pl.program_id(1)
    C = num_heads * head_dim
    D = head_dim

    def mm(a, w, b=None):
        y = jnp.dot(a.astype(w.dtype), w, preferred_element_type=jnp.float32)
        return y if b is None else y + b.astype(jnp.float32)

    def ln(v, eps):
        mu = jnp.mean(v, axis=-1, keepdims=True)
        vc = v - mu
        var = jnp.mean(vc * vc, axis=-1, keepdims=True)
        return vc * jax.lax.rsqrt(var + eps)

    def attn(q, k, v, wo, n_q, n_kv):
        """GQA attention.  Q heads of a KV group are stacked along rows (K/V go
        to the MXU once per KV head); each head's output is accumulated straight
        through row slices of wo (no lane concatenation)."""
        Lq = q.shape[0]
        group = n_q // n_kv
        q16 = q.astype(wo.dtype)
        k16 = k.astype(wo.dtype)
        v16 = v.astype(wo.dtype)
        acc = jnp.zeros((Lq, C), jnp.float32)
        for kh in range(n_kv):
            kk = k16[:, kh * D:(kh + 1) * D]
            vv = v16[:, kh * D:(kh + 1) * D]
            if group == 1:
                qs = q16[:, kh * D:(kh + 1) * D]
            else:
                qs = jnp.concatenate(
                    [q16[:, (kh * group + g) * D:(kh * group + g + 1) * D]
                     for g in range(group)], axis=0)             # (group*Lq, D)
            s = jax.lax.dot_general(qs, kk, (((1,), (1,)), ((), ())),
                                    preferred_element_type=jnp.float32)
            smax = jnp.max(s, axis=-1, keepdims=True)
            p = jnp.exp(s - smax)
            denom = jnp.sum(p, axis=-1, keepdims=True)
            o = jnp.dot(p.astype(wo.dtype), vv, preferred_element_type=jnp.float32)
            o = o * pl.reciprocal(denom, approx=True)
            for g in range(group):
                hi = kh * group + g
                acc = acc + jnp.dot(o[g * Lq:(g + 1) * Lq, :].astype(wo.dtype),
                                    wo[hi * D:(hi + 1) * D, :],
                                    preferred_element_type=jnp.float32)
        return acc

    # ---- block 0: input_layer + APE positional add -> resident residual stream ----
    @pl.when(blk == 0)
    def _():
        in_w = in_w_ref[...]
        h0 = jnp.dot(feats_ref[0].astype(in_w.dtype), in_w,
                     preferred_element_type=jnp.float32)
        h_ref[...] = h0 + in_b_ref[...] + pos_ref[0]

    x = h_ref[...]                                  # (Lb, C) f32, VMEM-resident
    cond = cond_ref[0]                              # (Lc, Cc) f32
    m = mod_ref[0, 0]                               # (6, C): whole rows, no lane slicing
    shift_msa, scale_msa, gate_msa = m[0:1], m[1:2], m[2:3]
    shift_mlp, scale_mlp, gate_mlp = m[3:4], m[4:5], m[5:6]

    # ---- self-attention (adaLN modulated, GQA, full attention per batch) ----
    h = ln(x, eps_block) * (1.0 + scale_msa) + shift_msa
    q = mm(h, saq_w_ref[0], saq_b_ref[0])           # 1/sqrt(D) folded into W_q
    k = mm(h, sak_w_ref[0], sak_b_ref[0])
    v = mm(h, sav_w_ref[0], sav_b_ref[0])
    sa = attn(q, k, v, sao_w_ref[0], num_heads, num_kv_heads) + sao_b_ref[0]
    x = x + gate_msa * sa

    # ---- cross-attention to dense cond ----
    h = ln(x, eps_block)
    q = mm(h, caq_w_ref[0], caq_b_ref[0])
    kc = mm(cond, cak_w_ref[0], cak_b_ref[0])
    vc = mm(cond, cav_w_ref[0], cav_b_ref[0])
    ca = attn(q, kc, vc, cao_w_ref[0], num_heads, num_heads) + cao_b_ref[0]
    x = x + ca

    # ---- MLP (adaLN modulated, gated residual) ----
    h = ln(x, eps_block) * (1.0 + scale_mlp) + shift_mlp
    h = mm(h, mlp1_w_ref[0], mlp1_b_ref[0])
    h = jax.nn.gelu(h, approximate=True)            # matches nn.GELU(approximate="tanh")
    h = mm(h, mlp2_w_ref[0], mlp2_b_ref[0])
    x = x + gate_mlp * h

    h_ref[...] = x

    # ---- last block: fused final F.layer_norm (eps=1e-5) + out_layer ----
    @pl.when(blk == pl.num_programs(1) - 1)
    def _():
        out_w = out_w_ref[...]
        y = jnp.dot(ln(x, eps_final).astype(out_w.dtype), out_w,
                    preferred_element_type=jnp.float32) + out_b_ref[...]
        o_ref[0] = y.astype(o_ref.dtype)


# ----------------------------- kernel wrappers -------------------------------

def _full_spec(shape):
    return pl.BlockSpec(shape, lambda i, _n=len(shape): (0,) * _n)


def tmod_forward(params, t_freq, cfg):
    B, F = t_freq.shape
    C = cfg["model_channels"]
    M = params["adaln_w_all"].shape[1]              # num_blocks * 6C (lane-dense)
    out = pl.pallas_call(
        _tmod_kernel,
        out_shape=jax.ShapeDtypeStruct((B, M), jnp.float32),
        grid=(1,),
        in_specs=[
            _full_spec((B, F)),
            _full_spec((F, C)), _full_spec((1, C)),
            _full_spec((C, C)), _full_spec((1, C)),
            _full_spec((C, M)), _full_spec((1, M)),
        ],
        out_specs=_full_spec((B, M)),
    )(t_freq, params["t_w1"], params["t_b1"], params["t_w2"], params["t_b2"],
      params["adaln_w_all"], params["adaln_b_all"])
    # Re-view as per-(batch, block) modulation ROWS (free row-major reshape):
    # the block kernel then reads a (6, C) tile and slices sublane rows only.
    return out.reshape(B, cfg["num_blocks"], 6, C)


def dit_core_forward(params, feats_blc, pos_blc, cond, mod, cfg):
    B, Lb, Cin = feats_blc.shape
    C = cfg["model_channels"]
    Cout = cfg["out_channels"]
    nb = cfg["num_blocks"]
    Hq, Hkv = cfg["num_heads"], cfg["num_kv_heads"]
    assert Hq % Hkv == 0, "GQA requires num_heads % num_kv_heads == 0"
    D = C // Hq
    hid = int(C * cfg["mlp_ratio"])
    Lc, Cc = cond.shape[1], cond.shape[2]
    bw = params["blocks"]

    kernel = functools.partial(_dit_kernel, num_heads=Hq, num_kv_heads=Hkv,
                               head_dim=D, eps_block=1e-6, eps_final=1e-5)

    batch3 = lambda b, k: (b, 0, 0)     # per-batch tensors: fetched once per batch
    blk3 = lambda b, k: (k, 0, 0)       # per-block weights: prefetched along block axis
    const2 = lambda b, k: (0, 0)        # global weights: fetched once

    def wspec(shape):
        return pl.BlockSpec((1,) + shape, blk3)

    in_specs = [
        pl.BlockSpec((1, Lb, Cin), batch3),                      # feats
        pl.BlockSpec((1, Lb, C), batch3),                        # APE pos embedding
        pl.BlockSpec((1, Lc, Cc), batch3),                       # cond
        pl.BlockSpec((1, 1, 6, C), lambda b, k: (b, k, 0, 0)),   # adaLN rows
        pl.BlockSpec((Cin, C), const2), pl.BlockSpec((1, C), const2),    # input_layer
        wspec((C, C)), wspec((1, C)),                            # self-attn Q
        wspec((C, Hkv * D)), wspec((1, Hkv * D)),                # self-attn K
        wspec((C, Hkv * D)), wspec((1, Hkv * D)),                # self-attn V
        wspec((C, C)), wspec((1, C)),                            # self-attn out
        wspec((C, C)), wspec((1, C)),                            # cross-attn Q
        wspec((Cc, C)), wspec((1, C)),                           # cross-attn K
        wspec((Cc, C)), wspec((1, C)),                           # cross-attn V
        wspec((C, C)), wspec((1, C)),                            # cross-attn out
        wspec((C, hid)), wspec((1, hid)),                        # MLP fc1
        wspec((hid, C)), wspec((1, C)),                          # MLP fc2
        pl.BlockSpec((C, Cout), const2), pl.BlockSpec((1, Cout), const2),  # out_layer
    ]

    return pl.pallas_call(
        kernel,
        out_shape=jax.ShapeDtypeStruct((B, Lb, Cout), jnp.float32),
        grid=(B, nb),
        in_specs=in_specs,
        out_specs=pl.BlockSpec((1, Lb, Cout), batch3),           # written at last block only
        scratch_shapes=[pltpu.VMEM((Lb, C), jnp.float32)],       # resident residual stream
        compiler_params=pltpu.CompilerParams(
            dimension_semantics=("parallel", "arbitrary"),
            vmem_limit_bytes=64 << 20),
    )(feats_blc, pos_blc, cond, mod,
      params["in_w"], params["in_b"],
      bw["sa_q_w"], bw["sa_q_b"], bw["sa_k_w"], bw["sa_k_b"],
      bw["sa_v_w"], bw["sa_v_b"], bw["sa_o_w"], bw["sa_o_b"],
      bw["ca_q_w"], bw["ca_q_b"], bw["ca_k_w"], bw["ca_k_b"],
      bw["ca_v_w"], bw["ca_v_b"], bw["ca_o_w"], bw["ca_o_b"],
      bw["mlp1_w"], bw["mlp1_b"], bw["mlp2_w"], bw["mlp2_b"],
      params["out_w"], params["out_b"])


# ----------------------------- Model glue (JAX) ------------------------------

CFG = dict(
    resolution=16,
    in_channels=8,
    model_channels=32,
    cond_channels=16,
    out_channels=8,
    num_blocks=2,
    num_heads=2,        # head_dim = 16
    num_kv_heads=1,     # GQA group of 2
    mlp_ratio=4,
    freq_embed_size=256,
    factor=1.0,
)


def timestep_embedding(t, dim, max_period=10000):
    half = dim // 2
    freqs = jnp.exp(-math.log(max_period) *
                    jnp.arange(half, dtype=jnp.float32) / half)
    args = t.astype(jnp.float32)[:, None] * freqs[None, :]
    return jnp.concatenate([jnp.cos(args), jnp.sin(args)], axis=-1)


def abs_pos_embed(coords_xyz, channels, factor=1.0):
    """AbsolutePositionEmbedder: per-axis sin/cos, zero-padded to `channels`."""
    n, in_channels = coords_xyz.shape
    freq_dim = channels // in_channels // 2
    freqs = 1.0 / (10000.0 ** (jnp.arange(freq_dim, dtype=jnp.float32) / freq_dim))
    x = coords_xyz.astype(jnp.float32).reshape(-1) * factor
    out = x[:, None] * freqs[None, :]
    emb = jnp.concatenate([jnp.sin(out), jnp.cos(out)], axis=-1).reshape(n, -1)
    pad = channels - emb.shape[1]
    if pad > 0:
        emb = jnp.concatenate([emb, jnp.zeros((n, pad), jnp.float32)], axis=-1)
    return emb


def sparse_dit_forward(params, feats, coords, t, cond, cfg):
    C = cfg["model_channels"]
    B = cond.shape[0]
    N = feats.shape[0]
    Lb = N // B
    assert Lb * B == N and Lb % 8 == 0, "tokens must be equal-per-batch, multiple of 8"

    # APE positional embedding (tiny one-time elementwise preprocessing in JAX)
    pos = abs_pos_embed(coords[:, 1:], C, factor=cfg["factor"]).reshape(B, Lb, C)
    feats_blc = feats.reshape(B, Lb, -1)

    # fused t_embedder + all per-block adaLN modulation vectors
    t_freq = timestep_embedding(t, cfg["freq_embed_size"])
    mod = tmod_forward(params, t_freq, cfg)                      # (B, nb, 6, C)

    # one fused pallas_call: embed + all blocks + final LN/out_layer
    out = dit_core_forward(params, feats_blc, pos, cond, mod, cfg)
    return out.reshape(N, -1)


def init_params(key, cfg):
    C = cfg["model_channels"]
    Cin = cfg["in_channels"]
    Cc = cfg["cond_channels"]
    Cout = cfg["out_channels"]
    Hq, Hkv = cfg["num_heads"], cfg["num_kv_heads"]
    D = C // Hq
    hid = int(C * cfg["mlp_ratio"])
    nb = cfg["num_blocks"]
    scale = 1.0 / math.sqrt(D)        # softmax scale folded into Q projections
    keys = iter(jax.random.split(key, 1024))

    def xavier(fi, fo):
        lim = math.sqrt(6.0 / (fi + fo))
        return jax.random.uniform(next(keys), (fi, fo), jnp.float32, -lim, lim)

    def normal(shape, std=0.02):
        return std * jax.random.normal(next(keys), shape, jnp.float32)

    zb = lambda n: jnp.zeros((1, n), jnp.float32)   # biases kept (1, n) for lane broadcast

    params = dict(
        in_w=xavier(Cin, C).astype(W_DTYPE), in_b=zb(C),
        t_w1=normal((cfg["freq_embed_size"], C)), t_b1=zb(C),
        t_w2=normal((C, C)), t_b2=zb(C),
        out_w=normal((C, Cout)).astype(W_DTYPE), out_b=zb(Cout),  # PyTorch zero-inits these
    )

    per_block = []
    adaln_ws, adaln_bs = [], []
    for _ in range(nb):
        adaln_ws.append(normal((C, 6 * C)))          # PyTorch zero-inits adaLN; random here
        adaln_bs.append(zb(6 * C))
        per_block.append(dict(
            sa_q_w=xavier(C, Hq * D) * scale, sa_q_b=zb(Hq * D),
            sa_k_w=xavier(C, Hkv * D), sa_k_b=zb(Hkv * D),
            sa_v_w=xavier(C, Hkv * D), sa_v_b=zb(Hkv * D),
            sa_o_w=xavier(C, C), sa_o_b=zb(C),
            ca_q_w=xavier(C, C) * scale, ca_q_b=zb(C),
            ca_k_w=xavier(Cc, C), ca_k_b=zb(C),
            ca_v_w=xavier(Cc, C), ca_v_b=zb(C),
            ca_o_w=xavier(C, C), ca_o_b=zb(C),
            mlp1_w=xavier(C, hid), mlp1_b=zb(hid),
            mlp2_w=xavier(hid, C), mlp2_b=zb(C),
        ))
    # stack per-block weights along a leading (num_blocks, ...) axis so the
    # fused kernel's BlockSpecs can index them by the block grid axis
    blocks = {}
    for name in per_block[0]:
        stacked = jnp.stack([blk[name] for blk in per_block], axis=0)
        blocks[name] = stacked.astype(W_DTYPE) if name.endswith("_w") else stacked
    params["blocks"] = blocks
    # all blocks' adaLN weights concatenated -> one lane-dense (C, nb*6C) matmul
    params["adaln_w_all"] = jnp.concatenate(adaln_ws, axis=1)
    params["adaln_b_all"] = jnp.concatenate(adaln_bs, axis=1)
    return params


if __name__ == "__main__":
    cfg = CFG
    key = jax.random.PRNGKey(0)
    kp, kf, kc, kt, kx = jax.random.split(key, 5)
    params = init_params(kp, cfg)

    B, Lb, Lc = 2, 64, 16
    N = B * Lb
    feats = jax.random.normal(kf, (N, cfg["in_channels"]), jnp.float32)
    coords_xyz = jax.random.randint(kx, (N, 3), 0, cfg["resolution"], dtype=jnp.int32)
    batch_col = jnp.repeat(jnp.arange(B, dtype=jnp.int32), Lb)[:, None]
    coords = jnp.concatenate([batch_col, coords_xyz], axis=1)           # (N, 4)
    t = jax.random.uniform(kt, (B,), jnp.float32, 0.0, 1000.0)
    cond = jax.random.normal(kc, (B, Lc, cfg["cond_channels"]), jnp.float32)

    fwd = jax.jit(lambda p, f, c, tt, cd: sparse_dit_forward(p, f, c, tt, cd, cfg))
    out = jax.block_until_ready(fwd(params, feats, coords, t, cond))

    assert out.shape == (N, cfg["out_channels"]), out.shape
    assert bool(jnp.all(jnp.isfinite(out)))
    print("KERNEL_OK")
</pallas_src>

<mosaic_0001>
module attributes {stable_mosaic.version = 11 : i64} {
  func.func @_tmod_kernel(%arg0: i32, %arg1: memref<2x256xf32, #tpu.memory_space<vmem>>, %arg2: memref<256x32xf32, #tpu.memory_space<vmem>>, %arg3: memref<1x32xf32, #tpu.memory_space<vmem>>, %arg4: memref<32x32xf32, #tpu.memory_space<vmem>>, %arg5: memref<1x32xf32, #tpu.memory_space<vmem>>, %arg6: memref<32x384xf32, #tpu.memory_space<vmem>>, %arg7: memref<1x384xf32, #tpu.memory_space<vmem>>, %arg8: memref<2x384xf32, #tpu.memory_space<vmem>>) attributes {dimension_semantics = [#tpu.dimension_semantics<arbitrary>], iteration_bounds = array<i64: 1>, scalar_prefetch = 0 : i64, scratch_operands = 0 : i64, tpu.core_type = #tpu.core_type<tc>, window_params = [{pipeline_mode = #tpu.pipeline_mode<synchronous>, transform_indices = @transform_0, window_bounds = array<i64: 2, 256>}, {pipeline_mode = #tpu.pipeline_mode<synchronous>, transform_indices = @transform_1, window_bounds = array<i64: 256, 32>}, {pipeline_mode = #tpu.pipeline_mode<synchronous>, transform_indices = @transform_2, window_bounds = array<i64: 1, 32>}, {pipeline_mode = #tpu.pipeline_mode<synchronous>, transform_indices = @transform_3, window_bounds = array<i64: 32, 32>}, {pipeline_mode = #tpu.pipeline_mode<synchronous>, transform_indices = @transform_4, window_bounds = array<i64: 1, 32>}, {pipeline_mode = #tpu.pipeline_mode<synchronous>, transform_indices = @transform_5, window_bounds = array<i64: 32, 384>}, {pipeline_mode = #tpu.pipeline_mode<synchronous>, transform_indices = @transform_6, window_bounds = array<i64: 1, 384>}, {pipeline_mode = #tpu.pipeline_mode<synchronous>, transform_indices = @transform_7, window_bounds = array<i64: 2, 384>}]} {
    %c0 = arith.constant 0 : index
    %c0_0 = arith.constant 0 : index
    %0 = vector.load %arg1[%c0, %c0_0] : memref<2x256xf32, #tpu.memory_space<vmem>>, vector<2x256xf32>
    %c0_1 = arith.constant 0 : index
    %c0_2 = arith.constant 0 : index
    %1 = vector.load %arg2[%c0_1, %c0_2] : memref<256x32xf32, #tpu.memory_space<vmem>>, vector<256x32xf32>
    %cst = arith.constant dense<0.000000e+00> : vector<2x32xf32>
    %2 = tpu.matmul %0, %1, %cst {dimension_numbers = #tpu.dot_dimension_numbers<[1], [0], [0], [1], [0, 0, 1, 1], [], []>} : vector<2x256xf32>, vector<256x32xf32>, vector<2x32xf32> -> vector<2x32xf32>
    %c0_3 = arith.constant 0 : index
    %c0_4 = arith.constant 0 : index
    %3 = vector.load %arg3[%c0_3, %c0_4] : memref<1x32xf32, #tpu.memory_space<vmem>>, vector<1x32xf32>
    %4 = vector.broadcast %3 : vector<1x32xf32> to vector<2x32xf32>
    %5 = arith.addf %2, %4 : vector<2x32xf32>
    %6 = arith.negf %5 : vector<2x32xf32>
    %7 = math.exp %6 : vector<2x32xf32>
    %cst_5 = arith.constant 1.000000e+00 : f32
    %8 = vector.broadcast %cst_5 : f32 to vector<2x32xf32>
    %9 = arith.addf %8, %7 : vector<2x32xf32>
    %10 = arith.divf %8, %9 : vector<2x32xf32>
    %11 = arith.mulf %5, %10 : vector<2x32xf32>
    %c0_6 = arith.constant 0 : index
    %c0_7 = arith.constant 0 : index
    %12 = vector.load %arg4[%c0_6, %c0_7] : memref<32x32xf32, #tpu.memory_space<vmem>>, vector<32x32xf32>
    %cst_8 = arith.constant dense<0.000000e+00> : vector<2x32xf32>
    %13 = tpu.matmul %11, %12, %cst_8 {dimension_numbers = #tpu.dot_dimension_numbers<[1], [0], [0], [1], [0, 0, 1, 1], [], []>} : vector<2x32xf32>, vector<32x32xf32>, vector<2x32xf32> -> vector<2x32xf32>
    %c0_9 = arith.constant 0 : index
    %c0_10 = arith.constant 0 : index
    %14 = vector.load %arg5[%c0_9, %c0_10] : memref<1x32xf32, #tpu.memory_space<vmem>>, vector<1x32xf32>
    %15 = vector.broadcast %14 : vector<1x32xf32> to vector<2x32xf32>
    %16 = arith.addf %13, %15 : vector<2x32xf32>
    %17 = arith.negf %16 : vector<2x32xf32>
    %18 = math.exp %17 : vector<2x32xf32>
    %cst_11 = arith.constant 1.000000e+00 : f32
    %19 = vector.broadcast %cst_11 : f32 to vector<2x32xf32>
    %20 = arith.addf %19, %18 : vector<2x32xf32>
    %21 = arith.divf %19, %20 : vector<2x32xf32>
    %22 = arith.mulf %16, %21 : vector<2x32xf32>
    %c0_12 = arith.constant 0 : index
    %c0_13 = arith.constant 0 : index
    %23 = vector.load %arg6[%c0_12, %c0_13] : memref<32x384xf32, #tpu.memory_space<vmem>>, vector<32x384xf32>
    %cst_14 = arith.constant dense<0.000000e+00> : vector<2x384xf32>
    %24 = tpu.matmul %22, %23, %cst_14 {dimension_numbers = #tpu.dot_dimension_numbers<[1], [0], [0], [1], [0, 0, 1, 1], [], []>} : vector<2x32xf32>, vector<32x384xf32>, vector<2x384xf32> -> vector<2x384xf32>
    %c0_15 = arith.constant 0 : index
    %c0_16 = arith.constant 0 : index
    %25 = vector.load %arg7[%c0_15, %c0_16] : memref<1x384xf32, #tpu.memory_space<vmem>>, vector<1x384xf32>
    %26 = vector.broadcast %25 : vector<1x384xf32> to vector<2x384xf32>
    %27 = arith.addf %24, %26 : vector<2x384xf32>
    %c0_17 = arith.constant 0 : index
    %c0_18 = arith.constant 0 : index
    %28 = vector.load %arg8[%c0_17, %c0_18] : memref<2x384xf32, #tpu.memory_space<vmem>>, vector<2x384xf32>
    tpu.vector_store %arg8[%c0_17, %c0_18], %27 {strides = array<i32>} : memref<2x384xf32, #tpu.memory_space<vmem>>, vector<2x384xf32>,
    return
  }
  func.func @transform_0(%arg0: i32) -> (i32, i32) {
    %c0_i32 = arith.constant 0 : i32
    %c0_i32_0 = arith.constant 0 : i32
    %c0_i32_1 = arith.constant 0 : i32
    return %c0_i32, %c0_i32_0 : i32, i32
  }
  func.func @transform_1(%arg0: i32) -> (i32, i32) {
    %c0_i32 = arith.constant 0 : i32
    %c0_i32_0 = arith.constant 0 : i32
    %c0_i32_1 = arith.constant 0 : i32
    return %c0_i32, %c0_i32_0 : i32, i32
  }
  func.func @transform_2(%arg0: i32) -> (i32, i32) {
    %c0_i32 = arith.constant 0 : i32
    %c0_i32_0 = arith.constant 0 : i32
    %c0_i32_1 = arith.constant 0 : i32
    return %c0_i32, %c0_i32_0 : i32, i32
  }
  func.func @transform_3(%arg0: i32) -> (i32, i32) {
    %c0_i32 = arith.constant 0 : i32
    %c0_i32_0 = arith.constant 0 : i32
    %c0_i32_1 = arith.constant 0 : i32
    return %c0_i32, %c0_i32_0 : i32, i32
  }
  func.func @transform_4(%arg0: i32) -> (i32, i32) {
    %c0_i32 = arith.constant 0 : i32
    %c0_i32_0 = arith.constant 0 : i32
    %c0_i32_1 = arith.constant 0 : i32
    return %c0_i32, %c0_i32_0 : i32, i32
  }
  func.func @transform_5(%arg0: i32) -> (i32, i32) {
    %c0_i32 = arith.constant 0 : i32
    %c0_i32_0 = arith.constant 0 : i32
    %c0_i32_1 = arith.constant 0 : i32
    return %c0_i32, %c0_i32_0 : i32, i32
  }
  func.func @transform_6(%arg0: i32) -> (i32, i32) {
    %c0_i32 = arith.constant 0 : i32
    %c0_i32_0 = arith.constant 0 : i32
    %c0_i32_1 = arith.constant 0 : i32
    return %c0_i32, %c0_i32_0 : i32, i32
  }
  func.func @transform_7(%arg0: i32) -> (i32, i32) {
    %c0_i32 = arith.constant 0 : i32
    %c0_i32_0 = arith.constant 0 : i32
    %c0_i32_1 = arith.constant 0 : i32
    return %c0_i32, %c0_i32_0 : i32, i32
  }
}

module attributes {stable_mosaic.version = 11 : i64} {
  func.func @_dit_kernel(%arg0: i32, %arg1: i32, %arg2: memref<1x64x8xf32, #tpu.memory_space<vmem>>, %arg3: memref<1x64x32xf32, #tpu.memory_space<vmem>>, %arg4: memref<1x16x16xf32, #tpu.memory_space<vmem>>, %arg5: memref<1x1x6x32xf32, #tpu.memory_space<vmem>>, %arg6: memref<8x32xbf16, #tpu.memory_space<vmem>>, %arg7: memref<1x32xf32, #tpu.memory_space<vmem>>, %arg8: memref<1x32x32xbf16, #tpu.memory_space<vmem>>, %arg9: memref<1x1x32xf32, #tpu.memory_space<vmem>>, %arg10: memref<1x32x16xbf16, #tpu.memory_space<vmem>>, %arg11: memref<1x1x16xf32, #tpu.memory_space<vmem>>, %arg12: memref<1x32x16xbf16, #tpu.memory_space<vmem>>, %arg13: memref<1x1x16xf32, #tpu.memory_space<vmem>>, %arg14: memref<1x32x32xbf16, #tpu.memory_space<vmem>>, %arg15: memref<1x1x32xf32, #tpu.memory_space<vmem>>, %arg16: memref<1x32x32xbf16, #tpu.memory_space<vmem>>, %arg17: memref<1x1x32xf32, #tpu.memory_space<vmem>>, %arg18: memref<1x16x32xbf16, #tpu.memory_space<vmem>>, %arg19: memref<1x1x32xf32, #tpu.memory_space<vmem>>, %arg20: memref<1x16x32xbf16, #tpu.memory_space<vmem>>, %arg21: memref<1x1x32xf32, #tpu.memory_space<vmem>>, %arg22: memref<1x32x32xbf16, #tpu.memory_space<vmem>>, %arg23: memref<1x1x32xf32, #tpu.memory_space<vmem>>, %arg24: memref<1x32x128xbf16, #tpu.memory_space<vmem>>, %arg25: memref<1x1x128xf32, #tpu.memory_space<vmem>>, %arg26: memref<1x128x32xbf16, #tpu.memory_space<vmem>>, %arg27: memref<1x1x32xf32, #tpu.memory_space<vmem>>, %arg28: memref<32x8xbf16, #tpu.memory_space<vmem>>, %arg29: memref<1x8xf32, #tpu.memory_space<vmem>>, %arg30: memref<1x64x8xf32, #tpu.memory_space<vmem>>, %arg31: memref<64x32xf32, #tpu.memory_space<vmem>>) attributes {dimension_semantics = [#tpu.dimension_semantics<parallel>, #tpu.dimension_semantics<arbitrary>], iteration_bounds = array<i64: 2, 2>, scalar_prefetch = 0 : i64, scratch_operands = 1 : i64, tpu.core_type = #tpu.core_type<tc>, window_params = [{transform_indices = @transform_0, window_bounds = array<i64: 1, 64, 8>}, {transform_indices = @transform_1, window_bounds = array<i64: 1, 64, 32>}, {transform_indices = @transform_2, window_bounds = array<i64: 1, 16, 16>}, {transform_indices = @transform_3, window_bounds = array<i64: 1, 1, 6, 32>}, {pipeline_mode = #tpu.pipeline_mode<synchronous>, transform_indices = @transform_4, window_bounds = array<i64: 8, 32>}, {pipeline_mode = #tpu.pipeline_mode<synchronous>, transform_indices = @transform_5, window_bounds = array<i64: 1, 32>}, {transform_indices = @transform_6, window_bounds = array<i64: 1, 32, 32>}, {transform_indices = @transform_7, window_bounds = array<i64: 1, 1, 32>}, {transform_indices = @transform_8, window_bounds = array<i64: 1, 32, 16>}, {transform_indices = @transform_9, window_bounds = array<i64: 1, 1, 16>}, {transform_indices = @transform_10, window_bounds = array<i64: 1, 32, 16>}, {transform_indices = @transform_11, window_bounds = array<i64: 1, 1, 16>}, {transform_indices = @transform_12, window_bounds = array<i64: 1, 32, 32>}, {transform_indices = @transform_13, window_bounds = array<i64: 1, 1, 32>}, {transform_indices = @transform_14, window_bounds = array<i64: 1, 32, 32>}, {transform_indices = @transform_15, window_bounds = array<i64: 1, 1, 32>}, {transform_indices = @transform_16, window_bounds = array<i64: 1, 16, 32>}, {transform_indices = @transform_17, window_bounds = array<i64: 1, 1, 32>}, {transform_indices = @transform_18, window_bounds = array<i64: 1, 16, 32>}, {transform_indices = @transform_19, window_bounds = array<i64: 1, 1, 32>}, {transform_indices = @transform_20, window_bounds = array<i64: 1, 32, 32>}, {transform_indices = @transform_21, window_bounds = array<i64: 1, 1, 32>}, {transform_indices = @transform_22, window_bounds = array<i64: 1, 32, 128>}, {transform_indices = @transform_23, window_bounds = array<i64: 1, 1, 128>}, {transform_indices = @transform_24, window_bounds = array<i64: 1, 128, 32>}, {transform_indices = @transform_25, window_bounds = array<i64: 1, 1, 32>}, {pipeline_mode = #tpu.pipeline_mode<synchronous>, transform_indices = @transform_26, window_bounds = array<i64: 32, 8>}, {pipeline_mode = #tpu.pipeline_mode<synchronous>, transform_indices = @transform_27, window_bounds = array<i64: 1, 8>}, {transform_indices = @transform_28, window_bounds = array<i64: 1, 64, 8>}]} {
    %c0_i32 = arith.constant 0 : i32
    %0 = arith.cmpi eq, %arg1, %c0_i32 : i32
    %1 = arith.extui %0 : i1 to i32
    %c0_i32_0 = arith.constant 0 : i32
    %2 = arith.cmpi ne, %1, %c0_i32_0 : i32
    scf.if %2 {
      %c0_118 = arith.constant 0 : index
      %c0_119 = arith.constant 0 : index
      %248 = vector.load %arg6[%c0_118, %c0_119] : memref<8x32xbf16, #tpu.memory_space<vmem>>, vector<8x32xbf16>
      %c0_120 = arith.constant 0 : index
      %c0_121 = arith.constant 0 : index
      %c0_122 = arith.constant 0 : index
      %249 = vector.load %arg2[%c0_120, %c0_121, %c0_122] : memref<1x64x8xf32, #tpu.memory_space<vmem>>, vector<1x64x8xf32>
      %250 = vector.shape_cast %249 : vector<1x64x8xf32> to vector<64x8xf32>
      %251 = arith.truncf %250 : vector<64x8xf32> to vector<64x8xbf16>
      %cst_123 = arith.constant dense<0.000000e+00> : vector<64x32xf32>
      %252 = tpu.matmul %251, %248, %cst_123 {dimension_numbers = #tpu.dot_dimension_numbers<[1], [0], [0], [1], [0, 0, 1, 1], [], []>} : vector<64x8xbf16>, vector<8x32xbf16>, vector<64x32xf32> -> vector<64x32xf32>
      %c0_124 = arith.constant 0 : index
      %c0_125 = arith.constant 0 : index
      %253 = vector.load %arg7[%c0_124, %c0_125] : memref<1x32xf32, #tpu.memory_space<vmem>>, vector<1x32xf32>
      %254 = vector.broadcast %253 : vector<1x32xf32> to vector<64x32xf32>
      %255 = arith.addf %252, %254 : vector<64x32xf32>
      %c0_126 = arith.constant 0 : index
      %c0_127 = arith.constant 0 : index
      %c0_128 = arith.constant 0 : index
      %256 = vector.load %arg3[%c0_126, %c0_127, %c0_128] : memref<1x64x32xf32, #tpu.memory_space<vmem>>, vector<1x64x32xf32>
      %257 = vector.shape_cast %256 : vector<1x64x32xf32> to vector<64x32xf32>
      %258 = arith.addf %255, %257 : vector<64x32xf32>
      %c0_129 = arith.constant 0 : index
      %c0_130 = arith.constant 0 : index
      %259 = vector.load %arg31[%c0_129, %c0_130] : memref<64x32xf32, #tpu.memory_space<vmem>>, vector<64x32xf32>
      tpu.vector_store %arg31[%c0_129, %c0_130], %258 {strides = array<i32>} : memref<64x32xf32, #tpu.memory_space<vmem>>, vector<64x32xf32>,
    } else {
    }
    %c0 = arith.constant 0 : index
    %c0_1 = arith.constant 0 : index
    %3 = vector.load %arg31[%c0, %c0_1] : memref<64x32xf32, #tpu.memory_space<vmem>>, vector<64x32xf32>
    %c0_2 = arith.constant 0 : index
    %c0_3 = arith.constant 0 : index
    %c0_4 = arith.constant 0 : index
    %4 = vector.load %arg4[%c0_2, %c0_3, %c0_4] : memref<1x16x16xf32, #tpu.memory_space<vmem>>, vector<1x16x16xf32>
    %5 = vector.shape_cast %4 : vector<1x16x16xf32> to vector<16x16xf32>
    %c0_5 = arith.constant 0 : index
    %c0_6 = arith.constant 0 : index
    %c0_7 = arith.constant 0 : index
    %c0_8 = arith.constant 0 : index
    %6 = vector.load %arg5[%c0_5, %c0_6, %c0_7, %c0_8] : memref<1x1x6x32xf32, #tpu.memory_space<vmem>>, vector<1x1x6x32xf32>
    %7 = vector.shape_cast %6 : vector<1x1x6x32xf32> to vector<6x32xf32>
    %8 = vector.extract_strided_slice %7 {offsets = [0, 0], sizes = [1, 32], strides = [1, 1]} : vector<6x32xf32> to vector<1x32xf32>
    %9 = vector.extract_strided_slice %7 {offsets = [1, 0], sizes = [1, 32], strides = [1, 1]} : vector<6x32xf32> to vector<1x32xf32>
    %10 = vector.extract_strided_slice %7 {offsets = [2, 0], sizes = [1, 32], strides = [1, 1]} : vector<6x32xf32> to vector<1x32xf32>
    %11 = vector.extract_strided_slice %7 {offsets = [3, 0], sizes = [1, 32], strides = [1, 1]} : vector<6x32xf32> to vector<1x32xf32>
    %12 = vector.extract_strided_slice %7 {offsets = [4, 0], sizes = [1, 32], strides = [1, 1]} : vector<6x32xf32> to vector<1x32xf32>
    %13 = vector.extract_strided_slice %7 {offsets = [5, 0], sizes = [1, 32], strides = [1, 1]} : vector<6x32xf32> to vector<1x32xf32>
    %cst = arith.constant dense<0.000000e+00> : vector<64xf32>
    %14 = vector.multi_reduction <add>, %3, %cst [1] : vector<64x32xf32> to vector<64xf32>
    %15 = vector.shape_cast %14 : vector<64xf32> to vector<64x1xf32>
    %cst_9 = arith.constant 3.200000e+01 : f32
    %16 = vector.broadcast %cst_9 : f32 to vector<64x1xf32>
    %17 = arith.divf %15, %16 : vector<64x1xf32>
    %18 = vector.broadcast %17 : vector<64x1xf32> to vector<64x32xf32>
    %19 = arith.subf %3, %18 : vector<64x32xf32>
    %20 = arith.mulf %19, %19 : vector<64x32xf32>
    %cst_10 = arith.constant dense<0.000000e+00> : vector<64xf32>
    %21 = vector.multi_reduction <add>, %20, %cst_10 [1] : vector<64x32xf32> to vector<64xf32>
    %22 = vector.shape_cast %21 : vector<64xf32> to vector<64x1xf32>
    %cst_11 = arith.constant 3.200000e+01 : f32
    %23 = vector.broadcast %cst_11 : f32 to vector<64x1xf32>
    %24 = arith.divf %22, %23 : vector<64x1xf32>
    %cst_12 = arith.constant 9.99999997E-7 : f32
    %25 = vector.broadcast %cst_12 : f32 to vector<64x1xf32>
    %26 = arith.addf %24, %25 : vector<64x1xf32>
    %27 = math.rsqrt %26 : vector<64x1xf32>
    %28 = vector.broadcast %27 : vector<64x1xf32> to vector<64x32xf32>
    %29 = arith.mulf %19, %28 : vector<64x32xf32>
    %cst_13 = arith.constant 1.000000e+00 : f32
    %30 = vector.broadcast %cst_13 : f32 to vector<1x32xf32>
    %31 = arith.addf %30, %9 : vector<1x32xf32>
    %32 = vector.broadcast %31 : vector<1x32xf32> to vector<64x32xf32>
    %33 = arith.mulf %29, %32 : vector<64x32xf32>
    %34 = vector.broadcast %8 : vector<1x32xf32> to vector<64x32xf32>
    %35 = arith.addf %33, %34 : vector<64x32xf32>
    %c0_14 = arith.constant 0 : index
    %c0_15 = arith.constant 0 : index
    %c0_16 = arith.constant 0 : index
    %36 = vector.load %arg8[%c0_14, %c0_15, %c0_16] : memref<1x32x32xbf16, #tpu.memory_space<vmem>>, vector<1x32x32xbf16>
    %37 = vector.shape_cast %36 : vector<1x32x32xbf16> to vector<32x32xbf16>
    %c0_17 = arith.constant 0 : index
    %c0_18 = arith.constant 0 : index
    %c0_19 = arith.constant 0 : index
    %38 = vector.load %arg9[%c0_17, %c0_18, %c0_19] : memref<1x1x32xf32, #tpu.memory_space<vmem>>, vector<1x1x32xf32>
    %39 = vector.shape_cast %38 : vector<1x1x32xf32> to vector<1x32xf32>
    %40 = arith.truncf %35 : vector<64x32xf32> to vector<64x32xbf16>
    %cst_20 = arith.constant dense<0.000000e+00> : vector<64x32xf32>
    %41 = tpu.matmul %40, %37, %cst_20 {dimension_numbers = #tpu.dot_dimension_numbers<[1], [0], [0], [1], [0, 0, 1, 1], [], []>} : vector<64x32xbf16>, vector<32x32xbf16>, vector<64x32xf32> -> vector<64x32xf32>
    %42 = vector.broadcast %39 : vector<1x32xf32> to vector<64x32xf32>
    %43 = arith.addf %41, %42 : vector<64x32xf32>
    %c0_21 = arith.constant 0 : index
    %c0_22 = arith.constant 0 : index
    %c0_23 = arith.constant 0 : index
    %44 = vector.load %arg10[%c0_21, %c0_22, %c0_23] : memref<1x32x16xbf16, #tpu.memory_space<vmem>>, vector<1x32x16xbf16>
    %45 = vector.shape_cast %44 : vector<1x32x16xbf16> to vector<32x16xbf16>
    %c0_24 = arith.constant 0 : index
    %c0_25 = arith.constant 0 : index
    %c0_26 = arith.constant 0 : index
    %46 = vector.load %arg11[%c0_24, %c0_25, %c0_26] : memref<1x1x16xf32, #tpu.memory_space<vmem>>, vector<1x1x16xf32>
    %47 = vector.shape_cast %46 : vector<1x1x16xf32> to vector<1x16xf32>
    %48 = arith.truncf %35 : vector<64x32xf32> to vector<64x32xbf16>
    %cst_27 = arith.constant dense<0.000000e+00> : vector<64x16xf32>
    %49 = tpu.matmul %48, %45, %cst_27 {dimension_numbers = #tpu.dot_dimension_numbers<[1], [0], [0], [1], [0, 0, 1, 1], [], []>} : vector<64x32xbf16>, vector<32x16xbf16>, vector<64x16xf32> -> vector<64x16xf32>
    %50 = vector.broadcast %47 : vector<1x16xf32> to vector<64x16xf32>
    %51 = arith.addf %49, %50 : vector<64x16xf32>
    %c0_28 = arith.constant 0 : index
    %c0_29 = arith.constant 0 : index
    %c0_30 = arith.constant 0 : index
    %52 = vector.load %arg12[%c0_28, %c0_29, %c0_30] : memref<1x32x16xbf16, #tpu.memory_space<vmem>>, vector<1x32x16xbf16>
    %53 = vector.shape_cast %52 : vector<1x32x16xbf16> to vector<32x16xbf16>
    %c0_31 = arith.constant 0 : index
    %c0_32 = arith.constant 0 : index
    %c0_33 = arith.constant 0 : index
    %54 = vector.load %arg13[%c0_31, %c0_32, %c0_33] : memref<1x1x16xf32, #tpu.memory_space<vmem>>, vector<1x1x16xf32>
    %55 = vector.shape_cast %54 : vector<1x1x16xf32> to vector<1x16xf32>
    %56 = arith.truncf %35 : vector<64x32xf32> to vector<64x32xbf16>
    %cst_34 = arith.constant dense<0.000000e+00> : vector<64x16xf32>
    %57 = tpu.matmul %56, %53, %cst_34 {dimension_numbers = #tpu.dot_dimension_numbers<[1], [0], [0], [1], [0, 0, 1, 1], [], []>} : vector<64x32xbf16>, vector<32x16xbf16>, vector<64x16xf32> -> vector<64x16xf32>
    %58 = vector.broadcast %55 : vector<1x16xf32> to vector<64x16xf32>
    %59 = arith.addf %57, %58 : vector<64x16xf32>
    %c0_35 = arith.constant 0 : index
    %c0_36 = arith.constant 0 : index
    %c0_37 = arith.constant 0 : index
    %60 = vector.load %arg14[%c0_35, %c0_36, %c0_37] : memref<1x32x32xbf16, #tpu.memory_space<vmem>>, vector<1x32x32xbf16>
    %61 = vector.shape_cast %60 : vector<1x32x32xbf16> to vector<32x32xbf16>
    %62 = arith.truncf %43 : vector<64x32xf32> to vector<64x32xbf16>
    %63 = arith.truncf %51 : vector<64x16xf32> to vector<64x16xbf16>
    %64 = arith.truncf %59 : vector<64x16xf32> to vector<64x16xbf16>
    %cst_38 = arith.constant 0.000000e+00 : f32
    %65 = vector.broadcast %cst_38 : f32 to vector<64x32xf32>
    %66 = vector.extract_strided_slice %62 {offsets = [0, 0], sizes = [64, 16], strides = [1, 1]} : vector<64x32xbf16> to vector<64x16xbf16>
    %67 = vector.extract_strided_slice %62 {offsets = [0, 16], sizes = [64, 16], strides = [1, 1]} : vector<64x32xbf16> to vector<64x16xbf16>
    %68 = tpu.concatenate %66, %67 in 0 : vector<64x16xbf16>, vector<64x16xbf16> -> vector<128x16xbf16>
    %cst_39 = arith.constant dense<0.000000e+00> : vector<128x64xf32>
    %69 = tpu.matmul %68, %63, %cst_39 {dimension_numbers = #tpu.dot_dimension_numbers<[1], [1], [0], [0], [0, 0, 1, 0], [], []>} : vector<128x16xbf16>, vector<64x16xbf16>, vector<128x64xf32> -> vector<128x64xf32>
    %cst_40 = arith.constant dense<0xFF800000> : vector<128xf32>
    %70 = vector.multi_reduction <maximumf>, %69, %cst_40 [1] : vector<128x64xf32> to vector<128xf32>
    %71 = vector.shape_cast %70 : vector<128xf32> to vector<128x1xf32>
    %72 = vector.broadcast %71 : vector<128x1xf32> to vector<128x64xf32>
    %73 = arith.subf %69, %72 : vector<128x64xf32>
    %74 = math.exp %73 : vector<128x64xf32>
    %cst_41 = arith.constant dense<0.000000e+00> : vector<128xf32>
    %75 = vector.multi_reduction <add>, %74, %cst_41 [1] : vector<128x64xf32> to vector<128xf32>
    %76 = vector.shape_cast %75 : vector<128xf32> to vector<128x1xf32>
    %77 = arith.truncf %74 : vector<128x64xf32> to vector<128x64xbf16>
    %cst_42 = arith.constant dense<0.000000e+00> : vector<128x16xf32>
    %78 = tpu.matmul %77, %64, %cst_42 {dimension_numbers = #tpu.dot_dimension_numbers<[1], [0], [0], [1], [0, 0, 1, 1], [], []>} : vector<128x64xbf16>, vector<64x16xbf16>, vector<128x16xf32> -> vector<128x16xf32>
    %79 = tpu.reciprocal %76 {approx = true} : vector<128x1xf32> -> vector<128x1xf32>
    %80 = vector.broadcast %79 : vector<128x1xf32> to vector<128x16xf32>
    %81 = arith.mulf %78, %80 : vector<128x16xf32>
    %82 = vector.extract_strided_slice %81 {offsets = [0, 0], sizes = [64, 16], strides = [1, 1]} : vector<128x16xf32> to vector<64x16xf32>
    %83 = arith.truncf %82 : vector<64x16xf32> to vector<64x16xbf16>
    %84 = vector.extract_strided_slice %61 {offsets = [0, 0], sizes = [16, 32], strides = [1, 1]} : vector<32x32xbf16> to vector<16x32xbf16>
    %cst_43 = arith.constant dense<0.000000e+00> : vector<64x32xf32>
    %85 = tpu.matmul %83, %84, %cst_43 {dimension_numbers = #tpu.dot_dimension_numbers<[1], [0], [0], [1], [0, 0, 1, 1], [], []>} : vector<64x16xbf16>, vector<16x32xbf16>, vector<64x32xf32> -> vector<64x32xf32>
    %86 = arith.addf %65, %85 : vector<64x32xf32>
    %87 = vector.extract_strided_slice %81 {offsets = [64, 0], sizes = [64, 16], strides = [1, 1]} : vector<128x16xf32> to vector<64x16xf32>
    %88 = arith.truncf %87 : vector<64x16xf32> to vector<64x16xbf16>
    %89 = vector.extract_strided_slice %61 {offsets = [16, 0], sizes = [16, 32], strides = [1, 1]} : vector<32x32xbf16> to vector<16x32xbf16>
    %cst_44 = arith.constant dense<0.000000e+00> : vector<64x32xf32>
    %90 = tpu.matmul %88, %89, %cst_44 {dimension_numbers = #tpu.dot_dimension_numbers<[1], [0], [0], [1], [0, 0, 1, 1], [], []>} : vector<64x16xbf16>, vector<16x32xbf16>, vector<64x32xf32> -> vector<64x32xf32>
    %91 = arith.addf %86, %90 : vector<64x32xf32>
    %c0_45 = arith.constant 0 : index
    %c0_46 = arith.constant 0 : index
    %c0_47 = arith.constant 0 : index
    %92 = vector.load %arg15[%c0_45, %c0_46, %c0_47] : memref<1x1x32xf32, #tpu.memory_space<vmem>>, vector<1x1x32xf32>
    %93 = vector.shape_cast %92 : vector<1x1x32xf32> to vector<1x32xf32>
    %94 = vector.broadcast %93 : vector<1x32xf32> to vector<64x32xf32>
    %95 = arith.addf %91, %94 : vector<64x32xf32>
    %96 = vector.broadcast %10 : vector<1x32xf32> to vector<64x32xf32>
    %97 = arith.mulf %96, %95 : vector<64x32xf32>
    %98 = arith.addf %3, %97 : vector<64x32xf32>
    %cst_48 = arith.constant dense<0.000000e+00> : vector<64xf32>
    %99 = vector.multi_reduction <add>, %98, %cst_48 [1] : vector<64x32xf32> to vector<64xf32>
    %100 = vector.shape_cast %99 : vector<64xf32> to vector<64x1xf32>
    %cst_49 = arith.constant 3.200000e+01 : f32
    %101 = vector.broadcast %cst_49 : f32 to vector<64x1xf32>
    %102 = arith.divf %100, %101 : vector<64x1xf32>
    %103 = vector.broadcast %102 : vector<64x1xf32> to vector<64x32xf32>
    %104 = arith.subf %98, %103 : vector<64x32xf32>
    %105 = arith.mulf %104, %104 : vector<64x32xf32>
    %cst_50 = arith.constant dense<0.000000e+00> : vector<64xf32>
    %106 = vector.multi_reduction <add>, %105, %cst_50 [1] : vector<64x32xf32> to vector<64xf32>
    %107 = vector.shape_cast %106 : vector<64xf32> to vector<64x1xf32>
    %cst_51 = arith.constant 3.200000e+01 : f32
    %108 = vector.broadcast %cst_51 : f32 to vector<64x1xf32>
    %109 = arith.divf %107, %108 : vector<64x1xf32>
    %cst_52 = arith.constant 9.99999997E-7 : f32
    %110 = vector.broadcast %cst_52 : f32 to vector<64x1xf32>
    %111 = arith.addf %109, %110 : vector<64x1xf32>
    %112 = math.rsqrt %111 : vector<64x1xf32>
    %113 = vector.broadcast %112 : vector<64x1xf32> to vector<64x32xf32>
    %114 = arith.mulf %104, %113 : vector<64x32xf32>
    %c0_53 = arith.constant 0 : index
    %c0_54 = arith.constant 0 : index
    %c0_55 = arith.constant 0 : index
    %115 = vector.load %arg16[%c0_53, %c0_54, %c0_55] : memref<1x32x32xbf16, #tpu.memory_space<vmem>>, vector<1x32x32xbf16>
    %116 = vector.shape_cast %115 : vector<1x32x32xbf16> to vector<32x32xbf16>
    %c0_56 = arith.constant 0 : index
    %c0_57 = arith.constant 0 : index
    %c0_58 = arith.constant 0 : index
    %117 = vector.load %arg17[%c0_56, %c0_57, %c0_58] : memref<1x1x32xf32, #tpu.memory_space<vmem>>, vector<1x1x32xf32>
    %118 = vector.shape_cast %117 : vector<1x1x32xf32> to vector<1x32xf32>
    %119 = arith.truncf %114 : vector<64x32xf32> to vector<64x32xbf16>
    %cst_59 = arith.constant dense<0.000000e+00> : vector<64x32xf32>
    %120 = tpu.matmul %119, %116, %cst_59 {dimension_numbers = #tpu.dot_dimension_numbers<[1], [0], [0], [1], [0, 0, 1, 1], [], []>} : vector<64x32xbf16>, vector<32x32xbf16>, vector<64x32xf32> -> vector<64x32xf32>
    %121 = vector.broadcast %118 : vector<1x32xf32> to vector<64x32xf32>
    %122 = arith.addf %120, %121 : vector<64x32xf32>
    %c0_60 = arith.constant 0 : index
    %c0_61 = arith.constant 0 : index
    %c0_62 = arith.constant 0 : index
    %123 = vector.load %arg18[%c0_60, %c0_61, %c0_62] : memref<1x16x32xbf16, #tpu.memory_space<vmem>>, vector<1x16x32xbf16>
    %124 = vector.shape_cast %123 : vector<1x16x32xbf16> to vector<16x32xbf16>
    %c0_63 = arith.constant 0 : index
    %c0_64 = arith.constant 0 : index
    %c0_65 = arith.constant 0 : index
    %125 = vector.load %arg19[%c0_63, %c0_64, %c0_65] : memref<1x1x32xf32, #tpu.memory_space<vmem>>, vector<1x1x32xf32>
    %126 = vector.shape_cast %125 : vector<1x1x32xf32> to vector<1x32xf32>
    %127 = arith.truncf %5 : vector<16x16xf32> to vector<16x16xbf16>
    %cst_66 = arith.constant dense<0.000000e+00> : vector<16x32xf32>
    %128 = tpu.matmul %127, %124, %cst_66 {dimension_numbers = #tpu.dot_dimension_numbers<[1], [0], [0], [1], [0, 0, 1, 1], [], []>} : vector<16x16xbf16>, vector<16x32xbf16>, vector<16x32xf32> -> vector<16x32xf32>
    %129 = vector.broadcast %126 : vector<1x32xf32> to vector<16x32xf32>
    %130 = arith.addf %128, %129 : vector<16x32xf32>
    %c0_67 = arith.constant 0 : index
    %c0_68 = arith.constant 0 : index
    %c0_69 = arith.constant 0 : index
    %131 = vector.load %arg20[%c0_67, %c0_68, %c0_69] : memref<1x16x32xbf16, #tpu.memory_space<vmem>>, vector<1x16x32xbf16>
    %132 = vector.shape_cast %131 : vector<1x16x32xbf16> to vector<16x32xbf16>
    %c0_70 = arith.constant 0 : index
    %c0_71 = arith.constant 0 : index
    %c0_72 = arith.constant 0 : index
    %133 = vector.load %arg21[%c0_70, %c0_71, %c0_72] : memref<1x1x32xf32, #tpu.memory_space<vmem>>, vector<1x1x32xf32>
    %134 = vector.shape_cast %133 : vector<1x1x32xf32> to vector<1x32xf32>
    %135 = arith.truncf %5 : vector<16x16xf32> to vector<16x16xbf16>
    %cst_73 = arith.constant dense<0.000000e+00> : vector<16x32xf32>
    %136 = tpu.matmul %135, %132, %cst_73 {dimension_numbers = #tpu.dot_dimension_numbers<[1], [0], [0], [1], [0, 0, 1, 1], [], []>} : vector<16x16xbf16>, vector<16x32xbf16>, vector<16x32xf32> -> vector<16x32xf32>
    %137 = vector.broadcast %134 : vector<1x32xf32> to vector<16x32xf32>
    %138 = arith.addf %136, %137 : vector<16x32xf32>
    %c0_74 = arith.constant 0 : index
    %c0_75 = arith.constant 0 : index
    %c0_76 = arith.constant 0 : index
    %139 = vector.load %arg22[%c0_74, %c0_75, %c0_76] : memref<1x32x32xbf16, #tpu.memory_space<vmem>>, vector<1x32x32xbf16>
    %140 = vector.shape_cast %139 : vector<1x32x32xbf16> to vector<32x32xbf16>
    %141 = arith.truncf %122 : vector<64x32xf32> to vector<64x32xbf16>
    %142 = arith.truncf %130 : vector<16x32xf32> to vector<16x32xbf16>
    %143 = arith.truncf %138 : vector<16x32xf32> to vector<16x32xbf16>
    %cst_77 = arith.constant 0.000000e+00 : f32
    %144 = vector.broadcast %cst_77 : f32 to vector<64x32xf32>
    %145 = vector.extract_strided_slice %142 {offsets = [0, 0], sizes = [16, 16], strides = [1, 1]} : vector<16x32xbf16> to vector<16x16xbf16>
    %146 = vector.extract_strided_slice %143 {offsets = [0, 0], sizes = [16, 16], strides = [1, 1]} : vector<16x32xbf16> to vector<16x16xbf16>
    %147 = vector.extract_strided_slice %141 {offsets = [0, 0], sizes = [64, 16], strides = [1, 1]} : vector<64x32xbf16> to vector<64x16xbf16>
    %cst_78 = arith.constant dense<0.000000e+00> : vector<64x16xf32>
    %148 = tpu.matmul %147, %145, %cst_78 {dimension_numbers = #tpu.dot_dimension_numbers<[1], [1], [0], [0], [0, 0, 1, 0], [], []>} : vector<64x16xbf16>, vector<16x16xbf16>, vector<64x16xf32> -> vector<64x16xf32>
    %cst_79 = arith.constant dense<0xFF800000> : vector<64xf32>
    %149 = vector.multi_reduction <maximumf>, %148, %cst_79 [1] : vector<64x16xf32> to vector<64xf32>
    %150 = vector.shape_cast %149 : vector<64xf32> to vector<64x1xf32>
    %151 = vector.broadcast %150 : vector<64x1xf32> to vector<64x16xf32>
    %152 = arith.subf %148, %151 : vector<64x16xf32>
    %153 = math.exp %152 : vector<64x16xf32>
    %cst_80 = arith.constant dense<0.000000e+00> : vector<64xf32>
    %154 = vector.multi_reduction <add>, %153, %cst_80 [1] : vector<64x16xf32> to vector<64xf32>
    %155 = vector.shape_cast %154 : vector<64xf32> to vector<64x1xf32>
    %156 = arith.truncf %153 : vector<64x16xf32> to vector<64x16xbf16>
    %cst_81 = arith.constant dense<0.000000e+00> : vector<64x16xf32>
    %157 = tpu.matmul %156, %146, %cst_81 {dimension_numbers = #tpu.dot_dimension_numbers<[1], [0], [0], [1], [0, 0, 1, 1], [], []>} : vector<64x16xbf16>, vector<16x16xbf16>, vector<64x16xf32> -> vector<64x16xf32>
    %158 = tpu.reciprocal %155 {approx = true} : vector<64x1xf32> -> vector<64x1xf32>
    %159 = vector.broadcast %158 : vector<64x1xf32> to vector<64x16xf32>
    %160 = arith.mulf %157, %159 : vector<64x16xf32>
    %161 = arith.truncf %160 : vector<64x16xf32> to vector<64x16xbf16>
    %162 = vector.extract_strided_slice %140 {offsets = [0, 0], sizes = [16, 32], strides = [1, 1]} : vector<32x32xbf16> to vector<16x32xbf16>
    %cst_82 = arith.constant dense<0.000000e+00> : vector<64x32xf32>
    %163 = tpu.matmul %161, %162, %cst_82 {dimension_numbers = #tpu.dot_dimension_numbers<[1], [0], [0], [1], [0, 0, 1, 1], [], []>} : vector<64x16xbf16>, vector<16x32xbf16>, vector<64x32xf32> -> vector<64x32xf32>
    %164 = arith.addf %144, %163 : vector<64x32xf32>
    %165 = vector.extract_strided_slice %142 {offsets = [0, 16], sizes = [16, 16], strides = [1, 1]} : vector<16x32xbf16> to vector<16x16xbf16>
    %166 = vector.extract_strided_slice %143 {offsets = [0, 16], sizes = [16, 16], strides = [1, 1]} : vector<16x32xbf16> to vector<16x16xbf16>
    %167 = vector.extract_strided_slice %141 {offsets = [0, 16], sizes = [64, 16], strides = [1, 1]} : vector<64x32xbf16> to vector<64x16xbf16>
    %cst_83 = arith.constant dense<0.000000e+00> : vector<64x16xf32>
    %168 = tpu.matmul %167, %165, %cst_83 {dimension_numbers = #tpu.dot_dimension_numbers<[1], [1], [0], [0], [0, 0, 1, 0], [], []>} : vector<64x16xbf16>, vector<16x16xbf16>, vector<64x16xf32> -> vector<64x16xf32>
    %cst_84 = arith.constant dense<0xFF800000> : vector<64xf32>
    %169 = vector.multi_reduction <maximumf>, %168, %cst_84 [1] : vector<64x16xf32> to vector<64xf32>
    %170 = vector.shape_cast %169 : vector<64xf32> to vector<64x1xf32>
    %171 = vector.broadcast %170 : vector<64x1xf32> to vector<64x16xf32>
    %172 = arith.subf %168, %171 : vector<64x16xf32>
    %173 = math.exp %172 : vector<64x16xf32>
    %cst_85 = arith.constant dense<0.000000e+00> : vector<64xf32>
    %174 = vector.multi_reduction <add>, %173, %cst_85 [1] : vector<64x16xf32> to vector<64xf32>
    %175 = vector.shape_cast %174 : vector<64xf32> to vector<64x1xf32>
    %176 = arith.truncf %173 : vector<64x16xf32> to vector<64x16xbf16>
    %cst_86 = arith.constant dense<0.000000e+00> : vector<64x16xf32>
    %177 = tpu.matmul %176, %166, %cst_86 {dimension_numbers = #tpu.dot_dimension_numbers<[1], [0], [0], [1], [0, 0, 1, 1], [], []>} : vector<64x16xbf16>, vector<16x16xbf16>, vector<64x16xf32> -> vector<64x16xf32>
    %178 = tpu.reciprocal %175 {approx = true} : vector<64x1xf32> -> vector<64x1xf32>
    %179 = vector.broadcast %178 : vector<64x1xf32> to vector<64x16xf32>
    %180 = arith.mulf %177, %179 : vector<64x16xf32>
    %181 = arith.truncf %180 : vector<64x16xf32> to vector<64x16xbf16>
    %182 = vector.extract_strided_slice %140 {offsets = [16, 0], sizes = [16, 32], strides = [1, 1]} : vector<32x32xbf16> to vector<16x32xbf16>
    %cst_87 = arith.constant dense<0.000000e+00> : vector<64x32xf32>
    %183 = tpu.matmul %181, %182, %cst_87 {dimension_numbers = #tpu.dot_dimension_numbers<[1], [0], [0], [1], [0, 0, 1, 1], [], []>} : vector<64x16xbf16>, vector<16x32xbf16>, vector<64x32xf32> -> vector<64x32xf32>
    %184 = arith.addf %164, %183 : vector<64x32xf32>
    %c0_88 = arith.constant 0 : index
    %c0_89 = arith.constant 0 : index
    %c0_90 = arith.constant 0 : index
    %185 = vector.load %arg23[%c0_88, %c0_89, %c0_90] : memref<1x1x32xf32, #tpu.memory_space<vmem>>, vector<1x1x32xf32>
    %186 = vector.shape_cast %185 : vector<1x1x32xf32> to vector<1x32xf32>
    %187 = vector.broadcast %186 : vector<1x32xf32> to vector<64x32xf32>
    %188 = arith.addf %184, %187 : vector<64x32xf32>
    %189 = arith.addf %98, %188 : vector<64x32xf32>
    %cst_91 = arith.constant dense<0.000000e+00> : vector<64xf32>
    %190 = vector.multi_reduction <add>, %189, %cst_91 [1] : vector<64x32xf32> to vector<64xf32>
    %191 = vector.shape_cast %190 : vector<64xf32> to vector<64x1xf32>
    %cst_92 = arith.constant 3.200000e+01 : f32
    %192 = vector.broadcast %cst_92 : f32 to vector<64x1xf32>
    %193 = arith.divf %191, %192 : vector<64x1xf32>
    %194 = vector.broadcast %193 : vector<64x1xf32> to vector<64x32xf32>
    %195 = arith.subf %189, %194 : vector<64x32xf32>
    %196 = arith.mulf %195, %195 : vector<64x32xf32>
    %cst_93 = arith.constant dense<0.000000e+00> : vector<64xf32>
    %197 = vector.multi_reduction <add>, %196, %cst_93 [1] : vector<64x32xf32> to vector<64xf32>
    %198 = vector.shape_cast %197 : vector<64xf32> to vector<64x1xf32>
    %cst_94 = arith.constant 3.200000e+01 : f32
    %199 = vector.broadcast %cst_94 : f32 to vector<64x1xf32>
    %200 = arith.divf %198, %199 : vector<64x1xf32>
    %cst_95 = arith.constant 9.99999997E-7 : f32
    %201 = vector.broadcast %cst_95 : f32 to vector<64x1xf32>
    %202 = arith.addf %200, %201 : vector<64x1xf32>
    %203 = math.rsqrt %202 : vector<64x1xf32>
    %204 = vector.broadcast %203 : vector<64x1xf32> to vector<64x32xf32>
    %205 = arith.mulf %195, %204 : vector<64x32xf32>
    %cst_96 = arith.constant 1.000000e+00 : f32
    %206 = vector.broadcast %cst_96 : f32 to vector<1x32xf32>
    %207 = arith.addf %206, %12 : vector<1x32xf32>
    %208 = vector.broadcast %207 : vector<1x32xf32> to vector<64x32xf32>
    %209 = arith.mulf %205, %208 : vector<64x32xf32>
    %210 = vector.broadcast %11 : vector<1x32xf32> to vector<64x32xf32>
    %211 = arith.addf %209, %210 : vector<64x32xf32>
    %c0_97 = arith.constant 0 : index
    %c0_98 = arith.constant 0 : index
    %c0_99 = arith.constant 0 : index
    %212 = vector.load %arg24[%c0_97, %c0_98, %c0_99] : memref<1x32x128xbf16, #tpu.memory_space<vmem>>, vector<1x32x128xbf16>
    %213 = vector.shape_cast %212 : vector<1x32x128xbf16> to vector<32x128xbf16>
    %c0_100 = arith.constant 0 : index
    %c0_101 = arith.constant 0 : index
    %c0_102 = arith.constant 0 : index
    %214 = vector.load %arg25[%c0_100, %c0_101, %c0_102] : memref<1x1x128xf32, #tpu.memory_space<vmem>>, vector<1x1x128xf32>
    %215 = vector.shape_cast %214 : vector<1x1x128xf32> to vector<1x128xf32>
    %216 = arith.truncf %211 : vector<64x32xf32> to vector<64x32xbf16>
    %cst_103 = arith.constant dense<0.000000e+00> : vector<64x128xf32>
    %217 = tpu.matmul %216, %213, %cst_103 {dimension_numbers = #tpu.dot_dimension_numbers<[1], [0], [0], [1], [0, 0, 1, 1], [], []>} : vector<64x32xbf16>, vector<32x128xbf16>, vector<64x128xf32> -> vector<64x128xf32>
    %218 = vector.broadcast %215 : vector<1x128xf32> to vector<64x128xf32>
    %219 = arith.addf %217, %218 : vector<64x128xf32>
    %220 = arith.mulf %219, %219 : vector<64x128xf32>
    %221 = arith.mulf %219, %220 : vector<64x128xf32>
    %cst_104 = arith.constant 4.471500e-02 : f32
    %222 = vector.broadcast %cst_104 : f32 to vector<64x128xf32>
    %223 = arith.mulf %222, %221 : vector<64x128xf32>
    %224 = arith.addf %219, %223 : vector<64x128xf32>
    %cst_105 = arith.constant 0.797884583 : f32
    %225 = vector.broadcast %cst_105 : f32 to vector<64x128xf32>
    %226 = arith.mulf %225, %224 : vector<64x128xf32>
    %227 = math.tanh %226 : vector<64x128xf32>
    %cst_106 = arith.constant 1.000000e+00 : f32
    %228 = vector.broadcast %cst_106 : f32 to vector<64x128xf32>
    %229 = arith.addf %228, %227 : vector<64x128xf32>
    %cst_107 = arith.constant 5.000000e-01 : f32
    %230 = vector.broadcast %cst_107 : f32 to vector<64x128xf32>
    %231 = arith.mulf %230, %229 : vector<64x128xf32>
    %232 = arith.mulf %219, %231 : vector<64x128xf32>
    %c0_108 = arith.constant 0 : index
    %c0_109 = arith.constant 0 : index
    %c0_110 = arith.constant 0 : index
    %233 = vector.load %arg26[%c0_108, %c0_109, %c0_110] : memref<1x128x32xbf16, #tpu.memory_space<vmem>>, vector<1x128x32xbf16>
    %234 = vector.shape_cast %233 : vector<1x128x32xbf16> to vector<128x32xbf16>
    %c0_111 = arith.constant 0 : index
    %c0_112 = arith.constant 0 : index
    %c0_113 = arith.constant 0 : index
    %235 = vector.load %arg27[%c0_111, %c0_112, %c0_113] : memref<1x1x32xf32, #tpu.memory_space<vmem>>, vector<1x1x32xf32>
    %236 = vector.shape_cast %235 : vector<1x1x32xf32> to vector<1x32xf32>
    %237 = arith.truncf %232 : vector<64x128xf32> to vector<64x128xbf16>
    %cst_114 = arith.constant dense<0.000000e+00> : vector<64x32xf32>
    %238 = tpu.matmul %237, %234, %cst_114 {dimension_numbers = #tpu.dot_dimension_numbers<[1], [0], [0], [1], [0, 0, 1, 1], [], []>} : vector<64x128xbf16>, vector<128x32xbf16>, vector<64x32xf32> -> vector<64x32xf32>
    %239 = vector.broadcast %236 : vector<1x32xf32> to vector<64x32xf32>
    %240 = arith.addf %238, %239 : vector<64x32xf32>
    %241 = vector.broadcast %13 : vector<1x32xf32> to vector<64x32xf32>
    %242 = arith.mulf %241, %240 : vector<64x32xf32>
    %243 = arith.addf %189, %242 : vector<64x32xf32>
    %c0_115 = arith.constant 0 : index
    %c0_116 = arith.constant 0 : index
    %244 = vector.load %arg31[%c0_115, %c0_116] : memref<64x32xf32, #tpu.memory_space<vmem>>, vector<64x32xf32>
    tpu.vector_store %arg31[%c0_115, %c0_116], %243 {strides = array<i32>} : memref<64x32xf32, #tpu.memory_space<vmem>>, vector<64x32xf32>,
    %c1_i32 = arith.constant 1 : i32
    %245 = arith.cmpi eq, %arg1, %c1_i32 : i32
    %246 = arith.extui %245 : i1 to i32
    %c0_i32_117 = arith.constant 0 : i32
    %247 = arith.cmpi ne, %246, %c0_i32_117 : i32
    scf.if %247 {
      %c0_118 = arith.constant 0 : index
      %c0_119 = arith.constant 0 : index
      %248 = vector.load %arg28[%c0_118, %c0_119] : memref<32x8xbf16, #tpu.memory_space<vmem>>, vector<32x8xbf16>
      %cst_120 = arith.constant dense<0.000000e+00> : vector<64xf32>
      %249 = vector.multi_reduction <add>, %243, %cst_120 [1] : vector<64x32xf32> to vector<64xf32>
      %250 = vector.shape_cast %249 : vector<64xf32> to vector<64x1xf32>
      %cst_121 = arith.constant 3.200000e+01 : f32
      %251 = vector.broadcast %cst_121 : f32 to vector<64x1xf32>
      %252 = arith.divf %250, %251 : vector<64x1xf32>
      %253 = vector.broadcast %252 : vector<64x1xf32> to vector<64x32xf32>
      %254 = arith.subf %243, %253 : vector<64x32xf32>
      %255 = arith.mulf %254, %254 : vector<64x32xf32>
      %cst_122 = arith.constant dense<0.000000e+00> : vector<64xf32>
      %256 = vector.multi_reduction <add>, %255, %cst_122 [1] : vector<64x32xf32> to vector<64xf32>
      %257 = vector.shape_cast %256 : vector<64xf32> to vector<64x1xf32>
      %cst_123 = arith.constant 3.200000e+01 : f32
      %258 = vector.broadcast %cst_123 : f32 to vector<64x1xf32>
      %259 = arith.divf %257, %258 : vector<64x1xf32>
      %cst_124 = arith.constant 9.99999974E-6 : f32
      %260 = vector.broadcast %cst_124 : f32 to vector<64x1xf32>
      %261 = arith.addf %259, %260 : vector<64x1xf32>
      %262 = math.rsqrt %261 : vector<64x1xf32>
      %263 = vector.broadcast %262 : vector<64x1xf32> to vector<64x32xf32>
      %264 = arith.mulf %254, %263 : vector<64x32xf32>
      %265 = arith.truncf %264 : vector<64x32xf32> to vector<64x32xbf16>
      %cst_125 = arith.constant dense<0.000000e+00> : vector<64x8xf32>
      %266 = tpu.matmul %265, %248, %cst_125 {dimension_numbers = #tpu.dot_dimension_numbers<[1], [0], [0], [1], [0, 0, 1, 1], [], []>} : vector<64x32xbf16>, vector<32x8xbf16>, vector<64x8xf32> -> vector<64x8xf32>
      %c0_126 = arith.constant 0 : index
      %c0_127 = arith.constant 0 : index
      %267 = vector.load %arg29[%c0_126, %c0_127] : memref<1x8xf32, #tpu.memory_space<vmem>>, vector<1x8xf32>
      %268 = vector.broadcast %267 : vector<1x8xf32> to vector<64x8xf32>
      %269 = arith.addf %266, %268 : vector<64x8xf32>
      %c0_128 = arith.constant 0 : index
      %c0_129 = arith.constant 0 : index
      %c0_130 = arith.constant 0 : index
      %270 = vector.load %arg30[%c0_128, %c0_129, %c0_130] : memref<1x64x8xf32, #tpu.memory_space<vmem>>, vector<1x64x8xf32>
      %271 = vector.shape_cast %270 : vector<1x64x8xf32> to vector<64x8xf32>
      %272 = vector.shape_cast %269 : vector<64x8xf32> to vector<1x64x8xf32>
      tpu.vector_store %arg30[%c0_128, %c0_129, %c0_130], %272 {strides = array<i32>} : memref<1x64x8xf32, #tpu.memory_space<vmem>>, vector<1x64x8xf32>,
    } else {
    }
    return
  }
  func.func @transform_0(%arg0: i32, %arg1: i32) -> (i32, i32, i32) {
    %c0_i32 = arith.constant 0 : i32
    %c0_i32_0 = arith.constant 0 : i32
    %c0_i32_1 = arith.constant 0 : i32
    return %arg0, %c0_i32, %c0_i32_0 : i32, i32, i32
  }
  func.func @transform_1(%arg0: i32, %arg1: i32) -> (i32, i32, i32) {
    %c0_i32 = arith.constant 0 : i32
    %c0_i32_0 = arith.constant 0 : i32
    %c0_i32_1 = arith.constant 0 : i32
    return %arg0, %c0_i32, %c0_i32_0 : i32, i32, i32
  }
  func.func @transform_2(%arg0: i32, %arg1: i32) -> (i32, i32, i32) {
    %c0_i32 = arith.constant 0 : i32
    %c0_i32_0 = arith.constant 0 : i32
    %c0_i32_1 = arith.constant 0 : i32
    return %arg0, %c0_i32, %c0_i32_0 : i32, i32, i32
  }
  func.func @transform_3(%arg0: i32, %arg1: i32) -> (i32, i32, i32, i32) {
    %c0_i32 = arith.constant 0 : i32
    %c0_i32_0 = arith.constant 0 : i32
    %c0_i32_1 = arith.constant 0 : i32
    return %arg0, %arg1, %c0_i32, %c0_i32_0 : i32, i32, i32, i32
  }
  func.func @transform_4(%arg0: i32, %arg1: i32) -> (i32, i32) {
    %c0_i32 = arith.constant 0 : i32
    %c0_i32_0 = arith.constant 0 : i32
    %c0_i32_1 = arith.constant 0 : i32
    return %c0_i32, %c0_i32_0 : i32, i32
  }
  func.func @transform_5(%arg0: i32, %arg1: i32) -> (i32, i32) {
    %c0_i32 = arith.constant 0 : i32
    %c0_i32_0 = arith.constant 0 : i32
    %c0_i32_1 = arith.constant 0 : i32
    return %c0_i32, %c0_i32_0 : i32, i32
  }
  func.func @transform_6(%arg0: i32, %arg1: i32) -> (i32, i32, i32) {
    %c0_i32 = arith.constant 0 : i32
    %c0_i32_0 = arith.constant 0 : i32
    %c0_i32_1 = arith.constant 0 : i32
    return %arg1, %c0_i32, %c0_i32_0 : i32, i32, i32
  }
  func.func @transform_7(%arg0: i32, %arg1: i32) -> (i32, i32, i32) {
    %c0_i32 = arith.constant 0 : i32
    %c0_i32_0 = arith.constant 0 : i32
    %c0_i32_1 = arith.constant 0 : i32
    return %arg1, %c0_i32, %c0_i32_0 : i32, i32, i32
  }
  func.func @transform_8(%arg0: i32, %arg1: i32) -> (i32, i32, i32) {
    %c0_i32 = arith.constant 0 : i32
    %c0_i32_0 = arith.constant 0 : i32
    %c0_i32_1 = arith.constant 0 : i32
    return %arg1, %c0_i32, %c0_i32_0 : i32, i32, i32
  }
  func.func @transform_9(%arg0: i32, %arg1: i32) -> (i32, i32, i32) {
    %c0_i32 = arith.constant 0 : i32
    %c0_i32_0 = arith.constant 0 : i32
    %c0_i32_1 = arith.constant 0 : i32
    return %arg1, %c0_i32, %c0_i32_0 : i32, i32, i32
  }
  func.func @transform_10(%arg0: i32, %arg1: i32) -> (i32, i32, i32) {
    %c0_i32 = arith.constant 0 : i32
    %c0_i32_0 = arith.constant 0 : i32
    %c0_i32_1 = arith.constant 0 : i32
    return %arg1, %c0_i32, %c0_i32_0 : i32, i32, i32
  }
  func.func @transform_11(%arg0: i32, %arg1: i32) -> (i32, i32, i32) {
    %c0_i32 = arith.constant 0 : i32
    %c0_i32_0 = arith.constant 0 : i32
    %c0_i32_1 = arith.constant 0 : i32
    return %arg1, %c0_i32, %c0_i32_0 : i32, i32, i32
  }
  func.func @transform_12(%arg0: i32, %arg1: i32) -> (i32, i32, i32) {
    %c0_i32 = arith.constant 0 : i32
    %c0_i32_0 = arith.constant 0 : i32
    %c0_i32_1 = arith.constant 0 : i32
    return %arg1, %c0_i32, %c0_i32_0 : i32, i32, i32
  }
  func.func @transform_13(%arg0: i32, %arg1: i32) -> (i32, i32, i32) {
    %c0_i32 = arith.constant 0 : i32
    %c0_i32_0 = arith.constant 0 : i32
    %c0_i32_1 = arith.constant 0 : i32
    return %arg1, %c0_i32, %c0_i32_0 : i32, i32, i32
  }
  func.func @transform_14(%arg0: i32, %arg1: i32) -> (i32, i32, i32) {
    %c0_i32 = arith.constant 0 : i32
    %c0_i32_0 = arith.constant 0 : i32
    %c0_i32_1 = arith.constant 0 : i32
    return %arg1, %c0_i32, %c0_i32_0 : i32, i32, i32
  }
  func.func @transform_15(%arg0: i32, %arg1: i32) -> (i32, i32, i32) {
    %c0_i32 = arith.constant 0 : i32
    %c0_i32_0 = arith.constant 0 : i32
    %c0_i32_1 = arith.constant 0 : i32
    return %arg1, %c0_i32, %c0_i32_0 : i32, i32, i32
  }
  func.func @transform_16(%arg0: i32, %arg1: i32) -> (i32, i32, i32) {
    %c0_i32 = arith.constant 0 : i32
    %c0_i32_0 = arith.constant 0 : i32
    %c0_i32_1 = arith.constant 0 : i32
    return %arg1, %c0_i32, %c0_i32_0 : i32, i32, i32
  }
  func.func @transform_17(%arg0: i32, %arg1: i32) -> (i32, i32, i32) {
    %c0_i32 = arith.constant 0 : i32
    %c0_i32_0 = arith.constant 0 : i32
    %c0_i32_1 = arith.constant 0 : i32
    return %arg1, %c0_i32, %c0_i32_0 : i32, i32, i32
  }
  func.func @transform_18(%arg0: i32, %arg1: i32) -> (i32, i32, i32) {
    %c0_i32 = arith.constant 0 : i32
    %c0_i32_0 = arith.constant 0 : i32
    %c0_i32_1 = arith.constant 0 : i32
    return %arg1, %c0_i32, %c0_i32_0 : i32, i32, i32
  }
  func.func @transform_19(%arg0: i32, %arg1: i32) -> (i32, i32, i32) {
    %c0_i32 = arith.constant 0 : i32
    %c0_i32_0 = arith.constant 0 : i32
    %c0_i32_1 = arith.constant 0 : i32
    return %arg1, %c0_i32, %c0_i32_0 : i32, i32, i32
  }
  func.func @transform_20(%arg0: i32, %arg1: i32) -> (i32, i32, i32) {
    %c0_i32 = arith.constant 0 : i32
    %c0_i32_0 = arith.constant 0 : i32
    %c0_i32_1 = arith.constant 0 : i32
    return %arg1, %c0_i32, %c0_i32_0 : i32, i32, i32
  }
  func.func @transform_21(%arg0: i32, %arg1: i32) -> (i32, i32, i32) {
    %c0_i32 = arith.constant 0 : i32
    %c0_i32_0 = arith.constant 0 : i32
    %c0_i32_1 = arith.constant 0 : i32
    return %arg1, %c0_i32, %c0_i32_0 : i32, i32, i32
  }
  func.func @transform_22(%arg0: i32, %arg1: i32) -> (i32, i32, i32) {
    %c0_i32 = arith.constant 0 : i32
    %c0_i32_0 = arith.constant 0 : i32
    %c0_i32_1 = arith.constant 0 : i32
    return %arg1, %c0_i32, %c0_i32_0 : i32, i32, i32
  }
  func.func @transform_23(%arg0: i32, %arg1: i32) -> (i32, i32, i32) {
    %c0_i32 = arith.constant 0 : i32
    %c0_i32_0 = arith.constant 0 : i32
    %c0_i32_1 = arith.constant 0 : i32
    return %arg1, %c0_i32, %c0_i32_0 : i32, i32, i32
  }
  func.func @transform_24(%arg0: i32, %arg1: i32) -> (i32, i32, i32) {
    %c0_i32 = arith.constant 0 : i32
    %c0_i32_0 = arith.constant 0 : i32
    %c0_i32_1 = arith.constant 0 : i32
    return %arg1, %c0_i32, %c0_i32_0 : i32, i32, i32
  }
  func.func @transform_25(%arg0: i32, %arg1: i32) -> (i32, i32, i32) {
    %c0_i32 = arith.constant 0 : i32
    %c0_i32_0 = arith.constant 0 : i32
    %c0_i32_1 = arith.constant 0 : i32
    return %arg1, %c0_i32, %c0_i32_0 : i32, i32, i32
  }
  func.func @transform_26(%arg0: i32, %arg1: i32) -> (i32, i32) {
    %c0_i32 = arith.constant 0 : i32
    %c0_i32_0 = arith.constant 0 : i32
    %c0_i32_1 = arith.constant 0 : i32
    return %c0_i32, %c0_i32_0 : i32, i32
  }
  func.func @transform_27(%arg0: i32, %arg1: i32) -> (i32, i32) {
    %c0_i32 = arith.constant 0 : i32
    %c0_i32_0 = arith.constant 0 : i32
    %c0_i32_1 = arith.constant 0 : i32
    return %c0_i32, %c0_i32_0 : i32, i32
  }
  func.func @transform_28(%arg0: i32, %arg1: i32) -> (i32, i32, i32) {
    %c0_i32 = arith.constant 0 : i32
    %c0_i32_0 = arith.constant 0 : i32
    %c0_i32_1 = arith.constant 0 : i32
    return %arg0, %c0_i32, %c0_i32_0 : i32, i32, i32
  }
}

</mosaic_0001>

<bundles_post_ra>
// kernel: mul.18
= control target key start
LH: loop header
LB: loop body
LE: loop exit
PB: predicated region body
PF: predicated region fallthrough
CT: control target
= control target key end

     0   :  { %vm9_vm0 = vcmask 7168   ;;  %vm13_vm1 = vcmask 15360   ;;  %s1128_s14 = smov 127   ;;  %s1129_s15 = smov 125   ;;  %vm3_vm2 = vcmask 23552   ;;  %vm16_vm3 = vcmask 1048568   ;;  %s1662_s0 = inlined_call_operand.vmem [shape: f32[128,3], index: 0, kind: input, shape index: {}]   ;;  %s1663_s1 = inlined_call_operand.vmem [shape: f32[384], index: 1, kind: output, shape index: {}]  }
   0x1   :  { %v872_v0 = vld [vmem:[%s1662_s0 + $0x55] sm:$0x1]   ;;  %v876_v3 = vld [vmem:[%s1662_s0 + $0x7f] sm:$0x1]   ;;  %v874_v4 = vld [vmem:[%s1662_s0 + $0x2a] sm:$0x1]  }
   0x2   :  { %v873_v1 = vld [vmem:[%s1662_s0 + $0x55] sm:$0x1]   ;;  %34 = vrot.lane.b32.xlu1 %v876_v3, %s1129_s15  ;;  %v875_v5 = vld [vmem:[%s1662_s0 + $0x2a] sm:$0x1]   ;;  %v877_v7 = vld [vmem:[%s1662_s0 + $0x54] sm:$0x1]  }
   0x3   :  { %v10_v2 = vsel %vm9_vm0, %v873_v1, %v872_v0  ;;  %v24_v6 = vsel %vm13_vm1, %v875_v5, %v874_v4  ;;  %s1130_s20 = smov 126   ;;  %s1131_s21 = smov 124   ;;  %v878_v8 = vld [vmem:[%s1662_s0 + $0x29] sm:$0x1]   ;;  %v879_v9 = vld [vmem:[%s1662_s0 + $0x7e] sm:$0x1]  }
   0x4   :  { %11 = vrot.lane.b32.xlu0 %v10_v2, %s1128_s14  ;;  %s1132_s26 = smov 123   ;;  %s1133_s27 = smov 122   ;;  %v880_v10 = vld [vmem:[%s1662_s0 + $0x53] sm:$0x1]   ;;  %v881_v11 = vld [vmem:[%s1662_s0 + $0x28] sm:$0x1]  }
   0x5   :  { %s1134_s3 = smov 121   ;;  %s1135_s4 = smov 120   ;;  %v882_v12 = vld [vmem:[%s1662_s0 + $0x7d] sm:$0x1]   ;;  %v883_v13 = vld [vmem:[%s1662_s0 + $0x52] sm:$0x1]  }
   0x6   :  { %41 = vrot.lane.b32.xlu1 %v877_v7, %s1131_s21  ;;  %s1136_s9 = smov 119   ;;  %s1137_s10 = smov 118   ;;  %v884_v14 = vld [vmem:[%s1662_s0 + $0x27] sm:$0x1]   ;;  %v885_v15 = vld [vmem:[%s1662_s0 + $0x7c] sm:$0x1]  }
   0x7   :  { %s1138_s15 = smov 117   ;;  %s1139_s16 = smov 116   ;;  %v886_v16 = vld [vmem:[%s1662_s0 + $0x51] sm:$0x1]   ;;  %v887_v17 = vld [vmem:[%s1662_s0 + $0x26] sm:$0x1]  }
   0x8   :  { %25 = vrot.lane.b32.xlu0 %v24_v6, %s1130_s20  ;;  %s1140_s21 = smov 115   ;;  %s1141_s22 = smov 114   ;;  %v888_v18 = vld [vmem:[%s1662_s0 + $0x7b] sm:$0x1]   ;;  %v889_v19 = vld [vmem:[%s1662_s0 + $0x50] sm:$0x1]  }
   0x9   :  { %s1143_s28 = smov 112   ;;  %v890_v20 = vld [vmem:[%s1662_s0 + $0x25] sm:$0x1]   ;;  %v891_v21 = vld [vmem:[%s1662_s0 + $0x7a] sm:$0x1]   ;;  %s1144_s6 = smov 111  }
   0xa   :  { %54 = vrot.lane.b32.xlu1 %v879_v9, %s1133_s27  ;;  %s1142_s27 = smov 113   ;;  %v2_v22 = vld [vmem:[%s1662_s0] sm:$0x1]   ;;  %s1145_s7 = smov 110   ;;  %v892_v23 = vld [vmem:[%s1662_s0 + $0x4f] sm:$0x1]  }
   0xb   :  { %4 = vst.msk [vmem:[#allocation0] sm:$0x1] %vm3_vm2, %v2_v22   ;;  %v893_v24 = vld [vmem:[%s1662_s0 + $0x24] sm:$0x1]   ;;  %s1146_s12 = smov 109   ;;  %s1147_s13 = smov 108  }
   0xc   :  { %48 = vrot.lane.b32.xlu0 %v878_v8, %s1132_s26  ;;  %v894_v25 = vld [vmem:[%s1662_s0 + $0x79] sm:$0x1]   ;;  %v895_v26 = vld [vmem:[%s1662_s0 + $0x4e] sm:$0x1]   ;;  %s1148_s18 = smov 107   ;;  %s1149_s19 = smov 106  }
   0xd   :  { %v896_v27 = vld [vmem:[%s1662_s0 + $0x23] sm:$0x1]   ;;  %v897_v28 = vld [vmem:[%s1662_s0 + $0x78] sm:$0x1]   ;;  %s1150_s24 = smov 105   ;;  %s1151_s25 = smov 104  }
   0xe   :  { %68 = vrot.lane.b32.xlu1 %v881_v11, %s1135_s4  ;;  %v898_v29 = vld [vmem:[%s1662_s0 + $0x4d] sm:$0x1]   ;;  %v899_v30 = vld [vmem:[%s1662_s0 + $0x22] sm:$0x1]   ;;  %s1152_s30 = smov 103   ;;  %s1153_s2 = smov 102  }
   0xf   :  { %v900_v31 = vld [vmem:[%s1662_s0 + $0x77] sm:$0x1]   ;;  %v901_v32 = vld [vmem:[%s1662_s0 + $0x4c] sm:$0x1]   ;;  %s1155_s8 = smov 100   ;;  %s1157_s14 = smov 98  }
  0x10   :  { %61 = vrot.lane.b32.xlu0 %v880_v10, %s1134_s3  ;;  %v902_v33 = vld [vmem:[%s1662_s0 + $0x21] sm:$0x1]   ;;  %v903_v34 = vld [vmem:[%s1662_s0 + $0x76] sm:$0x1]   ;;  %v904_v35 = vld [vmem:[%s1662_s0 + $0x4b] sm:$0x1]  }
  0x11   :  { %v905_v36 = vld [vmem:[%s1662_s0 + $0x20] sm:$0x1]   ;;  %s1159_s20 = smov 96   ;;  %v906_v37 = vld [vmem:[%s1662_s0 + $0x75] sm:$0x1]   ;;  %s1161_s26 = smov 94  }
  0x12   :  { %81 = vrot.lane.b32.xlu1 %v883_v13, %s1137_s10  ;;  %v907_v38 = vld [vmem:[%s1662_s0 + $0x4a] sm:$0x1]   ;;  %v908_v39 = vld [vmem:[%s1662_s0 + $0x1f] sm:$0x1]   ;;  %v909_v40 = vld [vmem:[%s1662_s0 + $0x74] sm:$0x1]  }
  0x13   :  { %s1163_s3 = smov 92   ;;  %v910_v41 = vld [vmem:[%s1662_s0 + $0x49] sm:$0x1]   ;;  %v911_v42 = vld [vmem:[%s1662_s0 + $0x1e] sm:$0x1]   ;;  %s1173_s4 = smov 82  }
  0x14   :  { %74 = vrot.lane.b32.xlu0 %v882_v12, %s1136_s9  ;;  %s1165_s9 = smov 90   ;;  %v912_v43 = vld [vmem:[%s1662_s0 + $0x73] sm:$0x1]   ;;  %v913_v44 = vld [vmem:[%s1662_s0 + $0x48] sm:$0x1]   ;;  %s1175_s10 = smov 80  }
  0x15   :  { %v914_v45 = vld [vmem:[%s1662_s0 + $0x1d] sm:$0x1]   ;;  %v915_v46 = vld [vmem:[%s1662_s0 + $0x72] sm:$0x1]   ;;  %v916_v47 = vld [vmem:[%s1662_s0 + $0x47] sm:$0x1]  }
  0x16   :  { %94 = vrot.lane.b32.xlu1 %v885_v15, %s1139_s16  ;;  %v917_v48 = vld [vmem:[%s1662_s0 + $0x1c] sm:$0x1]   ;;  %v918_v49 = vld [vmem:[%s1662_s0 + $0x71] sm:$0x1]   ;;  %v919_v50 = vld [vmem:[%s1662_s0 + $0x46] sm:$0x1]  }
  0x17   :  { %v920_v51 = vld [vmem:[%s1662_s0 + $0x1b] sm:$0x1]   ;;  %v921_v52 = vld [vmem:[%s1662_s0 + $0x70] sm:$0x1]   ;;  %v922_v53 = vld [vmem:[%s1662_s0 + $0x45] sm:$0x1]  }
  0x18   :  { %88 = vrot.lane.b32.xlu0 %v884_v14, %s1138_s15  ;;  %s1167_s15 = smov 88   ;;  %v923_v54 = vld [vmem:[%s1662_s0 + $0x1a] sm:$0x1]   ;;  %s1177_s16 = smov 78   ;;  %v924_v55 = vld [vmem:[%s1662_s0 + $0x6f] sm:$0x1]  }
  0x19   :  { %v925_v56 = vld [vmem:[%s1662_s0 + $0x44] sm:$0x1]   ;;  %v926_v57 = vld [vmem:[%s1662_s0 + $0x19] sm:$0x1]   ;;  %v927_v58 = vld [vmem:[%s1662_s0 + $0x6e] sm:$0x1]  }
  0x1a   :  { %108 = vrot.lane.b32.xlu1 %v887_v17, %s1141_s22  ;;  %s1179_s22 = smov 76   ;;  %v928_v59 = vld [vmem:[%s1662_s0 + $0x43] sm:$0x1]   ;;  %v929_v60 = vld [vmem:[%s1662_s0 + $0x18] sm:$0x1]   ;;  %s1183_s5 = smov 72  }
  0x1b   :  { %v930_v61 = vld [vmem:[%s1662_s0 + $0x6d] sm:$0x1]   ;;  %v931_v62 = vld [vmem:[%s1662_s0 + $0x42] sm:$0x1]   ;;  %s1185_s11 = smov 70   ;;  %vm36_vm4 = vcmask 1048552  }
  0x1c   :  { %101 = vrot.lane.b32.xlu0 %v886_v16, %s1140_s21  ;;  %s1169_s21 = smov 86   ;;  %v932_v63 = vld [vmem:[%s1662_s0 + $0x17] sm:$0x1]   ;;  %v933_v0 = vld [vmem:[%s1662_s0 + $0x6c] sm:$0x1]   ;;  %vm30_vm5 = vcmask 1048560  }
  0x1d   :  { %s1187_s17 = smov 68   ;;  %v934_v3 = vld [vmem:[%s1662_s0 + $0x41] sm:$0x1]   ;;  %vm43_vm6 = vcmask 1040352   ;;  %v935_v4 = vld [vmem:[%s1662_s0 + $0x16] sm:$0x1]  }
  0x1e   :  { %121 = vrot.lane.b32.xlu1 %v889_v19, %s1143_s28  ;;  %s1181_s28 = smov 74   ;;  %vm50_vm7 = vcmask 1032152   ;;  %s1189_s23 = smov 66   ;;  %vm56_vm8 = vcmask 1023952   ;;  %v936_v7 = vld [vmem:[%s1662_s0 + $0x6b] sm:$0x1]  }
  0x1f   :  { %v937_v8 = vld [vmem:[%s1662_s0 + $0x40] sm:$0x1]   ;;  %vm63_vm9 = vcmask 1015752   ;;  %s1191_s29 = smov 64   ;;  %vm70_vm10 = vcmask 1007552   ;;  %vm76_vm11 = vcmask 999352  }
  0x20   :  { %114 = vrot.lane.b32.xlu0 %v888_v18, %s1142_s27  ;;  %s1171_s27 = smov 84   ;;  %v938_v11 = vld [vmem:[%s1662_s0 + $0x15] sm:$0x1]   ;;  %v939_v12 = vld [vmem:[%s1662_s0 + $0x6a] sm:$0x1]   ;;  %vm83_vm12 = vcmask 991152  }
  0x21   :  { %v940_v15 = vld [vmem:[%s1662_s0 + $0x3f] sm:$0x1]   ;;  %v941_v16 = vld [vmem:[%s1662_s0 + $0x14] sm:$0x1]   ;;  %vm90_vm13 = vcmask 982952   ;;  %vm96_vm14 = vcmask 974752  }
  0x22   :  { %134 = vrot.lane.b32.xlu1 %v891_v21, %s1145_s7  ;;  %s1154_s7 = smov 101   ;;  %v942_v19 = vld [vmem:[%s1662_s0 + $0x69] sm:$0x1]   ;;  %vm103_vm15 = vcmask 966552   ;;  %vm123_vm2 = vcmask 941952  }
  0x24   :  { %128 = vrot.lane.b32.xlu0 %v890_v20, %s1144_s6  ;;  %s1193_s6 = smov 62   ;;  %v943_v20 = vld [vmem:[%s1662_s0 + $0x3e] sm:$0x1]  }
  0x26   :  { %148 = vrot.lane.b32.xlu1 %v893_v24, %s1147_s13  ;;  %s1156_s13 = smov 99   ;;  %v945_v24 = vld [vmem:[%s1662_s0 + $0x68] sm:$0x1]  }
  0x28   :  { %141 = vrot.lane.b32.xlu0 %v892_v23, %s1146_s12  ;;  %s1195_s12 = smov 60   ;;  %v944_v23 = vld [vmem:[%s1662_s0 + $0x13] sm:$0x1]  }
  0x2a   :  { %161 = vrot.lane.b32.xlu1 %v895_v26, %s1149_s19  ;;  %s1158_s19 = smov 97  }
  0x2c   :  { %154 = vrot.lane.b32.xlu0 %v894_v25, %s1148_s18  ;;  %s1197_s18 = smov 58  }
  0x2e   :  { %174 = vrot.lane.b32.xlu1 %v897_v28, %s1151_s25  ;;  %s1160_s25 = smov 95   ;;  %v947_v28 = vld [vmem:[%s1662_s0 + $0x12] sm:$0x1]  }
  0x30   :  { %168 = vrot.lane.b32.xlu0 %v896_v27, %s1150_s24  ;;  %s1199_s24 = smov 56   ;;  %v946_v27 = vld [vmem:[%s1662_s0 + $0x3d] sm:$0x1]  }
  0x32   :  { %188 = vrot.lane.b32.xlu1 %v899_v30, %s1153_s2  ;;  %s1162_s2 = smov 93  }
  0x34   :  { %181 = vrot.lane.b32.xlu0 %v898_v29, %s1152_s30  ;;  %s1201_s30 = smov 54  }
  0x36   :  { %201 = vrot.lane.b32.xlu1 %v901_v32, %s1155_s8  ;;  %s1164_s8 = smov 91   ;;  %v949_v32 = vld [vmem:[%s1662_s0 + $0x3c] sm:$0x1]  }
  0x38   :  { %194 = vrot.lane.b32.xlu0 %v900_v31, %s1154_s7  ;;  %v948_v31 = vld [vmem:[%s1662_s0 + $0x67] sm:$0x1]   ;;  %s1203_s7 = smov 52  }
  0x3a   :  { %214 = vrot.lane.b32.xlu1 %v903_v34, %s1157_s14  ;;  %s1166_s14 = smov 89  }
  0x3c   :  { %208 = vrot.lane.b32.xlu0 %v902_v33, %s1156_s13  ;;  %s1205_s13 = smov 50  }
  0x3e   :  { %228 = vrot.lane.b32.xlu1 %v905_v36, %s1159_s20  ;;  %s1168_s20 = smov 87   ;;  %v951_v36 = vld [vmem:[%s1662_s0 + $0x66] sm:$0x1]  }
  0x40   :  { %221 = vrot.lane.b32.xlu0 %v904_v35, %s1158_s19  ;;  %v950_v35 = vld [vmem:[%s1662_s0 + $0x11] sm:$0x1]   ;;  %s1207_s19 = smov 48  }
  0x42   :  { %241 = vrot.lane.b32.xlu1 %v907_v38, %s1161_s26  ;;  %s1170_s26 = smov 85  }
  0x44   :  { %234 = vrot.lane.b32.xlu0 %v906_v37, %s1160_s25  ;;  %s1209_s25 = smov 46  }
  0x46   :  { %254 = vrot.lane.b32.xlu1 %v909_v40, %s1163_s3  ;;  %s1172_s3 = smov 83   ;;  %v953_v40 = vld [vmem:[%s1662_s0 + $0x10] sm:$0x1]  }
  0x48   :  { %248 = vrot.lane.b32.xlu0 %v908_v39, %s1162_s2  ;;  %v952_v39 = vld [vmem:[%s1662_s0 + $0x3b] sm:$0x1]   ;;  %s1211_s2 = smov 44  }
  0x4a   :  { %268 = vrot.lane.b32.xlu1 %v911_v42, %s1165_s9  ;;  %s1174_s9 = smov 81  }
  0x4c   :  { %261 = vrot.lane.b32.xlu0 %v910_v41, %s1164_s8  ;;  %s1213_s8 = smov 42  }
  0x4e   :  { %281 = vrot.lane.b32.xlu1 %v913_v44, %s1167_s15  ;;  %s1176_s15 = smov 79   ;;  %v955_v44 = vld [vmem:[%s1662_s0 + $0x3a] sm:$0x1]  }
  0x50   :  { %274 = vrot.lane.b32.xlu0 %v912_v43, %s1166_s14  ;;  %v954_v43 = vld [vmem:[%s1662_s0 + $0x65] sm:$0x1]   ;;  %s1215_s14 = smov 40  }
  0x52   :  { %294 = vrot.lane.b32.xlu1 %v915_v46, %s1169_s21  ;;  %s1178_s21 = smov 77  }
  0x54   :  { %288 = vrot.lane.b32.xlu0 %v914_v45, %s1168_s20  ;;  %s1217_s20 = smov 38  }
  0x56   :  { %308 = vrot.lane.b32.xlu1 %v917_v48, %s1171_s27  ;;  %s1180_s27 = smov 75   ;;  %v957_v48 = vld [vmem:[%s1662_s0 + $0x64] sm:$0x1]  }
  0x58   :  { %301 = vrot.lane.b32.xlu0 %v916_v47, %s1170_s26  ;;  %v956_v47 = vld [vmem:[%s1662_s0 + $0xf] sm:$0x1]   ;;  %s1219_s26 = smov 36  }
  0x5a   :  { %321 = vrot.lane.b32.xlu1 %v919_v50, %s1173_s4  ;;  %s1182_s4 = smov 73  }
  0x5c   :  { %314 = vrot.lane.b32.xlu0 %v918_v49, %s1172_s3  ;;  %s1221_s3 = smov 34  }
  0x5e   :  { %334 = vrot.lane.b32.xlu1 %v921_v52, %s1175_s10  ;;  %s1184_s10 = smov 71   ;;  %v959_v52 = vld [vmem:[%s1662_s0 + $0xe] sm:$0x1]  }
  0x60   :  { %328 = vrot.lane.b32.xlu0 %v920_v51, %s1174_s9  ;;  %v958_v51 = vld [vmem:[%s1662_s0 + $0x39] sm:$0x1]   ;;  %s1223_s9 = smov 32  }
  0x62   :  { %348 = vrot.lane.b32.xlu1 %v923_v54, %s1177_s16  ;;  %s1186_s16 = smov 69  }
  0x64   :  { %341 = vrot.lane.b32.xlu0 %v922_v53, %s1176_s15  ;;  %s1225_s15 = smov 30  }
  0x66   :  { %361 = vrot.lane.b32.xlu1 %v925_v56, %s1179_s22  ;;  %s1188_s22 = smov 67   ;;  %v961_v56 = vld [vmem:[%s1662_s0 + $0x38] sm:$0x1]  }
  0x68   :  { %354 = vrot.lane.b32.xlu0 %v924_v55, %s1178_s21  ;;  %v960_v55 = vld [vmem:[%s1662_s0 + $0x63] sm:$0x1]   ;;  %s1227_s21 = smov 28  }
  0x6a   :  { %374 = vrot.lane.b32.xlu1 %v927_v58, %s1181_s28  ;;  %s1190_s28 = smov 65  }
  0x6c   :  { %368 = vrot.lane.b32.xlu0 %v926_v57, %s1180_s27  ;;  %s1229_s27 = smov 26  }
  0x6e   :  { %388 = vrot.lane.b32.xlu1 %v929_v60, %s1183_s5  ;;  %s1192_s5 = smov 63   ;;  %v963_v60 = vld [vmem:[%s1662_s0 + $0x62] sm:$0x1]  }
  0x70   :  { %381 = vrot.lane.b32.xlu0 %v928_v59, %s1182_s4  ;;  %v962_v59 = vld [vmem:[%s1662_s0 + $0xd] sm:$0x1]   ;;  %s1231_s4 = smov 24  }
  0x72   :  { %401 = vrot.lane.b32.xlu1 %v931_v62, %s1185_s11  ;;  %s1194_s11 = smov 61  }
  0x74   :  { %394 = vrot.lane.b32.xlu0 %v930_v61, %s1184_s10  ;;  %v35_v2 = vpop.permute.xlu1 %34   ;;  %s1233_s10 = smov 22  }
  0x76   :  { %v12_v1 = vpop.permute.xlu0 %11   ;;  %414 = vrot.lane.b32.xlu1 %v933_v0, %s1187_s17  ;;  %s1196_s17 = smov 59   ;;  %v965_v0 = vld [vmem:[%s1662_s0 + $0xc] sm:$0x1]  }
  0x77   :  { %15 = vst.msk [vmem:[#allocation0 + $0x2] sm:$0x1] %vm13_vm1, %v12_v1   ;;  %vm116_vm1 = vcmask 950152  }
  0x78   :  { %18 = vst.msk [vmem:[#allocation0 + $0x1] sm:$0x1] %vm16_vm3, %v12_v1   ;;  %408 = vrot.lane.b32.xlu0 %v932_v63, %s1186_s16  ;;  %v42_v6 = vpop.permute.xlu1 %41   ;;  %vm130_vm3 = vcmask 933752   ;;  %v964_v63 = vld [vmem:[%s1662_s0 + $0x37] sm:$0x1]   ;;  %s1235_s16 = smov 20  }
  0x79   :  { %38 = vst.msk [vmem:[#allocation0 + $0x2] sm:$0x1] %vm36_vm4, %v35_v2   ;;  %vm136_vm4 = vcmask 925552  }
  0x7a   :  { %v26_v5 = vpop.permute.xlu0 %25   ;;  %428 = vrot.lane.b32.xlu1 %v935_v4, %s1189_s23  ;;  %s1198_s23 = smov 57   ;;  %v967_v4 = vld [vmem:[%s1662_s0 + $0x36] sm:$0x1]  }
  0x7b   :  { %29 = vst.msk [vmem:[#allocation0 + $0x1] sm:$0x1] %vm9_vm0, %v26_v5   ;;  %vm110_vm0 = vcmask 958352  }
  0x7c   :  { %31 = vst.msk [vmem:[#allocation0] sm:$0x1] %vm30_vm5, %v26_v5   ;;  %421 = vrot.lane.b32.xlu0 %v934_v3, %s1188_s22  ;;  %v55_v10 = vpop.permute.xlu1 %54   ;;  %vm143_vm5 = vcmask 917352   ;;  %v966_v3 = vld [vmem:[%s1662_s0 + $0x61] sm:$0x1]   ;;  %s1237_s22 = smov 18  }
  0x7d   :  { %45 = vst.msk [vmem:[#allocation0 + $0x1] sm:$0x1] %vm43_vm6, %v42_v6   ;;  %vm150_vm6 = vcmask 909152  }
  0x7e   :  { %v49_v9 = vpop.permute.xlu0 %48   ;;  %58 = vst.msk [vmem:[#allocation0 + $0x2] sm:$0x1] %vm56_vm8, %v55_v10   ;;  %441 = vrot.lane.b32.xlu1 %v937_v8, %s1191_s29  ;;  %s1200_s29 = smov 55   ;;  %vm163_vm8 = vcmask 892752   ;;  %v969_v8 = vld [vmem:[%s1662_s0 + $0x60] sm:$0x1]  }
  0x7f   :  { %51 = vst.msk [vmem:[#allocation0] sm:$0x1] %vm50_vm7, %v49_v9   ;;  %vm156_vm7 = vcmask 900952  }
  0x80   :  { %434 = vrot.lane.b32.xlu0 %v936_v7, %s1190_s28  ;;  %v69_v14 = vpop.permute.xlu1 %68   ;;  %v968_v7 = vld [vmem:[%s1662_s0 + $0xb] sm:$0x1]   ;;  %s1239_s28 = smov 16  }
  0x81   :  { %71 = vst.msk [vmem:[#allocation0] sm:$0x1] %vm70_vm10, %v69_v14   ;;  %vm176_vm10 = vcmask 876352  }
  0x82   :  { %v62_v13 = vpop.permute.xlu0 %61   ;;  %454 = vrot.lane.b32.xlu1 %v939_v12, %s1193_s6  ;;  %s1202_s6 = smov 53   ;;  %v971_v12 = vld [vmem:[%s1662_s0 + $0xa] sm:$0x1]  }
  0x83   :  { %65 = vst.msk [vmem:[#allocation0 + $0x1] sm:$0x1] %vm63_vm9, %v62_v13   ;;  %vm170_vm9 = vcmask 884552  }
  0x84   :  { %448 = vrot.lane.b32.xlu0 %v938_v11, %s1192_s5  ;;  %v82_v18 = vpop.permute.xlu1 %81   ;;  %v970_v11 = vld [vmem:[%s1662_s0 + $0x35] sm:$0x1]   ;;  %s1241_s5 = smov 14  }
  0x85   :  { %85 = vst.msk [vmem:[#allocation0 + $0x1] sm:$0x1] %vm83_vm12, %v82_v18   ;;  %vm190_vm12 = vcmask 859952  }
  0x86   :  { %v75_v17 = vpop.permute.xlu0 %74   ;;  %468 = vrot.lane.b32.xlu1 %v941_v16, %s1195_s12  ;;  %s1204_s12 = smov 51   ;;  %v973_v16 = vld [vmem:[%s1662_s0 + $0x34] sm:$0x1]  }
  0x87   :  { %78 = vst.msk [vmem:[#allocation0 + $0x2] sm:$0x1] %vm76_vm11, %v75_v17   ;;  %vm183_vm11 = vcmask 868152  }
  0x88   :  { %461 = vrot.lane.b32.xlu0 %v940_v15, %s1194_s11  ;;  %v95_v22 = vpop.permute.xlu1 %94   ;;  %v972_v15 = vld [vmem:[%s1662_s0 + $0x5f] sm:$0x1]   ;;  %s1243_s11 = smov 12  }
  0x89   :  { %98 = vst.msk [vmem:[#allocation0 + $0x2] sm:$0x1] %vm96_vm14, %v95_v22   ;;  %vm203_vm14 = vcmask 843552  }
  0x8a   :  { %v89_v21 = vpop.permute.xlu0 %88   ;;  %481 = vrot.lane.b32.xlu1 %v943_v20, %s1197_s18  ;;  %s1206_s18 = smov 49   ;;  %v975_v20 = vld [vmem:[%s1662_s0 + $0x5e] sm:$0x1]  }
  0x8b   :  { %91 = vst.msk [vmem:[#allocation0] sm:$0x1] %vm90_vm13, %v89_v21   ;;  %vm196_vm13 = vcmask 851752  }
  0x8c   :  { %474 = vrot.lane.b32.xlu0 %v942_v19, %s1196_s17  ;;  %v109_v26 = vpop.permute.xlu1 %108   ;;  %v974_v19 = vld [vmem:[%s1662_s0 + $0x9] sm:$0x1]   ;;  %s1245_s17 = smov 10  }
  0x8d   :  { %111 = vst.msk [vmem:[#allocation0] sm:$0x1] %vm110_vm0, %v109_v26   ;;  %vm216_vm0 = vcmask 827152  }
  0x8e   :  { %v102_v25 = vpop.permute.xlu0 %101   ;;  %494 = vrot.lane.b32.xlu1 %v945_v24, %s1199_s24  ;;  %s1208_s24 = smov 47   ;;  %v977_v24 = vld [vmem:[%s1662_s0 + $0x8] sm:$0x1]  }
  0x8f   :  { %105 = vst.msk [vmem:[#allocation0 + $0x1] sm:$0x1] %vm103_vm15, %v102_v25   ;;  %vm210_vm15 = vcmask 835352  }
  0x90   :  { %488 = vrot.lane.b32.xlu0 %v944_v23, %s1198_s23  ;;  %v122_v30 = vpop.permute.xlu1 %121   ;;  %v976_v23 = vld [vmem:[%s1662_s0 + $0x33] sm:$0x1]   ;;  %s1247_s23 = smov 8  }
  0x91   :  { %125 = vst.msk [vmem:[#allocation0 + $0x1] sm:$0x1] %vm123_vm2, %v122_v30   ;;  %vm230_vm2 = vcmask 810752  }
  0x92   :  { %v115_v29 = vpop.permute.xlu0 %114   ;;  %508 = vrot.lane.b32.xlu1 %v947_v28, %s1201_s30  ;;  %s1210_s30 = smov 45   ;;  %v979_v28 = vld [vmem:[%s1662_s0 + $0x32] sm:$0x1]  }
  0x93   :  { %118 = vst.msk [vmem:[#allocation0 + $0x2] sm:$0x1] %vm116_vm1, %v115_v29   ;;  %vm223_vm1 = vcmask 818952  }
  0x94   :  { %501 = vrot.lane.b32.xlu0 %v946_v27, %s1200_s29  ;;  %v135_v34 = vpop.permute.xlu1 %134   ;;  %v978_v27 = vld [vmem:[%s1662_s0 + $0x5d] sm:$0x1]   ;;  %s1249_s29 = smov 6  }
  0x95   :  { %138 = vst.msk [vmem:[#allocation0 + $0x2] sm:$0x1] %vm136_vm4, %v135_v34   ;;  %vm243_vm4 = vcmask 794352  }
  0x96   :  { %v129_v33 = vpop.permute.xlu0 %128   ;;  %521 = vrot.lane.b32.xlu1 %v949_v32, %s1203_s7  ;;  %s1212_s7 = smov 43   ;;  %v981_v32 = vld [vmem:[%s1662_s0 + $0x5c] sm:$0x1]  }
  0x97   :  { %131 = vst.msk [vmem:[#allocation0] sm:$0x1] %vm130_vm3, %v129_v33   ;;  %vm236_vm3 = vcmask 802552  }
  0x98   :  { %514 = vrot.lane.b32.xlu0 %v948_v31, %s1202_s6  ;;  %v149_v38 = vpop.permute.xlu1 %148   ;;  %v980_v31 = vld [vmem:[%s1662_s0 + $0x7] sm:$0x1]   ;;  %s1251_s6 = smov 4  }
  0x99   :  { %151 = vst.msk [vmem:[#allocation0] sm:$0x1] %vm150_vm6, %v149_v38   ;;  %vm256_vm6 = vcmask 777952  }
  0x9a   :  { %v142_v37 = vpop.permute.xlu0 %141   ;;  %534 = vrot.lane.b32.xlu1 %v951_v36, %s1205_s13  ;;  %s1214_s13 = smov 41   ;;  %v983_v36 = vld [vmem:[%s1662_s0 + $0x6] sm:$0x1]  }
  0x9b   :  { %145 = vst.msk [vmem:[#allocation0 + $0x1] sm:$0x1] %vm143_vm5, %v142_v37   ;;  %vm250_vm5 = vcmask 786152  }
  0x9c   :  { %528 = vrot.lane.b32.xlu0 %v950_v35, %s1204_s12  ;;  %v162_v42 = vpop.permute.xlu1 %161   ;;  %v982_v35 = vld [vmem:[%s1662_s0 + $0x31] sm:$0x1]   ;;  %s1253_s12 = smov 2  }
  0x9d   :  { %165 = vst.msk [vmem:[#allocation0 + $0x1] sm:$0x1] %vm163_vm8, %v162_v42   ;;  %vm270_vm8 = vcmask 761552  }
  0x9e   :  { %v155_v41 = vpop.permute.xlu0 %154   ;;  %548 = vrot.lane.b32.xlu1 %v953_v40, %s1207_s19  ;;  %s1216_s19 = smov 39   ;;  %v985_v40 = vld [vmem:[%s1662_s0 + $0x30] sm:$0x1]  }
  0x9f   :  { %158 = vst.msk [vmem:[#allocation0 + $0x2] sm:$0x1] %vm156_vm7, %v155_v41   ;;  %vm263_vm7 = vcmask 769752  }
  0xa0   :  { %541 = vrot.lane.b32.xlu0 %v952_v39, %s1206_s18  ;;  %v175_v46 = vpop.permute.xlu1 %174   ;;  %v984_v39 = vld [vmem:[%s1662_s0 + $0x5b] sm:$0x1]  }
  0xa1   :  { %178 = vst.msk [vmem:[#allocation0 + $0x2] sm:$0x1] %vm176_vm10, %v175_v46   ;;  %vm283_vm10 = vcmask 745152  }
  0xa2   :  { %v169_v45 = vpop.permute.xlu0 %168   ;;  %561 = vrot.lane.b32.xlu1 %v955_v44, %s1209_s25  ;;  %s1218_s25 = smov 37   ;;  %v987_v44 = vld [vmem:[%s1662_s0 + $0x5a] sm:$0x1]  }
  0xa3   :  { %171 = vst.msk [vmem:[#allocation0] sm:$0x1] %vm170_vm9, %v169_v45   ;;  %vm276_vm9 = vcmask 753352  }
  0xa4   :  { %554 = vrot.lane.b32.xlu0 %v954_v43, %s1208_s24  ;;  %v189_v50 = vpop.permute.xlu1 %188   ;;  %v986_v43 = vld [vmem:[%s1662_s0 + $0x5] sm:$0x1]  }
  0xa5   :  { %191 = vst.msk [vmem:[#allocation0] sm:$0x1] %vm190_vm12, %v189_v50   ;;  %vm296_vm12 = vcmask 728752  }
  0xa6   :  { %v182_v49 = vpop.permute.xlu0 %181   ;;  %574 = vrot.lane.b32.xlu1 %v957_v48, %s1211_s2  ;;  %s1220_s2 = smov 35   ;;  %v989_v48 = vld [vmem:[%s1662_s0 + $0x4] sm:$0x1]  }
  0xa7   :  { %185 = vst.msk [vmem:[#allocation0 + $0x1] sm:$0x1] %vm183_vm11, %v182_v49   ;;  %vm290_vm11 = vcmask 736952  }
  0xa8   :  { %568 = vrot.lane.b32.xlu0 %v956_v47, %s1210_s30  ;;  %v202_v54 = vpop.permute.xlu1 %201   ;;  %v988_v47 = vld [vmem:[%s1662_s0 + $0x2f] sm:$0x1]  }
  0xa9   :  { %205 = vst.msk [vmem:[#allocation0 + $0x1] sm:$0x1] %vm203_vm14, %v202_v54   ;;  %vm310_vm14 = vcmask 712352  }
  0xaa   :  { %v195_v53 = vpop.permute.xlu0 %194   ;;  %588 = vrot.lane.b32.xlu1 %v959_v52, %s1213_s8  ;;  %s1222_s8 = smov 33   ;;  %v991_v52 = vld [vmem:[%s1662_s0 + $0x2e] sm:$0x1]  }
  0xab   :  { %198 = vst.msk [vmem:[#allocation0 + $0x2] sm:$0x1] %vm196_vm13, %v195_v53   ;;  %vm303_vm13 = vcmask 720552  }
  0xac   :  { %581 = vrot.lane.b32.xlu0 %v958_v51, %s1212_s7  ;;  %v215_v58 = vpop.permute.xlu1 %214   ;;  %v990_v51 = vld [vmem:[%s1662_s0 + $0x59] sm:$0x1]  }
  0xad   :  { %218 = vst.msk [vmem:[#allocation0 + $0x2] sm:$0x1] %vm216_vm0, %v215_v58   ;;  %vm323_vm0 = vcmask 695952  }
  0xae   :  { %v209_v57 = vpop.permute.xlu0 %208   ;;  %601 = vrot.lane.b32.xlu1 %v961_v56, %s1215_s14  ;;  %s1224_s14 = smov 31   ;;  %v993_v56 = vld [vmem:[%s1662_s0 + $0x58] sm:$0x1]  }
  0xaf   :  { %211 = vst.msk [vmem:[#allocation0] sm:$0x1] %vm210_vm15, %v209_v57   ;;  %vm316_vm15 = vcmask 704152  }
  0xb0   :  { %594 = vrot.lane.b32.xlu0 %v960_v55, %s1214_s13  ;;  %v229_v62 = vpop.permute.xlu1 %228   ;;  %v992_v55 = vld [vmem:[%s1662_s0 + $0x3] sm:$0x1]  }
  0xb1   :  { %231 = vst.msk [vmem:[#allocation0] sm:$0x1] %vm230_vm2, %v229_v62   ;;  %vm336_vm2 = vcmask 679552  }
  0xb2   :  { %v222_v61 = vpop.permute.xlu0 %221   ;;  %614 = vrot.lane.b32.xlu1 %v963_v60, %s1217_s20  ;;  %s1226_s20 = smov 29   ;;  %v995_v60 = vld [vmem:[%s1662_s0 + $0x2] sm:$0x1]  }
  0xb3   :  { %225 = vst.msk [vmem:[#allocation0 + $0x1] sm:$0x1] %vm223_vm1, %v222_v61   ;;  %vm330_vm1 = vcmask 687752  }
  0xb4   :  { %608 = vrot.lane.b32.xlu0 %v962_v59, %s1216_s19  ;;  %v242_v2 = vpop.permute.xlu1 %241   ;;  %v994_v59 = vld [vmem:[%s1662_s0 + $0x2d] sm:$0x1]  }
  0xb5   :  { %245 = vst.msk [vmem:[#allocation0 + $0x1] sm:$0x1] %vm243_vm4, %v242_v2   ;;  %vm350_vm4 = vcmask 663152  }
  0xb6   :  { %v235_v1 = vpop.permute.xlu0 %234   ;;  %628 = vrot.lane.b32.xlu1 %v965_v0, %s1219_s26  ;;  %s1228_s26 = smov 27   ;;  %v997_v0 = vld [vmem:[%s1662_s0 + $0x2c] sm:$0x1]  }
  0xb7   :  { %238 = vst.msk [vmem:[#allocation0 + $0x2] sm:$0x1] %vm236_vm3, %v235_v1   ;;  %vm343_vm3 = vcmask 671352  }
  0xb8   :  { %621 = vrot.lane.b32.xlu0 %v964_v63, %s1218_s25  ;;  %v255_v6 = vpop.permute.xlu1 %254   ;;  %v996_v63 = vld [vmem:[%s1662_s0 + $0x57] sm:$0x1]  }
  0xb9   :  { %258 = vst.msk [vmem:[#allocation0 + $0x2] sm:$0x1] %vm256_vm6, %v255_v6   ;;  %vm363_vm6 = vcmask 646752  }
  0xba   :  { %v249_v5 = vpop.permute.xlu0 %248   ;;  %641 = vrot.lane.b32.xlu1 %v967_v4, %s1221_s3  ;;  %s1230_s3 = smov 25   ;;  %v999_v4 = vld [vmem:[%s1662_s0 + $0x56] sm:$0x1]  }
  0xbb   :  { %251 = vst.msk [vmem:[#allocation0] sm:$0x1] %vm250_vm5, %v249_v5   ;;  %vm356_vm5 = vcmask 654952  }
  0xbc   :  { %634 = vrot.lane.b32.xlu0 %v966_v3, %s1220_s2  ;;  %v269_v10 = vpop.permute.xlu1 %268   ;;  %v998_v3 = vld [vmem:[%s1662_s0 + $0x1] sm:$0x1]  }
  0xbd   :  { %271 = vst.msk [vmem:[#allocation0] sm:$0x1] %vm270_vm8, %v269_v10   ;;  %vm376_vm8 = vcmask 630352  }
  0xbe   :  { %v262_v9 = vpop.permute.xlu0 %261   ;;  %654 = vrot.lane.b32.xlu1 %v969_v8, %s1223_s9  ;;  %s1232_s9 = smov 23  }
  0xbf   :  { %265 = vst.msk [vmem:[#allocation0 + $0x1] sm:$0x1] %vm263_vm7, %v262_v9   ;;  %vm370_vm7 = vcmask 638552  }
  0xc0   :  { %648 = vrot.lane.b32.xlu0 %v968_v7, %s1222_s8  ;;  %v282_v14 = vpop.permute.xlu1 %281   ;;  %v1000_v7 = vld [vmem:[%s1662_s0 + $0x2b] sm:$0x1]   ;;  %s1254_s0 = smov 1  }
  0xc1   :  { %285 = vst.msk [vmem:[#allocation0 + $0x1] sm:$0x1] %vm283_vm10, %v282_v14   ;;  %vm390_vm10 = vcmask 613952  }
  0xc2   :  { %v275_v13 = vpop.permute.xlu0 %274   ;;  %668 = vrot.lane.b32.xlu1 %v971_v12, %s1225_s15  ;;  %s1234_s15 = smov 21  }
  0xc3   :  { %278 = vst.msk [vmem:[#allocation0 + $0x2] sm:$0x1] %vm276_vm9, %v275_v13   ;;  %vm383_vm9 = vcmask 622152  }
  0xc4   :  { %661 = vrot.lane.b32.xlu0 %v970_v11, %s1224_s14  ;;  %v295_v18 = vpop.permute.xlu1 %294  }
  0xc5   :  { %298 = vst.msk [vmem:[#allocation0 + $0x2] sm:$0x1] %vm296_vm12, %v295_v18   ;;  %vm403_vm12 = vcmask 597552  }
  0xc6   :  { %v289_v17 = vpop.permute.xlu0 %288   ;;  %681 = vrot.lane.b32.xlu1 %v973_v16, %s1227_s21  ;;  %s1236_s21 = smov 19  }
  0xc7   :  { %291 = vst.msk [vmem:[#allocation0] sm:$0x1] %vm290_vm11, %v289_v17   ;;  %vm396_vm11 = vcmask 605752  }
  0xc8   :  { %674 = vrot.lane.b32.xlu0 %v972_v15, %s1226_s20  ;;  %v309_v22 = vpop.permute.xlu1 %308  }
  0xc9   :  { %311 = vst.msk [vmem:[#allocation0] sm:$0x1] %vm310_vm14, %v309_v22   ;;  %vm416_vm14 = vcmask 581152  }
  0xca   :  { %v302_v21 = vpop.permute.xlu0 %301   ;;  %694 = vrot.lane.b32.xlu1 %v975_v20, %s1229_s27  ;;  %s1238_s27 = smov 17  }
  0xcb   :  { %305 = vst.msk [vmem:[#allocation0 + $0x1] sm:$0x1] %vm303_vm13, %v302_v21   ;;  %vm410_vm13 = vcmask 589352  }
  0xcc   :  { %688 = vrot.lane.b32.xlu0 %v974_v19, %s1228_s26  ;;  %v322_v26 = vpop.permute.xlu1 %321  }
  0xcd   :  { %325 = vst.msk [vmem:[#allocation0 + $0x1] sm:$0x1] %vm323_vm0, %v322_v26   ;;  %vm430_vm0 = vcmask 564752  }
  0xce   :  { %v315_v25 = vpop.permute.xlu0 %314   ;;  %708 = vrot.lane.b32.xlu1 %v977_v24, %s1231_s4  ;;  %s1240_s4 = smov 15  }
  0xcf   :  { %318 = vst.msk [vmem:[#allocation0 + $0x2] sm:$0x1] %vm316_vm15, %v315_v25   ;;  %vm423_vm15 = vcmask 572952  }
  0xd0   :  { %701 = vrot.lane.b32.xlu0 %v976_v23, %s1230_s3  ;;  %v335_v30 = vpop.permute.xlu1 %334  }
  0xd1   :  { %338 = vst.msk [vmem:[#allocation0 + $0x2] sm:$0x1] %vm336_vm2, %v335_v30   ;;  %vm443_vm2 = vcmask 548352  }
  0xd2   :  { %v329_v29 = vpop.permute.xlu0 %328   ;;  %721 = vrot.lane.b32.xlu1 %v979_v28, %s1233_s10  ;;  %s1242_s10 = smov 13  }
  0xd3   :  { %331 = vst.msk [vmem:[#allocation0] sm:$0x1] %vm330_vm1, %v329_v29   ;;  %vm436_vm1 = vcmask 556552  }
  0xd4   :  { %714 = vrot.lane.b32.xlu0 %v978_v27, %s1232_s9  ;;  %v349_v34 = vpop.permute.xlu1 %348  }
  0xd5   :  { %351 = vst.msk [vmem:[#allocation0] sm:$0x1] %vm350_vm4, %v349_v34   ;;  %vm456_vm4 = vcmask 531952  }
  0xd6   :  { %v342_v33 = vpop.permute.xlu0 %341   ;;  %734 = vrot.lane.b32.xlu1 %v981_v32, %s1235_s16  ;;  %s1244_s16 = smov 11  }
  0xd7   :  { %345 = vst.msk [vmem:[#allocation0 + $0x1] sm:$0x1] %vm343_vm3, %v342_v33   ;;  %vm450_vm3 = vcmask 540152  }
  0xd8   :  { %728 = vrot.lane.b32.xlu0 %v980_v31, %s1234_s15  ;;  %v362_v38 = vpop.permute.xlu1 %361  }
  0xd9   :  { %365 = vst.msk [vmem:[#allocation0 + $0x1] sm:$0x1] %vm363_vm6, %v362_v38   ;;  %vm470_vm6 = vcmask 515552  }
  0xda   :  { %v355_v37 = vpop.permute.xlu0 %354   ;;  %748 = vrot.lane.b32.xlu1 %v983_v36, %s1237_s22  ;;  %s1246_s22 = smov 9  }
  0xdb   :  { %358 = vst.msk [vmem:[#allocation0 + $0x2] sm:$0x1] %vm356_vm5, %v355_v37   ;;  %vm463_vm5 = vcmask 523752  }
  0xdc   :  { %741 = vrot.lane.b32.xlu0 %v982_v35, %s1236_s21  ;;  %v375_v42 = vpop.permute.xlu1 %374  }
  0xdd   :  { %378 = vst.msk [vmem:[#allocation0 + $0x2] sm:$0x1] %vm376_vm8, %v375_v42   ;;  %vm483_vm8 = vcmask 499152  }
  0xde   :  { %v369_v41 = vpop.permute.xlu0 %368   ;;  %761 = vrot.lane.b32.xlu1 %v985_v40, %s1239_s28  ;;  %s1248_s28 = smov 7  }
  0xdf   :  { %371 = vst.msk [vmem:[#allocation0] sm:$0x1] %vm370_vm7, %v369_v41   ;;  %vm476_vm7 = vcmask 507352  }
  0xe0   :  { %754 = vrot.lane.b32.xlu0 %v984_v39, %s1238_s27  ;;  %v389_v46 = vpop.permute.xlu1 %388  }
  0xe1   :  { %391 = vst.msk [vmem:[#allocation0] sm:$0x1] %vm390_vm10, %v389_v46   ;;  %vm496_vm10 = vcmask 482752  }
  0xe2   :  { %v382_v45 = vpop.permute.xlu0 %381   ;;  %774 = vrot.lane.b32.xlu1 %v987_v44, %s1241_s5  ;;  %s1250_s5 = smov 5  }
  0xe3   :  { %385 = vst.msk [vmem:[#allocation0 + $0x1] sm:$0x1] %vm383_vm9, %v382_v45   ;;  %vm490_vm9 = vcmask 490952  }
  0xe4   :  { %768 = vrot.lane.b32.xlu0 %v986_v43, %s1240_s4  ;;  %v402_v50 = vpop.permute.xlu1 %401  }
  0xe5   :  { %405 = vst.msk [vmem:[#allocation0 + $0x1] sm:$0x1] %vm403_vm12, %v402_v50   ;;  %vm510_vm12 = vcmask 466352  }
  0xe6   :  { %v395_v49 = vpop.permute.xlu0 %394   ;;  %788 = vrot.lane.b32.xlu1 %v989_v48, %s1243_s11  ;;  %s1252_s11 = smov 3  }
  0xe7   :  { %398 = vst.msk [vmem:[#allocation0 + $0x2] sm:$0x1] %vm396_vm11, %v395_v49   ;;  %vm503_vm11 = vcmask 474552  }
  0xe8   :  { %781 = vrot.lane.b32.xlu0 %v988_v47, %s1242_s10  ;;  %v415_v54 = vpop.permute.xlu1 %414  }
  0xe9   :  { %418 = vst.msk [vmem:[#allocation0 + $0x2] sm:$0x1] %vm416_vm14, %v415_v54   ;;  %vm523_vm14 = vcmask 449952  }
  0xea   :  { %v409_v53 = vpop.permute.xlu0 %408   ;;  %801 = vrot.lane.b32.xlu1 %v991_v52, %s1245_s17 }
  0xeb   :  { %411 = vst.msk [vmem:[#allocation0] sm:$0x1] %vm410_vm13, %v409_v53   ;;  %vm516_vm13 = vcmask 458152  }
  0xec   :  { %794 = vrot.lane.b32.xlu0 %v990_v51, %s1244_s16  ;;  %v429_v58 = vpop.permute.xlu1 %428  }
  0xed   :  { %431 = vst.msk [vmem:[#allocation0] sm:$0x1] %vm430_vm0, %v429_v58   ;;  %vm536_vm0 = vcmask 433552  }
  0xee   :  { %v422_v57 = vpop.permute.xlu0 %421   ;;  %814 = vrot.lane.b32.xlu1 %v993_v56, %s1247_s23 }
  0xef   :  { %425 = vst.msk [vmem:[#allocation0 + $0x1] sm:$0x1] %vm423_vm15, %v422_v57   ;;  %vm530_vm15 = vcmask 441752  }
  0xf0   :  { %808 = vrot.lane.b32.xlu0 %v992_v55, %s1246_s22  ;;  %v442_v62 = vpop.permute.xlu1 %441  }
  0xf1   :  { %445 = vst.msk [vmem:[#allocation0 + $0x1] sm:$0x1] %vm443_vm2, %v442_v62   ;;  %vm550_vm2 = vcmask 417152  }
  0xf2   :  { %v435_v61 = vpop.permute.xlu0 %434   ;;  %828 = vrot.lane.b32.xlu1 %v995_v60, %s1249_s29 }
  0xf3   :  { %438 = vst.msk [vmem:[#allocation0 + $0x2] sm:$0x1] %vm436_vm1, %v435_v61   ;;  %vm543_vm1 = vcmask 425352  }
  0xf4   :  { %821 = vrot.lane.b32.xlu0 %v994_v59, %s1248_s28  ;;  %v455_v2 = vpop.permute.xlu1 %454  }
  0xf5   :  { %458 = vst.msk [vmem:[#allocation0 + $0x2] sm:$0x1] %vm456_vm4, %v455_v2   ;;  %vm563_vm4 = vcmask 400752  }
  0xf6   :  { %v449_v1 = vpop.permute.xlu0 %448   ;;  %841 = vrot.lane.b32.xlu1 %v997_v0, %s1251_s6 }
  0xf7   :  { %451 = vst.msk [vmem:[#allocation0] sm:$0x1] %vm450_vm3, %v449_v1   ;;  %vm556_vm3 = vcmask 408952  }
  0xf8   :  { %834 = vrot.lane.b32.xlu0 %v996_v63, %s1250_s5  ;;  %v469_v6 = vpop.permute.xlu1 %468  }
  0xf9   :  { %471 = vst.msk [vmem:[#allocation0] sm:$0x1] %vm470_vm6, %v469_v6   ;;  %vm576_vm6 = vcmask 384352  }
  0xfa   :  { %v462_v5 = vpop.permute.xlu0 %461   ;;  %854 = vrot.lane.b32.xlu1 %v999_v4, %s1253_s12 }
  0xfb   :  { %465 = vst.msk [vmem:[#allocation0 + $0x1] sm:$0x1] %vm463_vm5, %v462_v5   ;;  %vm570_vm5 = vcmask 392552  }
  0xfc   :  { %848 = vrot.lane.b32.xlu0 %v998_v3, %s1252_s11  ;;  %v482_v9 = vpop.permute.xlu1 %481  }
  0xfd   :  { %485 = vst.msk [vmem:[#allocation0 + $0x1] sm:$0x1] %vm483_vm8, %v482_v9   ;;  %vm590_vm8 = vcmask 367952  }
  0xfe   :  { %v475_v8 = vpop.permute.xlu0 %474  }
  0xff   :  { %478 = vst.msk [vmem:[#allocation0 + $0x2] sm:$0x1] %vm476_vm7, %v475_v8   ;;  %vm583_vm7 = vcmask 376152  }
 0x100   :  { %861 = vrot.lane.b32.xlu0 %v1000_v7, %s1254_s0  ;;  %v495_v11 = vpop.permute.xlu1 %494  }
 0x101   :  { %498 = vst.msk [vmem:[#allocation0 + $0x2] sm:$0x1] %vm496_vm10, %v495_v11   ;;  %vm603_vm10 = vcmask 351552  }
 0x102   :  { %v489_v10 = vpop.permute.xlu0 %488  }
 0x103   :  { %491 = vst.msk [vmem:[#allocation0] sm:$0x1] %vm490_vm9, %v489_v10   ;;  %vm596_vm9 = vcmask 359752  }
 0x104   :  { %v509_v13 = vpop.permute.xlu1 %508  }
 0x105   :  { %511 = vst.msk [vmem:[#allocation0] sm:$0x1] %vm510_vm12, %v509_v13   ;;  %vm616_vm12 = vcmask 335152  }
 0x106   :  { %v502_v12 = vpop.permute.xlu0 %501  }
 0x107   :  { %505 = vst.msk [vmem:[#allocation0 + $0x1] sm:$0x1] %vm503_vm11, %v502_v12   ;;  %vm610_vm11 = vcmask 343352  }
 0x108   :  { %v522_v15 = vpop.permute.xlu1 %521  }
 0x109   :  { %525 = vst.msk [vmem:[#allocation0 + $0x1] sm:$0x1] %vm523_vm14, %v522_v15   ;;  %vm630_vm14 = vcmask 318752  }
 0x10a   :  { %v515_v14 = vpop.permute.xlu0 %514  }
 0x10b   :  { %518 = vst.msk [vmem:[#allocation0 + $0x2] sm:$0x1] %vm516_vm13, %v515_v14   ;;  %vm623_vm13 = vcmask 326952  }
 0x10c   :  { %v535_v17 = vpop.permute.xlu1 %534  }
 0x10d   :  { %538 = vst.msk [vmem:[#allocation0 + $0x2] sm:$0x1] %vm536_vm0, %v535_v17   ;;  %vm643_vm0 = vcmask 302352  }
 0x10e   :  { %v529_v16 = vpop.permute.xlu0 %528  }
 0x10f   :  { %531 = vst.msk [vmem:[#allocation0] sm:$0x1] %vm530_vm15, %v529_v16   ;;  %vm636_vm15 = vcmask 310552  }
 0x110   :  { %v549_v19 = vpop.permute.xlu1 %548  }
 0x111   :  { %551 = vst.msk [vmem:[#allocation0] sm:$0x1] %vm550_vm2, %v549_v19   ;;  %vm656_vm2 = vcmask 285952  }
 0x112   :  { %v542_v18 = vpop.permute.xlu0 %541  }
 0x113   :  { %545 = vst.msk [vmem:[#allocation0 + $0x1] sm:$0x1] %vm543_vm1, %v542_v18   ;;  %vm650_vm1 = vcmask 294152  }
 0x114   :  { %v562_v21 = vpop.permute.xlu1 %561  }
 0x115   :  { %565 = vst.msk [vmem:[#allocation0 + $0x1] sm:$0x1] %vm563_vm4, %v562_v21   ;;  %vm670_vm4 = vcmask 269552  }
 0x116   :  { %v555_v20 = vpop.permute.xlu0 %554  }
 0x117   :  { %558 = vst.msk [vmem:[#allocation0 + $0x2] sm:$0x1] %vm556_vm3, %v555_v20   ;;  %vm663_vm3 = vcmask 277752  }
 0x118   :  { %v575_v23 = vpop.permute.xlu1 %574  }
 0x119   :  { %578 = vst.msk [vmem:[#allocation0 + $0x2] sm:$0x1] %vm576_vm6, %v575_v23   ;;  %vm683_vm6 = vcmask 253152  }
 0x11a   :  { %v569_v22 = vpop.permute.xlu0 %568  }
 0x11b   :  { %571 = vst.msk [vmem:[#allocation0] sm:$0x1] %vm570_vm5, %v569_v22   ;;  %vm676_vm5 = vcmask 261352  }
 0x11c   :  { %v589_v25 = vpop.permute.xlu1 %588  }
 0x11d   :  { %591 = vst.msk [vmem:[#allocation0] sm:$0x1] %vm590_vm8, %v589_v25   ;;  %vm696_vm8 = vcmask 236752  }
 0x11e   :  { %v582_v24 = vpop.permute.xlu0 %581  }
 0x11f   :  { %585 = vst.msk [vmem:[#allocation0 + $0x1] sm:$0x1] %vm583_vm7, %v582_v24   ;;  %vm690_vm7 = vcmask 244952  }
 0x120   :  { %v602_v27 = vpop.permute.xlu1 %601  }
 0x121   :  { %605 = vst.msk [vmem:[#allocation0 + $0x1] sm:$0x1] %vm603_vm10, %v602_v27   ;;  %vm710_vm10 = vcmask 220352  }
 0x122   :  { %v595_v26 = vpop.permute.xlu0 %594  }
 0x123   :  { %598 = vst.msk [vmem:[#allocation0 + $0x2] sm:$0x1] %vm596_vm9, %v595_v26   ;;  %vm703_vm9 = vcmask 228552  }
 0x124   :  { %v615_v29 = vpop.permute.xlu1 %614  }
 0x125   :  { %618 = vst.msk [vmem:[#allocation0 + $0x2] sm:$0x1] %vm616_vm12, %v615_v29   ;;  %vm723_vm12 = vcmask 203952  }
 0x126   :  { %v609_v28 = vpop.permute.xlu0 %608  }
 0x127   :  { %611 = vst.msk [vmem:[#allocation0] sm:$0x1] %vm610_vm11, %v609_v28   ;;  %vm716_vm11 = vcmask 212152  }
 0x128   :  { %v629_v31 = vpop.permute.xlu1 %628  }
 0x129   :  { %631 = vst.msk [vmem:[#allocation0] sm:$0x1] %vm630_vm14, %v629_v31   ;;  %vm736_vm14 = vcmask 187552  }
 0x12a   :  { %v622_v30 = vpop.permute.xlu0 %621  }
 0x12b   :  { %625 = vst.msk [vmem:[#allocation0 + $0x1] sm:$0x1] %vm623_vm13, %v622_v30   ;;  %vm730_vm13 = vcmask 195752  }
 0x12c   :  { %v642_v33 = vpop.permute.xlu1 %641  }
 0x12d   :  { %645 = vst.msk [vmem:[#allocation0 + $0x1] sm:$0x1] %vm643_vm0, %v642_v33   ;;  %vm750_vm0 = vcmask 171152  }
 0x12e   :  { %v635_v32 = vpop.permute.xlu0 %634  }
 0x12f   :  { %638 = vst.msk [vmem:[#allocation0 + $0x2] sm:$0x1] %vm636_vm15, %v635_v32   ;;  %vm743_vm15 = vcmask 179352  }
 0x130   :  { %v655_v35 = vpop.permute.xlu1 %654  }
 0x131   :  { %658 = vst.msk [vmem:[#allocation0 + $0x2] sm:$0x1] %vm656_vm2, %v655_v35   ;;  %vm763_vm2 = vcmask 154752  }
 0x132   :  { %v649_v34 = vpop.permute.xlu0 %648  }
 0x133   :  { %651 = vst.msk [vmem:[#allocation0] sm:$0x1] %vm650_vm1, %v649_v34   ;;  %vm756_vm1 = vcmask 162952  }
 0x134   :  { %v669_v37 = vpop.permute.xlu1 %668  }
 0x135   :  { %671 = vst.msk [vmem:[#allocation0] sm:$0x1] %vm670_vm4, %v669_v37   ;;  %vm776_vm4 = vcmask 138352  }
 0x136   :  { %v662_v36 = vpop.permute.xlu0 %661  }
 0x137   :  { %665 = vst.msk [vmem:[#allocation0 + $0x1] sm:$0x1] %vm663_vm3, %v662_v36   ;;  %vm770_vm3 = vcmask 146552  }
 0x138   :  { %v682_v39 = vpop.permute.xlu1 %681  }
 0x139   :  { %685 = vst.msk [vmem:[#allocation0 + $0x1] sm:$0x1] %vm683_vm6, %v682_v39   ;;  %vm790_vm6 = vcmask 121952  }
 0x13a   :  { %v675_v38 = vpop.permute.xlu0 %674  }
 0x13b   :  { %678 = vst.msk [vmem:[#allocation0 + $0x2] sm:$0x1] %vm676_vm5, %v675_v38   ;;  %vm783_vm5 = vcmask 130152  }
 0x13c   :  { %v695_v41 = vpop.permute.xlu1 %694  }
 0x13d   :  { %698 = vst.msk [vmem:[#allocation0 + $0x2] sm:$0x1] %vm696_vm8, %v695_v41   ;;  %vm803_vm8 = vcmask 105552  }
 0x13e   :  { %v689_v40 = vpop.permute.xlu0 %688  }
 0x13f   :  { %691 = vst.msk [vmem:[#allocation0] sm:$0x1] %vm690_vm7, %v689_v40   ;;  %vm796_vm7 = vcmask 113752  }
 0x140   :  { %v709_v43 = vpop.permute.xlu1 %708  }
 0x141   :  { %711 = vst.msk [vmem:[#allocation0] sm:$0x1] %vm710_vm10, %v709_v43   ;;  %vm816_vm10 = vcmask 89152  }
 0x142   :  { %v702_v42 = vpop.permute.xlu0 %701  }
 0x143   :  { %705 = vst.msk [vmem:[#allocation0 + $0x1] sm:$0x1] %vm703_vm9, %v702_v42   ;;  %vm810_vm9 = vcmask 97352  }
 0x144   :  { %v722_v45 = vpop.permute.xlu1 %721  }
 0x145   :  { %725 = vst.msk [vmem:[#allocation0 + $0x1] sm:$0x1] %vm723_vm12, %v722_v45   ;;  %vm830_vm12 = vcmask 72752  }
 0x146   :  { %v715_v44 = vpop.permute.xlu0 %714  }
 0x147   :  { %718 = vst.msk [vmem:[#allocation0 + $0x2] sm:$0x1] %vm716_vm11, %v715_v44   ;;  %vm823_vm11 = vcmask 80952  }
 0x148   :  { %v735_v47 = vpop.permute.xlu1 %734  }
 0x149   :  { %738 = vst.msk [vmem:[#allocation0 + $0x2] sm:$0x1] %vm736_vm14, %v735_v47   ;;  %vm843_vm14 = vcmask 56352  }
 0x14a   :  { %v729_v46 = vpop.permute.xlu0 %728  }
 0x14b   :  { %731 = vst.msk [vmem:[#allocation0] sm:$0x1] %vm730_vm13, %v729_v46   ;;  %vm836_vm13 = vcmask 64552  }
 0x14c   :  { %v749_v49 = vpop.permute.xlu1 %748  }
 0x14d   :  { %751 = vst.msk [vmem:[#allocation0] sm:$0x1] %vm750_vm0, %v749_v49   ;;  %vm856_vm0 = vcmask 39952  }
 0x14e   :  { %v742_v48 = vpop.permute.xlu0 %741  }
 0x14f   :  { %745 = vst.msk [vmem:[#allocation0 + $0x1] sm:$0x1] %vm743_vm15, %v742_v48   ;;  %vm850_vm15 = vcmask 48152  }
 0x150   :  { %v762_v51 = vpop.permute.xlu1 %761  }
 0x151   :  { %765 = vst.msk [vmem:[#allocation0 + $0x1] sm:$0x1] %vm763_vm2, %v762_v51  }
 0x152   :  { %v755_v50 = vpop.permute.xlu0 %754  }
 0x153   :  { %758 = vst.msk [vmem:[#allocation0 + $0x2] sm:$0x1] %vm756_vm1, %v755_v50   ;;  %vm863_vm1 = vcmask 31752  }
 0x154   :  { %v775_v53 = vpop.permute.xlu1 %774  }
 0x155   :  { %778 = vst.msk [vmem:[#allocation0 + $0x2] sm:$0x1] %vm776_vm4, %v775_v53  }
 0x156   :  { %v769_v52 = vpop.permute.xlu0 %768  }
 0x157   :  { %771 = vst.msk [vmem:[#allocation0] sm:$0x1] %vm770_vm3, %v769_v52  }
 0x158   :  { %v789_v55 = vpop.permute.xlu1 %788  }
 0x159   :  { %791 = vst.msk [vmem:[#allocation0] sm:$0x1] %vm790_vm6, %v789_v55  }
 0x15a   :  { %v782_v54 = vpop.permute.xlu0 %781  }
 0x15b   :  { %785 = vst.msk [vmem:[#allocation0 + $0x1] sm:$0x1] %vm783_vm5, %v782_v54  }
 0x15c   :  { %v802_v57 = vpop.permute.xlu1 %801  }
 0x15d   :  { %805 = vst.msk [vmem:[#allocation0 + $0x1] sm:$0x1] %vm803_vm8, %v802_v57  }
 0x15e   :  { %v795_v56 = vpop.permute.xlu0 %794  }
 0x15f   :  { %798 = vst.msk [vmem:[#allocation0 + $0x2] sm:$0x1] %vm796_vm7, %v795_v56  }
 0x160   :  { %v815_v59 = vpop.permute.xlu1 %814  }
 0x161   :  { %818 = vst.msk [vmem:[#allocation0 + $0x2] sm:$0x1] %vm816_vm10, %v815_v59  }
 0x162   :  { %v809_v58 = vpop.permute.xlu0 %808  }
 0x163   :  { %811 = vst.msk [vmem:[#allocation0] sm:$0x1] %vm810_vm9, %v809_v58  }
 0x164   :  { %v829_v61 = vpop.permute.xlu1 %828  }
 0x165   :  { %831 = vst.msk [vmem:[#allocation0] sm:$0x1] %vm830_vm12, %v829_v61  }
 0x166   :  { %v822_v60 = vpop.permute.xlu0 %821  }
 0x167   :  { %825 = vst.msk [vmem:[#allocation0 + $0x1] sm:$0x1] %vm823_vm11, %v822_v60  }
 0x168   :  { %v842_v63 = vpop.permute.xlu1 %841  }
 0x169   :  { %845 = vst.msk [vmem:[#allocation0 + $0x1] sm:$0x1] %vm843_vm14, %v842_v63  }
 0x16a   :  { %v835_v62 = vpop.permute.xlu0 %834  }
 0x16b   :  { %838 = vst.msk [vmem:[#allocation0 + $0x2] sm:$0x1] %vm836_vm13, %v835_v62  }
 0x16c   :  { %v855_v1 = vpop.permute.xlu1 %854  }
 0x16d   :  { %858 = vst.msk [vmem:[#allocation0 + $0x2] sm:$0x1] %vm856_vm0, %v855_v1  }
 0x16e   :  { %v849_v0 = vpop.permute.xlu0 %848  }
 0x16f   :  { %851 = vst.msk [vmem:[#allocation0] sm:$0x1] %vm850_vm15, %v849_v0  }
 0x172   :  { %v862_v2 = vpop.permute.xlu0 %861  }
 0x173   :  { %865 = vst.msk [vmem:[#allocation0 + $0x1] sm:$0x1] %vm863_vm1, %v862_v2  }
 0x17a   :  { %v869_v3 = vld [vmem:[#allocation0] sm:$0xf] }
 0x17b   :  { %871 = vst [vmem:[%s1663_s1] sm:$0xf] %v869_v3 }

// kernel: _lambda_.2
= control target key start
LH: loop header
LB: loop body
LE: loop exit
PB: predicated region body
PF: predicated region fallthrough
CT: control target
= control target key end

     0   :  { %v583_v53 = vmov 0.0|0.0   ;;  %vm584_vm0 = vmmov 0   ;;  %v585_v57 = vmov 0.0   ;;  %vm165_vm1 = vcmask 261120   ;;  %s795_s1 = inlined_call_operand.vmem [shape: f32[256,32], index: 1, kind: input, shape index: {}]   ;;  %s796_s0 = inlined_call_operand.vmem [shape: f32[2,256], index: 0, kind: input, shape index: {}]   ;;  %s797_s3 = inlined_call_operand.vmem [shape: f32[32,32], index: 3, kind: input, shape index: {}]   ;;  %s798_s2 = inlined_call_operand.vmem [shape: f32[1,32], index: 2, kind: input, shape index: {}]   ;;  %s799_s5 = inlined_call_operand.vmem [shape: f32[32,384], index: 5, kind: input, shape index: {}]   ;;  %s800_s4 = inlined_call_operand.vmem [shape: f32[1,32], index: 4, kind: input, shape index: {}]   ;;  %s801_s6 = inlined_call_operand.vmem [shape: f32[1,384], index: 6, kind: input, shape index: {}]   ;;  %s802_s7 = inlined_call_operand.vmem [shape: f32[2,384], index: 7, kind: output, shape index: {}]  }
   0x1   :  { %v43_v0 = vld [vmem:[%s795_s1 + $0x80] sm:$0xff]  ;;  %v44_v1 = vld [vmem:[%s795_s1 + $0x88] sm:$0xff]  ;;  %v45_v5 = vld [vmem:[%s795_s1 + $0x90] sm:$0xff]  ;;  %551 = vmatprep.subr.bf16.mxu1 %v583_v53  ;;  %505 = vmatprep.mubr.msk.f32.mxu1 %vm584_vm0, %v585_v57 }
   0x2   :  { %v27_v2 = vld [vmem:[%s795_s1] sm:$0xff]  ;;  %v519_v3 = vpack.c.bf16 %v44_v1, %v43_v0  ;;  %v28_v4 = vld [vmem:[%s795_s1 + $0x8] sm:$0xff]  ;;  %v46_v6 = vld [vmem:[%s795_s1 + $0x98] sm:$0xff] }
   0x3   :  { %v521_v7 = vpack.c.bf16 %v28_v4, %v27_v2  ;;  %v523_v8 = vpack.c.bf16 %v46_v6, %v45_v5  ;;  %v29_v9 = vld [vmem:[%s795_s1 + $0x10] sm:$0xff]  ;;  %v30_v10 = vld [vmem:[%s795_s1 + $0x18] sm:$0xff]  ;;  %v47_v11 = vld [vmem:[%s795_s1 + $0xa0] sm:$0xff] }
   0x4   :  { %520 = vmatprep.subr.bf16.mxu0 %v519_v3  ;;  %v48_v12 = vld [vmem:[%s795_s1 + $0xa8] sm:$0xff]  ;;  %v525_v13 = vpack.c.bf16 %v30_v10, %v29_v9  ;;  %v31_v15 = vld [vmem:[%s795_s1 + $0x20] sm:$0xff]  ;;  %v49_v17 = vld [vmem:[%s795_s1 + $0xb0] sm:$0xff] }
   0x5   :  { %522 = vmatpush3.bf16.msra.mxu0 %v521_v7  ;;  %v527_v14 = vpack.c.bf16 %v48_v12, %v47_v11  ;;  %v32_v16 = vld [vmem:[%s795_s1 + $0x28] sm:$0xff]  ;;  %v50_v18 = vld [vmem:[%s795_s1 + $0xb8] sm:$0xff]  ;;  %v33_v21 = vld [vmem:[%s795_s1 + $0x30] sm:$0xff] }
   0x6   :  { %524 = vmatprep.subr.bf16.mxu0 %v523_v8  ;;  %v529_v19 = vpack.c.bf16 %v32_v16, %v31_v15  ;;  %v531_v20 = vpack.c.bf16 %v50_v18, %v49_v17  ;;  %v34_v22 = vld [vmem:[%s795_s1 + $0x38] sm:$0xff]  ;;  %v51_v23 = vld [vmem:[%s795_s1 + $0xc0] sm:$0xff]  ;;  %v52_v24 = vld [vmem:[%s795_s1 + $0xc8] sm:$0xff] }
   0x7   :  { %v445_v25 = vld.sshfl [vmem:[%s796_s0] sm:$0x33 pattern:$0x76325410]  ;;  %v533_v27 = vpack.c.bf16 %v34_v22, %v33_v21  ;;  %v535_v28 = vpack.c.bf16 %v52_v24, %v51_v23  ;;  %v36_v30 = vld [vmem:[%s795_s1 + $0x48] sm:$0xff]  ;;  %v53_v31 = vld [vmem:[%s795_s1 + $0xd0] sm:$0xff] }
   0x8   :  { %v74_v26 = vcombine.high %v445_v25, %v445_v25  ;;  %v35_v29 = vld [vmem:[%s795_s1 + $0x40] sm:$0xff]  ;;  %v54_v32 = vld [vmem:[%s795_s1 + $0xd8] sm:$0xff]  ;;  %v37_v35 = vld [vmem:[%s795_s1 + $0x50] sm:$0xff] }
   0x9   :  { %526 = vmatpush3.bf16.msra.mxu0 %v525_v13  ;;  %v537_v33 = vpack.c.bf16 %v36_v30, %v35_v29  ;;  %v539_v34 = vpack.c.bf16 %v54_v32, %v53_v31  ;;  %v38_v36 = vld [vmem:[%s795_s1 + $0x58] sm:$0xff]  ;;  %v55_v37 = vld [vmem:[%s795_s1 + $0xe0] sm:$0xff]  ;;  %v56_v38 = vld [vmem:[%s795_s1 + $0xe8] sm:$0xff]  ;;  %v260_v31 = vlaneseq }
   0xa   :  { %528 = vmatprep.subr.bf16.mxu0 %v527_v14  ;;  %141 = vmatprep.mubr.f32.mxu0 %v74_v26  ;;  %v541_v39 = vpack.c.bf16 %v38_v36, %v37_v35  ;;  %v543_v40 = vpack.c.bf16 %v56_v38, %v55_v37  ;;  %v39_v41 = vld [vmem:[%s795_s1 + $0x60] sm:$0xff]  ;;  %v40_v42 = vld [vmem:[%s795_s1 + $0x68] sm:$0xff]  ;;  %v57_v43 = vld [vmem:[%s795_s1 + $0xf0] sm:$0xff]  ;;  %v586_v38 = vmov 1983009808  }
   0xb   :  { %v58_v44 = vld [vmem:[%s795_s1 + $0xf8] sm:$0xff]  ;;  %v545_v45 = vpack.c.bf16 %v40_v42, %v39_v41  ;;  %v41_v47 = vld [vmem:[%s795_s1 + $0x70] sm:$0xff]  ;;  %v154_v50 = vld [vmem:[%s797_s3] sm:$0xff]  ;;  %v261_v32 = vshrl.u32 %v260_v31, 7 }
   0xc   :  { %v547_v46 = vpack.c.bf16 %v58_v44, %v57_v43  ;;  %v42_v48 = vld [vmem:[%s795_s1 + $0x78] sm:$0xff]  ;;  %v155_v51 = vld [vmem:[%s797_s3 + $0x8] sm:$0xff]  ;;  %v156_v54 = vld [vmem:[%s797_s3 + $0x10] sm:$0xff] }
   0xd   :  { %530 = vmatpush3.bf16.msra.mxu0 %v529_v19  ;;  %v549_v49 = vpack.c.bf16 %v42_v48, %v41_v47  ;;  %v552_v52 = vpack.c.bf16 %v155_v51, %v154_v50  ;;  %v157_v55 = vld [vmem:[%s797_s3 + $0x18] sm:$0xff]  ;;  %v444_v59 = vld [vmem:[%s798_s2] ss:$0 sm:$0xff]  ;;  %v247_v4 = vld [vmem:[%s799_s5 + $0x8] sm:$0xff]  ;;  %v266_v35 = vsub.s32 1, %v261_v32  ;;  %v270_v43 = vsub.s32 2, %v261_v32 }
   0xe   :  { %532 = vmatprep.subr.bf16.mxu0 %v531_v20  ;;  %v555_v56 = vpack.c.bf16 %v157_v55, %v156_v54  ;;  %v250_v5 = vld [vmem:[%s799_s5 + $0x20] sm:$0xff]  ;;  %v249_v8 = vld [vmem:[%s799_s5 + $0x18] sm:$0xff]  ;;  %v256_v11 = vld [vmem:[%s799_s5 + $0x50] sm:$0xff] }
   0xf   :  { %553 = vmatpush3.bf16.msra.mxu1 %v552_v52  ;;  %v557_v6 = vpack.c.bf16 %v250_v5, %v247_v4  ;;  %v246_v7 = vld [vmem:[%s799_s5] sm:$0xff]  ;;  %v253_v10 = vld [vmem:[%s799_s5 + $0x38] sm:$0xff]  ;;  %v252_v13 = vld [vmem:[%s799_s5 + $0x30] sm:$0xff] }
  0x10   :  { %554 = vmatprep.subr.bf16.mxu1 %v583_v53  ;;  %v559_v9 = vpack.c.bf16 %v249_v8, %v246_v7  ;;  %v561_v12 = vpack.c.bf16 %v256_v11, %v253_v10  ;;  %v255_v14 = vld [vmem:[%s799_s5 + $0x48] sm:$0xff]  ;;  %v447_v16 = vld [vmem:[%s800_s4] ss:$0 sm:$0xff]  ;;  %v248_v23 = vld [vmem:[%s799_s5 + $0x10] sm:$0xff] }
  0x11   :  { %534 = vmatpush3.bf16.msra.mxu0 %v533_v27  ;;  %v563_v15 = vpack.c.bf16 %v255_v14, %v252_v13  ;;  %v251_v24 = vld [vmem:[%s799_s5 + $0x28] sm:$0xff]  ;;  %v257_v29 = vld [vmem:[%s799_s5 + $0x58] sm:$0xff] }
  0x12   :  { %536 = vmatprep.subr.bf16.mxu0 %v535_v28  ;;  %v566_v26 = vpack.c.bf16 %v251_v24, %v248_v23  ;;  %v254_v28 = vld [vmem:[%s799_s5 + $0x40] sm:$0xff] }
  0x13   :  { %556 = vmatpush3.bf16.msra.mxu1 %v555_v56  ;;  %v569_v30 = vpack.c.bf16 %v257_v29, %v254_v28 }
  0x14   :  { %558 = vmatprep.subr.bf16.mxu1 %v557_v6 }
  0x15   :  { %538 = vmatpush3.bf16.msra.mxu0 %v537_v33  ;;  %v262_v33 = vsub.s32 0, %v261_v32 }
  0x16   :  { %540 = vmatprep.subr.bf16.mxu0 %v539_v34  ;;  %v258_v34 = vld [vmem:[%s801_s6] sm:$0x7] }
  0x17   :  { %v263_v36 = vrot.slane %v258_v34, %v262_v33  ;;  %v267_v37 = vrot.slane %v258_v34, %v266_v35  ;;  %v271_v47 = vrot.slane %v258_v34, %v270_v43 }
  0x19   :  { %542 = vmatpush3.bf16.msra.mxu0 %v541_v39  ;;  %v424_v39 = vunpack.c.l.s4 %v586_v38 }
  0x1a   :  { %544 = vmatprep.subr.bf16.mxu0 %v543_v40 }
  0x1d   :  { %546 = vmatpush3.bf16.msra.mxu0 %v545_v45  ;;  %v425_v45 = vunpack.c.0.s8 %v424_v39 }
  0x1e   :  { %548 = vmatprep.subr.bf16.mxu0 %v547_v46 }
  0x1f   :  { %v428_v48 = vsub.s32 %v425_v45, %v261_v32 }
  0x21   :  { %550 = vmatpush3.bf16.msra.mxu0 %v549_v49 }
  0x24   :  { %142 = vmatmul.mubr.f32.vlgmr.msra.gmra.mrb[0].mxu0 %v445_v25 }
  0xf7   :  { %v484_v58 = vpop.f32.mrb[0].mxu0 }
  0xf8   :  { %v485_v60 = vpop.f32.mrb[1].mxu0 }
  0xf9   :  { %v486_v61 = vadd.f32 %v485_v60, %v484_v58 }
  0xfb   :  { %v144_v62 = vadd.f32 %v486_v61, %v444_v59 }
  0xfd   :  { %v446_v63 = vmul.f32 -1.442695, %v144_v62 }
  0xff   :  { %575 = vpow2.f32 %v446_v63 }
 0x109   :  { %v576_v0 = vpop.eup %575 }
 0x10a   :  { %v150_v1 = vadd.f32 1.0, %v576_v0 }
 0x10c   :  { %577 = vrcp.f32 %v150_v1 }
 0x116   :  { %v578_v2 = vpop.eup %577 }
 0x117   :  { %v153_v3 = vmul.f32 %v578_v2, %v144_v62 }
 0x119   :  { %506 = vmatmul.mubr.msk.f32.vlgmr.msra.gmra.mrb[0].mxu1 %vm165_vm1, %v153_v3 }
 0x11a   :  { %342 = vmatprep.mubr.f32.mxu1 %v585_v57  ;;  %560 = vmatpush1.bf16.msra.mxu1 %v559_v9 }
 0x11b   :  { %562 = vmatprep.subr.bf16.mxu1 %v561_v12 }
 0x11e   :  { %564 = vmatpush1.bf16.msra.mxu1 %v563_v15 }
 0x11f   :  { %565 = vmatprep.subr.bf16.mxu1 %v583_v53 }
 0x1ec   :  { %v235_v17 = vpop.f32.mrb[0].mxu1 }
 0x1ed   :  { %v236_v18 = vadd.f32 %v447_v16, %v235_v17  ;;  %v507_v19 = vpop.f32.mrb[1].mxu1 }
 0x1ef   :  { %v449_v20 = vmul.f32 -1.442695, %v236_v18 }
 0x1f1   :  { %579 = vpow2.f32 %v449_v20 }
 0x1fb   :  { %v580_v21 = vpop.eup %579 }
 0x1fc   :  { %v242_v22 = vadd.f32 1.0, %v580_v21 }
 0x1fe   :  { %581 = vrcp.f32 %v242_v22 }
 0x208   :  { %v582_v25 = vpop.eup %581 }
 0x209   :  { %v245_v27 = vmul.f32 %v582_v25, %v236_v18 }
 0x20b   :  { %450 = vmatmul.mubr.msk.f32.vlgmr.msra.gmra.mrb[2].mxu1 %vm165_vm1, %v245_v27 }
 0x20c   :  { %567 = vmatpush3.bf16.msra.mxu1 %v566_v26  ;;  %516 = vmatprep.mubr.msk.f32.mxu1 %vm584_vm0, %v585_v57 }
 0x20d   :  { %568 = vmatprep.subr.bf16.mxu1 %v583_v53 }
 0x210   :  { %570 = vmatpush3.bf16.msra.mxu1 %v569_v30 }
 0x213   :  { %517 = vmatmul.mubr.msk.f32.vlgmr.msra.gmra.mrb[4].mxu1 %vm165_vm1, %v245_v27 }
 0x2de   :  { %v344_v40 = vpop.f32.mrb[2].mxu1 }
 0x2df   :  { %v345_v41 = vadd.f32 %v344_v40, %v263_v36  ;;  %v346_v42 = vpop.f32.mrb[3].mxu1 }
 0x2e0   :  { %v347_v44 = vadd.f32 %v346_v42, %v267_v37 }
 0x2e2   :  { %v422_v46 = vcombine.low %v345_v41, %v347_v44 }
 0x2e4   :  { %v429_v52 = vrot.slane %v422_v46, %v428_v48 }
 0x2e6   :  { %v415_v49 = vpop.f32.mrb[4].mxu1 }
 0x2e7   :  { %v416_v50 = vadd.f32 %v415_v49, %v271_v47  ;;  %v518_v51 = vpop.f32.mrb[5].mxu1 }
 0x2e9   :  { %v436_v53 = vrot.slane %v416_v50, %v428_v48 }
 0x2eb   :  { %v437_v54 = vcombine.low %v429_v52, %v436_v53 }
 0x2ed   :  { %439 = vst [vmem:[%s802_s7] sm:$0x3f] %v437_v54 }

// kernel: _lambda_.3
= control target key start
LH: loop header
LB: loop body
LE: loop exit
PB: predicated region body
PF: predicated region fallthrough
CT: control target
= control target key end

     0   :  { %s9768_s0 = inlined_call_operand.hbm [shape: f32[2,64,8], index: 0, kind: input, shape index: {}]   ;;  %s9769_s1 = inlined_call_operand.hbm [shape: f32[2,64,32], index: 1, kind: input, shape index: {}]   ;;  %s9770_s2 = inlined_call_operand.hbm [shape: f32[2,16,16], index: 2, kind: input, shape index: {}]   ;;  %s9771_s3 = inlined_call_operand.hbm [shape: f32[2,2,6,32], index: 3, kind: input, shape index: {}]   ;;  %s9772_s4 = inlined_call_operand.hbm [shape: bf16[8,32], index: 4, kind: input, shape index: {}]   ;;  %s9773_s5 = inlined_call_operand.hbm [shape: f32[1,32], index: 5, kind: input, shape index: {}]   ;;  %s9774_s6 = inlined_call_operand.hbm [shape: bf16[2,32,32], index: 6, kind: input, shape index: {}]   ;;  %s9775_s7 = inlined_call_operand.hbm [shape: f32[2,1,32], index: 7, kind: input, shape index: {}]   ;;  %s9776_s8 = inlined_call_operand.hbm [shape: bf16[2,32,16], index: 8, kind: input, shape index: {}]   ;;  %s9777_s9 = inlined_call_operand.hbm [shape: f32[2,1,16], index: 9, kind: input, shape index: {}]   ;;  %s9778_s10 = inlined_call_operand.hbm [shape: bf16[2,32,16], index: 10, kind: input, shape index: {}]   ;;  %s9779_s11 = inlined_call_operand.hbm [shape: f32[2,1,16], index: 11, kind: input, shape index: {}]   ;;  %s9780_s12 = inlined_call_operand.hbm [shape: bf16[2,32,32], index: 12, kind: input, shape index: {}]   ;;  %s9781_s13 = inlined_call_operand.hbm [shape: f32[2,1,32], index: 13, kind: input, shape index: {}]   ;;  %s9782_s14 = inlined_call_operand.hbm [shape: bf16[2,32,32], index: 14, kind: input, shape index: {}]   ;;  %s9783_s15 = inlined_call_operand.hbm [shape: f32[2,1,32], index: 15, kind: input, shape index: {}]   ;;  %s9784_s16 = inlined_call_operand.hbm [shape: bf16[2,16,32], index: 16, kind: input, shape index: {}]   ;;  %s9785_s17 = inlined_call_operand.hbm [shape: f32[2,1,32], index: 17, kind: input, shape index: {}]   ;;  %s9786_s18 = inlined_call_operand.hbm [shape: bf16[2,16,32], index: 18, kind: input, shape index: {}]   ;;  %s9787_s19 = inlined_call_operand.hbm [shape: f32[2,1,32], index: 19, kind: input, shape index: {}]   ;;  %s9788_s20 = inlined_call_operand.hbm [shape: bf16[2,32,32], index: 20, kind: input, shape index: {}]   ;;  %s9789_s21 = inlined_call_operand.hbm [shape: f32[2,1,32], index: 21, kind: input, shape index: {}]   ;;  %s9790_s22 = inlined_call_operand.hbm [shape: bf16[2,32,128], index: 22, kind: input, shape index: {}]   ;;  %s9791_s23 = inlined_call_operand.hbm [shape: f32[2,1,128], index: 23, kind: input, shape index: {}]   ;;  %s9792_s24 = inlined_call_operand.hbm [shape: bf16[2,128,32], index: 24, kind: input, shape index: {}]   ;;  %s9793_s25 = inlined_call_operand.hbm [shape: f32[2,1,32], index: 25, kind: input, shape index: {}]   ;;  %s9794_s26 = inlined_call_operand.hbm [shape: bf16[32,8], index: 26, kind: input, shape index: {}]   ;;  %s9795_s27 = inlined_call_operand.hbm [shape: f32[1,8], index: 27, kind: input, shape index: {}]   ;;  %s9796_s28 = inlined_call_operand.hbm [shape: f32[2,64,8], index: 28, kind: output, shape index: {}]  }
   0x1   :  { %9875 = sst [smem:[#allocation87_spill]] %s9768_s0 }
   0x2   :  { %9876 = sst [smem:[#allocation88_spill]] %s9769_s1 }
   0x3   :  { %9877 = sst [smem:[#allocation89_spill]] %s9770_s2 }
   0x4   :  { %9878 = sst [smem:[#allocation90_spill]] %s9771_s3 }
   0x5   :  { %9879 = sst [smem:[#allocation91_spill]] %s9772_s4 }
   0x6   :  { %9880 = sst [smem:[#allocation92_spill]] %s9773_s5 }
   0x7   :  { %9881 = sst [smem:[#allocation93_spill]] %s9774_s6 }
   0x8   :  { %9882 = sst [smem:[#allocation94_spill]] %s9775_s7 }
   0x9   :  { %9883 = sst [smem:[#allocation95_spill]] %s9776_s8 }
   0xa   :  { %9884 = sst [smem:[#allocation96_spill]] %s9777_s9 }
   0xb   :  { %9885 = sst [smem:[#allocation97_spill]] %s9778_s10 }
   0xc   :  { %9886 = sst [smem:[#allocation98_spill]] %s9779_s11 }
   0xd   :  { %9887 = sst [smem:[#allocation99_spill]] %s9780_s12 }
   0xe   :  { %9888 = sst [smem:[#allocation100_spill]] %s9781_s13 }
   0xf   :  { %9889 = sst [smem:[#allocation101_spill]] %s9782_s14 }
  0x10   :  { %9890 = sst [smem:[#allocation102_spill]] %s9783_s15 }
  0x11   :  { %9891 = sst [smem:[#allocation103_spill]] %s9784_s16 }
  0x12   :  { %9892 = sst [smem:[#allocation104_spill]] %s9785_s17 }
  0x13   :  { %9893 = sst [smem:[#allocation105_spill]] %s9786_s18 }
  0x14   :  { %9894 = sst [smem:[#allocation106_spill]] %s9787_s19 }
  0x15   :  { %9895 = sst [smem:[#allocation107_spill]] %s9788_s20 }
  0x16   :  { %9896 = sst [smem:[#allocation108_spill]] %s9789_s21 }
  0x17   :  { %9897 = sst [smem:[#allocation109_spill]] %s9790_s22 }
  0x18   :  { %9898 = sst [smem:[#allocation110_spill]] %s9791_s23 }
  0x19   :  { %9899 = sst [smem:[#allocation111_spill]] %s9792_s24 }
  0x1a   :  { %9900 = sst [smem:[#allocation112_spill]] %s9793_s25 }
  0x1b   :  { %9901 = sst [smem:[#allocation113_spill]] %s9794_s26 }
  0x1c   :  { %9902 = sst [smem:[#allocation114_spill]] %s9795_s27 }
  0x1d   :  { %9903 = sst [smem:[#allocation115_spill]] %s9796_s28 }
  0x1e   :  { %33 = vsyncpa [#allocation4], 0 }
  0x1f   :  { %35 = vsyncpa [#allocation4 + $0x1], 0 }
  0x20   :  { %36 = vsyncpa [#allocation7], 0 }
  0x21   :  { %38 = vsyncpa [#allocation7 + $0x1], 0 }
  0x22   :  { %39 = vsyncpa [#allocation10], 0 }
  0x23   :  { %41 = vsyncpa [#allocation10 + $0x1], 0 }
  0x24   :  { %42 = vsyncpa [#allocation13], 0 }
  0x25   :  { %43 = vsyncpa [#allocation5], 0 }
  0x26   :  { %45 = vsyncpa [#allocation5 + $0x1], 0  ;;  %s7571_s8 = smov 0   ;;  %s7573_s5 = smov 0  }
  0x27   :  { %s7575_s9 = smov 0   ;;  %s7577_s30 = smov 0  }
  0x28   :  { %s7579_s3 = smov 0   ;;  %s7581_s6 = smov 0  }
  0x29   :  { %s7583_s10 = smov 0   ;;  %s7585_s0 = smov 0  }
  0x2a   :  { %s7587_s11 = smov 0   ;;  %s7589_s29 = smov 0  }
  0x2b   :  { %s7591_s2 = smov 0   ;;  %s7593_s7 = smov 0  }
  0x2c   :  { %s7595_s12 = smov 0   ;;  %s7597_s1 = smov 0  }
  0x2d LB: > { %9904 = sst [smem:[#allocation65_spill]] %s7336_s5  ;;  %s7642_s4 = sadd.s32 4294967295, %s7384_s1   ;;  %s7384_s1 = sphi %s7597_s1, %s51_s1   ;;  %s7380_s12 = sphi %s7595_s12, %s10042_s12   ;;  %s7376_s7 = sphi %s7593_s7, %s10044_s7   ;;  %s7372_s2 = sphi %s7591_s2, %s10040_s2   ;;  %s7368_s29 = sphi %s7589_s29, %s10043_s29   ;;  %s7364_s11 = sphi %s7587_s11, %s10039_s11   ;;  %s7360_s0 = sphi %s7585_s0, %s10038_s0   ;;  %s7356_s10 = sphi %s7583_s10, %s10037_s10   ;;  %s7352_s6 = sphi %s7581_s6, %s10036_s6   ;;  %s7348_s3 = sphi %s7579_s3, %s10035_s3   ;;  %s7344_s30 = sphi %s7577_s30, %s10034_s30   ;;  %s7340_s9 = sphi %s7575_s9, %s10033_s9   ;;  %s7336_s5 = sphi %s7573_s5, %s10032_s5   ;;  %s7332_s8 = sphi %s7571_s8, %s10031_s8  }
  0x2e   : > { %9905 = sst [smem:[#allocation66_spill]] %s7340_s9  ;;  %s70_s25 = sadd.s32 1, %s7364_s11 }
  0x2f   : > { %9906 = sst [smem:[#allocation67_spill]] %s7348_s3  ;;  %p9823_p1 = scmp.ne.s32.totalorder %s7364_s11, %s7360_s0 }
  0x30   : > { %9907 = sst [smem:[#allocation68_spill]] %s7352_s6  ;;  %p78_p2 = scmp.eq.s32.totalorder %s7384_s1, 0 }
  0x31   : > { %9908 = sst [smem:[#allocation69_spill]] %s7356_s10  ;;  %p9822_p4 = scmp.ne.s32.totalorder %s7360_s0, %s7356_s10 }
  0x32   : > { %9909 = sst [smem:[#allocation70_spill]] %s7360_s0  ;;  %p7659_p3 = por %p78_p2, %p9823_p1 }
  0x33   : > { %9910 = sst [smem:[#allocation71_spill]] %s7364_s11  ;;  %p9840_p6 = scmp.eq.s32.totalorder %s7642_s4, 0 }
  0x34   : > { %9911 = sst [smem:[#allocation72_spill]] %s7368_s29  ;;  %s63_s29 = sadd.s32 1, %s7380_s12 }
  0x35   : > { %9912 = sst [smem:[#allocation73_spill]] %s7372_s2  ;;  %s60_s2 = sadd.s32 1, %s7376_s7 }
  0x36   : > { %9913 = sst [smem:[#allocation74_spill]] %s7380_s12  ;;  %p61_p0 = scmp.ge.s32.totalorder %s60_s2, 2 }
  0x37   : > { %9914 = sst [smem:[#allocation75_spill]] %s7642_s4  ;;  %s150_s23 = sadd.s32 1, %s7352_s6 }
  0x38   : > { %s10046_s2 = smov (%p61_p0, %s60_s2), 0  ;;  %s10048_s29 = smov (!%p61_p0, %s63_s29), %s7380_s12 }
  0x39   : > { %9915 = sst [smem:[#allocation76_spill]] %s10046_s2  ;;  %p65_p5 = scmp.ge.s32.totalorder %s10048_s29, 2 }
  0x3a   : > { %s9916_s28 = scalar_select %p7659_p3, 1, 0 }
  0x3b   : > { %s146_s24 = ssub.s32 %s7376_s7, %s10046_s2  ;;  %s10050_s29 = smov (%p65_p5, %s10048_s29), 0 }
  0x3c   : > { %9917 = sst [smem:[#allocation77_spill]] %s10050_s29  ;;  %p7676_p7 = por %p9840_p6, %p9822_p4 }
  0x3d   : > { %p157_p8 = scmp.ne.s32.totalorder %s7352_s6, %s7348_s3  ;;  %s67_s21 = ssub.s32 %s7380_s12, %s10050_s29 }
  0x3e   : > { %s9918_s22 = scalar_select %p7676_p7, 1, 0 }
  0x3f   : > { %p163_p9 = scmp.ne.s32.totalorder %s7348_s3, %s7344_s30  ;;  %p68_p10 = scmp.eq.s32.totalorder %s67_s21, 0 }
  0x40   : > { %9919 = sst [smem:[#allocation78_spill]] %s9918_s22  ;;  %s147_s2 = sor.u32 %s146_s24, %s67_s21 }
  0x41   : > { %p148_p11 = scmp.eq.s32.totalorder %s147_s2, 0  ;;  %p7688_p12 = por %p157_p8, %p78_p2 }
  0x42   : > { %s7693_s22 = scalar_select %p68_p10, %s7364_s11, %s70_s25  }
  0x43   : > { %s9920_s20 = scalar_select %p7688_p12, 1, 0 }
  0x44   : > { %9921 = sst [smem:[#allocation79_spill]] %s7693_s22  ;;  %p7700_p13 = por %p163_p9, %p9840_p6 }
  0x45   : > { %s7696_s29 = scalar_select %p148_p11, %s7352_s6, %s150_s23  }
  0x46   : > { %s9923_s30 = scalar_select %p7700_p13, 1, 0 }
  0x47   : > { %9922 = sst [smem:[#allocation80_spill]] %s7696_s29  ;;  %p216_p0 = scmp.eq.s32.totalorder %s146_s24, 0 }
  0x48   : > { %9924 = sst [smem:[#allocation81_spill]] %s9923_s30  ;;  %s218_s21 = sadd.s32 1, %s7340_s9 }
  0x49   : > { %p225_p5 = scmp.ne.s32.totalorder %s7340_s9, %s7336_s5  ;;  %p231_p4 = scmp.ne.s32.totalorder %s7336_s5, %s7332_s8 }
  0x4a   : > { %s7708_s2 = scalar_select %p216_p0, %s7340_s9, %s218_s21  }
  0x4b   : > { %p7712_p8 = por %p225_p5, %p78_p2  ;;  %p791_p10 = scmp.eq.s32.totalorder %s7642_s4, 3 }
  0x4c   : > { %9925 = sst [smem:[#allocation82_spill]] %s7708_s2  ;;  %s9927_s23 = sadd.s32 4294967294, %s7384_s1  }
  0x4d   : > { %s9926_s3 = scalar_select %p7712_p8, 1, 0 }
  0x4e   : > { %p797_p11 = scmp.eq.s32.totalorder %s9927_s23, 3  ;;  %p7723_p9 = por %p231_p4, %p9840_p6 }
  0x4f   : > { %p5272_p1 = scmp.ge.s32.totalorder %s7384_s1, 1  ;;  %p9930_p13 = scmp.ne.s32.totalorder %s7364_s11, %s7360_s0 }
  0x50   : > { %s9928_s25 = scalar_select %p7723_p9, 1, 0 }
  0x51   : > { %p7731_p7 = por %p791_p10, %p9930_p13  ;;  %p9933_p2 = scmp.ne.s32.totalorder %s7360_s0, %s7356_s10 }
  0x52   : > { %9929 = sst [smem:[#allocation83_spill]] %s9928_s25  ;;  %p804_p5 = scmp.lt.s32.totalorder %s7384_s1, 5 }
  0x53   : > { %s9931_s24 = scalar_select %p7731_p7, 1, 0 }
  0x54   : > { %p7738_p0 = por %p797_p11, %p9933_p2  ;;  %p7743_p8 = pnand %p5272_p1, %p804_p5 }
  0x55   : > { %9932 = sst [smem:[#allocation84_spill]] %s9931_s24  ;;  %s7386_s23 = smov [#allocation11]  }
  0x56   : > { %s9934_s21 = scalar_select %p7738_p0, 1, 0 }
  0x57   : > { %s9936_s8 = scalar_select %p7743_p8, 1, 0 }
  0x58   : > { %9935 = sst [smem:[#allocation85_spill]] %s9934_s21  ;;  %s817_s22 = sshll.u32 %s7386_s23, 4  ;;  %s818_s22 = int_to_ptr.vmem [resolvable:$true] %s817_s22 }
  0x59   : > { %9937 = sst [smem:[#allocation86_spill]] %s9936_s8  ;;  %s7387_s29 = smov [#allocation12]  }
  0x5a   : > { %s828_s2 = sshll.u32 %s7387_s29, 4  ;;  %p5954_p4 = pneg %p7743_p8  ;;  %s7749_s2 = int_to_ptr.vmem [resolvable:$true] %s828_s2 }
  0x5b   : > { %s7388_s21 = smov [#allocation34]   ;;  %s9939_s23 = sld [smem:[#allocation91_spill]] }
  0x5c   : > { %p7753_p13 = pnand %p5954_p4, %p9840_p6  ;;  %s838_s24 = sshll.u32 %s7388_s21, 4  ;;  %s7757_s24 = int_to_ptr.vmem [resolvable:$true] %s838_s24 }
  0x5e   : > { %p7767_p10 = pneg %p7753_p13 }
  0x61   : > { %s6350_s30 = scalar_lea.hbm %s9939_s23, 64 }
  0x62   : > { %p6351_p1 = scmp.ne.s32.totalorder %s9939_s23, %s6350_s30  ;;  %p6357_p5 = scmp.lt.u32.totalorder %s6350_s30, %s9939_s23 }
  0x64   : > { %p6353_p11 = pnand %p7767_p10, %p6351_p1 }
  0x66   : > { %p6354_p2 = pneg %p6353_p11 }
  0x68   : > { %p6359_p4 = pnand %p6357_p5, %p6354_p2 }
  0x6a   : > { %6362 = shalt.err (!%p6359_p4)
}
  0x6b   : > { %s6363_s5 = scalar_lea.vmem %s818_s22, 64  ;;  %p6371_p9 = scmp.lt.s32.totalorder %s818_s22, %s818_s22 }
  0x6c   : > { %p6364_p6 = scmp.ne.s32.totalorder %s818_s22, %s6363_s5  ;;  %p6372_p8 = scmp.lt.s32.totalorder %s6363_s5, %s6363_s5 }
  0x6e   : > { %p6366_p0 = pnand %p6364_p6, %p7767_p10  ;;  %p6373_p12 = por %p6372_p8, %p6371_p9 }
  0x70   : > { %p6367_p7 = pneg %p6366_p0 }
  0x72   : > { %p6374_p3 = pnand %p6373_p12, %p6367_p7 }
  0x74   : > { %6377 = shalt.err (!%p6374_p3)
}
  0x75   : > { %5957 = dma.hbm_to_vmem [thread:$0]  (!%p7753_p13), %s9939_s23, 64, %s818_s22, [#allocation10]  }
  0x76   : > { %s9941_s29 = sld [smem:[#allocation92_spill]] }
  0x7c   : > { %s9942_s21 = smov %s9941_s29  ;;  %s6378_s19 = scalar_lea.hbm %s9941_s29, 16 }
  0x7d   : > { %p6379_p6 = scmp.ne.s32.totalorder %s9942_s21, %s6378_s19  ;;  %p6385_p3 = scmp.lt.u32.totalorder %s6378_s19, %s9942_s21 }
  0x7f   : > { %p6381_p0 = pnand %p6379_p6, %p7767_p10 }
  0x81   : > { %p6382_p8 = pneg %p6381_p0 }
  0x83   : > { %p6387_p7 = pnand %p6385_p3, %p6382_p8 }
  0x85   : > { %6390 = shalt.err (!%p6387_p7)
}
  0x86   : > { %s6391_s22 = scalar_lea.vmem %s7749_s2, 16  ;;  %s6398_s17 = scalar_lea.vmem %s7749_s2, 32 }
  0x87   : > { %p6392_p12 = scmp.ne.s32.totalorder %s7749_s2, %s6391_s22  ;;  %p6399_p11 = scmp.lt.s32.totalorder %s7749_s2, %s7749_s2 }
  0x88   : > { %p6400_p2 = scmp.lt.s32.totalorder %s6398_s17, %s6391_s22 }
  0x89   : > { %p6394_p9 = pnand %p6392_p12, %p7767_p10 }
  0x8a   : > { %p6401_p5 = por %p6400_p2, %p6399_p11 }
  0x8b   : > { %p6395_p1 = pneg %p6394_p9 }
  0x8d   : > { %p6402_p4 = pnand %p6401_p5, %p6395_p1 }
  0x8f   : > { %6405 = shalt.err (!%p6402_p4)
}
  0x90   : > { %5960 = dma.hbm_to_vmem [thread:$0]  (!%p7753_p13), %s9942_s21, 16, %s7749_s2, [#allocation13]  }
  0x91   : > { %s9943_s26 = sld [smem:[#allocation113_spill]] }
  0x97   : > { %s6406_s25 = scalar_lea.hbm %s9943_s26, 256 }
  0x98   : > { %p6407_p6 = scmp.ne.s32.totalorder %s9943_s26, %s6406_s25  ;;  %p6413_p3 = scmp.lt.u32.totalorder %s6406_s25, %s9943_s26 }
  0x9a   : > { %p6409_p0 = pnand %p6407_p6, %p7767_p10 }
  0x9c   : > { %p6410_p8 = pneg %p6409_p0 }
  0x9e   : > { %p6415_p7 = pnand %p6413_p3, %p6410_p8 }
  0xa0   : > { %6418 = shalt.err (!%p6415_p7)
}
  0xa1   : > { %s6419_s2 = scalar_lea.vmem %s7757_s24, 256  ;;  %p6427_p11 = scmp.lt.s32.totalorder %s7757_s24, %s7757_s24 }
  0xa2   : > { %p6420_p12 = scmp.ne.s32.totalorder %s7757_s24, %s6419_s2  ;;  %p6428_p2 = scmp.lt.s32.totalorder %s6419_s2, %s6419_s2 }
  0xa4   : > { %p6422_p9 = pnand %p6420_p12, %p7767_p10  ;;  %p6429_p5 = por %p6428_p2, %p6427_p11 }
  0xa6   : > { %p6423_p1 = pneg %p6422_p9 }
  0xa8   : > { %p6430_p4 = pnand %p6429_p5, %p6423_p1 }
  0xaa   : > { %6433 = shalt.err (!%p6430_p4)
}
  0xab   : > { %s7389_s22 = smov 64   ;;  %s7390_s17 = smov 4  }
  0xac   : > { %5963 = dma.hbm_to_vmem [thread:$0]  (!%p7753_p13), %s9943_s26, 256, %s7757_s24, [#allocation10], %s7389_s22, %s7389_s22, %s7390_s17  }
  0xad   : > { %s7391_s19 = smov [#allocation35]   ;;  %s9944_s27 = sld [smem:[#allocation114_spill]] }
  0xae   : > { %s852_s0 = sshll.u32 %s7391_s19, 4  ;;  %s853_s0 = int_to_ptr.vmem [resolvable:$true] %s852_s0 }
  0xb3   : > { %s6434_s8 = scalar_lea.hbm %s9944_s27, 16 }
  0xb4   : > { %p6435_p6 = scmp.ne.s32.totalorder %s9944_s27, %s6434_s8  ;;  %p6441_p3 = scmp.lt.u32.totalorder %s6434_s8, %s9944_s27 }
  0xb6   : > { %p6437_p0 = pnand %p6435_p6, %p7767_p10 }
  0xb8   : > { %p6438_p8 = pneg %p6437_p0 }
  0xba   : > { %p6443_p7 = pnand %p6441_p3, %p6438_p8 }
  0xbc   : > { %6446 = shalt.err (!%p6443_p7)
}
  0xbd   : > { %s6447_s24 = scalar_lea.vmem %s853_s0, 16  ;;  %s6454_s22 = scalar_lea.vmem %s853_s0, 32 }
  0xbe   : > { %p6448_p12 = scmp.ne.s32.totalorder %s853_s0, %s6447_s24  ;;  %p6455_p11 = scmp.lt.s32.totalorder %s853_s0, %s853_s0 }
  0xbf   : > { %p6456_p2 = scmp.lt.s32.totalorder %s6454_s22, %s6447_s24 }
  0xc0   : > { %p6450_p9 = pnand %p6448_p12, %p7767_p10 }
  0xc1   : > { %p6457_p5 = por %p6456_p2, %p6455_p11 }
  0xc2   : > { %p6451_p1 = pneg %p6450_p9 }
  0xc4   : > { %p6458_p4 = pnand %p6457_p5, %p6451_p1 }
  0xc6   : > { %6461 = shalt.err (!%p6458_p4)
}
  0xc7   : > { %5966 = dma.hbm_to_vmem [thread:$0]  (!%p7753_p13), %s9944_s27, 16, %s853_s0, [#allocation13]  }
  0xc8   : > { %p5277_p6 = scmp.ge.s32.totalorder %s7384_s1, 4 }
  0xc9   : > { %s7850_s4 = sand.u32 (!%p5277_p6), 1, %s7384_s1   ;;  %s9851_s21 = sand.u32 (!%p5277_p6), 1, %s7364_s11  }
  0xca   : > { %859 = sbr.rel (%p5277_p6) target bundleno = 828 (0x33c), region = 32  ;;  %s7855_s18 = sshll.u32 (!%p5277_p6), %s9851_s21, 6 }
  0xcb   : > { %s5473_s10 = sshll.u32 (!%p5277_p6), %s7380_s12, 10  ;;  %s9945_s25 = sld [smem:[#allocation88_spill]] (!%p5277_p6) }
  0xcc   : > { %s888_s8 = scalar_lea.vmem (!%p5277_p6), [#allocation6], %s7855_s18  ;;  %s7869_s5 = scalar_lea.sflag (!%p5277_p6), [#allocation7], %s7850_s4 }
  0xcd   : > { %s895_s29 = sshll.u32 (!%p5277_p6), %s888_s8, 4  ;;  %p9946_p10 = scmp.ne.s32.totalorder (!%p5277_p6), %s9916_s28, 0  ;;  %s7866_s29 = int_to_ptr.vmem [resolvable:$true] %s895_s29 }
  0xd1   : > { %s7863_s30 = scalar_lea.hbm %s9945_s25, %s5473_s10  ;;  %s6466_s17 = scalar_lea.hbm %s9945_s25, 2048 }
  0xd2   : > { %s6462_s2 = scalar_lea.hbm %s7863_s30, 1024  ;;  %p6467_p3 = scmp.lt.u32.totalorder %s7863_s30, %s9945_s25 }
  0xd3   : > { %p6463_p13 = scmp.ne.s32.totalorder %s7863_s30, %s6462_s2  ;;  %p6468_p7 = scmp.lt.u32.totalorder %s6466_s17, %s6462_s2 }
  0xd4   : > { %p6470_p9 = scmp.lt.u32.totalorder %s6462_s2, %s7863_s30 }
  0xd5   : > { %p6464_p0 = pnand %p6463_p13, %p9946_p10  ;;  %p6469_p12 = por %p6468_p7, %p6467_p3 }
  0xd7   : > { %p6465_p8 = pneg %p6464_p0  ;;  %p6471_p1 = por %p6470_p9, %p6469_p12 }
  0xd9   : > { %p6472_p11 = pnand %p6471_p1, %p6465_p8 }
  0xdb   : > { %6475 = shalt.err (!%p6472_p11)
}
  0xdc   : > { %s6476_s0 = scalar_lea.vmem %s7866_s29, 1024  ;;  %s7392_s8 = smov [#allocation6]  }
  0xdd   : > { %p6477_p2 = scmp.ne.s32.totalorder %s7866_s29, %s6476_s0  ;;  %s6480_s24 = sshll.u32 %s7392_s8, 4  ;;  %s6481_s24 = int_to_ptr.vmem [resolvable:$false] %s6480_s24 }
  0xde   : > { %s6482_s22 = scalar_lea.vmem %s6481_s24, 2048  ;;  %p6483_p6 = scmp.lt.s32.totalorder %s7866_s29, %s6481_s24 }
  0xdf   : > { %p6478_p5 = pnand %p6477_p2, %p9946_p10  ;;  %p6484_p13 = scmp.lt.s32.totalorder %s6482_s22, %s6476_s0 }
  0xe1   : > { %p6479_p4 = pneg %p6478_p5  ;;  %p6485_p0 = por %p6484_p13, %p6483_p6 }
  0xe3   : > { %p6486_p3 = pnand %p6485_p0, %p6479_p4 }
  0xe5   : > { %6489 = shalt.err (!%p6486_p3)
}
  0xe6   : > { %s7393_s2 = smov 128   ;;  %s7394_s17 = smov 8  }
  0xe7   : > { %5897 = dma.hbm_to_vmem [thread:$0]  (%p9946_p10), %s7863_s30, 1024, %s7866_s29, %s7869_s5, %s7393_s2, %s7393_s2, %s7394_s17  }
  0xe8   : > { %s9947_s0 = sld [smem:[#allocation87_spill]]  ;;  %s867_s22 = scalar_lea.vmem [#allocation3], %s7855_s18 }
  0xe9   : > { %s874_s21 = sshll.u32 %s867_s22, 4  ;;  %s9949_s23 = sand.u32 1, %s7364_s11   ;;  %s7908_s21 = int_to_ptr.vmem [resolvable:$true] %s874_s21 }
  0xea   : > { %s7906_s25 = sshll.u32 %s9949_s23, 4  ;;  %s7911_s26 = scalar_lea.sflag [#allocation4], %s7850_s4 }
  0xee   : > { %s9948_s24 = smov %s9947_s0  ;;  %s7901_s8 = scalar_lea.hbm %s9947_s0, %s5473_s10 }
  0xef   : > { %s6490_s30 = scalar_lea.hbm %s7901_s8, 1024  ;;  %s6494_s16 = scalar_lea.hbm %s9948_s24, 2048 }
  0xf0   : > { %p6491_p8 = scmp.ne.s32.totalorder %s7901_s8, %s6490_s30  ;;  %p6495_p9 = scmp.lt.u32.totalorder %s7901_s8, %s9948_s24 }
  0xf1   : > { %p6496_p1 = scmp.lt.u32.totalorder %s6494_s16, %s6490_s30  ;;  %p6498_p2 = scmp.lt.u32.totalorder %s6490_s30, %s7901_s8 }
  0xf2   : > { %p6492_p7 = pnand %p6491_p8, %p9946_p10 }
  0xf3   : > { %p6497_p11 = por %p6496_p1, %p6495_p9 }
  0xf4   : > { %p6493_p12 = pneg %p6492_p7 }
  0xf5   : > { %p6499_p5 = por %p6498_p2, %p6497_p11 }
  0xf7   : > { %p6500_p4 = pnand %p6499_p5, %p6493_p12 }
  0xf9   : > { %6503 = shalt.err (!%p6500_p4)
}
  0xfa   : > { %s6504_s23 = scalar_lea.vmem %s7908_s21, 1024  ;;  %s7395_s18 = smov [#allocation3]  }
  0xfb   : > { %p6505_p6 = scmp.ne.s32.totalorder %s7908_s21, %s6504_s23  ;;  %s6508_s22 = sshll.u32 %s7395_s18, 4  ;;  %s6509_s22 = int_to_ptr.vmem [resolvable:$false] %s6508_s22 }
  0xfc   : > { %s6510_s10 = scalar_lea.vmem %s6509_s22, 2048  ;;  %p6511_p3 = scmp.lt.s32.totalorder %s7908_s21, %s6509_s22 }
  0xfd   : > { %p6506_p13 = pnand %p6505_p6, %p9946_p10  ;;  %p6512_p8 = scmp.lt.s32.totalorder %s6510_s10, %s6504_s23 }
  0xff   : > { %p6507_p0 = pneg %p6506_p13  ;;  %p6513_p7 = por %p6512_p8, %p6511_p3 }
 0x101   : > { %p6514_p9 = pnand %p6513_p7, %p6507_p0 }
 0x103   : > { %6517 = shalt.err (!%p6514_p9)
}
 0x104   : > { %5896 = dma.hbm_to_vmem [thread:$0]  (%p9946_p10), %s7901_s8, 1024, %s7908_s21, %s7911_s26, %s7393_s2, %s7393_s2, %s7394_s17  }
 0x105   : > { %s5475_s30 = sshll.u32 %s7380_s12, 8  ;;  %s909_s29 = scalar_lea.vmem [#allocation8], %s7906_s25 }
 0x106   : > { %s916_s16 = sshll.u32 %s909_s29, 4  ;;  %s9950_s23 = sld [smem:[#allocation89_spill]]  ;;  %s7945_s16 = int_to_ptr.vmem [resolvable:$true] %s916_s16 }
 0x10c   : > { %s7943_s18 = scalar_lea.hbm %s9950_s23, %s5475_s30  ;;  %s6522_s25 = scalar_lea.hbm %s9950_s23, 512 }
 0x10d   : > { %s6518_s22 = scalar_lea.hbm %s7943_s18, 256  ;;  %p6523_p2 = scmp.lt.u32.totalorder %s7943_s18, %s9950_s23 }
 0x10e   : > { %p6519_p12 = scmp.ne.s32.totalorder %s7943_s18, %s6518_s22  ;;  %p6524_p5 = scmp.lt.u32.totalorder %s6522_s25, %s6518_s22 }
 0x10f   : > { %p6526_p6 = scmp.lt.u32.totalorder %s6518_s22, %s7943_s18 }
 0x110   : > { %p6520_p1 = pnand %p6519_p12, %p9946_p10  ;;  %p6525_p4 = por %p6524_p5, %p6523_p2 }
 0x112   : > { %p6521_p11 = pneg %p6520_p1  ;;  %p6527_p13 = por %p6526_p6, %p6525_p4 }
 0x114   : > { %p6528_p0 = pnand %p6527_p13, %p6521_p11 }
 0x116   : > { %6531 = shalt.err (!%p6528_p0)
}
 0x117   : > { %s6532_s30 = scalar_lea.vmem %s7945_s16, 256  ;;  %s7396_s19 = smov [#allocation8]  }
 0x118   : > { %p6533_p3 = scmp.ne.s32.totalorder %s7945_s16, %s6532_s30  ;;  %s6536_s0 = sshll.u32 %s7396_s19, 4  ;;  %s6537_s0 = int_to_ptr.vmem [resolvable:$false] %s6536_s0 }
 0x119   : > { %s6538_s21 = scalar_lea.vmem %s6537_s0, 512  ;;  %p6539_p9 = scmp.lt.s32.totalorder %s7945_s16, %s6537_s0 }
 0x11a   : > { %p6534_p8 = pnand %p6533_p3, %p9946_p10  ;;  %p6540_p12 = scmp.lt.s32.totalorder %s6538_s21, %s6532_s30 }
 0x11c   : > { %p6535_p7 = pneg %p6534_p8  ;;  %p6541_p1 = por %p6540_p12, %p6539_p9 }
 0x11e   : > { %p6542_p2 = pnand %p6541_p1, %p6535_p7 }
 0x120   : > { %6545 = shalt.err (!%p6542_p2)
}
 0x121   : > { %5898 = dma.hbm_to_vmem [thread:$0]  (%p9946_p10), %s7943_s18, 256, %s7945_s16, %s7869_s5, %s7393_s2, %s7393_s2, %s7394_s17  }
 0x122   : > { %s928_s22 = sand.u32 1, %s7352_s6   ;;  %s5288_s25 = sshll.u32 %s7380_s12, 1 }
 0x123   : > { %s5287_s8 = sshll.u32 %s928_s22, 3  ;;  %s935_s10 = sadd.s32 %s7376_s7, %s5288_s25 }
 0x124   : > { %s5289_s29 = sshll.u32 %s935_s10, 7  ;;  %s930_s30 = scalar_lea.vmem [#allocation9], %s5287_s8 }
 0x125   : > { %s939_s19 = sshll.u32 %s930_s30, 4  ;;  %s9951_s21 = sld [smem:[#allocation90_spill]]  ;;  %s940_s19 = int_to_ptr.vmem [resolvable:$true] %s939_s19 }
 0x126   : > { %s7981_s24 = scalar_lea.sflag [#allocation10], %s7850_s4  ;;  %p9952_p11 = scmp.ne.s32.totalorder %s9920_s20, 0 }
 0x12b   : > { %s7978_s23 = scalar_lea.hbm %s9951_s21, %s5289_s29  ;;  %s6550_s18 = scalar_lea.hbm %s9951_s21, 512 }
 0x12c   : > { %s6546_s2 = scalar_lea.hbm %s7978_s23, 128  ;;  %p6551_p6 = scmp.lt.u32.totalorder %s7978_s23, %s9951_s21 }
 0x12d   : > { %p6547_p10 = scmp.ne.s32.totalorder %s7978_s23, %s6546_s2  ;;  %p6552_p13 = scmp.lt.u32.totalorder %s6550_s18, %s6546_s2 }
 0x12e   : > { %p6554_p3 = scmp.lt.u32.totalorder %s6546_s2, %s7978_s23 }
 0x12f   : > { %p6548_p5 = pnand %p6547_p10, %p9952_p11  ;;  %p6553_p0 = por %p6552_p13, %p6551_p6 }
 0x131   : > { %p6549_p4 = pneg %p6548_p5  ;;  %p6555_p8 = por %p6554_p3, %p6553_p0 }
 0x133   : > { %p6556_p7 = pnand %p6555_p8, %p6549_p4 }
 0x135   : > { %6559 = shalt.err (!%p6556_p7)
}
 0x136   : > { %s6560_s4 = scalar_lea.vmem %s940_s19, 128  ;;  %s7397_s25 = smov [#allocation9]  }
 0x137   : > { %p6561_p9 = scmp.ne.s32.totalorder %s940_s19, %s6560_s4  ;;  %s6564_s10 = sshll.u32 %s7397_s25, 4  ;;  %s6565_s10 = int_to_ptr.vmem [resolvable:$false] %s6564_s10 }
 0x138   : > { %s6566_s29 = scalar_lea.vmem %s6565_s10, 256  ;;  %p6567_p2 = scmp.lt.s32.totalorder %s940_s19, %s6565_s10 }
 0x139   : > { %p6562_p12 = pnand %p6561_p9, %p9952_p11  ;;  %p6568_p10 = scmp.lt.s32.totalorder %s6566_s29, %s6560_s4 }
 0x13b   : > { %p6563_p1 = pneg %p6562_p12  ;;  %p6569_p5 = por %p6568_p10, %p6567_p2 }
 0x13d   : > { %p6570_p6 = pnand %p6569_p5, %p6563_p1 }
 0x13f   : > { %6573 = shalt.err (!%p6570_p6)
}
 0x140   : > { %5899 = dma.hbm_to_vmem [thread:$0]  (%p9952_p11), %s7978_s23, 128, %s940_s19, %s7981_s24  }
 0x141   : > { %s8002_s30 = sand.u32 1, %s7340_s9   ;;  %s8005_s28 = sshll.u32 %s7376_s7, 8 }
 0x142   : > { %s8008_s0 = sshll.u32 %s8002_s30, 4  ;;  %s9953_s16 = sld [smem:[#allocation93_spill]] }
 0x143   : > { %s950_s20 = scalar_lea.vmem [#allocation14], %s8008_s0  ;;  %p9954_p4 = scmp.ne.s32.totalorder %s9926_s3, 0 }
 0x144   : > { %s957_s23 = sshll.u32 %s950_s20, 4  ;;  %s8017_s23 = int_to_ptr.vmem [resolvable:$true] %s957_s23 }
 0x148   : > { %s8014_s18 = scalar_lea.hbm %s9953_s16, %s8005_s28  ;;  %s6578_s4 = scalar_lea.hbm %s9953_s16, 512 }
 0x149   : > { %s6574_s19 = scalar_lea.hbm %s8014_s18, 256  ;;  %p6579_p3 = scmp.lt.u32.totalorder %s8014_s18, %s9953_s16 }
 0x14a   : > { %p6575_p11 = scmp.ne.s32.totalorder %s8014_s18, %s6574_s19  ;;  %p6580_p8 = scmp.lt.u32.totalorder %s6578_s4, %s6574_s19 }
 0x14b   : > { %p6582_p9 = scmp.lt.u32.totalorder %s6574_s19, %s8014_s18 }
 0x14c   : > { %p6576_p13 = pnand %p6575_p11, %p9954_p4  ;;  %p6581_p7 = por %p6580_p8, %p6579_p3 }
 0x14e   : > { %p6577_p0 = pneg %p6576_p13  ;;  %p6583_p12 = por %p6582_p9, %p6581_p7 }
 0x150   : > { %p6584_p1 = pnand %p6583_p12, %p6577_p0 }
 0x152   : > { %6587 = shalt.err (!%p6584_p1)
}
 0x153   : > { %s6588_s29 = scalar_lea.vmem %s8017_s23, 256  ;;  %s7398_s2 = smov [#allocation14]  }
 0x154   : > { %p6589_p2 = scmp.ne.s32.totalorder %s8017_s23, %s6588_s29  ;;  %s6592_s17 = sshll.u32 %s7398_s2, 4  ;;  %s6593_s17 = int_to_ptr.vmem [resolvable:$false] %s6592_s17 }
 0x155   : > { %s6594_s20 = scalar_lea.vmem %s6593_s17, 512  ;;  %p6595_p6 = scmp.lt.s32.totalorder %s8017_s23, %s6593_s17 }
 0x156   : > { %p6590_p10 = pnand %p6589_p2, %p9954_p4  ;;  %p6596_p11 = scmp.lt.s32.totalorder %s6594_s20, %s6588_s29 }
 0x158   : > { %p6591_p5 = pneg %p6590_p10  ;;  %p6597_p13 = por %p6596_p11, %p6595_p6 }
 0x15a   : > { %p6598_p3 = pnand %p6597_p13, %p6591_p5 }
 0x15c   : > { %6601 = shalt.err (!%p6598_p3)
}
 0x15d   : > { %s9859_s19 = smov 64   ;;  %s9861_s22 = smov 4  }
 0x15e   : > { %5900 = dma.hbm_to_vmem [thread:$0]  (%p9954_p4), %s8014_s18, 256, %s8017_s23, %s7911_s26, %s9859_s19, %s9859_s19, %s9861_s22  }
 0x15f   : > { %s8045_s8 = sshll.u32 %s7376_s7, 4  ;;  %s970_s4 = scalar_lea.vmem [#allocation15], %s8002_s30 }
 0x160   : > { %s977_s25 = sshll.u32 %s970_s4, 4  ;;  %s9955_s2 = sld [smem:[#allocation94_spill]]  ;;  %s978_s25 = int_to_ptr.vmem [resolvable:$true] %s977_s25 }
 0x166   : > { %s9956_s17 = smov %s9955_s2  ;;  %s975_s20 = scalar_lea.hbm %s9955_s2, %s8045_s8 }
 0x167   : > { %s6602_s16 = scalar_lea.hbm %s975_s20, 16  ;;  %s6606_s12 = scalar_lea.hbm %s9956_s17, 32 }
 0x168   : > { %p6603_p0 = scmp.ne.s32.totalorder %s975_s20, %s6602_s16  ;;  %p6607_p9 = scmp.lt.u32.totalorder %s975_s20, %s9956_s17 }
 0x169   : > { %p6608_p12 = scmp.lt.u32.totalorder %s6606_s12, %s6602_s16  ;;  %p6610_p2 = scmp.lt.u32.totalorder %s6602_s16, %s975_s20 }
 0x16a   : > { %p6604_p8 = pnand %p6603_p0, %p9954_p4 }
 0x16b   : > { %p6609_p1 = por %p6608_p12, %p6607_p9 }
 0x16c   : > { %p6605_p7 = pneg %p6604_p8 }
 0x16d   : > { %p6611_p10 = por %p6610_p2, %p6609_p1 }
 0x16f   : > { %p6612_p5 = pnand %p6611_p10, %p6605_p7 }
 0x171   : > { %6615 = shalt.err (!%p6612_p5)
}
 0x172   : > { %s6616_s4 = scalar_lea.vmem %s978_s25, 16  ;;  %s7401_s10 = smov [#allocation15]  }
 0x173   : > { %p6617_p6 = scmp.ne.s32.totalorder %s978_s25, %s6616_s4  ;;  %s6620_s29 = sshll.u32 %s7401_s10, 4  ;;  %s6621_s29 = int_to_ptr.vmem [resolvable:$false] %s6620_s29 }
 0x174   : > { %s6622_s27 = scalar_lea.vmem %s6621_s29, 32  ;;  %p6623_p3 = scmp.lt.s32.totalorder %s978_s25, %s6621_s29 }
 0x175   : > { %p6618_p11 = pnand %p6617_p6, %p9954_p4  ;;  %p6624_p0 = scmp.lt.s32.totalorder %s6622_s27, %s6616_s4 }
 0x177   : > { %p6619_p13 = pneg %p6618_p11  ;;  %p6625_p8 = por %p6624_p0, %p6623_p3 }
 0x179   : > { %p6626_p9 = pnand %p6625_p8, %p6619_p13 }
 0x17b   : > { %6629 = shalt.err (!%p6626_p9)
}
 0x17c   : > { %5901 = dma.hbm_to_vmem [thread:$0]  (%p9954_p4), %s975_s20, 16, %s978_s25, %s7869_s5  }
 0x17d   : > { %s9957_s16 = sld [smem:[#allocation95_spill]]  ;;  %s988_s18 = scalar_lea.vmem [#allocation16], %s8008_s0 }
 0x17e   : > { %s995_s23 = sshll.u32 %s988_s18, 4  ;;  %s9958_s29 = sld [smem:[#allocation96_spill]]  ;;  %s8072_s23 = int_to_ptr.vmem [resolvable:$true] %s995_s23 }
 0x183   : > { %s8069_s2 = scalar_lea.hbm %s9957_s16, %s8005_s28  ;;  %s6634_s12 = scalar_lea.hbm %s9957_s16, 512 }
 0x184   : > { %s9959_s27 = smov %s9958_s29  ;;  %s8078_s19 = scalar_lea.hbm %s9958_s29, %s8045_s8 }
 0x185   : > { %s6630_s22 = scalar_lea.hbm %s8069_s2, 256  ;;  %p6635_p2 = scmp.lt.u32.totalorder %s8069_s2, %s9957_s16 }
 0x186   : > { %p6631_p7 = scmp.ne.s32.totalorder %s8069_s2, %s6630_s22  ;;  %p6636_p10 = scmp.lt.u32.totalorder %s6634_s12, %s6630_s22 }
 0x187   : > { %p6638_p6 = scmp.lt.u32.totalorder %s6630_s22, %s8069_s2 }
 0x188   : > { %p6632_p12 = pnand %p6631_p7, %p9954_p4  ;;  %p6637_p5 = por %p6636_p10, %p6635_p2 }
 0x18a   : > { %p6633_p1 = pneg %p6632_p12  ;;  %p6639_p11 = por %p6638_p6, %p6637_p5 }
 0x18c   : > { %p6640_p13 = pnand %p6639_p11, %p6633_p1 }
 0x18e   : > { %6643 = shalt.err (!%p6640_p13)
}
 0x18f   : > { %s6644_s18 = scalar_lea.vmem %s8072_s23, 256  ;;  %s7402_s4 = smov [#allocation16]  }
 0x190   : > { %p6645_p3 = scmp.ne.s32.totalorder %s8072_s23, %s6644_s18  ;;  %s6648_s10 = sshll.u32 %s7402_s4, 4  ;;  %s6649_s10 = int_to_ptr.vmem [resolvable:$false] %s6648_s10 }
 0x191   : > { %s6650_s17 = scalar_lea.vmem %s6649_s10, 512  ;;  %p6651_p9 = scmp.lt.s32.totalorder %s8072_s23, %s6649_s10 }
 0x192   : > { %p6646_p0 = pnand %p6645_p3, %p9954_p4  ;;  %p6652_p7 = scmp.lt.s32.totalorder %s6650_s17, %s6644_s18 }
 0x194   : > { %p6647_p8 = pneg %p6646_p0  ;;  %p6653_p12 = por %p6652_p7, %p6651_p9 }
 0x196   : > { %p6654_p2 = pnand %p6653_p12, %p6647_p8 }
 0x198   : > { %6657 = shalt.err (!%p6654_p2)
}
 0x199   : > { %s9960_s22 = smov 4   ;;  %s9961_s29 = smov 64  }
 0x19a   : > { %5902 = dma.hbm_to_vmem [thread:$0]  (%p9954_p4), %s8069_s2, 256, %s8072_s23, %s7981_s24, %s9961_s29, %s9961_s29, %s9960_s22  }
 0x19b   : > { %s1008_s25 = scalar_lea.vmem [#allocation17], %s8002_s30  ;;  %s9962_s18 = sld [smem:[#allocation97_spill]] }
 0x19c   : > { %s1015_s20 = sshll.u32 %s1008_s25, 4  ;;  %s6658_s10 = scalar_lea.hbm %s8078_s19, 16  ;;  %s1016_s20 = int_to_ptr.vmem [resolvable:$true] %s1015_s20 }
 0x19d   : > { %p6659_p1 = scmp.ne.s32.totalorder %s8078_s19, %s6658_s10  ;;  %s6662_s11 = scalar_lea.hbm %s9959_s27, 32 }
 0x19e   : > { %p6663_p6 = scmp.lt.u32.totalorder %s8078_s19, %s9959_s27  ;;  %p6664_p11 = scmp.lt.u32.totalorder %s6662_s11, %s6658_s10 }
 0x19f   : > { %p6660_p10 = pnand %p6659_p1, %p9954_p4  ;;  %p6666_p3 = scmp.lt.u32.totalorder %s6658_s10, %s8078_s19 }
 0x1a0   : > { %p6665_p13 = por %p6664_p11, %p6663_p6 }
 0x1a1   : > { %s8110_s4 = scalar_lea.hbm %s9962_s18, %s8005_s28  ;;  %p6661_p5 = pneg %p6660_p10 }
 0x1a2   : > { %p6667_p0 = por %p6666_p3, %p6665_p13 }
 0x1a4   : > { %p6668_p8 = pnand %p6667_p0, %p6661_p5 }
 0x1a6   : > { %6671 = shalt.err (!%p6668_p8)
}
 0x1a7   : > { %s6672_s2 = scalar_lea.vmem %s1016_s20, 16  ;;  %s7403_s23 = smov [#allocation17]  }
 0x1a8   : > { %p6673_p9 = scmp.ne.s32.totalorder %s1016_s20, %s6672_s2  ;;  %s6676_s25 = sshll.u32 %s7403_s23, 4  ;;  %s6677_s25 = int_to_ptr.vmem [resolvable:$false] %s6676_s25 }
 0x1a9   : > { %s6678_s16 = scalar_lea.vmem %s6677_s25, 32  ;;  %p6679_p2 = scmp.lt.s32.totalorder %s1016_s20, %s6677_s25 }
 0x1aa   : > { %p6674_p7 = pnand %p6673_p9, %p9954_p4  ;;  %p6680_p1 = scmp.lt.s32.totalorder %s6678_s16, %s6672_s2 }
 0x1ac   : > { %p6675_p12 = pneg %p6674_p7  ;;  %p6681_p10 = por %p6680_p1, %p6679_p2 }
 0x1ae   : > { %p6682_p6 = pnand %p6681_p10, %p6675_p12 }
 0x1b0   : > { %6685 = shalt.err (!%p6682_p6)
}
 0x1b1   : > { %5903 = dma.hbm_to_vmem [thread:$0]  (%p9954_p4), %s8078_s19, 16, %s1016_s20, %s7911_s26  }
 0x1b2   : > { %s1026_s9 = scalar_lea.vmem [#allocation18], %s8008_s0  ;;  %s9963_s21 = sld [smem:[#allocation98_spill]] }
 0x1b3   : > { %s1033_s6 = sshll.u32 %s1026_s9, 4  ;;  %s6686_s17 = scalar_lea.hbm %s8110_s4, 256  ;;  %s8131_s6 = int_to_ptr.vmem [resolvable:$true] %s1033_s6 }
 0x1b4   : > { %p6687_p5 = scmp.ne.s32.totalorder %s8110_s4, %s6686_s17  ;;  %s6690_s25 = scalar_lea.hbm %s9962_s18, 512 }
 0x1b5   : > { %p6691_p3 = scmp.lt.u32.totalorder %s8110_s4, %s9962_s18  ;;  %p6692_p0 = scmp.lt.u32.totalorder %s6690_s25, %s6686_s17 }
 0x1b6   : > { %p6688_p11 = pnand %p6687_p5, %p9954_p4  ;;  %p6694_p9 = scmp.lt.u32.totalorder %s6686_s17, %s8110_s4 }
 0x1b7   : > { %p6693_p8 = por %p6692_p0, %p6691_p3 }
 0x1b8   : > { %s8137_s10 = scalar_lea.hbm %s9963_s21, %s8045_s8  ;;  %p6689_p13 = pneg %p6688_p11 }
 0x1b9   : > { %p6695_p7 = por %p6694_p9, %p6693_p8 }
 0x1bb   : > { %p6696_p12 = pnand %p6695_p7, %p6689_p13 }
 0x1bd   : > { %6699 = shalt.err (!%p6696_p12)
}
 0x1be   : > { %s6700_s20 = scalar_lea.vmem %s8131_s6, 256  ;;  %s7404_s9 = smov [#allocation18]  }
 0x1bf   : > { %p6701_p2 = scmp.ne.s32.totalorder %s8131_s6, %s6700_s20  ;;  %s6704_s11 = sshll.u32 %s7404_s9, 4  ;;  %s6705_s11 = int_to_ptr.vmem [resolvable:$false] %s6704_s11 }
 0x1c0   : > { %s6706_s12 = scalar_lea.vmem %s6705_s11, 512  ;;  %p6707_p6 = scmp.lt.s32.totalorder %s8131_s6, %s6705_s11 }
 0x1c1   : > { %p6702_p1 = pnand %p6701_p2, %p9954_p4  ;;  %p6708_p5 = scmp.lt.s32.totalorder %s6706_s12, %s6700_s20 }
 0x1c3   : > { %p6703_p10 = pneg %p6702_p1  ;;  %p6709_p11 = por %p6708_p5, %p6707_p6 }
 0x1c5   : > { %p6710_p3 = pnand %p6709_p11, %p6703_p10 }
 0x1c7   : > { %6713 = shalt.err (!%p6710_p3)
}
 0x1c8   : > { %5904 = dma.hbm_to_vmem [thread:$0]  (%p9954_p4), %s8110_s4, 256, %s8131_s6, %s7869_s5, %s9961_s29, %s9961_s29, %s9960_s22  }
 0x1c9   : > { %s1046_s17 = scalar_lea.vmem [#allocation19], %s8002_s30  ;;  %s9964_s16 = sld [smem:[#allocation99_spill]] }
 0x1ca   : > { %s1053_s2 = sshll.u32 %s1046_s17, 4  ;;  %s6714_s20 = scalar_lea.hbm %s8137_s10, 16  ;;  %s1054_s2 = int_to_ptr.vmem [resolvable:$true] %s1053_s2 }
 0x1cb   : > { %p6715_p13 = scmp.ne.s32.totalorder %s8137_s10, %s6714_s20  ;;  %s6718_s12 = scalar_lea.hbm %s9963_s21, 32 }
 0x1cc   : > { %p6719_p9 = scmp.lt.u32.totalorder %s8137_s10, %s9963_s21  ;;  %p6720_p7 = scmp.lt.u32.totalorder %s6718_s12, %s6714_s20 }
 0x1cd   : > { %p6716_p0 = pnand %p6715_p13, %p9954_p4  ;;  %p6722_p2 = scmp.lt.u32.totalorder %s6714_s20, %s8137_s10 }
 0x1ce   : > { %p6721_p12 = por %p6720_p7, %p6719_p9 }
 0x1cf   : > { %s8169_s19 = scalar_lea.hbm %s9964_s16, %s8005_s28  ;;  %p6717_p8 = pneg %p6716_p0 }
 0x1d0   : > { %p6723_p1 = por %p6722_p2, %p6721_p12 }
 0x1d2   : > { %p6724_p10 = pnand %p6723_p1, %p6717_p8 }
 0x1d4   : > { %6727 = shalt.err (!%p6724_p10)
}
 0x1d5   : > { %s6728_s4 = scalar_lea.vmem %s1054_s2, 16  ;;  %s7405_s6 = smov [#allocation19]  }
 0x1d6   : > { %p6729_p6 = scmp.ne.s32.totalorder %s1054_s2, %s6728_s4  ;;  %s6732_s17 = sshll.u32 %s7405_s6, 4  ;;  %s6733_s17 = int_to_ptr.vmem [resolvable:$false] %s6732_s17 }
 0x1d7   : > { %s6734_s23 = scalar_lea.vmem %s6733_s17, 32  ;;  %p6735_p3 = scmp.lt.s32.totalorder %s1054_s2, %s6733_s17 }
 0x1d8   : > { %p6730_p5 = pnand %p6729_p6, %p9954_p4  ;;  %p6736_p13 = scmp.lt.s32.totalorder %s6734_s23, %s6728_s4 }
 0x1da   : > { %p6731_p11 = pneg %p6730_p5  ;;  %p6737_p0 = por %p6736_p13, %p6735_p3 }
 0x1dc   : > { %p6738_p7 = pnand %p6737_p0, %p6731_p11 }
 0x1de   : > { %6741 = shalt.err (!%p6738_p7)
}
 0x1df   : > { %5905 = dma.hbm_to_vmem [thread:$0]  (%p9954_p4), %s8137_s10, 16, %s1054_s2, %s7981_s24  }
 0x1e0   : > { %s1064_s27 = scalar_lea.vmem [#allocation20], %s8008_s0  ;;  %s9965_s13 = sld [smem:[#allocation100_spill]] }
 0x1e1   : > { %s1071_s18 = sshll.u32 %s1064_s27, 4  ;;  %s6742_s11 = scalar_lea.hbm %s8169_s19, 256  ;;  %s8190_s18 = int_to_ptr.vmem [resolvable:$true] %s1071_s18 }
 0x1e2   : > { %p6743_p8 = scmp.ne.s32.totalorder %s8169_s19, %s6742_s11  ;;  %s6746_s6 = scalar_lea.hbm %s9964_s16, 512 }
 0x1e3   : > { %p6747_p2 = scmp.lt.u32.totalorder %s8169_s19, %s9964_s16  ;;  %p6748_p1 = scmp.lt.u32.totalorder %s6746_s6, %s6742_s11 }
 0x1e4   : > { %p6744_p9 = pnand %p6743_p8, %p9954_p4  ;;  %p6750_p6 = scmp.lt.u32.totalorder %s6742_s11, %s8169_s19 }
 0x1e5   : > { %p6749_p10 = por %p6748_p1, %p6747_p2 }
 0x1e6   : > { %s8196_s9 = scalar_lea.hbm %s9965_s13, %s8045_s8  ;;  %p6745_p12 = pneg %p6744_p9 }
 0x1e7   : > { %p6751_p5 = por %p6750_p6, %p6749_p10 }
 0x1e9   : > { %p6752_p11 = pnand %p6751_p5, %p6745_p12 }
 0x1eb   : > { %6755 = shalt.err (!%p6752_p11)
}
 0x1ec   : > { %s6756_s2 = scalar_lea.vmem %s8190_s18, 256  ;;  %s7406_s23 = smov [#allocation20]  }
 0x1ed   : > { %p6757_p3 = scmp.ne.s32.totalorder %s8190_s18, %s6756_s2  ;;  %s6760_s27 = sshll.u32 %s7406_s23, 4  ;;  %s6761_s27 = int_to_ptr.vmem [resolvable:$false] %s6760_s27 }
 0x1ee   : > { %s6762_s25 = scalar_lea.vmem %s6761_s27, 512  ;;  %p6763_p7 = scmp.lt.s32.totalorder %s8190_s18, %s6761_s27 }
 0x1ef   : > { %p6758_p13 = pnand %p6757_p3, %p9954_p4  ;;  %p6764_p8 = scmp.lt.s32.totalorder %s6762_s25, %s6756_s2 }
 0x1f1   : > { %p6759_p0 = pneg %p6758_p13  ;;  %p6765_p9 = por %p6764_p8, %p6763_p7 }
 0x1f3   : > { %p6766_p2 = pnand %p6765_p9, %p6759_p0 }
 0x1f5   : > { %6769 = shalt.err (!%p6766_p2)
}
 0x1f6   : > { %5906 = dma.hbm_to_vmem [thread:$0]  (%p9954_p4), %s8169_s19, 256, %s8190_s18, %s7911_s26, %s9961_s29, %s9961_s29, %s9960_s22  }
 0x1f7   : > { %s1084_s20 = scalar_lea.vmem [#allocation21], %s8002_s30  ;;  %s9966_s14 = sld [smem:[#allocation101_spill]] }
 0x1f8   : > { %s1091_s11 = sshll.u32 %s1084_s20, 4  ;;  %s6770_s17 = scalar_lea.hbm %s8196_s9, 16  ;;  %s1092_s11 = int_to_ptr.vmem [resolvable:$true] %s1091_s11 }
 0x1f9   : > { %p6771_p12 = scmp.ne.s32.totalorder %s8196_s9, %s6770_s17  ;;  %s6774_s23 = scalar_lea.hbm %s9965_s13, 32 }
 0x1fa   : > { %p6775_p6 = scmp.lt.u32.totalorder %s8196_s9, %s9965_s13  ;;  %p6776_p5 = scmp.lt.u32.totalorder %s6774_s23, %s6770_s17 }
 0x1fb   : > { %p6772_p1 = pnand %p6771_p12, %p9954_p4  ;;  %p6778_p3 = scmp.lt.u32.totalorder %s6770_s17, %s8196_s9 }
 0x1fc   : > { %p6777_p11 = por %p6776_p5, %p6775_p6 }
 0x1fd   : > { %s8228_s6 = scalar_lea.hbm %s9966_s14, %s8005_s28  ;;  %p6773_p10 = pneg %p6772_p1 }
 0x1fe   : > { %p6779_p13 = por %p6778_p3, %p6777_p11 }
 0x200   : > { %p6780_p0 = pnand %p6779_p13, %p6773_p10 }
 0x202   : > { %6783 = shalt.err (!%p6780_p0)
}
 0x203   : > { %s6784_s19 = scalar_lea.vmem %s1092_s11, 16  ;;  %s7407_s18 = smov [#allocation21]  }
 0x204   : > { %p6785_p7 = scmp.ne.s32.totalorder %s1092_s11, %s6784_s19  ;;  %s6788_s20 = sshll.u32 %s7407_s18, 4  ;;  %s6789_s20 = int_to_ptr.vmem [resolvable:$false] %s6788_s20 }
 0x205   : > { %s6790_s12 = scalar_lea.vmem %s6789_s20, 32  ;;  %p6791_p2 = scmp.lt.s32.totalorder %s1092_s11, %s6789_s20 }
 0x206   : > { %p6786_p8 = pnand %p6785_p7, %p9954_p4  ;;  %p6792_p12 = scmp.lt.s32.totalorder %s6790_s12, %s6784_s19 }
 0x208   : > { %p6787_p9 = pneg %p6786_p8  ;;  %p6793_p1 = por %p6792_p12, %p6791_p2 }
 0x20a   : > { %p6794_p5 = pnand %p6793_p1, %p6787_p9 }
 0x20c   : > { %6797 = shalt.err (!%p6794_p5)
}
 0x20d   : > { %5907 = dma.hbm_to_vmem [thread:$0]  (%p9954_p4), %s8196_s9, 16, %s1092_s11, %s7869_s5  }
 0x20e   : > { %s1102_s4 = scalar_lea.vmem [#allocation22], %s8008_s0  ;;  %s9967_s15 = sld [smem:[#allocation102_spill]] }
 0x20f   : > { %s1109_s17 = sshll.u32 %s1102_s4, 4  ;;  %s6798_s27 = scalar_lea.hbm %s8228_s6, 256  ;;  %s8249_s17 = int_to_ptr.vmem [resolvable:$true] %s1109_s17 }
 0x210   : > { %p6799_p10 = scmp.ne.s32.totalorder %s8228_s6, %s6798_s27  ;;  %s6802_s18 = scalar_lea.hbm %s9966_s14, 512 }
 0x211   : > { %p6803_p3 = scmp.lt.u32.totalorder %s8228_s6, %s9966_s14  ;;  %p6804_p13 = scmp.lt.u32.totalorder %s6802_s18, %s6798_s27 }
 0x212   : > { %p6800_p6 = pnand %p6799_p10, %p9954_p4  ;;  %p6806_p7 = scmp.lt.u32.totalorder %s6798_s27, %s8228_s6 }
 0x213   : > { %p6805_p0 = por %p6804_p13, %p6803_p3 }
 0x214   : > { %s8255_s23 = scalar_lea.hbm %s9967_s15, %s8045_s8  ;;  %p6801_p11 = pneg %p6800_p6 }
 0x215   : > { %p6807_p8 = por %p6806_p7, %p6805_p0 }
 0x217   : > { %p6808_p9 = pnand %p6807_p8, %p6801_p11 }
 0x219   : > { %6811 = shalt.err (!%p6808_p9)
}
 0x21a   : > { %s6812_s11 = scalar_lea.vmem %s8249_s17, 256  ;;  %s7408_s12 = smov [#allocation22]  }
 0x21b   : > { %p6813_p2 = scmp.ne.s32.totalorder %s8249_s17, %s6812_s11  ;;  %s6816_s4 = sshll.u32 %s7408_s12, 4  ;;  %s6817_s4 = int_to_ptr.vmem [resolvable:$false] %s6816_s4 }
 0x21c   : > { %s6818_s10 = scalar_lea.vmem %s6817_s4, 512  ;;  %p6819_p5 = scmp.lt.s32.totalorder %s8249_s17, %s6817_s4 }
 0x21d   : > { %p6814_p12 = pnand %p6813_p2, %p9954_p4  ;;  %p6820_p10 = scmp.lt.s32.totalorder %s6818_s10, %s6812_s11 }
 0x21f   : > { %p6815_p1 = pneg %p6814_p12  ;;  %p6821_p6 = por %p6820_p10, %p6819_p5 }
 0x221   : > { %p6822_p3 = pnand %p6821_p6, %p6815_p1 }
 0x223   : > { %6825 = shalt.err (!%p6822_p3)
}
 0x224   : > { %5908 = dma.hbm_to_vmem [thread:$0]  (%p9954_p4), %s8228_s6, 256, %s8249_s17, %s7981_s24, %s9961_s29, %s9961_s29, %s9960_s22  }
 0x225   : > { %s1122_s2 = scalar_lea.vmem [#allocation23], %s8002_s30  ;;  %s9870_s25 = sshll.u32 %s8002_s30, 3 }
 0x226   : > { %s1129_s27 = sshll.u32 %s1122_s2, 4  ;;  %s6826_s19 = scalar_lea.hbm %s8255_s23, 16  ;;  %s1130_s27 = int_to_ptr.vmem [resolvable:$true] %s1129_s27 }
 0x227   : > { %p6827_p11 = scmp.ne.s32.totalorder %s8255_s23, %s6826_s19  ;;  %s6830_s9 = scalar_lea.hbm %s9967_s15, 32 }
 0x228   : > { %p6831_p7 = scmp.lt.u32.totalorder %s8255_s23, %s9967_s15  ;;  %p6832_p8 = scmp.lt.u32.totalorder %s6830_s9, %s6826_s19 }
 0x229   : > { %p6828_p13 = pnand %p6827_p11, %p9954_p4  ;;  %p6834_p2 = scmp.lt.u32.totalorder %s6826_s19, %s8255_s23 }
 0x22a   : > { %p6833_p9 = por %p6832_p8, %p6831_p7 }
 0x22b   : > { %p6829_p0 = pneg %p6828_p13 }
 0x22c   : > { %p6835_p12 = por %p6834_p2, %p6833_p9 }
 0x22e   : > { %p6836_p1 = pnand %p6835_p12, %p6829_p0 }
 0x230   : > { %6839 = shalt.err (!%p6836_p1)
}
 0x231   : > { %s6840_s6 = scalar_lea.vmem %s1130_s27, 16  ;;  %s7409_s17 = smov [#allocation23]  }
 0x232   : > { %p6841_p5 = scmp.ne.s32.totalorder %s1130_s27, %s6840_s6  ;;  %s6844_s4 = sshll.u32 %s7409_s17, 4  ;;  %s6845_s4 = int_to_ptr.vmem [resolvable:$false] %s6844_s4 }
 0x233   : > { %s6846_s10 = scalar_lea.vmem %s6845_s4, 32  ;;  %p6847_p3 = scmp.lt.s32.totalorder %s1130_s27, %s6845_s4 }
 0x234   : > { %p6842_p10 = pnand %p6841_p5, %p9954_p4  ;;  %p6848_p11 = scmp.lt.s32.totalorder %s6846_s10, %s6840_s6 }
 0x236   : > { %p6843_p6 = pneg %p6842_p10  ;;  %p6849_p13 = por %p6848_p11, %p6847_p3 }
 0x238   : > { %p6850_p7 = pnand %p6849_p13, %p6843_p6 }
 0x23a   : > { %6853 = shalt.err (!%p6850_p7)
}
 0x23b   : > { %5909 = dma.hbm_to_vmem [thread:$0]  (%p9954_p4), %s8255_s23, 16, %s1130_s27, %s7911_s26  }
 0x23c   : > { %s5481_s2 = sshll.u32 %s7376_s7, 7  ;;  %s1140_s19 = scalar_lea.vmem [#allocation24], %s9870_s25 }
 0x23d   : > { %s1147_s18 = sshll.u32 %s1140_s19, 4  ;;  %s9968_s11 = sld [smem:[#allocation103_spill]]  ;;  %s8312_s18 = int_to_ptr.vmem [resolvable:$true] %s1147_s18 }
 0x243   : > { %s9969_s17 = smov %s9968_s11  ;;  %s8310_s12 = scalar_lea.hbm %s9968_s11, %s5481_s2 }
 0x244   : > { %s6854_s6 = scalar_lea.hbm %s8310_s12, 128  ;;  %s6858_s4 = scalar_lea.hbm %s9969_s17, 256 }
 0x245   : > { %p6855_p0 = scmp.ne.s32.totalorder %s8310_s12, %s6854_s6  ;;  %p6859_p2 = scmp.lt.u32.totalorder %s8310_s12, %s9969_s17 }
 0x246   : > { %p6860_p12 = scmp.lt.u32.totalorder %s6858_s4, %s6854_s6  ;;  %p6862_p5 = scmp.lt.u32.totalorder %s6854_s6, %s8310_s12 }
 0x247   : > { %p6856_p8 = pnand %p6855_p0, %p9954_p4 }
 0x248   : > { %p6861_p1 = por %p6860_p12, %p6859_p2 }
 0x249   : > { %p6857_p9 = pneg %p6856_p8 }
 0x24a   : > { %p6863_p10 = por %p6862_p5, %p6861_p1 }
 0x24c   : > { %p6864_p6 = pnand %p6863_p10, %p6857_p9 }
 0x24e   : > { %6867 = shalt.err (!%p6864_p6)
}
 0x24f   : > { %s6868_s20 = scalar_lea.vmem %s8312_s18, 128  ;;  %s7410_s9 = smov [#allocation24]  }
 0x250   : > { %p6869_p3 = scmp.ne.s32.totalorder %s8312_s18, %s6868_s20  ;;  %s6872_s11 = sshll.u32 %s7410_s9, 4  ;;  %s6873_s11 = int_to_ptr.vmem [resolvable:$false] %s6872_s11 }
 0x251   : > { %s6874_s23 = scalar_lea.vmem %s6873_s11, 256  ;;  %p6875_p7 = scmp.lt.s32.totalorder %s8312_s18, %s6873_s11 }
 0x252   : > { %p6870_p11 = pnand %p6869_p3, %p9954_p4  ;;  %p6876_p0 = scmp.lt.s32.totalorder %s6874_s23, %s6868_s20 }
 0x254   : > { %p6871_p13 = pneg %p6870_p11  ;;  %p6877_p8 = por %p6876_p0, %p6875_p7 }
 0x256   : > { %p6878_p2 = pnand %p6877_p8, %p6871_p13 }
 0x258   : > { %6881 = shalt.err (!%p6878_p2)
}
 0x259   : > { %5910 = dma.hbm_to_vmem [thread:$0]  (%p9954_p4), %s8310_s12, 128, %s8312_s18, %s7869_s5, %s9961_s29, %s9961_s29, %s9960_s22  }
 0x25a   : > { %s9970_s4 = sld [smem:[#allocation104_spill]]  ;;  %s1160_s19 = scalar_lea.vmem [#allocation25], %s8002_s30 }
 0x25b   : > { %s1167_s20 = sshll.u32 %s1160_s19, 4  ;;  %s9971_s23 = sld [smem:[#allocation105_spill]]  ;;  %s1168_s20 = int_to_ptr.vmem [resolvable:$true] %s1167_s20 }
 0x260   : > { %s8343_s10 = scalar_lea.hbm %s9970_s4, %s8045_s8  ;;  %s6886_s6 = scalar_lea.hbm %s9970_s4, 32 }
 0x261   : > { %s8351_s25 = scalar_lea.hbm %s9971_s23, %s5481_s2  ;;  %s6882_s13 = scalar_lea.hbm %s8343_s10, 16 }
 0x262   : > { %p6883_p9 = scmp.ne.s32.totalorder %s8343_s10, %s6882_s13  ;;  %p6887_p5 = scmp.lt.u32.totalorder %s8343_s10, %s9970_s4 }
 0x263   : > { %p6888_p10 = scmp.lt.u32.totalorder %s6886_s6, %s6882_s13  ;;  %p6890_p3 = scmp.lt.u32.totalorder %s6882_s13, %s8343_s10 }
 0x264   : > { %p6884_p12 = pnand %p6883_p9, %p9954_p4 }
 0x265   : > { %p6889_p6 = por %p6888_p10, %p6887_p5 }
 0x266   : > { %p6885_p1 = pneg %p6884_p12 }
 0x267   : > { %p6891_p11 = por %p6890_p3, %p6889_p6 }
 0x269   : > { %p6892_p13 = pnand %p6891_p11, %p6885_p1 }
 0x26b   : > { %6895 = shalt.err (!%p6892_p13)
}
 0x26c   : > { %s6896_s2 = scalar_lea.vmem %s1168_s20, 16  ;;  %s7411_s19 = smov [#allocation25]  }
 0x26d   : > { %p6897_p7 = scmp.ne.s32.totalorder %s1168_s20, %s6896_s2  ;;  %s6900_s9 = sshll.u32 %s7411_s19, 4  ;;  %s6901_s9 = int_to_ptr.vmem [resolvable:$false] %s6900_s9 }
 0x26e   : > { %s6902_s11 = scalar_lea.vmem %s6901_s9, 32  ;;  %p6903_p2 = scmp.lt.s32.totalorder %s1168_s20, %s6901_s9 }
 0x26f   : > { %p6898_p0 = pnand %p6897_p7, %p9954_p4  ;;  %p6904_p9 = scmp.lt.s32.totalorder %s6902_s11, %s6896_s2 }
 0x271   : > { %p6899_p8 = pneg %p6898_p0  ;;  %p6905_p12 = por %p6904_p9, %p6903_p2 }
 0x273   : > { %p6906_p5 = pnand %p6905_p12, %p6899_p8 }
 0x275   : > { %6909 = shalt.err (!%p6906_p5)
}
 0x276   : > { %5911 = dma.hbm_to_vmem [thread:$0]  (%p9954_p4), %s8343_s10, 16, %s1168_s20, %s7981_s24  }
 0x277   : > { %s9972_s13 = sshll.u32 %s8002_s30, 3  ;;  %s9973_s27 = sld [smem:[#allocation106_spill]] }
 0x278   : > { %s1178_s14 = scalar_lea.vmem [#allocation26], %s9972_s13  ;;  %s6910_s19 = scalar_lea.hbm %s8351_s25, 128 }
 0x279   : > { %s1185_s18 = sshll.u32 %s1178_s14, 4  ;;  %p6911_p1 = scmp.ne.s32.totalorder %s8351_s25, %s6910_s19  ;;  %s8373_s18 = int_to_ptr.vmem [resolvable:$true] %s1185_s18 }
 0x27a   : > { %s6914_s4 = scalar_lea.hbm %s9971_s23, 256  ;;  %p6915_p3 = scmp.lt.u32.totalorder %s8351_s25, %s9971_s23 }
 0x27b   : > { %p6912_p10 = pnand %p6911_p1, %p9954_p4  ;;  %p6916_p11 = scmp.lt.u32.totalorder %s6914_s4, %s6910_s19 }
 0x27c   : > { %p6918_p7 = scmp.lt.u32.totalorder %s6910_s19, %s8351_s25 }
 0x27d   : > { %s8379_s2 = scalar_lea.hbm %s9973_s27, %s8045_s8  ;;  %p6913_p6 = pneg %p6912_p10 }
 0x27e   : > { %p6917_p13 = por %p6916_p11, %p6915_p3 }
 0x280   : > { %p6919_p0 = por %p6918_p7, %p6917_p13 }
 0x282   : > { %p6920_p8 = pnand %p6919_p0, %p6913_p6 }
 0x284   : > { %6923 = shalt.err (!%p6920_p8)
}
 0x285   : > { %s6924_s13 = scalar_lea.vmem %s8373_s18, 128  ;;  %s7412_s14 = smov [#allocation26]  }
 0x286   : > { %p6925_p2 = scmp.ne.s32.totalorder %s8373_s18, %s6924_s13  ;;  %s6928_s12 = sshll.u32 %s7412_s14, 4  ;;  %s6929_s12 = int_to_ptr.vmem [resolvable:$false] %s6928_s12 }
 0x287   : > { %s6930_s6 = scalar_lea.vmem %s6929_s12, 256  ;;  %p6931_p5 = scmp.lt.s32.totalorder %s8373_s18, %s6929_s12 }
 0x288   : > { %p6926_p9 = pnand %p6925_p2, %p9954_p4  ;;  %p6932_p1 = scmp.lt.s32.totalorder %s6930_s6, %s6924_s13 }
 0x28a   : > { %p6927_p12 = pneg %p6926_p9  ;;  %p6933_p10 = por %p6932_p1, %p6931_p5 }
 0x28c   : > { %p6934_p3 = pnand %p6933_p10, %p6927_p12 }
 0x28e   : > { %6937 = shalt.err (!%p6934_p3)
}
 0x28f   : > { %5912 = dma.hbm_to_vmem [thread:$0]  (%p9954_p4), %s8351_s25, 128, %s8373_s18, %s7911_s26, %s9961_s29, %s9961_s29, %s9960_s22  }
 0x290   : > { %s1198_s4 = scalar_lea.vmem [#allocation27], %s8002_s30  ;;  %s9974_s10 = sld [smem:[#allocation107_spill]] }
 0x291   : > { %s1205_s19 = sshll.u32 %s1198_s4, 4  ;;  %s6938_s14 = scalar_lea.hbm %s8379_s2, 16  ;;  %s1206_s19 = int_to_ptr.vmem [resolvable:$true] %s1205_s19 }
 0x292   : > { %p6939_p6 = scmp.ne.s32.totalorder %s8379_s2, %s6938_s14  ;;  %s6942_s15 = scalar_lea.hbm %s9973_s27, 32 }
 0x293   : > { %p6943_p7 = scmp.lt.u32.totalorder %s8379_s2, %s9973_s27  ;;  %p6944_p0 = scmp.lt.u32.totalorder %s6942_s15, %s6938_s14 }
 0x294   : > { %p6940_p11 = pnand %p6939_p6, %p9954_p4  ;;  %p6946_p2 = scmp.lt.u32.totalorder %s6938_s14, %s8379_s2 }
 0x295   : > { %p6945_p8 = por %p6944_p0, %p6943_p7 }
 0x296   : > { %s9975_s20 = smov %s9974_s10  ;;  %s8411_s13 = scalar_lea.hbm %s9974_s10, %s8005_s28 }
 0x297   : > { %p6941_p13 = pneg %p6940_p11  ;;  %p6947_p9 = por %p6946_p2, %p6945_p8 }
 0x299   : > { %p6948_p12 = pnand %p6947_p9, %p6941_p13 }
 0x29b   : > { %6951 = shalt.err (!%p6948_p12)
}
 0x29c   : > { %s6952_s25 = scalar_lea.vmem %s1206_s19, 16  ;;  %s7413_s18 = smov [#allocation27]  }
 0x29d   : > { %p6953_p5 = scmp.ne.s32.totalorder %s1206_s19, %s6952_s25  ;;  %s6956_s4 = sshll.u32 %s7413_s18, 4  ;;  %s6957_s4 = int_to_ptr.vmem [resolvable:$false] %s6956_s4 }
 0x29e   : > { %s6958_s9 = scalar_lea.vmem %s6957_s4, 32  ;;  %p6959_p3 = scmp.lt.s32.totalorder %s1206_s19, %s6957_s4 }
 0x29f   : > { %p6954_p1 = pnand %p6953_p5, %p9954_p4  ;;  %p6960_p6 = scmp.lt.s32.totalorder %s6958_s9, %s6952_s25 }
 0x2a1   : > { %p6955_p10 = pneg %p6954_p1  ;;  %p6961_p11 = por %p6960_p6, %p6959_p3 }
 0x2a3   : > { %p6962_p0 = pnand %p6961_p11, %p6955_p10 }
 0x2a5   : > { %6965 = shalt.err (!%p6962_p0)
}
 0x2a6   : > { %5913 = dma.hbm_to_vmem [thread:$0]  (%p9954_p4), %s8379_s2, 16, %s1206_s19, %s7869_s5  }
 0x2a7   : > { %s1216_s15 = scalar_lea.vmem [#allocation28], %s8008_s0  ;;  %s9976_s10 = sld [smem:[#allocation108_spill]] }
 0x2a8   : > { %s1223_s16 = sshll.u32 %s1216_s15, 4  ;;  %s6966_s6 = scalar_lea.hbm %s8411_s13, 256  ;;  %s8432_s16 = int_to_ptr.vmem [resolvable:$true] %s1223_s16 }
 0x2a9   : > { %p6967_p13 = scmp.ne.s32.totalorder %s8411_s13, %s6966_s6  ;;  %s6970_s4 = scalar_lea.hbm %s9975_s20, 512 }
 0x2aa   : > { %p6971_p2 = scmp.lt.u32.totalorder %s8411_s13, %s9975_s20  ;;  %p6972_p9 = scmp.lt.u32.totalorder %s6970_s4, %s6966_s6 }
 0x2ab   : > { %p6968_p7 = pnand %p6967_p13, %p9954_p4  ;;  %p6974_p5 = scmp.lt.u32.totalorder %s6966_s6, %s8411_s13 }
 0x2ac   : > { %p6973_p12 = por %p6972_p9, %p6971_p2 }
 0x2ad   : > { %s9977_s14 = smov %s9976_s10  ;;  %s8438_s12 = scalar_lea.hbm %s9976_s10, %s8045_s8 }
 0x2ae   : > { %p6969_p8 = pneg %p6968_p7  ;;  %p6975_p1 = por %p6974_p5, %p6973_p12 }
 0x2b0   : > { %p6976_p10 = pnand %p6975_p1, %p6969_p8 }
 0x2b2   : > { %6979 = shalt.err (!%p6976_p10)
}
 0x2b3   : > { %s6980_s19 = scalar_lea.vmem %s8432_s16, 256  ;;  %s7414_s15 = smov [#allocation28]  }
 0x2b4   : > { %p6981_p3 = scmp.ne.s32.totalorder %s8432_s16, %s6980_s19  ;;  %s6984_s17 = sshll.u32 %s7414_s15, 4  ;;  %s6985_s17 = int_to_ptr.vmem [resolvable:$false] %s6984_s17 }
 0x2b5   : > { %s6986_s11 = scalar_lea.vmem %s6985_s17, 512  ;;  %p6987_p0 = scmp.lt.s32.totalorder %s8432_s16, %s6985_s17 }
 0x2b6   : > { %p6982_p6 = pnand %p6981_p3, %p9954_p4  ;;  %p6988_p13 = scmp.lt.s32.totalorder %s6986_s11, %s6980_s19 }
 0x2b8   : > { %p6983_p11 = pneg %p6982_p6  ;;  %p6989_p7 = por %p6988_p13, %p6987_p0 }
 0x2ba   : > { %p6990_p2 = pnand %p6989_p7, %p6983_p11 }
 0x2bc   : > { %6993 = shalt.err (!%p6990_p2)
}
 0x2bd   : > { %5914 = dma.hbm_to_vmem [thread:$0]  (%p9954_p4), %s8411_s13, 256, %s8432_s16, %s7981_s24, %s9961_s29, %s9961_s29, %s9960_s22  }
 0x2be   : > { %s1236_s10 = scalar_lea.vmem [#allocation29], %s8002_s30  ;;  %s9978_s4 = sld [smem:[#allocation109_spill]] }
 0x2bf   : > { %s1243_s6 = sshll.u32 %s1236_s10, 4  ;;  %s6994_s2 = scalar_lea.hbm %s8438_s12, 16  ;;  %s1244_s6 = int_to_ptr.vmem [resolvable:$true] %s1243_s6 }
 0x2c0   : > { %p6995_p8 = scmp.ne.s32.totalorder %s8438_s12, %s6994_s2  ;;  %s6998_s17 = scalar_lea.hbm %s9977_s14, 32 }
 0x2c1   : > { %p6999_p5 = scmp.lt.u32.totalorder %s8438_s12, %s9977_s14  ;;  %p7000_p1 = scmp.lt.u32.totalorder %s6998_s17, %s6994_s2 }
 0x2c2   : > { %p6996_p9 = pnand %p6995_p8, %p9954_p4  ;;  %p7002_p3 = scmp.lt.u32.totalorder %s6994_s2, %s8438_s12 }
 0x2c3   : > { %p7001_p10 = por %p7000_p1, %p6999_p5 }
 0x2c4   : > { %s8470_s9 = scalar_lea.hbm %s9978_s4, %s8005_s28  ;;  %p6997_p12 = pneg %p6996_p9 }
 0x2c5   : > { %p7003_p6 = por %p7002_p3, %p7001_p10 }
 0x2c7   : > { %p7004_p11 = pnand %p7003_p6, %p6997_p12 }
 0x2c9   : > { %7007 = shalt.err (!%p7004_p11)
}
 0x2ca   : > { %s7008_s28 = scalar_lea.vmem %s1244_s6, 16  ;;  %s7415_s13 = smov [#allocation29]  }
 0x2cb   : > { %p7009_p0 = scmp.ne.s32.totalorder %s1244_s6, %s7008_s28  ;;  %s7012_s16 = sshll.u32 %s7415_s13, 4  ;;  %s7013_s16 = int_to_ptr.vmem [resolvable:$false] %s7012_s16 }
 0x2cc   : > { %s7014_s10 = scalar_lea.vmem %s7013_s16, 32  ;;  %p7015_p2 = scmp.lt.s32.totalorder %s1244_s6, %s7013_s16 }
 0x2cd   : > { %p7010_p13 = pnand %p7009_p0, %p9954_p4  ;;  %p7016_p8 = scmp.lt.s32.totalorder %s7014_s10, %s7008_s28 }
 0x2cf   : > { %p7011_p7 = pneg %p7010_p13  ;;  %p7017_p9 = por %p7016_p8, %p7015_p2 }
 0x2d1   : > { %p7018_p1 = pnand %p7017_p9, %p7011_p7 }
 0x2d3   : > { %7021 = shalt.err (!%p7018_p1)
}
 0x2d4   : > { %5915 = dma.hbm_to_vmem [thread:$0]  (%p9954_p4), %s8438_s12, 16, %s1244_s6, %s7911_s26  }
 0x2d5   : > { %s1254_s20 = scalar_lea.vmem [#allocation30], %s8008_s0  ;;  %s9979_s19 = sld [smem:[#allocation110_spill]] }
 0x2d6   : > { %s1261_s25 = sshll.u32 %s1254_s20, 4  ;;  %s7022_s17 = scalar_lea.hbm %s8470_s9, 256  ;;  %s8491_s25 = int_to_ptr.vmem [resolvable:$true] %s1261_s25 }
 0x2d7   : > { %p7023_p12 = scmp.ne.s32.totalorder %s8470_s9, %s7022_s17  ;;  %s7026_s13 = scalar_lea.hbm %s9978_s4, 512 }
 0x2d8   : > { %p7027_p3 = scmp.lt.u32.totalorder %s8470_s9, %s9978_s4  ;;  %p7028_p6 = scmp.lt.u32.totalorder %s7026_s13, %s7022_s17 }
 0x2d9   : > { %p7024_p5 = pnand %p7023_p12, %p9954_p4  ;;  %p7030_p0 = scmp.lt.u32.totalorder %s7022_s17, %s8470_s9 }
 0x2da   : > { %p7029_p11 = por %p7028_p6, %p7027_p3 }
 0x2db   : > { %s8497_s15 = scalar_lea.hbm %s9979_s19, %s8045_s8  ;;  %p7025_p10 = pneg %p7024_p5 }
 0x2dc   : > { %p7031_p13 = por %p7030_p0, %p7029_p11 }
 0x2de   : > { %p7032_p7 = pnand %p7031_p13, %p7025_p10 }
 0x2e0   : > { %7035 = shalt.err (!%p7032_p7)
}
 0x2e1   : > { %s7036_s0 = scalar_lea.vmem %s8491_s25, 256  ;;  %s7416_s6 = smov [#allocation30]  }
 0x2e2   : > { %p7037_p2 = scmp.ne.s32.totalorder %s8491_s25, %s7036_s0  ;;  %s7040_s10 = sshll.u32 %s7416_s6, 4  ;;  %s7041_s10 = int_to_ptr.vmem [resolvable:$false] %s7040_s10 }
 0x2e3   : > { %s7042_s20 = scalar_lea.vmem %s7041_s10, 512  ;;  %p7043_p1 = scmp.lt.s32.totalorder %s8491_s25, %s7041_s10 }
 0x2e4   : > { %p7038_p8 = pnand %p7037_p2, %p9954_p4  ;;  %p7044_p12 = scmp.lt.s32.totalorder %s7042_s20, %s7036_s0 }
 0x2e6   : > { %p7039_p9 = pneg %p7038_p8  ;;  %p7045_p5 = por %p7044_p12, %p7043_p1 }
 0x2e8   : > { %p7046_p3 = pnand %p7045_p5, %p7039_p9 }
 0x2ea   : > { %7049 = shalt.err (!%p7046_p3)
}
 0x2eb   : > { %5916 = dma.hbm_to_vmem [thread:$0]  (%p9954_p4), %s8470_s9, 256, %s8491_s25, %s7869_s5, %s9961_s29, %s9961_s29, %s9960_s22  }
 0x2ec   : > { %s1274_s18 = scalar_lea.vmem [#allocation31], %s8002_s30  ;;  %s5326_s17 = sshll.u32 %s8002_s30, 6 }
 0x2ed   : > { %s1281_s2 = sshll.u32 %s1274_s18, 4  ;;  %s7050_s11 = scalar_lea.hbm %s8497_s15, 16  ;;  %s1282_s2 = int_to_ptr.vmem [resolvable:$true] %s1281_s2 }
 0x2ee   : > { %p7051_p10 = scmp.ne.s32.totalorder %s8497_s15, %s7050_s11  ;;  %s7054_s16 = scalar_lea.hbm %s9979_s19, 32 }
 0x2ef   : > { %p7055_p0 = scmp.lt.u32.totalorder %s8497_s15, %s9979_s19  ;;  %p7056_p13 = scmp.lt.u32.totalorder %s7054_s16, %s7050_s11 }
 0x2f0   : > { %p7052_p6 = pnand %p7051_p10, %p9954_p4  ;;  %p7058_p2 = scmp.lt.u32.totalorder %s7050_s11, %s8497_s15 }
 0x2f1   : > { %p7057_p7 = por %p7056_p13, %p7055_p0 }
 0x2f2   : > { %p7053_p11 = pneg %p7052_p6 }
 0x2f3   : > { %p7059_p8 = por %p7058_p2, %p7057_p7 }
 0x2f5   : > { %p7060_p9 = pnand %p7059_p8, %p7053_p11 }
 0x2f7   : > { %7063 = shalt.err (!%p7060_p9)
}
 0x2f8   : > { %s7064_s9 = scalar_lea.vmem %s1282_s2, 16  ;;  %s7417_s25 = smov [#allocation31]  }
 0x2f9   : > { %p7065_p1 = scmp.ne.s32.totalorder %s1282_s2, %s7064_s9  ;;  %s7068_s6 = sshll.u32 %s7417_s25, 4  ;;  %s7069_s6 = int_to_ptr.vmem [resolvable:$false] %s7068_s6 }
 0x2fa   : > { %s7070_s10 = scalar_lea.vmem %s7069_s6, 32  ;;  %p7071_p3 = scmp.lt.s32.totalorder %s1282_s2, %s7069_s6 }
 0x2fb   : > { %p7066_p12 = pnand %p7065_p1, %p9954_p4  ;;  %p7072_p10 = scmp.lt.s32.totalorder %s7070_s10, %s7064_s9 }
 0x2fd   : > { %p7067_p5 = pneg %p7066_p12  ;;  %p7073_p6 = por %p7072_p10, %p7071_p3 }
 0x2ff   : > { %p7074_p0 = pnand %p7073_p6, %p7067_p5 }
 0x301   : > { %7077 = shalt.err (!%p7074_p0)
}
 0x302   : > { %5917 = dma.hbm_to_vmem [thread:$0]  (%p9954_p4), %s8497_s15, 16, %s1282_s2, %s7981_s24  }
 0x303   : > { %s5485_s20 = sshll.u32 %s7376_s7, 10  ;;  %s1292_s18 = scalar_lea.vmem [#allocation32], %s5326_s17 }
 0x304   : > { %s1299_s11 = sshll.u32 %s1292_s18, 4  ;;  %s9980_s16 = sld [smem:[#allocation111_spill]]  ;;  %s8552_s11 = int_to_ptr.vmem [resolvable:$true] %s1299_s11 }
 0x30a   : > { %s8550_s12 = scalar_lea.hbm %s9980_s16, %s5485_s20  ;;  %s7082_s2 = scalar_lea.hbm %s9980_s16, 2048 }
 0x30b   : > { %s7078_s0 = scalar_lea.hbm %s8550_s12, 1024  ;;  %p7083_p2 = scmp.lt.u32.totalorder %s8550_s12, %s9980_s16 }
 0x30c   : > { %p7079_p11 = scmp.ne.s32.totalorder %s8550_s12, %s7078_s0  ;;  %p7084_p8 = scmp.lt.u32.totalorder %s7082_s2, %s7078_s0 }
 0x30d   : > { %p7086_p1 = scmp.lt.u32.totalorder %s7078_s0, %s8550_s12 }
 0x30e   : > { %p7080_p13 = pnand %p7079_p11, %p9954_p4  ;;  %p7085_p9 = por %p7084_p8, %p7083_p2 }
 0x310   : > { %p7081_p7 = pneg %p7080_p13  ;;  %p7087_p12 = por %p7086_p1, %p7085_p9 }
 0x312   : > { %p7088_p5 = pnand %p7087_p12, %p7081_p7 }
 0x314   : > { %7091 = shalt.err (!%p7088_p5)
}
 0x315   : > { %s7092_s25 = scalar_lea.vmem %s8552_s11, 1024  ;;  %s7418_s6 = smov [#allocation32]  }
 0x316   : > { %p7093_p3 = scmp.ne.s32.totalorder %s8552_s11, %s7092_s25  ;;  %s7096_s10 = sshll.u32 %s7418_s6, 4  ;;  %s7097_s10 = int_to_ptr.vmem [resolvable:$false] %s7096_s10 }
 0x317   : > { %s7098_s20 = scalar_lea.vmem %s7097_s10, 2048  ;;  %p7099_p0 = scmp.lt.s32.totalorder %s8552_s11, %s7097_s10 }
 0x318   : > { %p7094_p10 = pnand %p7093_p3, %p9954_p4  ;;  %p7100_p11 = scmp.lt.s32.totalorder %s7098_s20, %s7092_s25 }
 0x31a   : > { %p7095_p6 = pneg %p7094_p10  ;;  %p7101_p13 = por %p7100_p11, %p7099_p0 }
 0x31c   : > { %p7102_p2 = pnand %p7101_p13, %p7095_p6 }
 0x31e   : > { %7105 = shalt.err (!%p7102_p2)
}
 0x31f   : > { %5918 = dma.hbm_to_vmem [thread:$0]  (%p9954_p4), %s8550_s12, 1024, %s8552_s11, %s7911_s26, %s9961_s29, %s9961_s29, %s9960_s22  }
 0x320   : > { %s9981_s13 = sld [smem:[#allocation112_spill]]  ;;  %s1312_s24 = scalar_lea.vmem [#allocation33], %s8002_s30 }
 0x321   : > { %s1319_s15 = sshll.u32 %s1312_s24, 4  ;;  %s1320_s15 = int_to_ptr.vmem [resolvable:$true] %s1319_s15 }
 0x326   : > { %s8583_s0 = scalar_lea.hbm %s9981_s13, %s8045_s8  ;;  %s7110_s26 = scalar_lea.hbm %s9981_s13, 32 }
 0x327   : > { %s7106_s2 = scalar_lea.hbm %s8583_s0, 16  ;;  %p7111_p1 = scmp.lt.u32.totalorder %s8583_s0, %s9981_s13 }
 0x328   : > { %p7107_p7 = scmp.ne.s32.totalorder %s8583_s0, %s7106_s2  ;;  %p7112_p12 = scmp.lt.u32.totalorder %s7110_s26, %s7106_s2 }
 0x329   : > { %p7114_p3 = scmp.lt.u32.totalorder %s7106_s2, %s8583_s0 }
 0x32a   : > { %p7108_p8 = pnand %p7107_p7, %p9954_p4  ;;  %p7113_p5 = por %p7112_p12, %p7111_p1 }
 0x32c   : > { %p7109_p9 = pneg %p7108_p8  ;;  %p7115_p10 = por %p7114_p3, %p7113_p5 }
 0x32e   : > { %p7116_p6 = pnand %p7115_p10, %p7109_p9 }
 0x330   : > { %7119 = shalt.err (!%p7116_p6)
}
 0x331   : > { %s7120_s30 = scalar_lea.vmem %s1320_s15, 16  ;;  %s7419_s8 = smov [#allocation33]  }
 0x332   : > { %p7121_p0 = scmp.ne.s32.totalorder %s1320_s15, %s7120_s30  ;;  %s7124_s11 = sshll.u32 %s7419_s8, 4  ;;  %s7125_s11 = int_to_ptr.vmem [resolvable:$false] %s7124_s11 }
 0x333   : > { %s7126_s12 = scalar_lea.vmem %s7125_s11, 32  ;;  %p7127_p2 = scmp.lt.s32.totalorder %s1320_s15, %s7125_s11 }
 0x334   : > { %p7122_p11 = pnand %p7121_p0, %p9954_p4  ;;  %p7128_p7 = scmp.lt.s32.totalorder %s7126_s12, %s7120_s30 }
 0x336   : > { %p7123_p13 = pneg %p7122_p11  ;;  %p7129_p8 = por %p7128_p7, %p7127_p2 }
 0x338   : > { %p7130_p1 = pnand %p7129_p8, %p7123_p13 }
 0x33a   : > { %7133 = shalt.err (!%p7130_p1)
}
 0x33b   : > { %5919 = dma.hbm_to_vmem [thread:$0]  (%p9954_p4), %s8583_s0, 16, %s1320_s15, %s7869_s5  }
 0x33c PF: > { %s9982_s25 = sld [smem:[#allocation86_spill]] }
 0x342   : > { %p9983_p9 = scmp.ne.s32.totalorder %s9982_s25, 0 }
 0x343   : > { %s9984_s6 = sld [smem:[#allocation75_spill]] (!%p9983_p9)  ;;  %s9985_s10 = sld [smem:[#allocation70_spill]] (!%p9983_p9) }
 0x344   : > { %1328 = sbr.rel (%p9983_p9) target bundleno = 5524 (0x1594), region = 132  ;;  %s9986_s20 = sld [smem:[#allocation78_spill]] (!%p9983_p9) }
 0x349   : > { %s1330_s18 = sand.u32 (!%p9983_p9), 1, %s9984_s6   ;;  %s8608_s28 = sand.u32 (!%p9983_p9), 1, %s9985_s10  }
 0x34a   : > { %s8611_s24 = sshll.u32 (!%p9983_p9), %s8608_s28, 6  ;;  %s8613_s2 = scalar_lea.sflag (!%p9983_p9), [#allocation4], %s1330_s18 }
 0x34b   : > { %s8616_s3 = scalar_lea.vmem [#allocation3], %s8611_s24  ;;  %p9987_p4 = scmp.ne.s32.totalorder %s9986_s20, 0 }
 0x34d   : > { %7219 = dma.done.wait (%p9987_p4), %s8613_s2, 1024  }
 0x34e   : > { %7221 = vsyncadd (%p9987_p4), %s8613_s2, 4294966272  ;;  %s8624_s5 = scalar_lea.sflag [#allocation7], %s1330_s18  ;;  %s8627_s0 = scalar_lea.vmem [#allocation6], %s8611_s24 }
 0x34f   : > { %7223 = dma.done.wait (%p9987_p4), %s8624_s5, 1280  }
 0x350   : > { %7225 = vsyncadd (%p9987_p4), %s8624_s5, 4294966016  ;;  %s9988_s15 = sld [smem:[#allocation67_spill]]  ;;  %s9989_s17 = sld [smem:[#allocation81_spill]] }
 0x351   : > { %s5333_s9 = sshll.u32 %s8608_s28, 4  ;;  %s8641_s30 = scalar_lea.sflag [#allocation10], %s1330_s18 }
 0x352   : > { %s8639_s29 = scalar_lea.vmem [#allocation8], %s5333_s9 }
 0x356   : > { %s1359_s26 = sand.u32 1, %s9988_s15   ;;  %p9990_p12 = scmp.ne.s32.totalorder %s9989_s17, 0 }
 0x357   : > { %s8637_s22 = sshll.u32 %s1359_s26, 3 }
 0x358   : > { %7227 = dma.done.wait (%p9990_p12), %s8641_s30, 128  }
 0x359   : > { %7229 = vsyncadd (%p9990_p12), %s8641_s30, 4294967168  ;;  %p9991_p5 = scmp.eq.s32.totalorder %s9984_s6, 0 }
 0x35b   : > { %7231 = dma.done.wait (%p9991_p5), [#allocation10], 64   ;;  %p9992_p3 = pmov %p9991_p5 }
 0x35d   : > { %7233 = vsyncadd (%p9992_p3), [#allocation10], 4294967232  ;;  %p9993_p10 = pmov %p9992_p3 }
 0x35e   : > { %p9994_p6 = pmov %p9992_p3 }
 0x35f   : > { %7235 = dma.done.wait (%p9993_p10), [#allocation13], 16  }
 0x360   : > { %7237 = vsyncadd (%p9994_p6), [#allocation13], 4294967280  ;;  %s9995_s11 = sld [smem:[#allocation65_spill]]  ;;  %s9996_s12 = sld [smem:[#allocation83_spill]] }
 0x366   : > { %s8659_s25 = sand.u32 1, %s9995_s11   ;;  %p9997_p0 = scmp.ne.s32.totalorder %s9996_s12, 0 }
 0x367   : > { %s8662_s10 = sshll.u32 %s8659_s25, 4 }
 0x368   : > { %s1378_s20 = scalar_lea.vmem [#allocation14], %s8662_s10 }
 0x369   : > { %7239 = dma.done.wait (%p9997_p0), %s8613_s2, 256  }
 0x36a   : > { %7241 = vsyncadd (%p9997_p0), %s8613_s2, 4294967040 }
 0x36b   : > { %7243 = dma.done.wait (%p9997_p0), %s8624_s5, 16  }
 0x36c   : > { %7245 = vsyncadd (%p9997_p0), %s8624_s5, 4294967280  ;;  %s1395_s15 = scalar_lea.vmem [#allocation16], %s8662_s10 }
 0x36d   : > { %7247 = dma.done.wait (%p9997_p0), %s8641_s30, 256  }
 0x36e   : > { %7249 = vsyncadd (%p9997_p0), %s8641_s30, 4294967040 }
 0x36f   : > { %7251 = dma.done.wait (%p9997_p0), %s8613_s2, 16  }
 0x370   : > { %7253 = vsyncadd (%p9997_p0), %s8613_s2, 4294967280  ;;  %s1412_s9 = scalar_lea.vmem [#allocation18], %s8662_s10 }
 0x371   : > { %7255 = dma.done.wait (%p9997_p0), %s8624_s5, 256  }
 0x372   : > { %7257 = vsyncadd (%p9997_p0), %s8624_s5, 4294967040 }
 0x373   : > { %7259 = dma.done.wait (%p9997_p0), %s8641_s30, 16  }
 0x374   : > { %7261 = vsyncadd (%p9997_p0), %s8641_s30, 4294967280 }
 0x375   : > { %7263 = dma.done.wait (%p9997_p0), %s8613_s2, 256  }
 0x376   : > { %7265 = vsyncadd (%p9997_p0), %s8613_s2, 4294967040 }
 0x377   : > { %7267 = dma.done.wait (%p9997_p0), %s8624_s5, 16  }
 0x378   : > { %7269 = vsyncadd (%p9997_p0), %s8624_s5, 4294967280 }
 0x379   : > { %7271 = dma.done.wait (%p9997_p0), %s8641_s30, 256  }
 0x37a   : > { %7273 = vsyncadd (%p9997_p0), %s8641_s30, 4294967040 }
 0x37b   : > { %7275 = dma.done.wait (%p9997_p0), %s8613_s2, 16  }
 0x37c   : > { %7277 = vsyncadd (%p9997_p0), %s8613_s2, 4294967280  ;;  %s5342_s11 = sshll.u32 %s8659_s25, 3 }
 0x37d   : > { %s8735_s17 = scalar_lea.vmem [#allocation24], %s5342_s11 }
 0x37e   : > { %7279 = dma.done.wait (%p9997_p0), %s8624_s5, 128  }
 0x37f   : > { %7281 = vsyncadd (%p9997_p0), %s8624_s5, 4294967168 }
 0x380   : > { %7283 = dma.done.wait (%p9997_p0), %s8641_s30, 16  }
 0x381   : > { %7285 = vsyncadd (%p9997_p0), %s8641_s30, 4294967280  ;;  %s8750_s18 = scalar_lea.vmem [#allocation26], %s5342_s11 }
 0x382   : > { %7287 = dma.done.wait (%p9997_p0), %s8613_s2, 128  }
 0x383   : > { %7289 = vsyncadd (%p9997_p0), %s8613_s2, 4294967168 }
 0x384   : > { %7291 = dma.done.wait (%p9997_p0), %s8624_s5, 16  }
 0x385   : > { %7293 = vsyncadd (%p9997_p0), %s8624_s5, 4294967280 }
 0x386   : > { %7295 = dma.done.wait (%p9997_p0), %s8641_s30, 256  }
 0x387   : > { %7297 = vsyncadd (%p9997_p0), %s8641_s30, 4294967040 }
 0x388   : > { %7299 = dma.done.wait (%p9997_p0), %s8613_s2, 16  }
 0x389   : > { %7301 = vsyncadd (%p9997_p0), %s8613_s2, 4294967280 }
 0x38a   : > { %7303 = dma.done.wait (%p9997_p0), %s8624_s5, 256  }
 0x38b   : > { %7305 = vsyncadd (%p9997_p0), %s8624_s5, 4294967040 }
 0x38c   : > { %7307 = dma.done.wait (%p9997_p0), %s8641_s30, 16  }
 0x38d   : > { %7309 = vsyncadd (%p9997_p0), %s8641_s30, 4294967280  ;;  %s5346_s11 = sshll.u32 %s8659_s25, 6 }
 0x38e   : > { %s8794_s8 = scalar_lea.vmem [#allocation32], %s5346_s11 }
 0x38f   : > { %7311 = dma.done.wait (%p9997_p0), %s8613_s2, 1024  }
 0x390   : > { %7313 = vsyncadd (%p9997_p0), %s8613_s2, 4294966272  ;;  %s1539_s26 = scalar_lea.vmem [#allocation33], %s8659_s25 }
 0x391   : > { %7315 = dma.done.wait (%p9997_p0), %s8624_s5, 16  }
 0x392   : > { %7317 = vsyncadd (%p9997_p0), %s8624_s5, 4294967280  ;;  %p9998_p11 = pmov %p9992_p3 }
 0x393   : > { %p9999_p13 = pmov %p9992_p3 }
 0x394   : > { %7319 = dma.done.wait (%p9998_p11), [#allocation10], 256  }
 0x395   : > { %7321 = vsyncadd (%p9999_p13), [#allocation10], 4294967040  ;;  %p10000_p2 = pmov %p9992_p3 }
 0x397   : > { %7323 = dma.done.wait (%p10000_p2), [#allocation13], 16   ;;  %p10001_p7 = pmov %p10000_p2 }
 0x398   : > { %s8818_s2 = scalar_lea.vmem [#allocation36], %s8611_s24  ;;  %s10002_s30 = sld [smem:[#allocation72_spill]] }
 0x399   : > { %7325 = vsyncadd (%p10001_p7), [#allocation13], 4294967280 }
 0x39e   : > { %p5350_p8 = scmp.ne.s32.totalorder %s10002_s30, 0 }
 0x39f   : > { %v1730_v0 = vld [vmem:[#allocation11] sm:$0xf] (!%p5350_p8)  ;;  %vm1763_vm0 = vcmask (!%p5350_p8), 1043456   ;;  %v1731_v1 = vld [vmem:[%s8616_s3] sm:$0xff] (!%p5350_p8)  ;;  %v1732_v2 = vld [vmem:[%s8616_s3 + $0x8] sm:$0xff] (!%p5350_p8)  ;;  %vm1750_vm1 = vcmask (!%p5350_p8), 64512  }
 0x3a0   : > { %1729 = sbr.rel (%p5350_p8) target bundleno = 1153 (0x481), region = 248  ;;  %5880 = vmatprep.subr.msk.bf16.mxu0 (!%p5350_p8), %vm1763_vm0, %v1730_v0  ;;  %5881 = vmatprep.subr.msk.bf16.mxu1 (!%p5350_p8), %vm1763_vm0, %v1730_v0  ;;  %v1765_v3 = vsel (!%p5350_p8), %vm1763_vm0, %v1730_v0, 0  ;;  %v1739_v4 = vpack.c.bf16 (!%p5350_p8), %v1732_v2, %v1731_v1  ;;  %v1735_v5 = vld [vmem:[%s8616_s3 + $0x20] sm:$0xff] (!%p5350_p8)  ;;  %v1736_v6 = vld [vmem:[%s8616_s3 + $0x28] sm:$0xff] (!%p5350_p8)  ;;  %v1733_v7 = vld [vmem:[%s8616_s3 + $0x10] sm:$0xff] (!%p5350_p8)  ;;  %vm1848_vm2 = vcmask (!%p5350_p8), 261120  }
 0x3a1   : > { %5609 = vmatpush3.bf16.msra.mxu0 (!%p5350_p8), %v1765_v3  ;;  %5855 = vmatpush3.bf16.msra.mxu1 (!%p5350_p8), %v1765_v3  ;;  %v1741_v8 = vpack.c.bf16 (!%p5350_p8), %v1736_v6, %v1735_v5  ;;  %v1734_v9 = vld [vmem:[%s8616_s3 + $0x18] sm:$0xff] (!%p5350_p8)  ;;  %v1737_v10 = vld [vmem:[%s8616_s3 + $0x30] sm:$0xff] (!%p5350_p8)  ;;  %v1832_v22 = vld [vmem:[%s8627_s0] sm:$0xff] (!%p5350_p8) }
 0x3a2   : > { %v1738_v11 = vld [vmem:[%s8616_s3 + $0x38] sm:$0xff] (!%p5350_p8)  ;;  %5610 = vmatprep.mubr.msk.bf16.mxu0 (!%p5350_p8), %vm1750_vm1, %v1739_v4  ;;  %v1740_v12 = vpack.c.bf16 (!%p5350_p8), %v1734_v9, %v1733_v7  ;;  %v5351_v14 = vld [vmem:[#allocation12] ss:$0 sm:$0xff] (!%p5350_p8)  ;;  %v1836_v24 = vld [vmem:[%s8627_s0 + $0x20] sm:$0xff] (!%p5350_p8) }
 0x3a3   : > { %v1742_v13 = vpack.c.bf16 (!%p5350_p8), %v1738_v11, %v1737_v10  ;;  %5614 = vmatprep.mubr.msk.bf16.mxu1 (!%p5350_p8), %vm1750_vm1, %v1741_v8  ;;  %v1834_v16 = vld [vmem:[%s8627_s0 + $0x10] sm:$0xff] (!%p5350_p8)  ;;  %v1835_v28 = vld [vmem:[%s8627_s0 + $0x18] sm:$0xff] (!%p5350_p8)  ;;  %v1833_v36 = vld [vmem:[%s8627_s0 + $0x8] sm:$0xff] (!%p5350_p8) }
 0x3a4   : > { %5611 = vmatmul.mubr.msk.bf16.vlgmr.msra.gmra.mrb[0].mxu0 (!%p5350_p8), %vm1750_vm1, %v1740_v12  ;;  %v1838_v18 = vld [vmem:[%s8627_s0 + $0x30] sm:$0xff] (!%p5350_p8)  ;;  %v1839_v30 = vld [vmem:[%s8627_s0 + $0x38] sm:$0xff] (!%p5350_p8)  ;;  %v1837_v38 = vld [vmem:[%s8627_s0 + $0x28] sm:$0xff] (!%p5350_p8) }
 0x3a5   : > { %5615 = vmatmul.mubr.msk.bf16.vlgmr.msra.gmra.mrb[0].mxu1 (!%p5350_p8), %vm1750_vm1, %v1742_v13 }
 0x477   : > { %v5612_v15 = vpop.f32.mrb[0].mxu0 }
 0x478   : > { %v5616_v17 = vpop.f32.mrb[0].mxu1  ;;  %v1810_v19 = vadd.f32 %v5612_v15, %v5351_v14  ;;  %v1801_v21 = vpop.f32.mrb[1].mxu0 }
 0x479   : > { %v1826_v20 = vadd.f32 %v5616_v17, %v5351_v14  ;;  %v1817_v23 = vpop.f32.mrb[1].mxu1  ;;  %v1802_v25 = vadd.f32 %v5351_v14, %v1801_v21  ;;  %v5613_v27 = vpop.f32.mrb[2].mxu0 }
 0x47a   : > { %v1818_v26 = vadd.f32 %v5351_v14, %v1817_v23  ;;  %v5617_v29 = vpop.f32.mrb[2].mxu1  ;;  %v1842_v31 = vadd.f32 %v1834_v16, %v1810_v19  ;;  %v1813_v33 = vadd.f32 %v5613_v27, %v5351_v14  ;;  %v1804_v35 = vpop.f32.mrb[3].mxu0 }
 0x47b   : > { %v1846_v32 = vadd.f32 %v1838_v18, %v1826_v20  ;;  %v1829_v34 = vadd.f32 %v5617_v29, %v5351_v14  ;;  %v1820_v37 = vpop.f32.mrb[3].mxu1  ;;  %v1840_v39 = vadd.f32 %v1832_v22, %v1802_v25  ;;  %v1805_v41 = vadd.f32 %v5351_v14, %v1804_v35 }
 0x47c   : > { %v1844_v40 = vadd.f32 %v1836_v24, %v1818_v26  ;;  %v1821_v42 = vadd.f32 %v5351_v14, %v1820_v37  ;;  %1851 = vst.msk [vmem:[#allocation2 + $0x10] sm:$0xff] %vm1848_vm2, %v1842_v31  ;;  %v1843_v43 = vadd.f32 %v1835_v28, %v1813_v33 }
 0x47d   : > { %1855 = vst.msk [vmem:[#allocation2 + $0x30] sm:$0xff] %vm1848_vm2, %v1846_v32  ;;  %v1847_v44 = vadd.f32 %v1839_v30, %v1829_v34  ;;  %1849 = vst.msk [vmem:[#allocation2] sm:$0xff] %vm1848_vm2, %v1840_v39  ;;  %v1841_v45 = vadd.f32 %v1833_v36, %v1805_v41 }
 0x47e   : > { %1853 = vst.msk [vmem:[#allocation2 + $0x20] sm:$0xff] %vm1848_vm2, %v1844_v40  ;;  %v1845_v46 = vadd.f32 %v1837_v38, %v1821_v42  ;;  %1852 = vst.msk [vmem:[#allocation2 + $0x18] sm:$0xff] %vm1848_vm2, %v1843_v43 }
 0x47f   : > { %1856 = vst.msk [vmem:[#allocation2 + $0x38] sm:$0xff] %vm1848_vm2, %v1847_v44  ;;  %1850 = vst.msk [vmem:[#allocation2 + $0x8] sm:$0xff] %vm1848_vm2, %v1841_v45 }
 0x480   : > { %1854 = vst.msk [vmem:[#allocation2 + $0x28] sm:$0xff] %vm1848_vm2, %v1845_v46 }
 0x481 PF: > { %vm1868_vm3 = vcmask 261120   ;;  %v6107_v39 = vld [vmem:[%s1378_s20] sm:$0xff]   ;;  %v6109_v41 = vld [vmem:[%s1378_s20 + $0x8] sm:$0xff]   ;;  %s10003_s6 = scalar_lea.vmem [#allocation9], %s8637_s22  ;;  %s10004_s24 = scalar_lea.vmem [#allocation15], %s8659_s25  ;;  %vm2307_vm4 = vcmask 130048  }
 0x482   : > { %v6108_v40 = vld [vmem:[%s1395_s15] sm:$0xff]   ;;  %5618 = vmatprep.subr.bf16.mxu0 %v6107_v39  ;;  %v6110_v42 = vld [vmem:[%s1395_s15 + $0x8] sm:$0xff]   ;;  %s10005_s3 = scalar_lea.vmem [#allocation17], %s8659_s25  ;;  %s7420_s5 = smov 112   ;;  %vm2441_vm5 = vcmask 523264   ;;  %vm7422_vm6 = vmmov 0  }
 0x483   : > { %v1859_v48 = vld [vmem:[#allocation2 + $0x10] sm:$0xff]  ;;  %5630 = vmatprep.subr.bf16.mxu1 %v6108_v40  ;;  %5619 = vmatpush3.bf16.msra.mxu0 %v6107_v39  ;;  %s10006_s0 = scalar_lea.vmem [#allocation19], %s8659_s25  ;;  %s10007_s12 = scalar_lea.vmem [#allocation20], %s8662_s10 }
 0x484   : > { %v1857_v47 = vld [vmem:[#allocation2] sm:$0xff]  ;;  %v1875_v51 = vsel %vm1868_vm3, %v1859_v48, 0.0  ;;  %v1863_v59 = vld [vmem:[#allocation2 + $0x30] sm:$0xff]  ;;  %5631 = vmatpush3.bf16.msra.mxu1 %v6108_v40  ;;  %5620 = vmatprep.subr.bf16.mxu0 %v6109_v41  ;;  %s10008_s20 = smov %s10007_s12  ;;  %s10009_s15 = scalar_lea.vmem [#allocation21], %s8659_s25 }
 0x485   : > { %v1869_v50 = vsel %vm1868_vm3, %v1857_v47, 0.0  ;;  %v1860_v52 = vld [vmem:[#allocation2 + $0x18] sm:$0xff]  ;;  %v1861_v53 = vld [vmem:[#allocation2 + $0x20] sm:$0xff]  ;;  %1876 = vadd.xlane.f32.xlu1 %v1875_v51  ;;  %v1887_v61 = vsel %vm1868_vm3, %v1863_v59, 0.0  ;;  %5632 = vmatprep.subr.bf16.mxu1 %v6110_v42  ;;  %s10015_s30 = scalar_lea.vmem [#allocation28], %s8662_s10 }
 0x486   : > { %v1858_v49 = vld [vmem:[#allocation2 + $0x8] sm:$0xff]  ;;  %1870 = vadd.xlane.f32.xlu0 %v1869_v50  ;;  %v1878_v56 = vsel %vm1868_vm3, %v1860_v52, 0.0  ;;  %v1881_v57 = vsel %vm1868_vm3, %v1861_v53, 0.0  ;;  %v1864_v60 = vld [vmem:[#allocation2 + $0x38] sm:$0xff] }
 0x487   : > { %v1862_v54 = vld [vmem:[#allocation2 + $0x28] sm:$0xff]  ;;  %v1872_v55 = vsel %vm1868_vm3, %v1858_v49, 0.0  ;;  %v1890_v62 = vsel %vm1868_vm3, %v1864_v60, 0.0  ;;  %5621 = vmatpush3.bf16.msra.mxu0 %v6109_v41 }
 0x488   : > { %v1884_v58 = vsel %vm1868_vm3, %v1862_v54, 0.0  ;;  %5633 = vmatpush3.bf16.msra.mxu1 %v6110_v42  ;;  %v8907_v43 = vld [vmem:[%s1412_s9] sm:$0xff]   ;;  %v6112_v42 = vld [vmem:[%s1412_s9 + $0x8] sm:$0xff]   ;;  %s10010_s9 = scalar_lea.vmem [#allocation22], %s8662_s10 }
 0x489   : > { %1879 = vadd.xlane.f32.xlu1 %v1878_v56  ;;  %5642 = vmatprep.subr.bf16.mxu0 %v8907_v43  ;;  %s10011_s11 = smov %s10010_s9 }
 0x48a   : > { %1873 = vadd.xlane.f32.xlu0 %v1872_v55 }
 0x48d   : > { %1885 = vadd.xlane.f32.xlu1 %v1884_v58 }
 0x48e   : > { %1882 = vadd.xlane.f32.xlu0 %v1881_v57 }
 0x491   : > { %1891 = vadd.xlane.f32.xlu1 %v1890_v62 }
 0x492   : > { %1888 = vadd.xlane.f32.xlu0 %v1887_v61 }
 0x512   : > { %v1877_v0 = vpop.xlane.xlu1 %1876 }
 0x513   : > { %v1871_v63 = vpop.xlane.xlu0 %1870  ;;  %v1896_v2 = vmul.f32 0.03125, %v1877_v0 }
 0x514   : > { %v1894_v1 = vmul.f32 0.03125, %v1871_v63 }
 0x515   : > { %v8859_v4 = vsub.f32 %v1859_v48, %v1896_v2 }
 0x516   : > { %v8857_v3 = vsub.f32 %v1857_v47, %v1894_v1  ;;  %v1880_v6 = vpop.xlane.xlu1 %1879 }
 0x517   : > { %v1874_v5 = vpop.xlane.xlu0 %1873  ;;  %v1897_v8 = vmul.f32 0.03125, %v1880_v6  ;;  %v1912_v10 = vmul.f32 %v8859_v4, %v8859_v4 }
 0x518   : > { %v1895_v7 = vmul.f32 0.03125, %v1874_v5  ;;  %v1910_v9 = vmul.f32 %v8857_v3, %v8857_v3 }
 0x519   : > { %v8867_v12 = vsub.f32 %v1860_v52, %v1897_v8  ;;  %v1924_v16 = vsel %vm1868_vm3, %v1912_v10, 0.0 }
 0x51a   : > { %v8865_v11 = vsub.f32 %v1858_v49, %v1895_v7  ;;  %v1918_v13 = vsel %vm1868_vm3, %v1910_v9, 0.0  ;;  %v1886_v15 = vpop.xlane.xlu1 %1885  ;;  %v1975_v49 = vlaneseq }
 0x51b   : > { %1919 = vadd.xlane.f32.xlu0 %v1918_v13  ;;  %v1883_v14 = vpop.xlane.xlu0 %1882  ;;  %v1899_v18 = vmul.f32 0.03125, %v1886_v15  ;;  %v1913_v20 = vmul.f32 %v8867_v12, %v8867_v12 }
 0x51c   : > { %v1898_v17 = vmul.f32 0.03125, %v1883_v14  ;;  %v1911_v19 = vmul.f32 %v8865_v11, %v8865_v11  ;;  %v8910_v56 = vshrl.u32 %v1975_v49, 7 }
 0x51d   : > { %v8877_v22 = vsub.f32 %v1862_v54, %v1899_v18  ;;  %v1927_v26 = vsel %vm1868_vm3, %v1913_v20, 0.0 }
 0x51e   : > { %v8875_v21 = vsub.f32 %v1861_v53, %v1898_v17  ;;  %v1921_v23 = vsel %vm1868_vm3, %v1911_v19, 0.0  ;;  %v1892_v25 = vpop.xlane.xlu1 %1891  ;;  %v1977_v1 = vsub.s32 1, %v8910_v56  ;;  %v1989_v14 = vsub.s32 0, %v8910_v56 }
 0x51f   : > { %1925 = vadd.xlane.f32.xlu0 %v1924_v16  ;;  %1922 = vadd.xlane.f32.xlu1 %v1921_v23  ;;  %v1889_v24 = vpop.xlane.xlu0 %1888  ;;  %v1901_v28 = vmul.f32 0.03125, %v1892_v25  ;;  %v1915_v30 = vmul.f32 %v8877_v22, %v8877_v22 }
 0x520   : > { %v1900_v27 = vmul.f32 0.03125, %v1889_v24  ;;  %v1914_v29 = vmul.f32 %v8875_v21, %v8875_v21 }
 0x521   : > { %v8887_v32 = vsub.f32 %v1864_v60, %v1901_v28  ;;  %v1933_v34 = vsel %vm1868_vm3, %v1915_v30, 0.0 }
 0x522   : > { %v8885_v31 = vsub.f32 %v1863_v59, %v1900_v27  ;;  %v1930_v33 = vsel %vm1868_vm3, %v1914_v29, 0.0  ;;  %v8914_v59 = vld [vmem:[%s10003_s6] sm:$0x3f]  ;;  %s10016_s6 = smov %s10015_s30 }
 0x523   : > { %1928 = vadd.xlane.f32.xlu1 %v1927_v26  ;;  %1931 = vadd.xlane.f32.xlu0 %v1930_v33  ;;  %v1917_v36 = vmul.f32 %v8887_v32, %v8887_v32  ;;  %v8917_v0 = vadd.f32 1.0, %v8914_v59  ;;  %v1990_v23 = vrot.slane %v8914_v59, %v1989_v14 }
 0x524   : > { %v1916_v35 = vmul.f32 %v8885_v31, %v8885_v31 }
 0x525   : > { %v1939_v38 = vsel %vm1868_vm3, %v1917_v36, 0.0  ;;  %v1978_v13 = vrot.slane %v8917_v0, %v1977_v1 }
 0x526   : > { %v1936_v37 = vsel %vm1868_vm3, %v1916_v35, 0.0 }
 0x527   : > { %1934 = vadd.xlane.f32.xlu1 %v1933_v34  ;;  %1937 = vadd.xlane.f32.xlu0 %v1936_v37 }
 0x52b   : > { %1940 = vadd.xlane.f32.xlu1 %v1939_v38 }
 0x5a8   : > { %v1920_v44 = vpop.xlane.xlu0 %1919 }
 0x5a9   : > { %v1942_v45 = vmul.f32 0.03125, %v1920_v44 }
 0x5ab   : > { %v1950_v46 = vadd.f32 1e-06, %v1942_v45 }
 0x5ac   : > { %v1923_v47 = vpop.xlane.xlu1 %1922  ;;  %v1926_v48 = vpop.xlane.xlu0 %1925 }
 0x5ad   : > { %6131 = vrsqrt.f32 %v1950_v46  ;;  %v1943_v50 = vmul.f32 0.03125, %v1923_v47  ;;  %v1944_v51 = vmul.f32 0.03125, %v1926_v48 }
 0x5af   : > { %v1951_v52 = vadd.f32 1e-06, %v1943_v50  ;;  %v1952_v53 = vadd.f32 1e-06, %v1944_v51  ;;  %v5356_v50 = vld [vmem:[%s10004_s24] ss:$0 sm:$0xff] }
 0x5b0   : > { %v1929_v54 = vpop.xlane.xlu1 %1928  ;;  %v1932_v55 = vpop.xlane.xlu0 %1931  ;;  %s10017_s24 = scalar_lea.vmem [#allocation29], %s8659_s25 }
 0x5b1   : > { %6133 = vrsqrt.f32 %v1951_v52  ;;  %v1945_v57 = vmul.f32 0.03125, %v1929_v54  ;;  %v1946_v58 = vmul.f32 0.03125, %v1932_v55  ;;  %v5363_v52 = vld [vmem:[%s10005_s3] ss:$0 sm:$0xff]  ;;  %s10018_s3 = scalar_lea.vmem [#allocation30], %s8662_s10  ;;  %s10020_s10 = scalar_lea.vmem [#allocation9], %s8637_s22 }
 0x5b2   : > { %6135 = vrsqrt.f32 %v1952_v53  ;;  %s10021_s22 = scalar_lea.vmem [#allocation31], %s8659_s25 }
 0x5b3   : > { %v1953_v60 = vadd.f32 1e-06, %v1945_v57  ;;  %v1954_v61 = vadd.f32 1e-06, %v1946_v58 }
 0x5b4   : > { %v1935_v62 = vpop.xlane.xlu1 %1934  ;;  %v1938_v63 = vpop.xlane.xlu0 %1937 }
 0x5b5   : > { %6137 = vrsqrt.f32 %v1953_v60  ;;  %v1947_v2 = vmul.f32 0.03125, %v1935_v62  ;;  %v1948_v5 = vmul.f32 0.03125, %v1938_v63 }
 0x5b6   : > { %6139 = vrsqrt.f32 %v1954_v61 }
 0x5b7   : > { %v6132_v6 = vpop.eup %6131  ;;  %v1955_v7 = vadd.f32 1e-06, %v1947_v2  ;;  %v1956_v8 = vadd.f32 1e-06, %v1948_v5 }
 0x5b8   : > { %v1941_v9 = vpop.xlane.xlu1 %1940  ;;  %v1966_v10 = vmul.f32 %v6132_v6, %v8857_v3 }
 0x5b9   : > { %6141 = vrsqrt.f32 %v1955_v7  ;;  %v1949_v15 = vmul.f32 0.03125, %v1941_v9 }
 0x5ba   : > { %6143 = vrsqrt.f32 %v1956_v8  ;;  %v1979_v20 = vmul.f32 %v1978_v13, %v1966_v10 }
 0x5bb   : > { %v6134_v16 = vpop.eup %6133  ;;  %v1957_v17 = vadd.f32 1e-06, %v1949_v15 }
 0x5bc   : > { %v6136_v18 = vpop.eup %6135  ;;  %v1967_v19 = vmul.f32 %v6134_v16, %v8865_v11  ;;  %v1991_v27 = vadd.f32 %v1990_v23, %v1979_v20 }
 0x5bd   : > { %6145 = vrsqrt.f32 %v1957_v17  ;;  %v1968_v24 = vmul.f32 %v6136_v18, %v8859_v4 }
 0x5be   : > { %v1980_v25 = vmul.f32 %v1978_v13, %v1967_v19 }
 0x5bf   : > { %v6138_v3 = vpop.eup %6137  ;;  %v1981_v30 = vmul.f32 %v1978_v13, %v1968_v24 }
 0x5c0   : > { %v6140_v26 = vpop.eup %6139  ;;  %v1992_v28 = vadd.f32 %v1990_v23, %v1980_v25  ;;  %v1969_v29 = vmul.f32 %v6138_v3, %v8867_v12 }
 0x5c1   : > { %v1970_v33 = vmul.f32 %v6140_v26, %v8875_v21  ;;  %v1993_v4 = vadd.f32 %v1990_v23, %v1981_v30 }
 0x5c2   : > { %v2004_v34 = vpack.c.bf16 %v1992_v28, %v1991_v27  ;;  %v1982_v35 = vmul.f32 %v1978_v13, %v1969_v29 }
 0x5c3   : > { %v6142_v11 = vpop.eup %6141  ;;  %v1983_v36 = vmul.f32 %v1978_v13, %v1970_v33 }
 0x5c4   : > { %v6144_v37 = vpop.eup %6143  ;;  %v1971_v38 = vmul.f32 %v6142_v11, %v8877_v22  ;;  %5622 = vmatprep.mubr.msk.bf16.mxu0 %vm1868_vm3, %v2004_v34  ;;  %5634 = vmatprep.mubr.msk.bf16.mxu1 %vm1868_vm3, %v2004_v34  ;;  %v1994_v39 = vadd.f32 %v1990_v23, %v1982_v35 }
 0x5c5   : > { %v1972_v40 = vmul.f32 %v6144_v37, %v8885_v31  ;;  %v1995_v44 = vadd.f32 %v1990_v23, %v1983_v36 }
 0x5c6   : > { %v2005_v12 = vpack.c.bf16 %v1994_v39, %v1993_v4  ;;  %v1984_v41 = vmul.f32 %v1978_v13, %v1971_v38  ;;  %v5370_v38 = vld [vmem:[%s10006_s0] ss:$0 sm:$0xff] }
 0x5c7   : > { %v6146_v21 = vpop.eup %6145  ;;  %v1985_v46 = vmul.f32 %v1978_v13, %v1972_v40 }
 0x5c8   : > { %v1973_v45 = vmul.f32 %v6146_v21, %v8887_v32  ;;  %5623 = vmatmul.mubr.msk.bf16.vlgmr.msra.gmra.mrb[0].mxu0 %vm1868_vm3, %v2005_v12  ;;  %5635 = vmatmul.mubr.msk.bf16.vlgmr.msra.gmra.mrb[0].mxu1 %vm1868_vm3, %v2005_v12  ;;  %v1996_v22 = vadd.f32 %v1990_v23, %v1984_v41 }
 0x5c9   : > { %5643 = vmatpush3.bf16.msra.mxu0 %v8907_v43  ;;  %v1997_v31 = vadd.f32 %v1990_v23, %v1985_v46 }
 0x5ca   : > { %v2006_v47 = vpack.c.bf16 %v1996_v22, %v1995_v44  ;;  %v1986_v48 = vmul.f32 %v1978_v13, %v1973_v45  ;;  %5644 = vmatprep.subr.bf16.mxu0 %v6112_v42 }
 0x5cc   : > { %5626 = vmatprep.mubr.msk.bf16.mxu0 %vm1868_vm3, %v2006_v47  ;;  %5638 = vmatprep.mubr.msk.bf16.mxu1 %vm1868_vm3, %v2006_v47  ;;  %v1998_v49 = vadd.f32 %v1990_v23, %v1986_v48 }
 0x5cd   : > { %5645 = vmatpush3.bf16.msra.mxu0 %v6112_v42 }
 0x5ce   : > { %v2007_v32 = vpack.c.bf16 %v1998_v49, %v1997_v31 }
 0x5d0   : > { %5627 = vmatmul.mubr.msk.bf16.gmra.mrb[4].mxu0 %vm1868_vm3, %v2007_v32  ;;  %5639 = vmatmul.mubr.msk.bf16.gmra.mrb[4].mxu1 %vm1868_vm3, %v2007_v32 }
 0x5d1   : > { %5646 = vmatprep.mubr.msk.bf16.mxu0 %vm1868_vm3, %v2004_v34 }
 0x5d8   : > { %5647 = vmatmul.mubr.msk.bf16.vlgmr.msra.gmra.mrb[8].mxu0 %vm1868_vm3, %v2005_v12 }
 0x5d9   : > { %5650 = vmatprep.mubr.msk.bf16.mxu0 %vm1868_vm3, %v2006_v47 }
 0x5e0   : > { %5651 = vmatmul.mubr.msk.bf16.gmra.mrb[12].mxu0 %vm1868_vm3, %v2007_v32 }
 0x69b   : > { %v5624_v43 = vpop.f32.mrb[0].mxu0  ;;  %v5636_v51 = vpop.f32.mrb[0].mxu1 }
 0x69c   : > { %v2072_v53 = vpop.f32.mrb[1].mxu0  ;;  %v2160_v54 = vpop.f32.mrb[1].mxu1  ;;  %v2081_v58 = vadd.f32 %v5624_v43, %v5356_v50  ;;  %v2169_v60 = vadd.f32 %v5636_v51, %v5363_v52 }
 0x69d   : > { %v5625_v55 = vpop.f32.mrb[2].mxu0  ;;  %v5637_v57 = vpop.f32.mrb[2].mxu1  ;;  %v2073_v2 = vadd.f32 %v5356_v50, %v2072_v53  ;;  %v2161_v5 = vadd.f32 %v5363_v52, %v2160_v54 }
 0x69e   : > { %v2084_v61 = vadd.f32 %v5625_v55, %v5356_v50  ;;  %v2172_v62 = vadd.f32 %v5637_v57, %v5363_v52  ;;  %v2075_v63 = vpop.f32.mrb[3].mxu0  ;;  %v2163_v1 = vpop.f32.mrb[3].mxu1 }
 0x69f   : > { %v2076_v6 = vadd.f32 %v5356_v50, %v2075_v63  ;;  %v2164_v7 = vadd.f32 %v5363_v52, %v2163_v1 }
 0x6a0   : > { %v8950_v8 = vpack.c.bf16 %v2084_v61, %v2081_v58  ;;  %v2288_v9 = vpack.c.bf16 %v2172_v62, %v2169_v60 }
 0x6a1   : > { %v2283_v10 = vpack.c.bf16 %v2076_v6, %v2073_v2  ;;  %v2287_v13 = vpack.c.bf16 %v2164_v7, %v2161_v5 }
 0x6a2   : > { %2301 = vrot.lane.b32.xlu1 %v8950_v8, %s7420_s5  ;;  %v2336_v4 = vsel %vm2307_vm4, %v2288_v9, 0 }
 0x6a3   : > { %5882 = vmatprep.subr.msk.bf16.mxu1 %vm2307_vm4, %v2287_v13  ;;  %2299 = vrot.lane.b32.xlu0 %v2283_v10, %s7420_s5  ;;  %v5628_v14 = vpop.f32.mrb[4].mxu0  ;;  %v5640_v15 = vpop.f32.mrb[4].mxu1  ;;  %v2333_v16 = vsel %vm2307_vm4, %v2287_v13, 0 }
 0x6a4   : > { %5662 = vmatprep.mubr.msk.bf16.mxu1 %vm2307_vm4, %v2283_v10  ;;  %v2088_v17 = vpop.f32.mrb[5].mxu0  ;;  %v2176_v18 = vpop.f32.mrb[5].mxu1  ;;  %5655 = vmatpush3.bf16.xpose.msra.mxu1 %v2333_v16  ;;  %v2097_v23 = vadd.f32 %v5628_v14, %v5356_v50  ;;  %v2185_v24 = vadd.f32 %v5640_v15, %v5363_v52 }
 0x6a5   : > { %v5629_v19 = vpop.f32.mrb[6].mxu0  ;;  %v5641_v20 = vpop.f32.mrb[6].mxu1  ;;  %5883 = vmatprep.subr.msk.bf16.mxu1 %vm2307_vm4, %v2288_v9  ;;  %v2089_v28 = vadd.f32 %v5356_v50, %v2088_v17  ;;  %v2177_v29 = vadd.f32 %v5363_v52, %v2176_v18 }
 0x6a6   : > { %v2100_v25 = vadd.f32 %v5629_v19, %v5356_v50  ;;  %v2188_v3 = vadd.f32 %v5641_v20, %v5363_v52  ;;  %v2091_v26 = vpop.f32.mrb[7].mxu0  ;;  %v2179_v27 = vpop.f32.mrb[7].mxu1 }
 0x6a7   : > { %v2092_v30 = vadd.f32 %v5356_v50, %v2091_v26  ;;  %v2180_v33 = vadd.f32 %v5363_v52, %v2179_v27 }
 0x6a8   : > { %v2286_v34 = vpack.c.bf16 %v2100_v25, %v2097_v23  ;;  %v2290_v35 = vpack.c.bf16 %v2188_v3, %v2185_v24 }
 0x6a9   : > { %v2285_v11 = vpack.c.bf16 %v2092_v30, %v2089_v28  ;;  %v2289_v36 = vpack.c.bf16 %v2180_v33, %v2177_v29 }
 0x6aa   : > { %v2342_v54 = vsel %vm2307_vm4, %v2290_v35, 0 }
 0x6ab   : > { %v5648_v37 = vpop.f32.mrb[8].mxu0  ;;  %2303 = vrot.lane.b32.xlu1 %v2285_v11, %s7420_s5  ;;  %v2339_v47 = vsel %vm2307_vm4, %v2289_v36, 0 }
 0x6ac   : > { %v2248_v39 = vpop.f32.mrb[9].mxu0  ;;  %5657 = vmatpush3.bf16.xpose.msra.mxu1 %v2336_v4  ;;  %v2257_v12 = vadd.f32 %v5648_v37, %v5370_v38 }
 0x6ad   : > { %v5649_v40 = vpop.f32.mrb[10].mxu0  ;;  %5884 = vmatprep.subr.msk.bf16.mxu1 %vm2307_vm4, %v2289_v36  ;;  %v2249_v21 = vadd.f32 %v5370_v38, %v2248_v39 }
 0x6ae   : > { %v2260_v41 = vadd.f32 %v5649_v40, %v5370_v38  ;;  %v2251_v42 = vpop.f32.mrb[11].mxu0 }
 0x6af   : > { %v2252_v44 = vadd.f32 %v5370_v38, %v2251_v42  ;;  %2305 = vrot.lane.b32.xlu1 %v2286_v34, %s7420_s5 }
 0x6b0   : > { %v2292_v45 = vpack.c.bf16 %v2260_v41, %v2257_v12 }
 0x6b1   : > { %v2291_v22 = vpack.c.bf16 %v2252_v44, %v2249_v21 }
 0x6b3   : > { %v5652_v46 = vpop.f32.mrb[12].mxu0  ;;  %5678 = vmatprep.subr.bf16.mxu0 %v2291_v22 }
 0x6b4   : > { %v2264_v48 = vpop.f32.mrb[13].mxu0  ;;  %5659 = vmatpush3.bf16.xpose.msra.mxu1 %v2339_v47  ;;  %5679 = vmatpush3.bf16.msra.mxu0 %v2291_v22  ;;  %v2273_v49 = vadd.f32 %v5652_v46, %v5370_v38 }
 0x6b5   : > { %v5653_v31 = vpop.f32.mrb[14].mxu0  ;;  %5885 = vmatprep.subr.msk.bf16.mxu1 %vm2307_vm4, %v2290_v35  ;;  %5680 = vmatprep.subr.bf16.mxu0 %v2292_v45  ;;  %v2265_v50 = vadd.f32 %v5370_v38, %v2264_v48 }
 0x6b6   : > { %v2276_v32 = vadd.f32 %v5653_v31, %v5370_v38  ;;  %v2267_v43 = vpop.f32.mrb[15].mxu0 }
 0x6b7   : > { %v2268_v51 = vadd.f32 %v5370_v38, %v2267_v43 }
 0x6b8   : > { %v2294_v52 = vpack.c.bf16 %v2276_v32, %v2273_v49  ;;  %5681 = vmatpush3.bf16.msra.mxu0 %v2292_v45 }
 0x6b9   : > { %v2293_v53 = vpack.c.bf16 %v2268_v51, %v2265_v50 }
 0x6bb   : > { %5682 = vmatprep.subr.bf16.mxu0 %v2293_v53 }
 0x6bc   : > { %5661 = vmatpush3.bf16.xpose.msra.mxu1 %v2342_v54  ;;  %5683 = vmatpush3.bf16.msra.mxu0 %v2293_v53 }
 0x6bd   : > { %5684 = vmatprep.subr.bf16.mxu0 %v2294_v52 }
 0x6c0   : > { %5685 = vmatpush3.bf16.msra.mxu0 %v2294_v52 }
 0x6c3   : > { %5663 = vmatmul.mubr.msk.bf16.vlgmr.msra.gmra.mrb[8].mxu1 %vm2307_vm4, %v8950_v8 }
 0x6c4   : > { %5666 = vmatprep.mubr.msk.bf16.mxu1 %vm2307_vm4, %v2285_v11 }
 0x6cb   : > { %5667 = vmatmul.mubr.msk.bf16.gmra.mrb[12].mxu1 %vm2307_vm4, %v2286_v34 }
 0x714   : > { %v2302_v57 = vpop.permute.xlu1 %2301 }
 0x715   : > { %v2300_v55 = vpop.permute.xlu0 %2299 }
 0x716   : > { %5670 = vmatprep.mubr.msk.bf16.mxu1 %vm2307_vm4, %v2300_v55 }
 0x717   : > { %5671 = vmatmul.mubr.msk.bf16.gmra.mrb[16].mxu1 %vm2307_vm4, %v2302_v57 }
 0x71d   : > { %v2304_v58 = vpop.permute.xlu1 %2303 }
 0x71e   : > { %5674 = vmatprep.mubr.msk.bf16.mxu1 %vm2307_vm4, %v2304_v58 }
 0x721   : > { %v2306_v60 = vpop.permute.xlu1 %2305 }
 0x722   : > { %5675 = vmatmul.mubr.msk.bf16.gmra.mrb[20].mxu1 %vm2307_vm4, %v2306_v60 }
 0x796   : > { %v5664_v61 = vpop.f32.mrb[8].mxu1 }
 0x797   : > { %v2378_v62 = vpop.f32.mrb[9].mxu1  ;;  %v2448_v6 = vsel %vm2441_vm5, %v5664_v61, -inf }
 0x798   : > { %v5665_v63 = vpop.f32.mrb[10].mxu1  ;;  %v2442_v1 = vsel %vm2441_vm5, %v2378_v62, -inf }
 0x799   : > { %2443 = vmax.xlane.f32.xlu0 %v2442_v1  ;;  %v2381_v2 = vpop.f32.mrb[11].mxu1  ;;  %v2451_v10 = vsel %vm2441_vm5, %v5665_v63, -inf }
 0x79a   : > { %v2445_v5 = vsel %vm2441_vm5, %v2381_v2, -inf }
 0x79b   : > { %2446 = vmax.xlane.f32.xlu1 %v2445_v5 }
 0x79d   : > { %2449 = vmax.xlane.f32.xlu0 %v2448_v6 }
 0x79e   : > { %v8979_v7 = vpop.f32.mrb[12].mxu1 }
 0x79f   : > { %v2394_v8 = vpop.f32.mrb[13].mxu1  ;;  %v2460_v17 = vsel %vm2441_vm5, %v8979_v7, -inf }
 0x7a0   : > { %v8981_v9 = vpop.f32.mrb[14].mxu1  ;;  %v2454_v15 = vsel %vm2441_vm5, %v2394_v8, -inf }
 0x7a1   : > { %2452 = vmax.xlane.f32.xlu0 %v2451_v10  ;;  %v2397_v13 = vpop.f32.mrb[15].mxu1  ;;  %v2463_v16 = vsel %vm2441_vm5, %v8981_v9, -inf }
 0x7a2   : > { %v2457_v14 = vsel %vm2441_vm5, %v2397_v13, -inf }
 0x7a3   : > { %2458 = vmax.xlane.f32.xlu1 %v2457_v14 }
 0x7a5   : > { %2455 = vmax.xlane.f32.xlu0 %v2454_v15 }
 0x7a7   : > { %2464 = vmax.xlane.f32.xlu1 %v2463_v16 }
 0x7a9   : > { %2461 = vmax.xlane.f32.xlu0 %v2460_v17 }
 0x7ea   : > { %v8990_v18 = vpop.f32.mrb[16].mxu1 }
 0x7eb   : > { %v8992_v19 = vpop.f32.mrb[17].mxu1  ;;  %v2472_v3 = vsel %vm2441_vm5, %v8990_v18, -inf }
 0x7ec   : > { %v8994_v20 = vpop.f32.mrb[18].mxu1  ;;  %v2466_v23 = vsel %vm2441_vm5, %v8992_v19, -inf }
 0x7ed   : > { %2467 = vmax.xlane.f32.xlu0 %v2466_v23  ;;  %v8998_v24 = vpop.f32.mrb[19].mxu1  ;;  %v2475_v26 = vsel %vm2441_vm5, %v8994_v20, -inf }
 0x7ee   : > { %v2469_v25 = vsel %vm2441_vm5, %v8998_v24, -inf }
 0x7ef   : > { %2470 = vmax.xlane.f32.xlu1 %v2469_v25 }
 0x7f1   : > { %2473 = vmax.xlane.f32.xlu0 %v2472_v3 }
 0x7f3   : > { %2476 = vmax.xlane.f32.xlu1 %v2475_v26 }
 0x7f5   : > { %v9006_v27 = vpop.f32.mrb[20].mxu1 }
 0x7f6   : > { %v9008_v28 = vpop.f32.mrb[21].mxu1  ;;  %v2484_v35 = vsel %vm2441_vm5, %v9006_v27, -inf }
 0x7f7   : > { %v9010_v29 = vpop.f32.mrb[22].mxu1  ;;  %v2478_v30 = vsel %vm2441_vm5, %v9008_v28, -inf }
 0x7f8   : > { %2479 = vmax.xlane.f32.xlu0 %v2478_v30  ;;  %v9014_v33 = vpop.f32.mrb[23].mxu1  ;;  %v2487_v11 = vsel %vm2441_vm5, %v9010_v29, -inf }
 0x7f9   : > { %v2481_v34 = vsel %vm2441_vm5, %v9014_v33, -inf }
 0x7fa   : > { %2482 = vmax.xlane.f32.xlu1 %v2481_v34 }
 0x7fc   : > { %2485 = vmax.xlane.f32.xlu0 %v2484_v35 }
 0x7fe   : > { %2488 = vmax.xlane.f32.xlu1 %v2487_v11 }
 0x826   : > { %v2444_v36 = vpop.xlane.xlu0 %2443 }
 0x827   : > { %v2490_v37 = vsub.f32 %v2378_v62, %v2444_v36 }
 0x828   : > { %v2447_v38 = vpop.xlane.xlu1 %2446 }
 0x829   : > { %v2506_v4 = vmul.f32 1.442695, %v2490_v37  ;;  %v2491_v39 = vsub.f32 %v2381_v2, %v2447_v38 }
 0x82a   : > { %v2450_v40 = vpop.xlane.xlu0 %2449 }
 0x82b   : > { %v2508_v12 = vmul.f32 1.442695, %v2491_v39  ;;  %v2492_v41 = vsub.f32 %v5664_v61, %v2450_v40  ;;  %6147 = vpow2.f32 %v2506_v4 }
 0x82d   : > { %6149 = vpow2.f32 %v2508_v12  ;;  %v2510_v42 = vmul.f32 1.442695, %v2492_v41 }
 0x82e   : > { %v2453_v21 = vpop.xlane.xlu0 %2452 }
 0x82f   : > { %v2493_v44 = vsub.f32 %v5665_v63, %v2453_v21  ;;  %6151 = vpow2.f32 %v2510_v42 }
 0x830   : > { %v2459_v45 = vpop.xlane.xlu1 %2458 }
 0x831   : > { %v2512_v22 = vmul.f32 1.442695, %v2493_v44  ;;  %v2495_v46 = vsub.f32 %v2397_v13, %v2459_v45 }
 0x832   : > { %v2456_v47 = vpop.xlane.xlu0 %2455 }
 0x833   : > { %6153 = vpow2.f32 %v2512_v22  ;;  %v2516_v48 = vmul.f32 1.442695, %v2495_v46  ;;  %v2494_v31 = vsub.f32 %v2394_v8, %v2456_v47 }
 0x834   : > { %v2465_v49 = vpop.xlane.xlu1 %2464 }
 0x835   : > { %v2514_v32 = vmul.f32 1.442695, %v2494_v31  ;;  %v2497_v43 = vsub.f32 %v8981_v9, %v2465_v49  ;;  %v9023_v50 = vpop.eup %6147  ;;  %6155 = vpow2.f32 %v2516_v48 }
 0x836   : > { %v2462_v51 = vpop.xlane.xlu0 %2461 }
 0x837   : > { %v9025_v52 = vpop.eup %6149  ;;  %6157 = vpow2.f32 %v2514_v32  ;;  %v2520_v53 = vmul.f32 1.442695, %v2497_v43  ;;  %v2496_v54 = vsub.f32 %v8979_v7, %v2462_v51  ;;  %v2538_v43 = vsel %vm2441_vm5, %v9023_v50, 0.0 }
 0x838   : > { %v2586_v55 = vpack.c.bf16 %v9025_v52, %v9023_v50  ;;  %v2541_v51 = vsel %vm2441_vm5, %v9025_v52, 0.0 }
 0x839   : > { %v2518_v57 = vmul.f32 1.442695, %v2496_v54  ;;  %6159 = vpow2.f32 %v2520_v53  ;;  %v9031_v58 = vpop.eup %6151 }
 0x83a   : > { %5686 = vmatprep.mubr.msk.bf16.mxu0 %vm2441_vm5, %v2586_v55  ;;  %v2544_v53 = vsel %vm2441_vm5, %v9031_v58, 0.0 }
 0x83b   : > { %6161 = vpow2.f32 %v2518_v57 }
 0x83d   : > { %v9033_v60 = vpop.eup %6153 }
 0x83e   : > { %v2587_v61 = vpack.c.bf16 %v9033_v60, %v9031_v58  ;;  %v2547_v54 = vsel %vm2441_vm5, %v9033_v60, 0.0  ;;  %v6113_v58 = vld [vmem:[%s10007_s12 + $0x8] sm:$0xff]  }
 0x83f   : > { %v9037_v62 = vpop.eup %6155  ;;  %5702 = vmatprep.subr.bf16.mxu0 %v6113_v58  ;;  %v9092_v60 = vld [vmem:[%s10008_s20] sm:$0xff]  }
 0x840   : > { %5687 = vmatmul.mubr.msk.bf16.vlgmr.msra.gmra.mrb[16].mxu0 %vm2441_vm5, %v2587_v61  ;;  %v2553_v50 = vsel %vm2441_vm5, %v9037_v62, 0.0 }
 0x841   : > { %v9040_v63 = vpop.eup %6157  ;;  %5703 = vmatpush3.bf16.msra.mxu0 %v6113_v58 }
 0x842   : > { %v2588_v1 = vpack.c.bf16 %v9037_v62, %v9040_v63  ;;  %v2550_v55 = vsel %vm2441_vm5, %v9040_v63, 0.0  ;;  %5712 = vmatprep.subr.bf16.mxu0 %v9092_v60 }
 0x843   : > { %v9044_v2 = vpop.eup %6159 }
 0x844   : > { %5690 = vmatprep.mubr.msk.bf16.mxu0 %vm2441_vm5, %v2588_v1  ;;  %v2559_v57 = vsel %vm2441_vm5, %v9044_v2, 0.0 }
 0x845   : > { %v9047_v5 = vpop.eup %6161 }
 0x846   : > { %v2589_v6 = vpack.c.bf16 %v9044_v2, %v9047_v5  ;;  %v2556_v52 = vsel %vm2441_vm5, %v9047_v5, 0.0 }
 0x848   : > { %5691 = vmatmul.mubr.msk.bf16.gmra.mrb[20].mxu0 %vm2441_vm5, %v2589_v6 }
 0x87a   : > { %v2468_v7 = vpop.xlane.xlu0 %2467 }
 0x87b   : > { %v2498_v8 = vsub.f32 %v8992_v19, %v2468_v7 }
 0x87c   : > { %v2471_v9 = vpop.xlane.xlu1 %2470 }
 0x87d   : > { %v2522_v10 = vmul.f32 1.442695, %v2498_v8  ;;  %v2499_v13 = vsub.f32 %v8998_v24, %v2471_v9 }
 0x87e   : > { %v2474_v14 = vpop.xlane.xlu0 %2473 }
 0x87f   : > { %6163 = vpow2.f32 %v2522_v10  ;;  %v2524_v15 = vmul.f32 1.442695, %v2499_v13  ;;  %v2500_v16 = vsub.f32 %v8990_v18, %v2474_v14 }
 0x880   : > { %v2477_v17 = vpop.xlane.xlu1 %2476 }
 0x881   : > { %6165 = vpow2.f32 %v2524_v15  ;;  %v2526_v23 = vmul.f32 1.442695, %v2500_v16  ;;  %v2501_v25 = vsub.f32 %v8994_v20, %v2477_v17 }
 0x883   : > { %6167 = vpow2.f32 %v2526_v23  ;;  %v2528_v3 = vmul.f32 1.442695, %v2501_v25 }
 0x885   : > { %6169 = vpow2.f32 %v2528_v3  ;;  %v2480_v26 = vpop.xlane.xlu0 %2479 }
 0x886   : > { %v2502_v19 = vsub.f32 %v9008_v28, %v2480_v26 }
 0x887   : > { %v2483_v30 = vpop.xlane.xlu1 %2482 }
 0x888   : > { %v2530_v34 = vmul.f32 1.442695, %v2502_v19  ;;  %v2503_v24 = vsub.f32 %v9014_v33, %v2483_v30 }
 0x889   : > { %v6164_v35 = vpop.eup %6163  ;;  %v2486_v11 = vpop.xlane.xlu0 %2485 }
 0x88a   : > { %6171 = vpow2.f32 %v2530_v34  ;;  %v2532_v36 = vmul.f32 1.442695, %v2503_v24  ;;  %v2504_v18 = vsub.f32 %v9006_v27, %v2486_v11  ;;  %v2562_v37 = vsel %vm2441_vm5, %v6164_v35, 0.0 }
 0x88b   : > { %v6166_v38 = vpop.eup %6165  ;;  %v2489_v20 = vpop.xlane.xlu1 %2488  ;;  %2563 = vadd.xlane.f32.xlu0 %v2562_v37 }
 0x88c   : > { %6173 = vpow2.f32 %v2532_v36  ;;  %v2534_v4 = vmul.f32 1.442695, %v2504_v18  ;;  %v2505_v39 = vsub.f32 %v9010_v29, %v2489_v20  ;;  %v2565_v28 = vsel %vm2441_vm5, %v6166_v38, 0.0 }
 0x88d   : > { %v6168_v40 = vpop.eup %6167  ;;  %2566 = vadd.xlane.f32.xlu1 %v2565_v28  ;;  %v2590_v33 = vpack.c.bf16 %v6166_v38, %v6164_v35 }
 0x88e   : > { %6175 = vpow2.f32 %v2534_v4  ;;  %v2536_v12 = vmul.f32 1.442695, %v2505_v39  ;;  %v2568_v41 = vsel %vm2441_vm5, %v6168_v40, 0.0 }
 0x88f   : > { %v6170_v42 = vpop.eup %6169  ;;  %5694 = vmatprep.mubr.msk.bf16.mxu0 %vm2441_vm5, %v2590_v33  ;;  %2569 = vadd.xlane.f32.xlu0 %v2568_v41 }
 0x890   : > { %6177 = vpow2.f32 %v2536_v12  ;;  %v2571_v27 = vsel %vm2441_vm5, %v6170_v42, 0.0  ;;  %v2591_v21 = vpack.c.bf16 %v6170_v42, %v6168_v40 }
 0x891   : > { %2572 = vadd.xlane.f32.xlu1 %v2571_v27 }
 0x892   : > { %5695 = vmatmul.mubr.msk.bf16.gmra.mrb[24].mxu0 %vm2441_vm5, %v2591_v21 }
 0x894   : > { %v6172_v29 = vpop.eup %6171 }
 0x895   : > { %v2574_v44 = vsel %vm2441_vm5, %v6172_v29, 0.0 }
 0x896   : > { %v6174_v45 = vpop.eup %6173  ;;  %2575 = vadd.xlane.f32.xlu0 %v2574_v44 }
 0x897   : > { %v2577_v22 = vsel %vm2441_vm5, %v6174_v45, 0.0  ;;  %v2592_v46 = vpack.c.bf16 %v6174_v45, %v6172_v29 }
 0x898   : > { %v6176_v47 = vpop.eup %6175  ;;  %2578 = vadd.xlane.f32.xlu1 %v2577_v22 }
 0x899   : > { %5698 = vmatprep.mubr.msk.bf16.mxu0 %vm2441_vm5, %v2592_v46  ;;  %v2580_v48 = vsel %vm2441_vm5, %v6176_v47, 0.0 }
 0x89a   : > { %v6178_v31 = vpop.eup %6177  ;;  %2581 = vadd.xlane.f32.xlu0 %v2580_v48 }
 0x89b   : > { %v2583_v49 = vsel %vm2441_vm5, %v6178_v31, 0.0  ;;  %v2593_v32 = vpack.c.bf16 %v6178_v31, %v6176_v47 }
 0x89c   : > { %2584 = vadd.xlane.f32.xlu1 %v2583_v49 }
 0x89d   : > { %5699 = vmatmul.mubr.msk.bf16.gmra.mrb[28].mxu0 %vm2441_vm5, %v2593_v32 }
 0x89e   : > { %2539 = vadd.xlane.f32.xlu0 %v2538_v43 }
 0x8a0   : > { %2542 = vadd.xlane.f32.xlu1 %v2541_v51 }
 0x8a2   : > { %2545 = vadd.xlane.f32.xlu0 %v2544_v53 }
 0x8a4   : > { %2548 = vadd.xlane.f32.xlu1 %v2547_v54 }
 0x8a6   : > { %2551 = vadd.xlane.f32.xlu0 %v2550_v55 }
 0x8a8   : > { %2554 = vadd.xlane.f32.xlu1 %v2553_v50 }
 0x8aa   : > { %2557 = vadd.xlane.f32.xlu0 %v2556_v52 }
 0x8ac   : > { %2560 = vadd.xlane.f32.xlu1 %v2559_v57 }
 0x913   : > { %v5688_v61 = vpop.f32.mrb[16].mxu0 }
 0x914   : > { %v2652_v62 = vpop.f32.mrb[17].mxu0 }
 0x915   : > { %v5689_v63 = vpop.f32.mrb[18].mxu0 }
 0x916   : > { %v2655_v1 = vpop.f32.mrb[19].mxu0 }
 0x918   : > { %v2564_v6 = vpop.xlane.xlu0 %2563 }
 0x91a   : > { %v2567_v5 = vpop.xlane.xlu1 %2566 }
 0x91b   : > { %v5692_v7 = vpop.f32.mrb[20].mxu0 }
 0x91c   : > { %v2668_v8 = vpop.f32.mrb[21].mxu0  ;;  %v2570_v10 = vpop.xlane.xlu0 %2569 }
 0x91d   : > { %v5693_v9 = vpop.f32.mrb[22].mxu0 }
 0x91e   : > { %v2671_v2 = vpop.f32.mrb[23].mxu0  ;;  %v2573_v13 = vpop.xlane.xlu1 %2572 }
 0x923   : > { %v2576_v14 = vpop.xlane.xlu0 %2575 }
 0x925   : > { %v2579_v15 = vpop.xlane.xlu1 %2578 }
 0x927   : > { %v2582_v16 = vpop.xlane.xlu0 %2581 }
 0x929   : > { %v2585_v17 = vpop.xlane.xlu1 %2584 }
 0x92b   : > { %v2540_v23 = vpop.xlane.xlu0 %2539 }
 0x92c   : > { %6179 = vrcp.f32 %v2540_v23  ;;  %v5403_v23 = vld [vmem:[%s10009_s15] ss:$0 sm:$0xff] }
 0x92d   : > { %v2543_v25 = vpop.xlane.xlu1 %2542 }
 0x92e   : > { %6181 = vrcp.f32 %v2543_v25 }
 0x92f   : > { %v2546_v3 = vpop.xlane.xlu0 %2545 }
 0x930   : > { %6183 = vrcp.f32 %v2546_v3 }
 0x931   : > { %v2549_v26 = vpop.xlane.xlu1 %2548 }
 0x932   : > { %6185 = vrcp.f32 %v2549_v26 }
 0x933   : > { %v2552_v19 = vpop.xlane.xlu0 %2551 }
 0x934   : > { %6187 = vrcp.f32 %v2552_v19 }
 0x935   : > { %v2555_v30 = vpop.xlane.xlu1 %2554 }
 0x936   : > { %v6180_v34 = vpop.eup %6179  ;;  %6189 = vrcp.f32 %v2555_v30 }
 0x937   : > { %v2558_v24 = vpop.xlane.xlu0 %2557  ;;  %v2731_v36 = vmul.f32 %v6180_v34, %v2652_v62 }
 0x938   : > { %v6182_v35 = vpop.eup %6181  ;;  %6191 = vrcp.f32 %v2558_v24 }
 0x939   : > { %v2561_v11 = vpop.xlane.xlu1 %2560  ;;  %v2732_v18 = vmul.f32 %v6182_v35, %v2655_v1 }
 0x93a   : > { %v6184_v37 = vpop.eup %6183  ;;  %6193 = vrcp.f32 %v2561_v11 }
 0x93b   : > { %v2747_v38 = vpack.c.bf16 %v2732_v18, %v2731_v36  ;;  %v2733_v4 = vmul.f32 %v6184_v37, %v5688_v61  ;;  %6195 = vrcp.f32 %v2564_v6 }
 0x93c   : > { %v6186_v20 = vpop.eup %6185  ;;  %6197 = vrcp.f32 %v2570_v10 }
 0x93d   : > { %v2734_v39 = vmul.f32 %v6186_v20, %v5689_v63  ;;  %6199 = vrcp.f32 %v2573_v13  ;;  %v6323_v20 = vld [vmem:[#allocation2 + $0x20] sm:$0xff] }
 0x93e   : > { %v6188_v28 = vpop.eup %6187  ;;  %6201 = vrcp.f32 %v2567_v5 }
 0x93f   : > { %v2748_v40 = vpack.c.bf16 %v2734_v39, %v2733_v4  ;;  %v2735_v12 = vmul.f32 %v6188_v28, %v2668_v8  ;;  %6203 = vrcp.f32 %v2576_v14 }
 0x940   : > { %v6190_v33 = vpop.eup %6189  ;;  %6205 = vrcp.f32 %v2582_v16 }
 0x941   : > { %v2736_v41 = vmul.f32 %v6190_v33, %v2671_v2  ;;  %6207 = vrcp.f32 %v2585_v17  ;;  %v2938_v17 = vsub.s32 2, %v8910_v56 }
 0x942   : > { %v6192_v42 = vpop.eup %6191  ;;  %6209 = vrcp.f32 %v2579_v15 }
 0x943   : > { %v2749_v27 = vpack.c.bf16 %v2736_v41, %v2735_v12  ;;  %v2737_v29 = vmul.f32 %v6192_v42, %v5692_v7  ;;  %v2939_v19 = vrot.slane %v8914_v59, %v2938_v17  ;;  %v6324_v12 = vld [vmem:[#allocation2 + $0x30] sm:$0xff]  ;;  %v6325_v59 = vld [vmem:[#allocation2 + $0x28] sm:$0xff] }
 0x944   : > { %v6194_v21 = vpop.eup %6193 }
 0x945   : > { %v2738_v44 = vmul.f32 %v6194_v21, %v5693_v9  ;;  %v6196_v22 = vpop.eup %6195 }
 0x946   : > { %v6198_v47 = vpop.eup %6197 }
 0x947   : > { %v2750_v45 = vpack.c.bf16 %v2738_v44, %v2737_v29  ;;  %v6200_v31 = vpop.eup %6199  ;;  %v6326_v44 = vld [vmem:[#allocation2 + $0x38] sm:$0xff] }
 0x948   : > { %v6202_v32 = vpop.eup %6201 }
 0x949   : > { %v6204_v57 = vpop.eup %6203 }
 0x94a   : > { %v6206_v61 = vpop.eup %6205 }
 0x94b   : > { %v6208_v63 = vpop.eup %6207 }
 0x94c   : > { %v6210_v6 = vpop.eup %6209 }
 0x965   : > { %v5696_v46 = vpop.f32.mrb[24].mxu0 }
 0x966   : > { %v2684_v48 = vpop.f32.mrb[25].mxu0  ;;  %v2741_v43 = vmul.f32 %v6198_v47, %v5696_v46  ;;  %v6327_v47 = vld [vmem:[#allocation2] sm:$0xff] }
 0x967   : > { %v5697_v49 = vpop.f32.mrb[26].mxu0  ;;  %v2739_v54 = vmul.f32 %v6196_v22, %v2684_v48 }
 0x968   : > { %v2742_v51 = vmul.f32 %v6200_v31, %v5697_v49  ;;  %v2687_v53 = vpop.f32.mrb[27].mxu0 }
 0x969   : > { %v2740_v55 = vmul.f32 %v6202_v32, %v2687_v53  ;;  %v6328_v32 = vld [vmem:[#allocation2 + $0x8] sm:$0xff]  ;;  %v6329_v53 = vld [vmem:[#allocation2 + $0x10] sm:$0xff] }
 0x96a   : > { %v2752_v50 = vpack.c.bf16 %v2742_v51, %v2741_v43 }
 0x96b   : > { %v2751_v52 = vpack.c.bf16 %v2740_v55, %v2739_v54 }
 0x96d   : > { %5704 = vmatprep.mubr.msk.bf16.mxu0 %vm2307_vm4, %v2751_v52 }
 0x96e   : > { %5705 = vmatmul.mubr.msk.bf16.vlgmr.msra.gmra.mrb[32].mxu0 %vm2307_vm4, %v2752_v50  ;;  %v6330_v50 = vld [vmem:[#allocation2 + $0x18] sm:$0xff] }
 0x96f   : > { %5713 = vmatpush3.bf16.msra.mxu0 %v9092_v60 }
 0x970   : > { %v5700_v58 = vpop.f32.mrb[28].mxu0 }
 0x971   : > { %v2700_v62 = vpop.f32.mrb[29].mxu0  ;;  %v2745_v5 = vmul.f32 %v6206_v61, %v5700_v58 }
 0x972   : > { %v5701_v1 = vpop.f32.mrb[30].mxu0  ;;  %v2743_v9 = vmul.f32 %v6204_v57, %v2700_v62 }
 0x973   : > { %v2746_v7 = vmul.f32 %v6208_v63, %v5701_v1  ;;  %v2703_v8 = vpop.f32.mrb[31].mxu0 }
 0x974   : > { %v2744_v2 = vmul.f32 %v6210_v6, %v2703_v8 }
 0x975   : > { %v2754_v10 = vpack.c.bf16 %v2746_v7, %v2745_v5 }
 0x976   : > { %v2753_v13 = vpack.c.bf16 %v2744_v2, %v2743_v9 }
 0x978   : > { %5708 = vmatprep.mubr.msk.bf16.mxu0 %vm2307_vm4, %v2753_v13 }
 0x979   : > { %5709 = vmatmul.mubr.msk.bf16.gmra.mrb[36].mxu0 %vm2307_vm4, %v2754_v10 }
 0x97a   : > { %5714 = vmatprep.mubr.msk.bf16.mxu0 %vm2307_vm4, %v2747_v38 }
 0x981   : > { %5715 = vmatmul.mubr.msk.bf16.vlgmr.msra.gmra.mrb[32].mxu0 %vm2307_vm4, %v2748_v40 }
 0x982   : > { %5718 = vmatprep.mubr.msk.bf16.mxu0 %vm2307_vm4, %v2749_v27 }
 0x989   : > { %5719 = vmatmul.mubr.msk.bf16.gmra.mrb[36].mxu0 %vm2307_vm4, %v2750_v45 }
 0xa54   : > { %v5716_v60 = vpop.f32.mrb[32].mxu0 }
 0xa55   : > { %v2890_v14 = vpop.f32.mrb[33].mxu0  ;;  %v2930_v40 = vadd.f32 %v5716_v60, %v5403_v23 }
 0xa56   : > { %v5717_v15 = vpop.f32.mrb[34].mxu0  ;;  %v2928_v11 = vadd.f32 %v5403_v23, %v2890_v14 }
 0xa57   : > { %v2893_v16 = vpop.f32.mrb[35].mxu0  ;;  %v2931_v21 = vadd.f32 %v5717_v15, %v5403_v23  ;;  %v2942_v46 = vmul.f32 %v2939_v19, %v2930_v40 }
 0xa58   : > { %v2929_v38 = vadd.f32 %v5403_v23, %v2893_v16  ;;  %v2940_v33 = vmul.f32 %v2939_v19, %v2928_v11 }
 0xa59   : > { %v2943_v49 = vmul.f32 %v2939_v19, %v2931_v21  ;;  %v9128_v54 = vadd.f32 %v6329_v53, %v2942_v46  ;;  %v7421_v46 = vmov 0.0  }
 0xa5a   : > { %v2941_v29 = vmul.f32 %v2939_v19, %v2929_v38  ;;  %v9120_v48 = vadd.f32 %v6327_v47, %v2940_v33 }
 0xa5b   : > { %v9132_v52 = vadd.f32 %v6330_v50, %v2943_v49  ;;  %v2962_v58 = vsel %vm1868_vm3, %v9128_v54, 0.0 }
 0xa5c   : > { %v5720_v25 = vpop.f32.mrb[36].mxu0  ;;  %v9124_v43 = vadd.f32 %v6328_v32, %v2941_v29  ;;  %v2956_v55 = vsel %vm1868_vm3, %v9120_v48, 0.0 }
 0xa5d   : > { %v2934_v3 = vadd.f32 %v5720_v25, %v5403_v23  ;;  %v2906_v26 = vpop.f32.mrb[37].mxu0  ;;  %v2965_v61 = vsel %vm1868_vm3, %v9132_v52, 0.0 }
 0xa5e   : > { %v2932_v30 = vadd.f32 %v5403_v23, %v2906_v26  ;;  %v5721_v34 = vpop.f32.mrb[38].mxu0  ;;  %v2959_v57 = vsel %vm1868_vm3, %v9124_v43, 0.0 }
 0xa5f   : > { %v2935_v24 = vadd.f32 %v5721_v34, %v5403_v23  ;;  %v2909_v35 = vpop.f32.mrb[39].mxu0  ;;  %v2946_v36 = vmul.f32 %v2939_v19, %v2934_v3 }
 0xa60   : > { %v2944_v18 = vmul.f32 %v2939_v19, %v2932_v30  ;;  %v2933_v37 = vadd.f32 %v5403_v23, %v2909_v35 }
 0xa61   : > { %v2947_v39 = vmul.f32 %v2939_v19, %v2935_v24  ;;  %v9110_v41 = vadd.f32 %v6324_v12, %v2946_v36 }
 0xa62   : > { %v9108_v4 = vadd.f32 %v6323_v20, %v2944_v18  ;;  %v2945_v28 = vmul.f32 %v2939_v19, %v2933_v37 }
 0xa63   : > { %v9116_v45 = vadd.f32 %v6326_v44, %v2947_v39  ;;  %v2974_v31 = vsel %vm1868_vm3, %v9110_v41, 0.0  ;;  %v6115_v44 = vld [vmem:[%s10010_s9] sm:$0xff]  }
 0xa64   : > { %v9112_v42 = vadd.f32 %v6325_v59, %v2945_v28  ;;  %v2968_v27 = vsel %vm1868_vm3, %v9108_v4, 0.0  ;;  %5856 = vmatprep.subr.bf16.mxu1 %v6115_v44  ;;  %5722 = vmatprep.subr.bf16.mxu0 %v6115_v44 }
 0xa65   : > { %2969 = vadd.xlane.f32.xlu0 %v2968_v27  ;;  %v2977_v51 = vsel %vm1868_vm3, %v9116_v45, 0.0  ;;  %5858 = vmatpush3.bf16.msra.mxu1 %v6115_v44 }
 0xa66   : > { %v2971_v22 = vsel %vm1868_vm3, %v9112_v42, 0.0  ;;  %5723 = vmatpush3.bf16.msra.mxu0 %v6115_v44 }
 0xa67   : > { %2972 = vadd.xlane.f32.xlu1 %v2971_v22  ;;  %v6116_v22 = vld [vmem:[%s10011_s11 + $0x8] sm:$0xff]  }
 0xa68   : > { %5857 = vmatprep.subr.bf16.mxu1 %v6116_v22  ;;  %5724 = vmatprep.subr.bf16.mxu0 %v6116_v22 }
 0xa69   : > { %2975 = vadd.xlane.f32.xlu0 %v2974_v31  ;;  %5859 = vmatpush3.bf16.msra.mxu1 %v6116_v22 }
 0xa6a   : > { %5725 = vmatpush3.bf16.msra.mxu0 %v6116_v22  ;;  %5734 = vmatprep.subr.bf16.mxu1 %v7421_v46 }
 0xa6b   : > { %2978 = vadd.xlane.f32.xlu1 %v2977_v51 }
 0xa6d   : > { %2957 = vadd.xlane.f32.xlu0 %v2956_v55 }
 0xa6f   : > { %2960 = vadd.xlane.f32.xlu1 %v2959_v57 }
 0xa71   : > { %2963 = vadd.xlane.f32.xlu0 %v2962_v58 }
 0xa73   : > { %2966 = vadd.xlane.f32.xlu1 %v2965_v61 }
 0xaf2   : > { %v2970_v62 = vpop.xlane.xlu0 %2969 }
 0xaf3   : > { %v2984_v63 = vmul.f32 0.03125, %v2970_v62 }
 0xaf4   : > { %v2973_v1 = vpop.xlane.xlu1 %2972 }
 0xaf5   : > { %v9141_v6 = vsub.f32 %v9108_v4, %v2984_v63  ;;  %v2985_v5 = vmul.f32 0.03125, %v2973_v1 }
 0xaf6   : > { %v2976_v7 = vpop.xlane.xlu0 %2975 }
 0xaf7   : > { %v9144_v8 = vsub.f32 %v9112_v42, %v2985_v5  ;;  %v2986_v9 = vmul.f32 0.03125, %v2976_v7  ;;  %v3000_v2 = vmul.f32 %v9141_v6, %v9141_v6 }
 0xaf8   : > { %v2979_v10 = vpop.xlane.xlu1 %2978 }
 0xaf9   : > { %v9149_v13 = vsub.f32 %v9110_v41, %v2986_v9  ;;  %v2987_v60 = vmul.f32 0.03125, %v2979_v10  ;;  %v3016_v14 = vsel %vm1868_vm3, %v3000_v2, 0.0  ;;  %v3001_v15 = vmul.f32 %v9144_v8, %v9144_v8 }
 0xafa   : > { %3017 = vadd.xlane.f32.xlu0 %v3016_v14  ;;  %v2958_v16 = vpop.xlane.xlu0 %2957 }
 0xafb   : > { %v9155_v17 = vsub.f32 %v9116_v45, %v2987_v60  ;;  %v2980_v23 = vmul.f32 0.03125, %v2958_v16  ;;  %v3019_v25 = vsel %vm1868_vm3, %v3001_v15, 0.0  ;;  %v3002_v3 = vmul.f32 %v9149_v13, %v9149_v13 }
 0xafc   : > { %3020 = vadd.xlane.f32.xlu1 %v3019_v25  ;;  %v2961_v26 = vpop.xlane.xlu1 %2960 }
 0xafd   : > { %v9161_v19 = vsub.f32 %v9120_v48, %v2980_v23  ;;  %v2981_v30 = vmul.f32 0.03125, %v2961_v26  ;;  %v3022_v34 = vsel %vm1868_vm3, %v3002_v3, 0.0  ;;  %v3003_v24 = vmul.f32 %v9155_v17, %v9155_v17 }
 0xafe   : > { %3023 = vadd.xlane.f32.xlu0 %v3022_v34  ;;  %v2964_v35 = vpop.xlane.xlu0 %2963 }
 0xaff   : > { %v9167_v11 = vsub.f32 %v9124_v43, %v2981_v30  ;;  %v2982_v36 = vmul.f32 0.03125, %v2964_v35  ;;  %v3025_v18 = vsel %vm1868_vm3, %v3003_v24, 0.0  ;;  %v2996_v37 = vmul.f32 %v9161_v19, %v9161_v19 }
 0xb00   : > { %3026 = vadd.xlane.f32.xlu1 %v3025_v18  ;;  %v2967_v38 = vpop.xlane.xlu1 %2966 }
 0xb01   : > { %v9173_v20 = vsub.f32 %v9128_v54, %v2982_v36  ;;  %v2983_v39 = vmul.f32 0.03125, %v2967_v38  ;;  %v3004_v28 = vsel %vm1868_vm3, %v2996_v37, 0.0  ;;  %v2997_v40 = vmul.f32 %v9167_v11, %v9167_v11  ;;  %v6117_v38 = vld [vmem:[%s8735_s17] sm:$0xff]   ;;  %s10013_s17 = scalar_lea.vmem [#allocation25], %s8659_s25 }
 0xb02   : > { %3005 = vadd.xlane.f32.xlu0 %v3004_v28 }
 0xb03   : > { %v9179_v33 = vsub.f32 %v9132_v52, %v2983_v39  ;;  %v3007_v12 = vsel %vm1868_vm3, %v2997_v40, 0.0  ;;  %v2998_v59 = vmul.f32 %v9173_v20, %v9173_v20 }
 0xb04   : > { %3008 = vadd.xlane.f32.xlu1 %v3007_v12 }
 0xb05   : > { %v3010_v27 = vsel %vm1868_vm3, %v2998_v59, 0.0  ;;  %v2999_v21 = vmul.f32 %v9179_v33, %v9179_v33 }
 0xb06   : > { %3011 = vadd.xlane.f32.xlu0 %v3010_v27 }
 0xb07   : > { %v3013_v29 = vsel %vm1868_vm3, %v2999_v21, 0.0 }
 0xb08   : > { %3014 = vadd.xlane.f32.xlu1 %v3013_v29 }
 0xb87   : > { %v3018_v47 = vpop.xlane.xlu0 %3017 }
 0xb88   : > { %v3032_v31 = vmul.f32 0.03125, %v3018_v47 }
 0xb89   : > { %v3021_v49 = vpop.xlane.xlu1 %3020 }
 0xb8a   : > { %v3040_v32 = vadd.f32 1e-06, %v3032_v31  ;;  %v3033_v51 = vmul.f32 0.03125, %v3021_v49 }
 0xb8b   : > { %v3024_v53 = vpop.xlane.xlu0 %3023 }
 0xb8c   : > { %6211 = vrsqrt.f32 %v3040_v32  ;;  %v3041_v55 = vadd.f32 1e-06, %v3033_v51  ;;  %v3034_v50 = vmul.f32 0.03125, %v3024_v53 }
 0xb8d   : > { %v3027_v57 = vpop.xlane.xlu1 %3026 }
 0xb8e   : > { %6213 = vrsqrt.f32 %v3041_v55  ;;  %v3042_v58 = vadd.f32 1e-06, %v3034_v50  ;;  %v3035_v61 = vmul.f32 0.03125, %v3027_v57  ;;  %v5411_v50 = vld [vmem:[%s10013_s17] ss:$0 sm:$0xff] }
 0xb8f   : > { %v3006_v62 = vpop.xlane.xlu0 %3005 }
 0xb90   : > { %6215 = vrsqrt.f32 %v3042_v58  ;;  %v3043_v63 = vadd.f32 1e-06, %v3035_v61  ;;  %v3028_v1 = vmul.f32 0.03125, %v3006_v62 }
 0xb91   : > { %v3009_v5 = vpop.xlane.xlu1 %3008 }
 0xb92   : > { %6217 = vrsqrt.f32 %v3043_v63  ;;  %v3036_v7 = vadd.f32 1e-06, %v3028_v1  ;;  %v3029_v9 = vmul.f32 0.03125, %v3009_v5 }
 0xb93   : > { %v3012_v2 = vpop.xlane.xlu0 %3011 }
 0xb94   : > { %6219 = vrsqrt.f32 %v3036_v7  ;;  %v3037_v10 = vadd.f32 1e-06, %v3029_v9  ;;  %v3030_v60 = vmul.f32 0.03125, %v3012_v2 }
 0xb95   : > { %v3015_v14 = vpop.xlane.xlu1 %3014 }
 0xb96   : > { %v6212_v15 = vpop.eup %6211  ;;  %6221 = vrsqrt.f32 %v3037_v10  ;;  %v3038_v16 = vadd.f32 1e-06, %v3030_v60  ;;  %v3031_v23 = vmul.f32 0.03125, %v3015_v14 }
 0xb97   : > { %v3056_v26 = vmul.f32 %v6212_v15, %v9141_v6 }
 0xb98   : > { %v6214_v25 = vpop.eup %6213  ;;  %6223 = vrsqrt.f32 %v3038_v16  ;;  %v3039_v3 = vadd.f32 1e-06, %v3031_v23 }
 0xb99   : > { %v3057_v30 = vmul.f32 %v6214_v25, %v9144_v8  ;;  %v6118_v25 = vld [vmem:[%s8750_s18] sm:$0xff]   ;;  %s10014_s18 = scalar_lea.vmem [#allocation27], %s8659_s25 }
 0xb9a   : > { %v6216_v34 = vpop.eup %6215  ;;  %6225 = vrsqrt.f32 %v3039_v3 }
 0xb9b   : > { %v3067_v24 = vpack.c.bf16 %v3057_v30, %v3056_v26  ;;  %v3058_v36 = vmul.f32 %v6216_v34, %v9149_v13  ;;  %v1865_v13 = vld [vmem:[%s8639_s29] sm:$0xff] }
 0xb9c   : > { %v6218_v35 = vpop.eup %6217 }
 0xb9d   : > { %v3059_v18 = vmul.f32 %v6218_v35, %v9155_v17  ;;  %5730 = vmatprep.mubr.msk.bf16.mxu1 %vm1868_vm3, %v3067_v24  ;;  %v1866_v17 = vld [vmem:[%s8639_s29 + $0x8] sm:$0xff]  ;;  %s10012_s29 = scalar_lea.vmem [#allocation23], %s8659_s25 }
 0xb9e   : > { %v6220_v37 = vpop.eup %6219  ;;  %v5404_v29 = vld [vmem:[%s10012_s29] ss:$0 sm:$0xff] }
 0xb9f   : > { %v3068_v39 = vpack.c.bf16 %v3059_v18, %v3058_v36  ;;  %v3052_v6 = vmul.f32 %v6220_v37, %v9161_v19  ;;  %v3167_v19 = vpack.c.bf16 %v1866_v17, %v1865_v13 }
 0xba0   : > { %v6222_v28 = vpop.eup %6221 }
 0xba1   : > { %5731 = vmatmul.mubr.msk.bf16.vlgmr.msra.gmra.mrb[24].mxu1 %vm1868_vm3, %v3068_v39  ;;  %v3053_v8 = vmul.f32 %v6222_v28, %v9167_v11 }
 0xba2   : > { %v6224_v40 = vpop.eup %6223  ;;  %5735 = vmatpush3.bf16.msra.mxu1 %v6117_v38  ;;  %5736 = vmatprep.mubr.msk.bf16.mxu1 %vm7422_vm6, %v7421_v46 }
 0xba3   : > { %v3065_v12 = vpack.c.bf16 %v3053_v8, %v3052_v6  ;;  %5740 = vmatprep.subr.bf16.mxu1 %v7421_v46  ;;  %v3054_v27 = vmul.f32 %v6224_v40, %v9173_v20 }
 0xba4   : > { %v6226_v59 = vpop.eup %6225 }
 0xba5   : > { %v3055_v21 = vmul.f32 %v6226_v59, %v9179_v33  ;;  %5726 = vmatprep.mubr.msk.bf16.mxu0 %vm1868_vm3, %v3065_v12 }
 0xba7   : > { %v3066_v11 = vpack.c.bf16 %v3055_v21, %v3054_v27 }
 0xba9   : > { %5727 = vmatmul.mubr.msk.bf16.vlgmr.msra.gmra.mrb[40].mxu0 %vm1868_vm3, %v3066_v11  ;;  %5737 = vmatmul.mubr.msk.bf16.vlgmr.msra.gmra.mrb[28].mxu1 %vm2307_vm4, %v3167_v19 }
 0xbaa   : > { %5742 = vmatprep.mubr.msk.bf16.mxu1 %vm7422_vm6, %v7421_v46  ;;  %5741 = vmatpush3.bf16.msra.mxu1 %v6118_v25 }
 0xbb1   : > { %5743 = vmatmul.mubr.msk.bf16.vlgmr.msra.gmra.mrb[32].mxu1 %vm2307_vm4, %v3167_v19 }
 0xc74   : > { %v5732_v44 = vpop.f32.mrb[24].mxu1 }
 0xc75   : > { %v3149_v22 = vpop.f32.mrb[25].mxu1  ;;  %v3158_v31 = vadd.f32 %v5732_v44, %v5404_v29 }
 0xc76   : > { %v5733_v47 = vpop.f32.mrb[26].mxu1  ;;  %v3150_v33 = vadd.f32 %v5404_v29, %v3149_v22 }
 0xc77   : > { %v3161_v20 = vadd.f32 %v5733_v47, %v5404_v29  ;;  %v3152_v49 = vpop.f32.mrb[27].mxu1 }
 0xc78   : > { %v3153_v32 = vadd.f32 %v5404_v29, %v3152_v49 }
 0xc79   : > { %v3287_v51 = vpack.c.bf16 %v3161_v20, %v3158_v31 }
 0xc7a   : > { %v3286_v53 = vpack.c.bf16 %v3153_v32, %v3150_v33 }
 0xc7c   : > { %v5728_v55 = vpop.f32.mrb[40].mxu0  ;;  %v3217_v57 = vpop.f32.mrb[28].mxu1 }
 0xc7d   : > { %v3133_v58 = vpop.f32.mrb[41].mxu0  ;;  %v5738_v61 = vpop.f32.mrb[29].mxu1  ;;  %v3142_v63 = vadd.f32 %v5728_v55, %v5404_v29  ;;  %v3218_v1 = vadd.f32 %v5411_v50, %v3217_v57 }
 0xc7e   : > { %v5729_v62 = vpop.f32.mrb[42].mxu0  ;;  %v3220_v46 = vpop.f32.mrb[30].mxu1  ;;  %v3134_v10 = vadd.f32 %v5404_v29, %v3133_v58 }
 0xc7f   : > { %v3145_v5 = vadd.f32 %v5729_v62, %v5404_v29  ;;  %v3221_v7 = vadd.f32 %v5411_v50, %v3220_v46  ;;  %v3136_v9 = vpop.f32.mrb[43].mxu0  ;;  %v5739_v2 = vpop.f32.mrb[31].mxu1 }
 0xc80   : > { %v3137_v60 = vadd.f32 %v5404_v29, %v3136_v9  ;;  %v5414_v29 = vld [vmem:[%s10014_s18] ss:$0 sm:$0xff] }
 0xc81   : > { %v3285_v14 = vpack.c.bf16 %v3145_v5, %v3142_v63  ;;  %v3288_v15 = vpack.c.bf16 %v3221_v7, %v3218_v1 }
 0xc82   : > { %v3284_v16 = vpack.c.bf16 %v3137_v60, %v3134_v10 }
 0xc83   : > { %3556 = vrot.lane.b32.xlu0 %v3288_v15, %s7420_s5  ;;  %5886 = vmatprep.subr.msk.bf16.mxu0 %vm2307_vm4, %v3288_v15  ;;  %v3303_v23 = vsel %vm2307_vm4, %v3288_v15, 0 }
 0xc84   : > { %5747 = vmatpush3.bf16.xpose.msra.mxu0 %v3303_v23  ;;  %3547 = vrot.lane.b32.xlu1 %v3284_v16, %s7420_s5  ;;  %v3273_v11 = vpop.f32.mrb[32].mxu1 }
 0xc85   : > { %5748 = vmatprep.mubr.msk.bf16.mxu0 %vm2307_vm4, %v3284_v16  ;;  %v5744_v44 = vpop.f32.mrb[33].mxu1  ;;  %v3274_v22 = vadd.f32 %v5414_v29, %v3273_v11 }
 0xc86   : > { %v3276_v47 = vpop.f32.mrb[34].mxu1 }
 0xc87   : > { %3553 = vrot.lane.b32.xlu0 %v3287_v51, %s7420_s5  ;;  %v3277_v31 = vadd.f32 %v5414_v29, %v3276_v47  ;;  %v5745_v20 = vpop.f32.mrb[35].mxu1 }
 0xc88   : > { %3549 = vrot.lane.b32.xlu1 %v3285_v14, %s7420_s5 }
 0xc89   : > { %v3289_v49 = vpack.c.bf16 %v3277_v31, %v3274_v22 }
 0xc8b   : > { %5749 = vmatmul.mubr.msk.bf16.vlgmr.msra.gmra.mrb[44].mxu0 %vm2307_vm4, %v3285_v14  ;;  %5756 = vmatprep.subr.bf16.mxu1 %v3289_v49 }
 0xc8c   : > { %3551 = vrot.lane.b32.xlu1 %v3286_v53, %s7420_s5  ;;  %5752 = vmatprep.mubr.msk.bf16.mxu0 %vm2307_vm4, %v3286_v53 }
 0xc8d   : > { %5757 = vmatpush3.bf16.msra.mxu1 %v3289_v49 }
 0xc93   : > { %5753 = vmatmul.mubr.msk.bf16.gmra.mrb[48].mxu0 %vm2307_vm4, %v3287_v51 }
 0xcf5   : > { %v3557_v3 = vpop.permute.xlu0 %3556 }
 0xcf6   : > { %v3571_v26 = vsel %vm2307_vm4, %v3557_v3, 0  ;;  %5887 = vmatprep.subr.msk.bf16.mxu0 %vm2307_vm4, %v3557_v3  ;;  %v3548_v30 = vpop.permute.xlu1 %3547 }
 0xcf7   : > { %5767 = vmatpush3.bf16.xpose.msra.mxu0 %v3571_v26  ;;  %5768 = vmatprep.mubr.msk.bf16.mxu0 %vm2307_vm4, %v3548_v30 }
 0xcf9   : > { %v3554_v35 = vpop.permute.xlu0 %3553 }
 0xcfa   : > { %v3550_v34 = vpop.permute.xlu1 %3549 }
 0xcfe   : > { %v3552_v24 = vpop.permute.xlu1 %3551  ;;  %5769 = vmatmul.mubr.msk.bf16.vlgmr.msra.gmra.mrb[52].mxu0 %vm2307_vm4, %v3550_v34 }
 0xcff   : > { %5772 = vmatprep.mubr.msk.bf16.mxu0 %vm2307_vm4, %v3552_v24 }
 0xd06   : > { %5773 = vmatmul.mubr.msk.bf16.gmra.mrb[56].mxu0 %vm2307_vm4, %v3554_v35 }
 0xd5e   : > { %v9235_v36 = vpop.f32.mrb[44].mxu0 }
 0xd5f   : > { %v3339_v18 = vpop.f32.mrb[45].mxu0  ;;  %v3376_v37 = vsel %vm2307_vm4, %v9235_v36, -inf }
 0xd60   : > { %3377 = vmax.xlane.f32.xlu0 %v3376_v37  ;;  %v9239_v38 = vpop.f32.mrb[46].mxu0  ;;  %v3370_v39 = vsel %vm2307_vm4, %v3339_v18, -inf }
 0xd61   : > { %3371 = vmax.xlane.f32.xlu1 %v3370_v39  ;;  %v3342_v28 = vpop.f32.mrb[47].mxu0  ;;  %v3379_v13 = vsel %vm2307_vm4, %v9239_v38, -inf }
 0xd62   : > { %v3373_v6 = vsel %vm2307_vm4, %v3342_v28, -inf }
 0xd64   : > { %3374 = vmax.xlane.f32.xlu0 %v3373_v6 }
 0xd66   : > { %v9243_v8 = vpop.f32.mrb[48].mxu0 }
 0xd67   : > { %v9245_v40 = vpop.f32.mrb[49].mxu0  ;;  %v3388_v17 = vsel %vm2307_vm4, %v9243_v8, -inf }
 0xd68   : > { %3380 = vmax.xlane.f32.xlu0 %v3379_v13  ;;  %3389 = vmax.xlane.f32.xlu1 %v3388_v17  ;;  %v9251_v12 = vpop.f32.mrb[50].mxu0  ;;  %v3382_v21 = vsel %vm2307_vm4, %v9245_v40, -inf }
 0xd69   : > { %v9253_v59 = vpop.f32.mrb[51].mxu0  ;;  %v3391_v19 = vsel %vm2307_vm4, %v9251_v12, -inf }
 0xd6a   : > { %v3385_v27 = vsel %vm2307_vm4, %v9253_v59, -inf }
 0xd6c   : > { %3383 = vmax.xlane.f32.xlu1 %v3382_v21  ;;  %3386 = vmax.xlane.f32.xlu0 %v3385_v27 }
 0xd70   : > { %3392 = vmax.xlane.f32.xlu0 %v3391_v19 }
 0xdd1   : > { %v9263_v33 = vpop.f32.mrb[52].mxu0 }
 0xdd2   : > { %v9265_v32 = vpop.f32.mrb[53].mxu0  ;;  %v3644_v51 = vsel %vm2307_vm4, %v9263_v33, -inf }
 0xdd3   : > { %3645 = vmax.xlane.f32.xlu1 %v3644_v51  ;;  %v9269_v53 = vpop.f32.mrb[54].mxu0  ;;  %v3638_v57 = vsel %vm2307_vm4, %v9265_v32, -inf }
 0xdd4   : > { %v9271_v55 = vpop.f32.mrb[55].mxu0  ;;  %v3647_v61 = vsel %vm2307_vm4, %v9269_v53, -inf }
 0xdd5   : > { %v3641_v50 = vsel %vm2307_vm4, %v9271_v55, -inf }
 0xdd6   : > { %3642 = vmax.xlane.f32.xlu0 %v3641_v50 }
 0xdd7   : > { %3639 = vmax.xlane.f32.xlu1 %v3638_v57 }
 0xdd9   : > { %v9277_v58 = vpop.f32.mrb[56].mxu0 }
 0xdda   : > { %v9281_v62 = vpop.f32.mrb[57].mxu0  ;;  %3648 = vmax.xlane.f32.xlu0 %v3647_v61  ;;  %v3656_v46 = vsel %vm2307_vm4, %v9277_v58, -inf }
 0xddb   : > { %3657 = vmax.xlane.f32.xlu1 %v3656_v46  ;;  %v9285_v63 = vpop.f32.mrb[58].mxu0  ;;  %v3650_v7 = vsel %vm2307_vm4, %v9281_v62, -inf }
 0xddc   : > { %v9287_v1 = vpop.f32.mrb[59].mxu0  ;;  %v3659_v9 = vsel %vm2307_vm4, %v9285_v63, -inf }
 0xddd   : > { %v3653_v5 = vsel %vm2307_vm4, %v9287_v1, -inf }
 0xdde   : > { %3654 = vmax.xlane.f32.xlu0 %v3653_v5 }
 0xddf   : > { %3651 = vmax.xlane.f32.xlu1 %v3650_v7 }
 0xde2   : > { %3660 = vmax.xlane.f32.xlu0 %v3659_v9 }
 0xded   : > { %v3378_v2 = vpop.xlane.xlu0 %3377 }
 0xdee   : > { %v3372_v10 = vpop.xlane.xlu1 %3371  ;;  %v3396_v14 = vsub.f32 %v9235_v36, %v3378_v2 }
 0xdef   : > { %v3394_v60 = vsub.f32 %v3339_v18, %v3372_v10 }
 0xdf0   : > { %3715 = vrot.lane.b32.xlu1 %v3289_v49, %s7420_s5  ;;  %v3406_v3 = vmul.f32 1.442695, %v3396_v14  ;;  %s10019_s5 = smov %s10018_s3 }
 0xdf1   : > { %v3402_v15 = vmul.f32 1.442695, %v3394_v60  ;;  %v3375_v16 = vpop.xlane.xlu0 %3374 }
 0xdf2   : > { %v3395_v23 = vsub.f32 %v3342_v28, %v3375_v16 }
 0xdf3   : > { %6227 = vpow2.f32 %v3402_v15 }
 0xdf4   : > { %v3404_v25 = vmul.f32 1.442695, %v3395_v23 }
 0xdf5   : > { %v3381_v26 = vpop.xlane.xlu0 %3380  ;;  %v3390_v30 = vpop.xlane.xlu1 %3389 }
 0xdf6   : > { %6229 = vpow2.f32 %v3404_v25  ;;  %v3397_v34 = vsub.f32 %v9239_v38, %v3381_v26  ;;  %v3400_v35 = vsub.f32 %v9243_v8, %v3390_v30 }
 0xdf7   : > { %6231 = vpow2.f32 %v3406_v3 }
 0xdf8   : > { %v3408_v24 = vmul.f32 1.442695, %v3397_v34  ;;  %v3414_v13 = vmul.f32 1.442695, %v3400_v35 }
 0xdf9   : > { %v3384_v18 = vpop.xlane.xlu1 %3383  ;;  %v3387_v37 = vpop.xlane.xlu0 %3386 }
 0xdfa   : > { %6233 = vpow2.f32 %v3408_v24  ;;  %v3398_v36 = vsub.f32 %v9245_v40, %v3384_v18  ;;  %v3399_v39 = vsub.f32 %v9253_v59, %v3387_v37 }
 0xdfc   : > { %v3410_v28 = vmul.f32 1.442695, %v3398_v36  ;;  %v3412_v6 = vmul.f32 1.442695, %v3399_v39 }
 0xdfd   : > { %v3393_v17 = vpop.xlane.xlu0 %3392  ;;  %v9302_v21 = vpop.eup %6227 }
 0xdfe   : > { %6235 = vpow2.f32 %v3410_v28  ;;  %v3401_v27 = vsub.f32 %v9251_v12, %v3393_v17 }
 0xdff   : > { %6237 = vpow2.f32 %v3412_v6 }
 0xe00   : > { %v9304_v38 = vpop.eup %6229  ;;  %v3416_v8 = vmul.f32 1.442695, %v3401_v27  ;;  %6239 = vpow2.f32 %v3414_v13 }
 0xe01   : > { %v3442_v19 = vpack.c.bf16 %v9304_v38, %v9302_v21  ;;  %v9308_v40 = vpop.eup %6231 }
 0xe02   : > { %6241 = vpow2.f32 %v3416_v8 }
 0xe03   : > { %5758 = vmatprep.mubr.msk.bf16.mxu1 %vm2307_vm4, %v3442_v19 }
 0xe04   : > { %v9311_v59 = vpop.eup %6233 }
 0xe05   : > { %v3443_v12 = vpack.c.bf16 %v9311_v59, %v9308_v40 }
 0xe07   : > { %5759 = vmatmul.mubr.msk.bf16.vlgmr.msra.gmra.mrb[36].mxu1 %vm2307_vm4, %v3443_v12 }
 0xe08   : > { %v9316_v11 = vpop.eup %6235 }
 0xe09   : > { %v9318_v29 = vpop.eup %6237 }
 0xe0a   : > { %v3444_v44 = vpack.c.bf16 %v9318_v29, %v9316_v11  ;;  %v9322_v22 = vpop.eup %6239 }
 0xe0b   : > { %v3436_v19 = vsel %vm2307_vm4, %v9322_v22, 0.0 }
 0xe0c   : > { %v9324_v47 = vpop.eup %6241  ;;  %5762 = vmatprep.mubr.msk.bf16.mxu1 %vm2307_vm4, %v3444_v44  ;;  %v3418_v44 = vsel %vm2307_vm4, %v9302_v21, 0.0  ;;  %v3427_v21 = vsel %vm2307_vm4, %v9311_v59, 0.0 }
 0xe0d   : > { %v3445_v31 = vpack.c.bf16 %v9324_v47, %v9322_v22 }
 0xe0f   : > { %5763 = vmatmul.mubr.msk.bf16.gmra.mrb[40].mxu1 %vm2307_vm4, %v3445_v31  ;;  %v3421_v31 = vsel %vm2307_vm4, %v9304_v38, 0.0  ;;  %v3430_v38 = vsel %vm2307_vm4, %v9316_v11, 0.0 }
 0xe60   : > { %v3646_v20 = vpop.xlane.xlu1 %3645 }
 0xe61   : > { %v3664_v49 = vsub.f32 %v9263_v33, %v3646_v20 }
 0xe63   : > { %v3674_v51 = vmul.f32 1.442695, %v3664_v49  ;;  %v3643_v50 = vpop.xlane.xlu0 %3642  ;;  %v3424_v49 = vsel %vm2307_vm4, %v9308_v40, 0.0  ;;  %v6119_v40 = vld [vmem:[%s10015_s30 + $0x8] sm:$0xff]  }
 0xe64   : > { %v3663_v57 = vsub.f32 %v9271_v55, %v3643_v50  ;;  %v3640_v61 = vpop.xlane.xlu1 %3639  ;;  %v3439_v50 = vsel %vm2307_vm4, %v9324_v47, 0.0  ;;  %5786 = vmatprep.subr.bf16.mxu0 %v6119_v40 }
 0xe65   : > { %6243 = vpow2.f32 %v3674_v51  ;;  %v3662_v46 = vsub.f32 %v9265_v32, %v3640_v61  ;;  %v3433_v51 = vsel %vm2307_vm4, %v9318_v29, 0.0  ;;  %5787 = vmatpush3.bf16.msra.mxu0 %v6119_v40 }
 0xe66   : > { %v3672_v5 = vmul.f32 1.442695, %v3663_v57 }
 0xe67   : > { %v3670_v7 = vmul.f32 1.442695, %v3662_v46  ;;  %v3649_v9 = vpop.xlane.xlu0 %3648 }
 0xe68   : > { %6245 = vpow2.f32 %v3672_v5  ;;  %v3665_v2 = vsub.f32 %v9269_v53, %v3649_v9  ;;  %v3658_v10 = vpop.xlane.xlu1 %3657  ;;  %v9370_v5 = vld [vmem:[%s10016_s6] sm:$0xff]  }
 0xe69   : > { %6247 = vpow2.f32 %v3670_v7  ;;  %v3668_v14 = vsub.f32 %v9277_v58, %v3658_v10  ;;  %5796 = vmatprep.subr.bf16.mxu0 %v9370_v5 }
 0xe6a   : > { %v3676_v60 = vmul.f32 1.442695, %v3665_v2 }
 0xe6b   : > { %v3655_v33 = vpop.xlane.xlu0 %3654  ;;  %v3682_v25 = vmul.f32 1.442695, %v3668_v14 }
 0xe6c   : > { %6249 = vpow2.f32 %v3676_v60  ;;  %v3667_v15 = vsub.f32 %v9287_v1, %v3655_v33  ;;  %v3652_v55 = vpop.xlane.xlu1 %3651 }
 0xe6d   : > { %v3666_v16 = vsub.f32 %v9281_v62, %v3652_v55 }
 0xe6e   : > { %v3680_v23 = vmul.f32 1.442695, %v3667_v15 }
 0xe6f   : > { %v6244_v32 = vpop.eup %6243  ;;  %v3678_v3 = vmul.f32 1.442695, %v3666_v16  ;;  %v3661_v26 = vpop.xlane.xlu0 %3660 }
 0xe70   : > { %6251 = vpow2.f32 %v3680_v23  ;;  %v3669_v53 = vsub.f32 %v9285_v63, %v3661_v26  ;;  %v3716_v30 = vpop.permute.xlu1 %3715  ;;  %v3692_v34 = vsel %vm2307_vm4, %v6244_v32, 0.0 }
 0xe71   : > { %6253 = vpow2.f32 %v3678_v3  ;;  %5776 = vmatprep.subr.bf16.mxu1 %v3716_v30  ;;  %3693 = vadd.xlane.f32.xlu0 %v3692_v34 }
 0xe72   : > { %v6246_v58 = vpop.eup %6245  ;;  %v3684_v24 = vmul.f32 1.442695, %v3669_v53  ;;  %5777 = vmatpush3.bf16.msra.mxu1 %v3716_v30  ;;  %6255 = vpow2.f32 %v3682_v25 }
 0xe73   : > { %v6248_v1 = vpop.eup %6247  ;;  %v3689_v6 = vsel %vm2307_vm4, %v6246_v58, 0.0 }
 0xe74   : > { %6257 = vpow2.f32 %v3684_v24  ;;  %v3686_v62 = vsel %vm2307_vm4, %v6248_v1, 0.0  ;;  %v3710_v35 = vpack.c.bf16 %v6246_v58, %v6248_v1 }
 0xe75   : > { %3687 = vadd.xlane.f32.xlu0 %v3686_v62 }
 0xe76   : > { %v6250_v18 = vpop.eup %6249  ;;  %5778 = vmatprep.mubr.msk.bf16.mxu1 %vm2307_vm4, %v3710_v35 }
 0xe77   : > { %v3711_v63 = vpack.c.bf16 %v6250_v18, %v6244_v32  ;;  %v3695_v37 = vsel %vm2307_vm4, %v6250_v18, 0.0 }
 0xe79   : > { %5779 = vmatmul.mubr.msk.bf16.vlgmr.msra.gmra.mrb[44].mxu1 %vm2307_vm4, %v3711_v63  ;;  %3696 = vadd.xlane.f32.xlu0 %v3695_v37 }
 0xe7a   : > { %v6252_v36 = vpop.eup %6251 }
 0xe7b   : > { %v6254_v39 = vpop.eup %6253  ;;  %v3701_v22 = vsel %vm2307_vm4, %v6252_v36, 0.0 }
 0xe7c   : > { %v3698_v28 = vsel %vm2307_vm4, %v6254_v39, 0.0  ;;  %v3712_v13 = vpack.c.bf16 %v6252_v36, %v6254_v39  ;;  %v6256_v17 = vpop.eup %6255 }
 0xe7d   : > { %3699 = vadd.xlane.f32.xlu1 %v3698_v28  ;;  %3690 = vadd.xlane.f32.xlu0 %v3689_v6  ;;  %v3704_v12 = vsel %vm2307_vm4, %v6256_v17, 0.0 }
 0xe7e   : > { %v6258_v27 = vpop.eup %6257  ;;  %5782 = vmatprep.mubr.msk.bf16.mxu1 %vm2307_vm4, %v3712_v13 }
 0xe7f   : > { %v3713_v8 = vpack.c.bf16 %v6258_v27, %v6256_v17  ;;  %v3707_v20 = vsel %vm2307_vm4, %v6258_v27, 0.0 }
 0xe81   : > { %3437 = vadd.xlane.f32.xlu1 %v3436_v19  ;;  %3705 = vadd.xlane.f32.xlu0 %v3704_v12 }
 0xe82   : > { %5783 = vmatmul.mubr.msk.bf16.gmra.mrb[48].mxu1 %vm2307_vm4, %v3713_v8 }
 0xe85   : > { %3419 = vadd.xlane.f32.xlu0 %v3418_v44 }
 0xe89   : > { %3422 = vadd.xlane.f32.xlu0 %v3421_v31 }
 0xe8d   : > { %3708 = vadd.xlane.f32.xlu0 %v3707_v20 }
 0xe91   : > { %3702 = vadd.xlane.f32.xlu0 %v3701_v22 }
 0xe95   : > { %3425 = vadd.xlane.f32.xlu0 %v3424_v49 }
 0xe99   : > { %3428 = vadd.xlane.f32.xlu0 %v3427_v21 }
 0xe9d   : > { %3431 = vadd.xlane.f32.xlu0 %v3430_v38 }
 0xea1   : > { %3434 = vadd.xlane.f32.xlu0 %v3433_v51 }
 0xea5   : > { %3440 = vadd.xlane.f32.xlu0 %v3439_v50 }
 0xeda   : > { %v5760_v57 = vpop.f32.mrb[36].mxu1 }
 0xedb   : > { %v3492_v61 = vpop.f32.mrb[37].mxu1 }
 0xedc   : > { %v5761_v59 = vpop.f32.mrb[38].mxu1 }
 0xedd   : > { %v3495_v46 = vpop.f32.mrb[39].mxu1 }
 0xee2   : > { %v5764_v11 = vpop.f32.mrb[40].mxu1 }
 0xee3   : > { %v3508_v29 = vpop.f32.mrb[41].mxu1 }
 0xee4   : > { %v5765_v7 = vpop.f32.mrb[42].mxu1 }
 0xee5   : > { %v3511_v9 = vpop.f32.mrb[43].mxu1 }
 0xefe   : > { %v3694_v2 = vpop.xlane.xlu0 %3693 }
 0xf02   : > { %v3688_v47 = vpop.xlane.xlu0 %3687 }
 0xf06   : > { %v3697_v10 = vpop.xlane.xlu0 %3696 }
 0xf0a   : > { %v3691_v60 = vpop.xlane.xlu0 %3690  ;;  %v3700_v34 = vpop.xlane.xlu1 %3699 }
 0xf0e   : > { %v3706_v14 = vpop.xlane.xlu0 %3705  ;;  %v3438_v24 = vpop.xlane.xlu1 %3437 }
 0xf12   : > { %v3420_v33 = vpop.xlane.xlu0 %3419 }
 0xf13   : > { %6259 = vrcp.f32 %v3420_v33 }
 0xf16   : > { %v3423_v15 = vpop.xlane.xlu0 %3422 }
 0xf17   : > { %6261 = vrcp.f32 %v3423_v15 }
 0xf1a   : > { %v3709_v55 = vpop.xlane.xlu0 %3708 }
 0xf1d   : > { %v6260_v23 = vpop.eup %6259 }
 0xf1e   : > { %v3703_v16 = vpop.xlane.xlu0 %3702  ;;  %v9373_v3 = vmul.f32 %v6260_v23, %v3492_v61 }
 0xf21   : > { %v6262_v32 = vpop.eup %6261 }
 0xf22   : > { %v3426_v25 = vpop.xlane.xlu0 %3425  ;;  %v9375_v26 = vmul.f32 %v6262_v32, %v3495_v46 }
 0xf23   : > { %6263 = vrcp.f32 %v3426_v25 }
 0xf24   : > { %v3539_v53 = vpack.c.bf16 %v9375_v26, %v9373_v3 }
 0xf26   : > { %v3429_v30 = vpop.xlane.xlu0 %3428 }
 0xf27   : > { %6265 = vrcp.f32 %v3429_v30 }
 0xf2a   : > { %v3432_v58 = vpop.xlane.xlu0 %3431 }
 0xf2b   : > { %6267 = vrcp.f32 %v3432_v58 }
 0xf2d   : > { %v6264_v62 = vpop.eup %6263 }
 0xf2e   : > { %v3435_v1 = vpop.xlane.xlu0 %3434  ;;  %v3533_v18 = vmul.f32 %v6264_v62, %v5760_v57 }
 0xf2f   : > { %6269 = vrcp.f32 %v3435_v1 }
 0xf30   : > { %6271 = vrcp.f32 %v3438_v24 }
 0xf31   : > { %v6266_v35 = vpop.eup %6265 }
 0xf32   : > { %v3534_v63 = vmul.f32 %v6266_v35, %v5761_v59  ;;  %v3441_v37 = vpop.xlane.xlu0 %3440 }
 0xf33   : > { %6273 = vrcp.f32 %v3441_v37 }
 0xf34   : > { %v3540_v36 = vpack.c.bf16 %v3534_v63, %v3533_v18  ;;  %6275 = vrcp.f32 %v3694_v2 }
 0xf35   : > { %v6268_v39 = vpop.eup %6267  ;;  %6277 = vrcp.f32 %v3688_v47 }
 0xf36   : > { %v3535_v6 = vmul.f32 %v6268_v39, %v3508_v29  ;;  %6279 = vrcp.f32 %v3697_v10 }
 0xf37   : > { %6281 = vrcp.f32 %v3691_v60 }
 0xf38   : > { %6283 = vrcp.f32 %v3700_v34 }
 0xf39   : > { %v6270_v28 = vpop.eup %6269  ;;  %6285 = vrcp.f32 %v3706_v14 }
 0xf3a   : > { %v3536_v13 = vmul.f32 %v6270_v28, %v3511_v9  ;;  %v6272_v17 = vpop.eup %6271  ;;  %6287 = vrcp.f32 %v3709_v55 }
 0xf3b   : > { %v3537_v19 = vmul.f32 %v6272_v17, %v5764_v11  ;;  %6289 = vrcp.f32 %v3703_v16 }
 0xf3c   : > { %v3541_v27 = vpack.c.bf16 %v3536_v13, %v3535_v6 }
 0xf3d   : > { %v6274_v8 = vpop.eup %6273 }
 0xf3e   : > { %v3538_v12 = vmul.f32 %v6274_v8, %v5765_v7  ;;  %v6276_v31 = vpop.eup %6275 }
 0xf3f   : > { %v6278_v22 = vpop.eup %6277 }
 0xf40   : > { %v3542_v44 = vpack.c.bf16 %v3538_v12, %v3537_v19  ;;  %v6280_v21 = vpop.eup %6279 }
 0xf41   : > { %v6282_v51 = vpop.eup %6281 }
 0xf42   : > { %v6284_v29 = vpop.eup %6283 }
 0xf43   : > { %v6286_v9 = vpop.eup %6285 }
 0xf44   : > { %v6288_v47 = vpop.eup %6287 }
 0xf45   : > { %v6290_v60 = vpop.eup %6289 }
 0xf4c   : > { %v5780_v20 = vpop.f32.mrb[44].mxu1 }
 0xf4d   : > { %v3764_v49 = vpop.f32.mrb[45].mxu1  ;;  %v3805_v50 = vmul.f32 %v6276_v31, %v5780_v20 }
 0xf4e   : > { %v5781_v38 = vpop.f32.mrb[46].mxu1  ;;  %v3803_v61 = vmul.f32 %v6278_v22, %v3764_v49 }
 0xf4f   : > { %v3806_v40 = vmul.f32 %v6280_v21, %v5781_v38  ;;  %v3767_v57 = vpop.f32.mrb[47].mxu1 }
 0xf50   : > { %v3804_v59 = vmul.f32 %v6282_v51, %v3767_v57 }
 0xf51   : > { %v3812_v46 = vpack.c.bf16 %v3806_v40, %v3805_v50 }
 0xf52   : > { %v3811_v11 = vpack.c.bf16 %v3804_v59, %v3803_v61 }
 0xf54   : > { %5788 = vmatprep.mubr.msk.bf16.mxu0 %vm2307_vm4, %v3811_v11 }
 0xf55   : > { %v5784_v7 = vpop.f32.mrb[48].mxu1  ;;  %5789 = vmatmul.mubr.msk.bf16.vlgmr.msra.gmra.mrb[60].mxu0 %vm2307_vm4, %v3812_v46 }
 0xf56   : > { %v3780_v2 = vpop.f32.mrb[49].mxu1  ;;  %5797 = vmatpush3.bf16.msra.mxu0 %v9370_v5  ;;  %v3809_v14 = vmul.f32 %v6286_v9, %v5784_v7  ;;  %v5443_v5 = vld [vmem:[%s10017_s24] ss:$0 sm:$0xff] }
 0xf57   : > { %v5785_v10 = vpop.f32.mrb[50].mxu1  ;;  %v3807_v55 = vmul.f32 %v6284_v29, %v3780_v2 }
 0xf58   : > { %v3810_v33 = vmul.f32 %v6288_v47, %v5785_v10  ;;  %v3783_v15 = vpop.f32.mrb[51].mxu1 }
 0xf59   : > { %v3808_v16 = vmul.f32 %v6290_v60, %v3783_v15 }
 0xf5a   : > { %v3814_v23 = vpack.c.bf16 %v3810_v33, %v3809_v14 }
 0xf5b   : > { %v3813_v32 = vpack.c.bf16 %v3808_v16, %v3807_v55 }
 0xf5d   : > { %5792 = vmatprep.mubr.msk.bf16.mxu0 %vm2307_vm4, %v3813_v32 }
 0xf5e   : > { %5793 = vmatmul.mubr.msk.bf16.gmra.mrb[64].mxu0 %vm2307_vm4, %v3814_v23 }
 0xf5f   : > { %5798 = vmatprep.mubr.msk.bf16.mxu0 %vm2307_vm4, %v3539_v53 }
 0xf66   : > { %5799 = vmatmul.mubr.msk.bf16.vlgmr.msra.gmra.mrb[60].mxu0 %vm2307_vm4, %v3540_v36 }
 0xf67   : > { %5802 = vmatprep.mubr.msk.bf16.mxu0 %vm2307_vm4, %v3541_v27 }
 0xf6e   : > { %5803 = vmatmul.mubr.msk.bf16.gmra.mrb[64].mxu0 %vm2307_vm4, %v3542_v44 }
0x1039   : > { %v5800_v25 = vpop.f32.mrb[60].mxu0 }
0x103a   : > { %v3950_v30 = vpop.f32.mrb[61].mxu0  ;;  %v3990_v34 = vadd.f32 %v5800_v25, %v5443_v5 }
0x103b   : > { %v3988_v58 = vadd.f32 %v5443_v5, %v3950_v30  ;;  %v5801_v24 = vpop.f32.mrb[62].mxu0 }
0x103c   : > { %v3953_v1 = vpop.f32.mrb[63].mxu0  ;;  %v3991_v3 = vadd.f32 %v5801_v24, %v5443_v5  ;;  %v9397_v53 = vadd.f32 %v3990_v34, %v9128_v54 }
0x103d   : > { %v9394_v62 = vadd.f32 %v3988_v58, %v9120_v48  ;;  %v3989_v26 = vadd.f32 %v5443_v5, %v3953_v1 }
0x103e   : > { %v9405_v63 = vadd.f32 %v3991_v3, %v9132_v52 }
0x103f   : > { %v9400_v35 = vadd.f32 %v3989_v26, %v9124_v43  ;;  %v4004_v18 = vsel %vm1868_vm3, %v9394_v62, 0.0  ;;  %v4010_v43 = vsel %vm1868_vm3, %v9397_v53, 0.0 }
0x1040   : > { %4005 = vadd.xlane.f32.xlu1 %v4004_v18  ;;  %v4013_v27 = vsel %vm1868_vm3, %v9405_v63, 0.0 }
0x1041   : > { %v5804_v37 = vpop.f32.mrb[64].mxu0  ;;  %v4007_v48 = vsel %vm1868_vm3, %v9400_v35, 0.0 }
0x1042   : > { %4008 = vadd.xlane.f32.xlu0 %v4007_v48  ;;  %v3966_v36 = vpop.f32.mrb[65].mxu0  ;;  %v3994_v39 = vadd.f32 %v5804_v37, %v5443_v5  ;;  %v6121_v48 = vld [vmem:[%s10018_s3] sm:$0xff]  }
0x1043   : > { %v3992_v28 = vadd.f32 %v5443_v5, %v3966_v36  ;;  %v5805_v54 = vpop.f32.mrb[66].mxu0  ;;  %5806 = vmatprep.subr.bf16.mxu1 %v6121_v48  ;;  %v6122_v36 = vld [vmem:[%s10019_s5 + $0x8] sm:$0xff]  }
0x1044   : > { %4011 = vadd.xlane.f32.xlu1 %v4010_v43  ;;  %v3969_v6 = vpop.f32.mrb[67].mxu0  ;;  %v3995_v17 = vadd.f32 %v5805_v54, %v5443_v5  ;;  %v9417_v8 = vadd.f32 %v3994_v39, %v9110_v41  ;;  %5807 = vmatpush3.bf16.msra.mxu1 %v6121_v48 }
0x1045   : > { %v9412_v13 = vadd.f32 %v3992_v28, %v9108_v4  ;;  %v3993_v52 = vadd.f32 %v5443_v5, %v3969_v6  ;;  %5808 = vmatprep.subr.bf16.mxu1 %v6122_v36 }
0x1046   : > { %4014 = vadd.xlane.f32.xlu0 %v4013_v27  ;;  %v9425_v44 = vadd.f32 %v3995_v17, %v9116_v45  ;;  %v4022_v31 = vsel %vm1868_vm3, %v9417_v8, 0.0 }
0x1047   : > { %v9420_v19 = vadd.f32 %v3993_v52, %v9112_v42  ;;  %v4016_v12 = vsel %vm1868_vm3, %v9412_v13, 0.0 }
0x1048   : > { %4017 = vadd.xlane.f32.xlu1 %v4016_v12  ;;  %v4025_v41 = vsel %vm1868_vm3, %v9425_v44, 0.0  ;;  %5809 = vmatpush3.bf16.msra.mxu1 %v6122_v36 }
0x1049   : > { %v4019_v4 = vsel %vm1868_vm3, %v9420_v19, 0.0 }
0x104a   : > { %4020 = vadd.xlane.f32.xlu0 %v4019_v4 }
0x104c   : > { %4023 = vadd.xlane.f32.xlu1 %v4022_v31 }
0x104e   : > { %4026 = vadd.xlane.f32.xlu0 %v4025_v41 }
0x10cd   : > { %v4006_v42 = vpop.xlane.xlu1 %4005 }
0x10ce   : > { %v4028_v20 = vmul.f32 0.03125, %v4006_v42 }
0x10cf   : > { %v4009_v22 = vpop.xlane.xlu0 %4008 }
0x10d0   : > { %v9434_v49 = vsub.f32 %v9394_v62, %v4028_v20  ;;  %v4029_v45 = vmul.f32 0.03125, %v4009_v22  ;;  %v4110_v22 = vsub.s32 4, %v8910_v56 }
0x10d1   : > { %v4012_v21 = vpop.xlane.xlu1 %4011 }
0x10d2   : > { %v9437_v38 = vsub.f32 %v9400_v35, %v4029_v45  ;;  %v4030_v51 = vmul.f32 0.03125, %v4012_v21  ;;  %v4044_v50 = vmul.f32 %v9434_v49, %v9434_v49 }
0x10d3   : > { %v4015_v40 = vpop.xlane.xlu0 %4014 }
0x10d4   : > { %v9442_v57 = vsub.f32 %v9397_v53, %v4030_v51  ;;  %v4031_v61 = vmul.f32 0.03125, %v4015_v40  ;;  %v4052_v59 = vsel %vm1868_vm3, %v4044_v50, 0.0  ;;  %v4045_v46 = vmul.f32 %v9437_v38, %v9437_v38 }
0x10d5   : > { %4053 = vadd.xlane.f32.xlu1 %v4052_v59  ;;  %v4018_v11 = vpop.xlane.xlu1 %4017  ;;  %v4111_v59 = vrot.slane %v8917_v0, %v4110_v22  ;;  %v6127_v22 = vld [vmem:[%s8794_s8 + $0x20] sm:$0xff]  }
0x10d6   : > { %v9448_v29 = vsub.f32 %v9405_v63, %v4031_v61  ;;  %v4032_v7 = vmul.f32 0.03125, %v4018_v11  ;;  %v4055_v9 = vsel %vm1868_vm3, %v4045_v46, 0.0  ;;  %v4046_v2 = vmul.f32 %v9442_v57, %v9442_v57 }
0x10d7   : > { %4056 = vadd.xlane.f32.xlu0 %v4055_v9  ;;  %v4021_v47 = vpop.xlane.xlu0 %4020  ;;  %v4122_v46 = vsub.s32 3, %v8910_v56 }
0x10d8   : > { %v9454_v10 = vsub.f32 %v9412_v13, %v4032_v7  ;;  %v4033_v60 = vmul.f32 0.03125, %v4021_v47  ;;  %v4058_v14 = vsel %vm1868_vm3, %v4046_v2, 0.0  ;;  %v4047_v33 = vmul.f32 %v9448_v29, %v9448_v29 }
0x10d9   : > { %4059 = vadd.xlane.f32.xlu1 %v4058_v14  ;;  %v4024_v15 = vpop.xlane.xlu1 %4023 }
0x10da   : > { %v9460_v55 = vsub.f32 %v9420_v19, %v4033_v60  ;;  %v4034_v16 = vmul.f32 0.03125, %v4024_v15  ;;  %v4061_v23 = vsel %vm1868_vm3, %v4047_v33, 0.0  ;;  %v4048_v32 = vmul.f32 %v9454_v10, %v9454_v10  ;;  %v9492_v15 = vld [vmem:[%s10020_s10] sm:$0x3f] }
0x10db   : > { %4062 = vadd.xlane.f32.xlu0 %v4061_v23  ;;  %v4027_v5 = vpop.xlane.xlu0 %4026 }
0x10dc   : > { %v9466_v25 = vsub.f32 %v9417_v8, %v4034_v16  ;;  %v4035_v30 = vmul.f32 0.03125, %v4027_v5  ;;  %v4064_v34 = vsel %vm1868_vm3, %v4048_v32, 0.0  ;;  %v4049_v58 = vmul.f32 %v9460_v55, %v9460_v55 }
0x10dd   : > { %4065 = vadd.xlane.f32.xlu1 %v4064_v34  ;;  %v4123_v16 = vrot.slane %v9492_v15, %v4122_v46 }
0x10de   : > { %v9472_v24 = vsub.f32 %v9425_v44, %v4035_v30  ;;  %v4067_v1 = vsel %vm1868_vm3, %v4049_v58, 0.0  ;;  %v4050_v3 = vmul.f32 %v9466_v25, %v9466_v25 }
0x10df   : > { %4068 = vadd.xlane.f32.xlu0 %v4067_v1 }
0x10e0   : > { %v4070_v26 = vsel %vm1868_vm3, %v4050_v3, 0.0  ;;  %v4051_v18 = vmul.f32 %v9472_v24, %v9472_v24 }
0x10e1   : > { %4071 = vadd.xlane.f32.xlu1 %v4070_v26 }
0x10e2   : > { %v4073_v37 = vsel %vm1868_vm3, %v4051_v18, 0.0 }
0x10e3   : > { %4074 = vadd.xlane.f32.xlu0 %v4073_v37 }
0x1162   : > { %v4054_v39 = vpop.xlane.xlu1 %4053 }
0x1163   : > { %v4076_v28 = vmul.f32 0.03125, %v4054_v39 }
0x1164   : > { %v4057_v54 = vpop.xlane.xlu0 %4056 }
0x1165   : > { %v4084_v43 = vadd.f32 1e-06, %v4076_v28  ;;  %v4077_v6 = vmul.f32 0.03125, %v4057_v54 }
0x1166   : > { %v4060_v17 = vpop.xlane.xlu1 %4059 }
0x1167   : > { %6291 = vrsqrt.f32 %v4084_v43  ;;  %v4085_v52 = vadd.f32 1e-06, %v4077_v6  ;;  %v4078_v27 = vmul.f32 0.03125, %v4060_v17 }
0x1168   : > { %v4063_v12 = vpop.xlane.xlu0 %4062 }
0x1169   : > { %6293 = vrsqrt.f32 %v4085_v52  ;;  %v4086_v4 = vadd.f32 1e-06, %v4078_v27  ;;  %v4079_v31 = vmul.f32 0.03125, %v4063_v12 }
0x116a   : > { %v4066_v41 = vpop.xlane.xlu1 %4065 }
0x116b   : > { %6295 = vrsqrt.f32 %v4086_v4  ;;  %v4087_v42 = vadd.f32 1e-06, %v4079_v31  ;;  %v4080_v20 = vmul.f32 0.03125, %v4066_v41  ;;  %v6123_v41 = vld [vmem:[%s8794_s8] sm:$0xff]  }
0x116c   : > { %v4069_v45 = vpop.xlane.xlu0 %4068  ;;  %5818 = vmatprep.subr.bf16.mxu1 %v6123_v41 }
0x116d   : > { %6297 = vrsqrt.f32 %v4087_v42  ;;  %v4088_v21 = vadd.f32 1e-06, %v4080_v20  ;;  %v4081_v51 = vmul.f32 0.03125, %v4069_v45  ;;  %v6125_v42 = vld [vmem:[%s8794_s8 + $0x10] sm:$0xff]   ;;  %v6126_v20 = vld [vmem:[%s8794_s8 + $0x18] sm:$0xff]   ;;  %v6128_v45 = vld [vmem:[%s8794_s8 + $0x28] sm:$0xff]  }
0x116e   : > { %v4072_v50 = vpop.xlane.xlu1 %4071 }
0x116f   : > { %6299 = vrsqrt.f32 %v4088_v21  ;;  %v4089_v40 = vadd.f32 1e-06, %v4081_v51  ;;  %v4082_v61 = vmul.f32 0.03125, %v4072_v50  ;;  %v6129_v21 = vld [vmem:[%s8794_s8 + $0x30] sm:$0xff]   ;;  %v6130_v51 = vld [vmem:[%s8794_s8 + $0x38] sm:$0xff]  }
0x1170   : > { %v4075_v11 = vpop.xlane.xlu0 %4074  ;;  %v5444_v50 = vld [vmem:[%s10021_s22] ss:$0 sm:$0xff] }
0x1171   : > { %v6292_v7 = vpop.eup %6291  ;;  %6301 = vrsqrt.f32 %v4089_v40  ;;  %v4090_v9 = vadd.f32 1e-06, %v4082_v61  ;;  %v4083_v2 = vmul.f32 0.03125, %v4075_v11 }
0x1172   : > { %v4100_v47 = vmul.f32 %v6292_v7, %v9434_v49 }
0x1173   : > { %v6294_v60 = vpop.eup %6293  ;;  %6303 = vrsqrt.f32 %v4090_v9  ;;  %v4091_v14 = vadd.f32 1e-06, %v4083_v2 }
0x1174   : > { %v4101_v33 = vmul.f32 %v6294_v60, %v9437_v38  ;;  %v4112_v0 = vmul.f32 %v4111_v59, %v4100_v47 }
0x1175   : > { %v6296_v23 = vpop.eup %6295  ;;  %6305 = vrsqrt.f32 %v4091_v14 }
0x1176   : > { %v4102_v32 = vmul.f32 %v6296_v23, %v9442_v57  ;;  %v4113_v5 = vmul.f32 %v4111_v59, %v4101_v33  ;;  %v4124_v58 = vadd.f32 %v4123_v16, %v4112_v0 }
0x1177   : > { %v6298_v30 = vpop.eup %6297 }
0x1178   : > { %v4114_v34 = vmul.f32 %v4111_v59, %v4102_v32  ;;  %v4103_v49 = vmul.f32 %v6298_v30, %v9448_v29  ;;  %v4125_v1 = vadd.f32 %v4123_v16, %v4113_v5 }
0x1179   : > { %v6300_v3 = vpop.eup %6299 }
0x117a   : > { %v4115_v26 = vmul.f32 %v4111_v59, %v4103_v49  ;;  %v4104_v38 = vmul.f32 %v6300_v3, %v9454_v10  ;;  %v4137_v18 = vpack.c.bf16 %v4125_v1, %v4124_v58  ;;  %v4126_v48 = vadd.f32 %v4123_v16, %v4114_v34 }
0x117b   : > { %v6302_v37 = vpop.eup %6301 }
0x117c   : > { %v4127_v36 = vadd.f32 %v4123_v16, %v4115_v26  ;;  %v4105_v39 = vmul.f32 %v6302_v37, %v9460_v55  ;;  %5810 = vmatprep.mubr.msk.bf16.mxu1 %vm1868_vm3, %v4137_v18  ;;  %v4116_v57 = vmul.f32 %v4111_v59, %v4104_v38 }
0x117d   : > { %v6304_v28 = vpop.eup %6303 }
0x117e   : > { %v4106_v54 = vmul.f32 %v6304_v28, %v9466_v25  ;;  %v4138_v29 = vpack.c.bf16 %v4127_v36, %v4126_v48  ;;  %v4117_v43 = vmul.f32 %v4111_v59, %v4105_v39  ;;  %v4128_v10 = vadd.f32 %v4123_v16, %v4116_v57 }
0x117f   : > { %v6306_v6 = vpop.eup %6305 }
0x1180   : > { %v4107_v17 = vmul.f32 %v6306_v6, %v9472_v24  ;;  %5811 = vmatmul.mubr.msk.bf16.vlgmr.msra.gmra.mrb[52].mxu1 %vm1868_vm3, %v4138_v29  ;;  %v4129_v52 = vadd.f32 %v4123_v16, %v4117_v43  ;;  %v4118_v27 = vmul.f32 %v4111_v59, %v4106_v54  ;;  %v6124_v24 = vld [vmem:[%s8794_s8 + $0x8] sm:$0xff]   ;;  %s10022_s8 = sld [smem:[#allocation72_spill]] }
0x1181   : > { %5819 = vmatpush3.bf16.msra.mxu1 %v6123_v41 }
0x1182   : > { %v4139_v55 = vpack.c.bf16 %v4129_v52, %v4128_v10  ;;  %v4119_v12 = vmul.f32 %v4111_v59, %v4107_v17  ;;  %v4130_v4 = vadd.f32 %v4123_v16, %v4118_v27  ;;  %5820 = vmatprep.subr.bf16.mxu1 %v6124_v24 }
0x1184   : > { %5814 = vmatprep.mubr.msk.bf16.mxu1 %vm1868_vm3, %v4139_v55  ;;  %v4131_v25 = vadd.f32 %v4123_v16, %v4119_v12 }
0x1185   : > { %5821 = vmatpush3.bf16.msra.mxu1 %v6124_v24 }
0x1186   : > { %v4140_v31 = vpack.c.bf16 %v4131_v25, %v4130_v4  ;;  %5822 = vmatprep.subr.bf16.mxu1 %v6125_v42  ;;  %p5460_p1 = scmp.ne.s32.totalorder %s10022_s8, 1 }
0x1187   : > { %vm4688_vm7 = vcmask (!%p5460_p1), 64512  }
0x1188   : > { %5815 = vmatmul.mubr.msk.bf16.gmra.mrb[56].mxu1 %vm1868_vm3, %v4140_v31 }
0x1189   : > { %5823 = vmatpush3.bf16.msra.mxu1 %v6125_v42 }
0x118a   : > { %5824 = vmatprep.subr.bf16.mxu1 %v6126_v20 }
0x118d   : > { %5825 = vmatpush3.bf16.msra.mxu1 %v6126_v20 }
0x118e   : > { %5826 = vmatprep.subr.bf16.mxu1 %v6127_v22 }
0x1191   : > { %5827 = vmatpush3.bf16.msra.mxu1 %v6127_v22 }
0x1192   : > { %5828 = vmatprep.subr.bf16.mxu1 %v6128_v45 }
0x1195   : > { %5829 = vmatpush3.bf16.msra.mxu1 %v6128_v45 }
0x1196   : > { %5830 = vmatprep.subr.bf16.mxu1 %v6129_v21 }
0x1199   : > { %5831 = vmatpush3.bf16.msra.mxu1 %v6129_v21 }
0x119a   : > { %5832 = vmatprep.subr.bf16.mxu1 %v6130_v51 }
0x119d   : > { %5833 = vmatpush3.bf16.msra.mxu1 %v6130_v51 }
0x1253   : > { %v5812_v40 = vpop.f32.mrb[52].mxu1 }
0x1254   : > { %v9515_v61 = vadd.f32 %v5812_v40, %v5444_v50  ;;  %v4205_v59 = vpop.f32.mrb[53].mxu1 }
0x1255   : > { %v9517_v46 = vadd.f32 %v5444_v50, %v4205_v59  ;;  %v5813_v11 = vpop.f32.mrb[54].mxu1 }
0x1256   : > { %v4238_v7 = vmul.f32 %v9515_v61, %v9515_v61  ;;  %v9521_v9 = vadd.f32 %v5813_v11, %v5444_v50  ;;  %v4208_v2 = vpop.f32.mrb[55].mxu1 }
0x1257   : > { %v4236_v47 = vmul.f32 %v9517_v46, %v9517_v46  ;;  %v9525_v60 = vadd.f32 %v5444_v50, %v4208_v2 }
0x1258   : > { %v4246_v14 = vmul.f32 %v4238_v7, %v9515_v61  ;;  %v4239_v33 = vmul.f32 %v9521_v9, %v9521_v9 }
0x1259   : > { %v4244_v16 = vmul.f32 %v4236_v47, %v9517_v46  ;;  %v4237_v0 = vmul.f32 %v9525_v60, %v9525_v60 }
0x125a   : > { %v4254_v23 = vmul.f32 0.044715, %v4246_v14  ;;  %v4247_v32 = vmul.f32 %v4239_v33, %v9521_v9 }
0x125b   : > { %v4252_v5 = vmul.f32 0.044715, %v4244_v16  ;;  %v4245_v30 = vmul.f32 %v4237_v0, %v9525_v60  ;;  %v5816_v34 = vpop.f32.mrb[56].mxu1 }
0x125c   : > { %v4262_v49 = vadd.f32 %v4254_v23, %v9515_v61  ;;  %v4255_v58 = vmul.f32 0.044715, %v4247_v32  ;;  %v9536_v1 = vadd.f32 %v5816_v34, %v5444_v50  ;;  %v4221_v3 = vpop.f32.mrb[57].mxu1 }
0x125d   : > { %v4260_v26 = vadd.f32 %v4252_v5, %v9517_v46  ;;  %v4253_v38 = vmul.f32 0.044715, %v4245_v30  ;;  %v9539_v18 = vadd.f32 %v5444_v50, %v4221_v3  ;;  %v5817_v37 = vpop.f32.mrb[58].mxu1 }
0x125e   : > { %v4270_v48 = vmul.f32 0.7978846, %v4262_v49  ;;  %v4263_v36 = vadd.f32 %v4255_v58, %v9521_v9  ;;  %v4242_v39 = vmul.f32 %v9536_v1, %v9536_v1  ;;  %v9544_v57 = vadd.f32 %v5817_v37, %v5444_v50  ;;  %v4224_v28 = vpop.f32.mrb[59].mxu1 }
0x125f   : > { %v4268_v54 = vmul.f32 0.7978846, %v4260_v26  ;;  %v4261_v29 = vadd.f32 %v4253_v38, %v9525_v60  ;;  %v4240_v43 = vmul.f32 %v9539_v18, %v9539_v18  ;;  %v9549_v6 = vadd.f32 %v5444_v50, %v4224_v28 }
0x1260   : > { %6307 = vtanh.f32 %v4270_v48  ;;  %v4271_v17 = vmul.f32 0.7978846, %v4263_v36  ;;  %v4250_v10 = vmul.f32 %v4242_v39, %v9536_v1  ;;  %v4243_v52 = vmul.f32 %v9544_v57, %v9544_v57 }
0x1261   : > { %6309 = vtanh.f32 %v4268_v54  ;;  %v4269_v27 = vmul.f32 0.7978846, %v4261_v29  ;;  %v4248_v55 = vmul.f32 %v4240_v43, %v9539_v18  ;;  %v4241_v12 = vmul.f32 %v9549_v6, %v9549_v6 }
0x1262   : > { %6311 = vtanh.f32 %v4271_v17  ;;  %v4258_v4 = vmul.f32 0.044715, %v4250_v10  ;;  %v4251_v25 = vmul.f32 %v4243_v52, %v9544_v57 }
0x1263   : > { %6313 = vtanh.f32 %v4269_v27  ;;  %v4256_v31 = vmul.f32 0.044715, %v4248_v55  ;;  %v4249_v41 = vmul.f32 %v4241_v12, %v9549_v6 }
0x1264   : > { %v4266_v24 = vadd.f32 %v4258_v4, %v9536_v1  ;;  %v4259_v42 = vmul.f32 0.044715, %v4251_v25  ;;  %v4450_v4 = vsub.s32 5, %v8910_v56  ;;  %v5451_v25 = vld [vmem:[%s1539_s26] ss:$0 sm:$0xff] }
0x1265   : > { %v4264_v20 = vadd.f32 %v4256_v31, %v9539_v18  ;;  %v4257_v22 = vmul.f32 0.044715, %v4249_v41 }
0x1266   : > { %v4274_v45 = vmul.f32 0.7978846, %v4266_v24  ;;  %v4267_v21 = vadd.f32 %v4259_v42, %v9544_v57  ;;  %v4451_v31 = vrot.slane %v9492_v15, %v4450_v4 }
0x1267   : > { %v4272_v51 = vmul.f32 0.7978846, %v4264_v20  ;;  %v4265_v50 = vadd.f32 %v4257_v22, %v9549_v6 }
0x1268   : > { %6315 = vtanh.f32 %v4274_v45  ;;  %v4275_v40 = vmul.f32 0.7978846, %v4267_v21 }
0x1269   : > { %6317 = vtanh.f32 %v4272_v51  ;;  %v4273_v59 = vmul.f32 0.7978846, %v4265_v50 }
0x126a   : > { %v6308_v11 = vpop.eup %6307  ;;  %6319 = vtanh.f32 %v4275_v40 }
0x126b   : > { %v6310_v7 = vpop.eup %6309  ;;  %v4286_v2 = vadd.f32 1.0, %v6308_v11  ;;  %6321 = vtanh.f32 %v4273_v59 }
0x126c   : > { %v6312_v47 = vpop.eup %6311  ;;  %v4284_v14 = vadd.f32 1.0, %v6310_v7 }
0x126d   : > { %v6314_v33 = vpop.eup %6313  ;;  %v4294_v16 = vmul.f32 0.5, %v4286_v2  ;;  %v4287_v0 = vadd.f32 1.0, %v6312_v47 }
0x126e   : > { %v4285_v23 = vadd.f32 1.0, %v6314_v33  ;;  %v4292_v32 = vmul.f32 0.5, %v4284_v14 }
0x126f   : > { %v4295_v5 = vmul.f32 0.5, %v4287_v0  ;;  %v4302_v34 = vmul.f32 %v4294_v16, %v9515_v61 }
0x1270   : > { %v4293_v30 = vmul.f32 0.5, %v4285_v23  ;;  %v4300_v3 = vmul.f32 %v4292_v32, %v9517_v46 }
0x1271   : > { %v4303_v49 = vmul.f32 %v4295_v5, %v9521_v9 }
0x1272   : > { %v6316_v58 = vpop.eup %6315  ;;  %v4301_v26 = vmul.f32 %v4293_v30, %v9525_v60 }
0x1273   : > { %v6318_v38 = vpop.eup %6317  ;;  %v4326_v37 = vpack.c.bf16 %v4303_v49, %v4302_v34  ;;  %v4290_v48 = vadd.f32 1.0, %v6316_v58 }
0x1274   : > { %v6320_v36 = vpop.eup %6319  ;;  %v4325_v39 = vpack.c.bf16 %v4301_v26, %v4300_v3  ;;  %v4288_v28 = vadd.f32 1.0, %v6318_v38 }
0x1275   : > { %v6322_v54 = vpop.eup %6321  ;;  %v4291_v29 = vadd.f32 1.0, %v6320_v36  ;;  %v4298_v43 = vmul.f32 0.5, %v4290_v48 }
0x1276   : > { %5834 = vmatprep.mubr.bf16.mxu1 %v4325_v39  ;;  %v4289_v17 = vadd.f32 1.0, %v6322_v54  ;;  %v4296_v61 = vmul.f32 0.5, %v4288_v28 }
0x1277   : > { %5835 = vmatmul.mubr.bf16.vlgmr.msra.gmra.mrb[60].mxu1 %v4326_v37  ;;  %v4299_v9 = vmul.f32 0.5, %v4291_v29  ;;  %v4306_v46 = vmul.f32 %v4298_v43, %v9536_v1 }
0x1278   : > { %v4297_v10 = vmul.f32 0.5, %v4289_v17  ;;  %v4304_v52 = vmul.f32 %v4296_v61, %v9539_v18 }
0x1279   : > { %v4307_v60 = vmul.f32 %v4299_v9, %v9544_v57 }
0x127a   : > { %v4305_v27 = vmul.f32 %v4297_v10, %v9549_v6 }
0x127b   : > { %v4328_v55 = vpack.c.bf16 %v4307_v60, %v4306_v46 }
0x127c   : > { %v4327_v12 = vpack.c.bf16 %v4305_v27, %v4304_v52 }
0x127e   : > { %5838 = vmatprep.mubr.bf16.mxu1 %v4327_v12 }
0x127f   : > { %5839 = vmatmul.mubr.bf16.gmra.mrb[64].mxu1 %v4328_v55 }
0x134a   : > { %v5836_v41 = vpop.f32.mrb[60].mxu1 }
0x134b   : > { %v4426_v24 = vadd.f32 %v5836_v41, %v5451_v25  ;;  %v4417_v42 = vpop.f32.mrb[61].mxu1 }
0x134c   : > { %v4418_v1 = vadd.f32 %v5451_v25, %v4417_v42  ;;  %v5837_v20 = vpop.f32.mrb[62].mxu1 }
0x134d   : > { %v4454_v57 = vmul.f32 %v4451_v31, %v4426_v24  ;;  %v4429_v22 = vadd.f32 %v5837_v20, %v5451_v25  ;;  %v4420_v18 = vpop.f32.mrb[63].mxu1 }
0x134e   : > { %v4452_v45 = vmul.f32 %v4451_v31, %v4418_v1  ;;  %v4421_v6 = vadd.f32 %v5451_v25, %v4420_v18 }
0x134f   : > { %v9576_v21 = vadd.f32 %v4454_v57, %v9397_v53  ;;  %v4455_v51 = vmul.f32 %v4451_v31, %v4429_v22 }
0x1350   : > { %v4460_v56 = vadd.f32 %v4452_v45, %v9394_v62  ;;  %v4453_v50 = vmul.f32 %v4451_v31, %v4421_v6 }
0x1351   : > { %4470 = vst.msk [vmem:[#allocation2 + $0x10] sm:$0xff] %vm1868_vm3, %v9576_v21  ;;  %v9582_v15 = vadd.f32 %v4455_v51, %v9405_v63 }
0x1352   : > { %4468 = vst.msk [vmem:[#allocation2] sm:$0xff] %vm1868_vm3, %v4460_v56  ;;  %v4461_v40 = vadd.f32 %v4453_v50, %v9400_v35  ;;  %v5840_v59 = vpop.f32.mrb[64].mxu1 }
0x1353   : > { %4471 = vst.msk [vmem:[#allocation2 + $0x18] sm:$0xff] %vm1868_vm3, %v9582_v15  ;;  %v4442_v53 = vadd.f32 %v5840_v59, %v5451_v25  ;;  %v4433_v11 = vpop.f32.mrb[65].mxu1  ;;  %v4493_v34 = vsel (!%p5460_p1), %vm1868_vm3, %v9582_v15, 0.0  ;;  %v6332_v59 = vld [vmem:[#allocation34] sm:$0xff] (!%p5460_p1)  }
0x1354   : > { %4469 = vst.msk [vmem:[#allocation2 + $0x8] sm:$0xff] %vm1868_vm3, %v4461_v40  ;;  %v4434_v62 = vadd.f32 %v5451_v25, %v4433_v11  ;;  %v5841_v7 = vpop.f32.mrb[66].mxu1  ;;  %v4487_v30 = vsel (!%p5460_p1), %vm1868_vm3, %v4461_v40, 0.0  ;;  %5842 = vmatprep.subr.bf16.mxu0 (!%p5460_p1), %v6332_v59  ;;  %5876 = vmatprep.subr.bf16.mxu1 (!%p5460_p1), %v6332_v59 }
0x1355   : > { %v4458_v2 = vmul.f32 %v4451_v31, %v4442_v53  ;;  %v4445_v47 = vadd.f32 %v5841_v7, %v5451_v25  ;;  %v4436_v14 = vpop.f32.mrb[67].mxu1  ;;  %5843 = vmatpush3.bf16.msra.mxu0 (!%p5460_p1), %v6332_v59  ;;  %v6333_v53 = vld [vmem:[#allocation34 + $0x8] sm:$0xff] (!%p5460_p1)   ;;  %5878 = vmatpush3.bf16.msra.mxu1 (!%p5460_p1), %v6332_v59 }
0x1356   : > { %v4456_v33 = vmul.f32 %v4451_v31, %v4434_v62  ;;  %v4437_v63 = vadd.f32 %v5451_v25, %v4436_v14  ;;  %4479 = sbr.rel (%p5460_p1) target bundleno = 5496 (0x1578), region = 252  ;;  %5844 = vmatprep.subr.bf16.mxu0 (!%p5460_p1), %v6333_v53  ;;  %5877 = vmatprep.subr.bf16.mxu1 (!%p5460_p1), %v6333_v53 }
0x1357   : > { %v9590_v16 = vadd.f32 %v4458_v2, %v9417_v8  ;;  %v4459_v0 = vmul.f32 %v4451_v31, %v4445_v47  ;;  %v4484_v8 = vsel (!%p5460_p1), %vm1868_vm3, %v4460_v56, 0.0 }
0x1358   : > { %v4464_v35 = vadd.f32 %v4456_v33, %v9412_v13  ;;  %v4457_v23 = vmul.f32 %v4451_v31, %v4437_v63  ;;  %4485 = vadd.xlane.f32.xlu0 (!%p5460_p1), %v4484_v8 }
0x1359   : > { %4474 = vst.msk [vmem:[#allocation2 + $0x30] sm:$0xff] %vm1868_vm3, %v9590_v16  ;;  %v4467_v32 = vadd.f32 %v4459_v0, %v9425_v44  ;;  %v4502_v49 = vsel (!%p5460_p1), %vm1868_vm3, %v9590_v16, 0.0  ;;  %5845 = vmatpush3.bf16.msra.mxu0 (!%p5460_p1), %v6333_v53  ;;  %5879 = vmatpush3.bf16.msra.mxu1 (!%p5460_p1), %v6333_v53 }
0x135a   : > { %4472 = vst.msk [vmem:[#allocation2 + $0x20] sm:$0xff] %vm1868_vm3, %v4464_v35  ;;  %v4465_v5 = vadd.f32 %v4457_v23, %v9420_v19  ;;  %v4496_v13 = vsel (!%p5460_p1), %vm1868_vm3, %v4464_v35, 0.0  ;;  %v4490_v19 = vsel (!%p5460_p1), %vm1868_vm3, %v9576_v21, 0.0 }
0x135b   : > { %4475 = vst.msk [vmem:[#allocation2 + $0x38] sm:$0xff] %vm1868_vm3, %v4467_v32  ;;  %4497 = vadd.xlane.f32.xlu1 (!%p5460_p1), %v4496_v13  ;;  %v4505_v58 = vsel (!%p5460_p1), %vm1868_vm3, %v4467_v32, 0.0 }
0x135c   : > { %4473 = vst.msk [vmem:[#allocation2 + $0x28] sm:$0xff] %vm1868_vm3, %v4465_v5  ;;  %v4499_v44 = vsel (!%p5460_p1), %vm1868_vm3, %v4465_v5, 0.0  ;;  %4488 = vadd.xlane.f32.xlu0 (!%p5460_p1), %v4487_v30 }
0x135f   : > { %4500 = vadd.xlane.f32.xlu1 %v4499_v44 }
0x1360   : > { %4491 = vadd.xlane.f32.xlu0 %v4490_v19 }
0x1363   : > { %4494 = vadd.xlane.f32.xlu1 %v4493_v34 }
0x1364   : > { %4503 = vadd.xlane.f32.xlu0 %v4502_v49 }
0x1367   : > { %4506 = vadd.xlane.f32.xlu1 %v4505_v58 }
0x13e5   : > { %v4486_v3 = vpop.xlane.xlu0 %4485 }
0x13e6   : > { %v4508_v38 = vmul.f32 0.03125, %v4486_v3 }
0x13e8   : > { %v4498_v26 = vpop.xlane.xlu1 %4497  ;;  %v9612_v48 = vsub.f32 %v4460_v56, %v4508_v38 }
0x13e9   : > { %v4512_v37 = vmul.f32 0.03125, %v4498_v26  ;;  %v4489_v39 = vpop.xlane.xlu0 %4488 }
0x13ea   : > { %v4509_v54 = vmul.f32 0.03125, %v4489_v39  ;;  %v4524_v43 = vmul.f32 %v9612_v48, %v9612_v48 }
0x13eb   : > { %v9614_v36 = vsub.f32 %v4464_v35, %v4512_v37 }
0x13ec   : > { %v4501_v28 = vpop.xlane.xlu1 %4500  ;;  %v9620_v61 = vsub.f32 %v4461_v40, %v4509_v54  ;;  %v4532_v10 = vsel %vm1868_vm3, %v4524_v43, 0.0 }
0x13ed   : > { %v4513_v29 = vmul.f32 0.03125, %v4501_v28  ;;  %v4528_v17 = vmul.f32 %v9614_v36, %v9614_v36  ;;  %4533 = vadd.xlane.f32.xlu0 %v4532_v10  ;;  %v4492_v46 = vpop.xlane.xlu0 %4491 }
0x13ee   : > { %v4510_v27 = vmul.f32 0.03125, %v4492_v46  ;;  %v4525_v12 = vmul.f32 %v9620_v61, %v9620_v61 }
0x13ef   : > { %v9622_v9 = vsub.f32 %v4465_v5, %v4513_v29  ;;  %v4544_v52 = vsel %vm1868_vm3, %v4528_v17, 0.0 }
0x13f0   : > { %v4495_v60 = vpop.xlane.xlu1 %4494  ;;  %v9631_v25 = vsub.f32 %v9576_v21, %v4510_v27  ;;  %v4535_v41 = vsel %vm1868_vm3, %v4525_v12, 0.0 }
0x13f1   : > { %v4511_v55 = vmul.f32 0.03125, %v4495_v60  ;;  %v4529_v4 = vmul.f32 %v9622_v9, %v9622_v9  ;;  %4545 = vadd.xlane.f32.xlu0 %v4544_v52  ;;  %4536 = vadd.xlane.f32.xlu1 %v4535_v41  ;;  %v4504_v24 = vpop.xlane.xlu0 %4503  ;;  %v5461_v41 = vld [vmem:[#allocation35] ss:$0 sm:$0xff] }
0x13f2   : > { %v4514_v20 = vmul.f32 0.03125, %v4504_v24  ;;  %v4526_v22 = vmul.f32 %v9631_v25, %v9631_v25 }
0x13f3   : > { %v9634_v31 = vsub.f32 %v9582_v15, %v4511_v55  ;;  %v4547_v1 = vsel %vm1868_vm3, %v4529_v4, 0.0 }
0x13f4   : > { %v4507_v42 = vpop.xlane.xlu1 %4506  ;;  %v9643_v45 = vsub.f32 %v9590_v16, %v4514_v20  ;;  %v4538_v21 = vsel %vm1868_vm3, %v4526_v22, 0.0 }
0x13f5   : > { %v4515_v57 = vmul.f32 0.03125, %v4507_v42  ;;  %v4527_v18 = vmul.f32 %v9634_v31, %v9634_v31  ;;  %4548 = vadd.xlane.f32.xlu1 %v4547_v1  ;;  %4539 = vadd.xlane.f32.xlu0 %v4538_v21 }
0x13f6   : > { %v4530_v56 = vmul.f32 %v9643_v45, %v9643_v45 }
0x13f7   : > { %v9645_v6 = vsub.f32 %v4467_v32, %v4515_v57  ;;  %v4541_v51 = vsel %vm1868_vm3, %v4527_v18, 0.0 }
0x13f8   : > { %v4550_v15 = vsel %vm1868_vm3, %v4530_v56, 0.0 }
0x13f9   : > { %v4531_v50 = vmul.f32 %v9645_v6, %v9645_v6  ;;  %4542 = vadd.xlane.f32.xlu1 %v4541_v51  ;;  %4551 = vadd.xlane.f32.xlu0 %v4550_v15 }
0x13fb   : > { %v4553_v40 = vsel %vm1868_vm3, %v4531_v50, 0.0 }
0x13fd   : > { %4554 = vadd.xlane.f32.xlu1 %v4553_v40 }
0x147a   : > { %v4534_v11 = vpop.xlane.xlu0 %4533 }
0x147b   : > { %v4556_v62 = vmul.f32 0.03125, %v4534_v11 }
0x147d   : > { %v4564_v7 = vadd.f32 1e-05, %v4556_v62 }
0x147e   : > { %v4537_v2 = vpop.xlane.xlu1 %4536  ;;  %v4546_v47 = vpop.xlane.xlu0 %4545 }
0x147f   : > { %v4557_v14 = vmul.f32 0.03125, %v4537_v2  ;;  %v4560_v33 = vmul.f32 0.03125, %v4546_v47  ;;  %6334 = vrsqrt.f32 %v4564_v7 }
0x1481   : > { %v4565_v63 = vadd.f32 1e-05, %v4557_v14  ;;  %v4568_v16 = vadd.f32 1e-05, %v4560_v33 }
0x1482   : > { %v4549_v0 = vpop.xlane.xlu1 %4548  ;;  %v4540_v35 = vpop.xlane.xlu0 %4539 }
0x1483   : > { %6336 = vrsqrt.f32 %v4565_v63  ;;  %v4561_v23 = vmul.f32 0.03125, %v4549_v0  ;;  %v4558_v32 = vmul.f32 0.03125, %v4540_v35 }
0x1484   : > { %6338 = vrsqrt.f32 %v4568_v16 }
0x1485   : > { %v4569_v5 = vadd.f32 1e-05, %v4561_v23  ;;  %v4566_v8 = vadd.f32 1e-05, %v4558_v32 }
0x1486   : > { %v4543_v13 = vpop.xlane.xlu1 %4542  ;;  %v4552_v30 = vpop.xlane.xlu0 %4551 }
0x1487   : > { %6340 = vrsqrt.f32 %v4569_v5  ;;  %v4559_v44 = vmul.f32 0.03125, %v4543_v13  ;;  %v4562_v19 = vmul.f32 0.03125, %v4552_v30 }
0x1488   : > { %6342 = vrsqrt.f32 %v4566_v8 }
0x1489   : > { %v4567_v34 = vadd.f32 1e-05, %v4559_v44  ;;  %v4570_v49 = vadd.f32 1e-05, %v4562_v19  ;;  %v6335_v3 = vpop.eup %6334 }
0x148a   : > { %v4555_v58 = vpop.xlane.xlu1 %4554  ;;  %v4580_v39 = vmul.f32 %v6335_v3, %v9612_v48 }
0x148b   : > { %6344 = vrsqrt.f32 %v4567_v34  ;;  %v4563_v26 = vmul.f32 0.03125, %v4555_v58 }
0x148c   : > { %6346 = vrsqrt.f32 %v4570_v49 }
0x148d   : > { %v6337_v38 = vpop.eup %6336  ;;  %v4571_v37 = vadd.f32 1e-05, %v4563_v26 }
0x148e   : > { %v4581_v28 = vmul.f32 %v6337_v38, %v9620_v61  ;;  %v6339_v54 = vpop.eup %6338 }
0x148f   : > { %6348 = vrsqrt.f32 %v4571_v37  ;;  %v4584_v17 = vmul.f32 %v6339_v54, %v9614_v36 }
0x1490   : > { %v4588_v29 = vpack.c.bf16 %v4581_v28, %v4580_v39 }
0x1491   : > { %v6341_v43 = vpop.eup %6340 }
0x1492   : > { %5846 = vmatprep.mubr.msk.bf16.mxu0 %vm1868_vm3, %v4588_v29  ;;  %v4585_v10 = vmul.f32 %v6341_v43, %v9622_v9  ;;  %v6343_v46 = vpop.eup %6342 }
0x1493   : > { %v4582_v27 = vmul.f32 %v6343_v46, %v9631_v25 }
0x1494   : > { %v4590_v60 = vpack.c.bf16 %v4585_v10, %v4584_v17 }
0x1495   : > { %v6345_v52 = vpop.eup %6344 }
0x1496   : > { %5850 = vmatprep.mubr.msk.bf16.mxu1 %vm1868_vm3, %v4590_v60  ;;  %v4583_v48 = vmul.f32 %v6345_v52, %v9634_v31  ;;  %v6347_v61 = vpop.eup %6346 }
0x1497   : > { %v4586_v36 = vmul.f32 %v6347_v61, %v9643_v45 }
0x1498   : > { %v4589_v55 = vpack.c.bf16 %v4583_v48, %v4582_v27 }
0x1499   : > { %v6349_v12 = vpop.eup %6348 }
0x149a   : > { %5847 = vmatmul.mubr.msk.bf16.vlgmr.msra.gmra.mrb[0].mxu0 %vm1868_vm3, %v4589_v55  ;;  %v4587_v9 = vmul.f32 %v6349_v12, %v9645_v6 }
0x149c   : > { %v4591_v4 = vpack.c.bf16 %v4587_v9, %v4586_v36 }
0x149e   : > { %5851 = vmatmul.mubr.msk.bf16.vlgmr.msra.gmra.mrb[0].mxu1 %vm1868_vm3, %v4591_v4 }
0x156d   : > { %v5848_v25 = vpop.f32.mrb[0].mxu0 }
0x156e   : > { %v4666_v31 = vadd.f32 %v5848_v25, %v5461_v41  ;;  %v4657_v24 = vpop.f32.mrb[1].mxu0 }
0x156f   : > { %v4658_v42 = vadd.f32 %v5461_v41, %v4657_v24  ;;  %v5849_v1 = vpop.f32.mrb[2].mxu0 }
0x1570   : > { %4691 = vst.msk [vmem:[%s8818_s2 + $0x10] sm:$0xff] %vm4688_vm7, %v4666_v31  ;;  %v4669_v20 = vadd.f32 %v5849_v1, %v5461_v41  ;;  %v4660_v57 = vpop.f32.mrb[3].mxu0 }
0x1571   : > { %4689 = vst.msk [vmem:[%s8818_s2] sm:$0xff] %vm4688_vm7, %v4658_v42  ;;  %v4661_v22 = vadd.f32 %v5461_v41, %v4660_v57  ;;  %v5852_v18 = vpop.f32.mrb[0].mxu1 }
0x1572   : > { %4692 = vst.msk [vmem:[%s8818_s2 + $0x18] sm:$0xff] %vm4688_vm7, %v4669_v20  ;;  %v4682_v45 = vadd.f32 %v5852_v18, %v5461_v41  ;;  %v4673_v6 = vpop.f32.mrb[1].mxu1 }
0x1573   : > { %4690 = vst.msk [vmem:[%s8818_s2 + $0x8] sm:$0xff] %vm4688_vm7, %v4661_v22  ;;  %v4674_v21 = vadd.f32 %v5461_v41, %v4673_v6  ;;  %v5853_v51 = vpop.f32.mrb[2].mxu1 }
0x1574   : > { %4695 = vst.msk [vmem:[%s8818_s2 + $0x30] sm:$0xff] %vm4688_vm7, %v4682_v45  ;;  %v4685_v56 = vadd.f32 %v5853_v51, %v5461_v41  ;;  %v4676_v50 = vpop.f32.mrb[3].mxu1 }
0x1575   : > { %4693 = vst.msk [vmem:[%s8818_s2 + $0x20] sm:$0xff] %vm4688_vm7, %v4674_v21  ;;  %v4677_v15 = vadd.f32 %v5461_v41, %v4676_v50 }
0x1576   : > { %4696 = vst.msk [vmem:[%s8818_s2 + $0x38] sm:$0xff] %vm4688_vm7, %v4685_v56 }
0x1577   : > { %4694 = vst.msk [vmem:[%s8818_s2 + $0x28] sm:$0xff] %vm4688_vm7, %v4677_v15 }
0x1578 PF: > { %s10023_s25 = sld [smem:[#allocation73_spill]]  ;;  %s10024_s26 = sld [smem:[#allocation84_spill]] }
0x1579   : > { %s10025_s15 = sld [smem:[#allocation115_spill]]  ;;  %s4711_s11 = sshll.u32 %s8818_s2, 4  ;;  %s9690_s11 = int_to_ptr.vmem [resolvable:$true] %s4711_s11 }
0x157a   : > { %s4698_s29 = scalar_lea.sflag [#allocation5], %s8608_s28  ;;  %s7134_s17 = scalar_lea.vmem %s9690_s11, 1024 }
0x157b   : > { %p7135_p9 = scmp.ne.s32.totalorder %s9690_s11, %s7134_s17  ;;  %s7423_s18 = smov [#allocation36]  }
0x157c   : > { %s7138_s30 = sshll.u32 %s7423_s18, 4  ;;  %s7139_s30 = int_to_ptr.vmem [resolvable:$false] %s7138_s30 }
0x157d   : > { %s7140_s6 = scalar_lea.vmem %s7139_s30, 2048  ;;  %p7141_p3 = scmp.lt.s32.totalorder %s9690_s11, %s7139_s30 }
0x157e   : > { %s5486_s0 = sshll.u32 %s10023_s25, 10  ;;  %p10026_p4 = scmp.ne.s32.totalorder %s10024_s26, 0 }
0x157f   : > { %s9687_s9 = scalar_lea.hbm %s10025_s15, %s5486_s0  ;;  %p7142_p10 = scmp.lt.s32.totalorder %s7140_s6, %s7134_s17 }
0x1580   : > { %p7136_p12 = pnand %p7135_p9, %p10026_p4 }
0x1581   : > { %p7143_p6 = por %p7142_p10, %p7141_p3 }
0x1582   : > { %p7137_p5 = pneg %p7136_p12 }
0x1584   : > { %p7144_p0 = pnand %p7143_p6, %p7137_p5 }
0x1586   : > { %7147 = shalt.err (!%p7144_p0)
}
0x1587   : > { %s7148_s2 = scalar_lea.hbm %s9687_s9, 1024  ;;  %s7152_s5 = scalar_lea.hbm %s10025_s15, 2048 }
0x1588   : > { %p7149_p11 = scmp.ne.s32.totalorder %s9687_s9, %s7148_s2  ;;  %p7153_p7 = scmp.lt.u32.totalorder %s9687_s9, %s10025_s15 }
0x1589   : > { %p7154_p8 = scmp.lt.u32.totalorder %s7152_s5, %s7148_s2  ;;  %p7156_p9 = scmp.lt.u32.totalorder %s7148_s2, %s9687_s9 }
0x158a   : > { %p7150_p13 = pnand %p7149_p11, %p10026_p4 }
0x158b   : > { %p7155_p1 = por %p7154_p8, %p7153_p7 }
0x158c   : > { %p7151_p2 = pneg %p7150_p13 }
0x158d   : > { %p7157_p12 = por %p7156_p9, %p7155_p1 }
0x158f   : > { %p7158_p5 = pnand %p7157_p12, %p7151_p2 }
0x1591   : > { %7161 = shalt.err (!%p7158_p5)
}
0x1592   : > { %s7424_s8 = smov 128   ;;  %s7425_s25 = smov 8  }
0x1593   : > { %5952 = dma.vmem_to_hbm [thread:$0]  (%p10026_p4), %s9690_s11, 1024, %s9687_s9, %s4698_s29, %s7424_s8, %s7424_s8, %s7425_s25  }
0x1594 PF: > { %s10027_s0 = sld [smem:[#allocation69_spill]]  ;;  %p5979_p3 = scmp.ge.s32.totalorder %s7384_s1, 2 }
0x1595   : > { %s10028_s12 = sld [smem:[#allocation85_spill]] }
0x159a   : > { %s4726_s20 = sand.u32 1, %s10027_s0  }
0x159b   : > { %p10029_p10 = scmp.ne.s32.totalorder %s10028_s12, 0  ;;  %s4727_s17 = scalar_lea.sflag [#allocation5], %s4726_s20 }
0x159d   : > { %p5968_p6 = pnand %p5979_p3, %p10029_p10 }
0x159f   : > { %7327 = dma.done.wait (!%p5968_p6), %s4727_s17, 1024  }
0x15a0   : > { %7329 = vsyncadd (!%p5968_p6), %s4727_s17, 4294966272  ;;  %s51_s1 = sadd.s32 1, %s7384_s1   ;;  %s10031_s8 = sld [smem:[#allocation65_spill]] }
0x15a1   : > { %p9721_p0 = scmp.ge.s32.totalorder %s51_s1, 6   ;;  %s10032_s5 = sld [smem:[#allocation66_spill]] }
0x15a2   : > { %s10033_s9 = sld [smem:[#allocation82_spill]]  ;;  %s10034_s30 = sld [smem:[#allocation67_spill]] }
0x15a3   : > { %s10035_s3 = sld [smem:[#allocation68_spill]]  ;;  %s10036_s6 = sld [smem:[#allocation80_spill]] }
0x15a4   : > { %s10037_s10 = sld [smem:[#allocation70_spill]]  ;;  %s10038_s0 = sld [smem:[#allocation71_spill]] }
0x15a5   : > { %s10039_s11 = sld [smem:[#allocation79_spill]]  ;;  %s10040_s2 = sld [smem:[#allocation74_spill]] }
0x15a6   : > { %s10041_s28 = sld [smem:[#allocation76_spill]]  ;;  %s10042_s12 = sld [smem:[#allocation77_spill]] }
0x15a7   : > { %s10043_s29 = smov %s7376_s7  ;;  %50 = sbr.rel (!%p9721_p0) target bundleno = 45 (0x2d), region = 458 }
0x15ac   : > { %s10044_s7 = smov %s10041_s28 }
0x15ae   :  { %4732 = vsyncpa [#allocation4], 1 }
0x15af   :  { %4734 = vsyncpa [#allocation4 + $0x1], 1 }
0x15b0   :  { %4735 = vsyncpa [#allocation7], 1 }
0x15b1   :  { %4737 = vsyncpa [#allocation7 + $0x1], 1 }
0x15b2   :  { %4738 = vsyncpa [#allocation10], 1 }
0x15b3   :  { %4740 = vsyncpa [#allocation10 + $0x1], 1 }
0x15b4   :  { %4741 = vsyncpa [#allocation13], 1 }
0x15b5   :  { %4742 = vsyncpa [#allocation5], 1 }
0x15b6   :  { %4744 = vsyncpa [#allocation5 + $0x1], 1 }

</bundles_post_ra>
